<compile_context>
chip_gen: v5e
topology: v5e:2x2
jax: 0.10.0
libtpu: 0.0.40
codegen_flags: <defaults>
</compile_context>

<pallas_src>
import functools

import numpy as np
import jax
import jax.numpy as jnp
from jax.experimental import pallas as pl
from jax.experimental.pallas import tpu as pltpu

LRELU_SLOPE = 0.01
BN_EPS = 1e-5
CPAD = 128          # all channel dims padded to one full lane tile
OFF = 8             # sublane-aligned start row of the activation inside the pad buffer


# ------------------------------- Pallas kernel -------------------------------

def _make_msfe_kernel(n_cs, cs_cfg, fs_cfg, slope, stem_cin):
    """Fully fused MSFE kernel: course branch + fine branch + both 1x1 convs."""

    def kernel(*refs):
        x_ref = refs[0]
        cs_params = refs[1:1 + n_cs]
        fs_params = refs[1 + n_cs:-3]
        out_cs_ref, out_fs_ref, hp_ref = refs[-3], refs[-2], refs[-1]

        zero_row = jnp.zeros((1, CPAD), jnp.float32)
        x = x_ref[0]                                    # (T, Cin), loaded once

        def leaky(y):                                   # slope in (0,1) -> max form
            return jnp.maximum(y, slope * y)

        def run_branch(params, K, has_ds, out_ref):
            it = iter(params)

            def conv_k(h, w_ref, s_ref, b_ref, act):
                """K-tap Conv1d (stride=1, padding=1) as one im2col MXU matmul."""
                t = h.shape[0]
                t_out = t + 3 - K
                # Zero only the two halo rows that are actually read.
                hp_ref[OFF - 1:OFF, :] = zero_row
                hp_ref[OFF + t:OFF + t + 1, :] = zero_row
                hp_ref[OFF:OFF + t, :] = h              # sublane-aligned store
                # K shifted slabs, each a full 128-lane tile -> lane-aligned concat.
                lhs = jnp.concatenate(
                    [hp_ref[OFF - 1 + k: OFF - 1 + k + t_out, :] for k in range(K)],
                    axis=1)                             # (t_out, K*128)
                y = jnp.dot(lhs.astype(jnp.bfloat16), w_ref[...],
                            preferred_element_type=jnp.float32)
                y = y * s_ref[...] + b_ref[...]         # folded BN (f32)
                return leaky(y) if act else y

            # ---- stem: Conv1d(in_ch, out_main_ch, k=1, bias=False) -> BN -> LReLU
            w0, s0, b0 = next(it), next(it), next(it)
            if stem_cin == 1:
                h = x.astype(jnp.float32) * w0[...]     # VPU broadcast (T,1)*(1,128)
            else:
                h = jnp.dot(x.astype(jnp.bfloat16), w0[...],
                            preferred_element_type=jnp.float32)
            h = leaky(h * s0[...] + b0[...])

            # ---- ConvBlocks: conv->BN->LReLU->conv->BN (+downsample) + residual
            for ds in has_ds:
                w1, s1, b1 = next(it), next(it), next(it)
                w2, s2, b2 = next(it), next(it), next(it)
                out = conv_k(h, w1, s1, b1, act=True)
                out = conv_k(out, w2, s2, b2, act=False)
                if ds:                                  # downsample = Conv1d(1x1)+BN
                    wd, sd, bd = next(it), next(it), next(it)
                    res = jnp.dot(h.astype(jnp.bfloat16), wd[...],
                                  preferred_element_type=jnp.float32)
                    res = res * sd[...] + bd[...]
                else:
                    res = h
                # COURSE: residual[:, :, 0:-d] == first t_out rows; FINE: no-op crop.
                h = leaky(out + res[:out.shape[0], :])

            # ---- modality-attention 1x1 conv (with bias) ----
            wf, bf = next(it), next(it)
            y = jnp.dot(h.astype(jnp.bfloat16), wf[...],
                        preferred_element_type=jnp.float32) + bf[...]
            out_ref[0] = y.astype(out_ref.dtype)

        run_branch(cs_params, cs_cfg["K"], cs_cfg["has_ds"], out_cs_ref)
        run_branch(fs_params, fs_cfg["K"], fs_cfg["has_ds"], out_fs_ref)

    return kernel


# ------------------------------ Pallas wrapper -------------------------------

def msfe_forward(x, cs_flat, fs_flat, *, cs_cfg, fs_cfg):
    """x: (B, T, Cin) f32 -> (y_cs, y_fs) each (B, T_branch, out_filters) f32."""
    B, T, Cin = x.shape
    T_cs = T + 2 * len(cs_cfg["has_ds"]) * (3 - cs_cfg["K"])
    T_fs = T + 2 * len(fs_cfg["has_ds"]) * (3 - fs_cfg["K"])

    kernel = _make_msfe_kernel(len(cs_flat), cs_cfg, fs_cfg, LRELU_SLOPE, Cin)

    in_specs = [pl.BlockSpec((1, T, Cin), lambda b: (b, 0, 0))]
    in_specs += [pl.BlockSpec(a.shape, lambda b: (0, 0)) for a in (*cs_flat, *fs_flat)]

    out_shapes = (
        jax.ShapeDtypeStruct((B, T_cs, cs_cfg["out_filters"]), jnp.float32),
        jax.ShapeDtypeStruct((B, T_fs, fs_cfg["out_filters"]), jnp.float32),
    )
    out_specs = (
        pl.BlockSpec((1, T_cs, cs_cfg["out_filters"]), lambda b: (b, 0, 0)),
        pl.BlockSpec((1, T_fs, fs_cfg["out_filters"]), lambda b: (b, 0, 0)),
    )

    return pl.pallas_call(
        kernel,
        out_shape=out_shapes,
        grid=(B,),
        in_specs=in_specs,
        out_specs=out_specs,
        scratch_shapes=[pltpu.VMEM((T + 2 * OFF, CPAD), jnp.float32)],
        compiler_params=pltpu.CompilerParams(
            dimension_semantics=("parallel",)),
    )(x, *cs_flat, *fs_flat)


# ----------------------------- parameter setup -------------------------------

def _bn_affine(key, c):
    """Folded inference-mode BatchNorm -> (1, CPAD) f32 scale/shift (zero-padded)."""
    k1, k2, k3, k4 = jax.random.split(key, 4)
    gamma = 1.0 + 0.1 * jax.random.normal(k1, (c,), jnp.float32)
    beta = 0.1 * jax.random.normal(k2, (c,), jnp.float32)
    mean = 0.1 * jax.random.normal(k3, (c,), jnp.float32)
    var = 1.0 + 0.1 * jnp.abs(jax.random.normal(k4, (c,), jnp.float32))
    s = gamma / jnp.sqrt(var + BN_EPS)
    b = beta - mean * s
    pad = (0, CPAD - c)
    return jnp.pad(s, pad).reshape(1, CPAD), jnp.pad(b, pad).reshape(1, CPAD)


def _conv_w_padded(key, k, cin, cout):
    """(K, Cin, Cout) random conv weight -> channel-padded (K*CPAD, CPAD) bf16."""
    w = 0.1 * jax.random.normal(key, (k, cin, cout), jnp.float32)
    wp = jnp.zeros((k, CPAD, CPAD), jnp.float32).at[:, :cin, :cout].set(w)
    return wp.reshape(k * CPAD, CPAD).astype(jnp.bfloat16)


def make_branch_params(key, *, in_ch, out_main_ch, filters, K, out_filters):
    """Flat array list (kernel consumption order) + static config for one branch."""
    flat = []
    key, k1, k2 = jax.random.split(key, 3)
    # stem 1x1 conv (bias=False) + BN
    w0 = 0.1 * jax.random.normal(k1, (in_ch, out_main_ch), jnp.float32)
    w0 = jnp.pad(w0, ((0, 0), (0, CPAD - out_main_ch)))
    if in_ch > 1:
        w0 = w0.astype(jnp.bfloat16)
    s0, b0 = _bn_affine(k2, out_main_ch)
    flat += [w0, s0, b0]

    has_ds = []
    inplanes = out_main_ch
    for out_ch in filters:
        key, ka, kb, kc, kd, ke, kf = jax.random.split(key, 7)
        s1, b1 = _bn_affine(kb, out_ch)
        s2, b2 = _bn_affine(kd, out_ch)
        flat += [_conv_w_padded(ka, K, inplanes, out_ch), s1, b1,
                 _conv_w_padded(kc, K, out_ch, out_ch), s2, b2]
        if inplanes != out_ch:      # downsample = Conv1d(1x1, stride=1) + BN
            sd, bd = _bn_affine(kf, out_ch)
            flat += [_conv_w_padded(ke, 1, inplanes, out_ch), sd, bd]
            has_ds.append(True)
        else:
            has_ds.append(False)
        inplanes = out_ch

    # modality-attention 1x1 conv (with bias)
    key, kw, kb2 = jax.random.split(key, 3)
    wf = 0.1 * jax.random.normal(kw, (filters[-1], out_filters), jnp.float32)
    wf = jnp.pad(wf, ((0, CPAD - filters[-1]), (0, 0))).astype(jnp.bfloat16)
    bf = (0.1 * jax.random.normal(kb2, (out_filters,), jnp.float32)).reshape(1, out_filters)
    flat += [wf, bf]

    cfg = {"K": K, "has_ds": tuple(has_ds), "out_filters": out_filters}
    return flat, cfg


# --------------------------- pure-JAX reference -------------------------------

def _ref_branch(x, flat, *, K, has_ds, out_filters, stem_cin):
    """Same math as the kernel (folded BN, bf16 MXU operands) in plain JAX."""
    del out_filters
    it = iter(flat)
    leaky = lambda y: jnp.maximum(y, LRELU_SLOPE * y)

    def conv_k(h, w, s, b, act):
        t = h.shape[0]
        t_out = t + 3 - K
        hp = jnp.pad(h, ((1, 1), (0, 0)))
        lhs = jnp.concatenate([hp[k:k + t_out] for k in range(K)], axis=1)
        y = jnp.dot(lhs.astype(jnp.bfloat16), w, preferred_element_type=jnp.float32)
        y = y * s + b
        return leaky(y) if act else y

    w0, s0, b0 = next(it), next(it), next(it)
    if stem_cin == 1:
        h = x.astype(jnp.float32) * w0
    else:
        h = jnp.dot(x.astype(jnp.bfloat16), w0, preferred_element_type=jnp.float32)
    h = leaky(h * s0 + b0)

    for ds in has_ds:
        w1, s1, b1 = next(it), next(it), next(it)
        w2, s2, b2 = next(it), next(it), next(it)
        out = conv_k(h, w1, s1, b1, True)
        out = conv_k(out, w2, s2, b2, False)
        if ds:
            wd, sd, bd = next(it), next(it), next(it)
            res = jnp.dot(h.astype(jnp.bfloat16), wd,
                          preferred_element_type=jnp.float32) * sd + bd
        else:
            res = h
        h = leaky(out + res[:out.shape[0]])

    wf, bf = next(it), next(it)
    return jnp.dot(h.astype(jnp.bfloat16), wf, preferred_element_type=jnp.float32) + bf


# ----------------------------------- main -------------------------------------

if __name__ == "__main__":
    key = jax.random.PRNGKey(0)
    kx, kp = jax.random.split(key)

    B, C_in, L = 2, 1, 64                          # PyTorch input: (B, in_ch, L)
    x_ncw = jax.random.normal(kx, (B, C_in, L), jnp.float32)
    x_btc = jnp.transpose(x_ncw, (0, 2, 1))        # kernel layout (B, T, C)

    kcs, kfs = jax.random.split(kp)
    cs_arrays, cs_cfg = make_branch_params(kcs, in_ch=C_in, out_main_ch=32,
                                           filters=(32, 64, 128), K=7, out_filters=128)
    fs_arrays, fs_cfg = make_branch_params(kfs, in_ch=C_in, out_main_ch=32,
                                           filters=(32, 64, 128), K=3, out_filters=128)

    fwd = jax.jit(functools.partial(msfe_forward, cs_cfg=cs_cfg, fs_cfg=fs_cfg))
    y_cs, y_fs = jax.block_until_ready(fwd(x_btc, cs_arrays, fs_arrays))

    # --- shape checks (back to PyTorch NCW convention) ---
    y_cs_ncw = jnp.transpose(y_cs, (0, 2, 1))
    y_fs_ncw = jnp.transpose(y_fs, (0, 2, 1))
    # course: each of the 3 blocks shrinks length by 8 -> L - 24; fine preserves length.
    assert y_cs_ncw.shape == (B, 128, L - 24), y_cs_ncw.shape
    assert y_fs_ncw.shape == (B, 128, L), y_fs_ncw.shape
    assert bool(jnp.all(jnp.isfinite(y_cs_ncw))) and bool(jnp.all(jnp.isfinite(y_fs_ncw)))

    # --- numerical check against a pure-JAX reference ---
    ref_cs = jax.vmap(lambda xb: _ref_branch(xb, cs_arrays, stem_cin=C_in, **cs_cfg))(x_btc)
    ref_fs = jax.vmap(lambda xb: _ref_branch(xb, fs_arrays, stem_cin=C_in, **fs_cfg))(x_btc)
    np.testing.assert_allclose(np.asarray(y_cs), np.asarray(ref_cs), rtol=2e-2, atol=2e-2)
    np.testing.assert_allclose(np.asarray(y_fs), np.asarray(ref_fs), rtol=2e-2, atol=2e-2)

    # TODO(synk): BatchNorm1d is implemented in folded inference form only
    # (training-mode batch statistics are not computed inside the kernel).
    print("KERNEL_OK")
</pallas_src>

<mosaic_0001>
module attributes {stable_mosaic.version = 11 : i64} {
  func.func @kernel(%arg0: i32, %arg1: memref<1x64x1xf32, #tpu.memory_space<vmem>>, %arg2: memref<1x128xf32, #tpu.memory_space<vmem>>, %arg3: memref<1x128xf32, #tpu.memory_space<vmem>>, %arg4: memref<1x128xf32, #tpu.memory_space<vmem>>, %arg5: memref<896x128xbf16, #tpu.memory_space<vmem>>, %arg6: memref<1x128xf32, #tpu.memory_space<vmem>>, %arg7: memref<1x128xf32, #tpu.memory_space<vmem>>, %arg8: memref<896x128xbf16, #tpu.memory_space<vmem>>, %arg9: memref<1x128xf32, #tpu.memory_space<vmem>>, %arg10: memref<1x128xf32, #tpu.memory_space<vmem>>, %arg11: memref<896x128xbf16, #tpu.memory_space<vmem>>, %arg12: memref<1x128xf32, #tpu.memory_space<vmem>>, %arg13: memref<1x128xf32, #tpu.memory_space<vmem>>, %arg14: memref<896x128xbf16, #tpu.memory_space<vmem>>, %arg15: memref<1x128xf32, #tpu.memory_space<vmem>>, %arg16: memref<1x128xf32, #tpu.memory_space<vmem>>, %arg17: memref<128x128xbf16, #tpu.memory_space<vmem>>, %arg18: memref<1x128xf32, #tpu.memory_space<vmem>>, %arg19: memref<1x128xf32, #tpu.memory_space<vmem>>, %arg20: memref<896x128xbf16, #tpu.memory_space<vmem>>, %arg21: memref<1x128xf32, #tpu.memory_space<vmem>>, %arg22: memref<1x128xf32, #tpu.memory_space<vmem>>, %arg23: memref<896x128xbf16, #tpu.memory_space<vmem>>, %arg24: memref<1x128xf32, #tpu.memory_space<vmem>>, %arg25: memref<1x128xf32, #tpu.memory_space<vmem>>, %arg26: memref<128x128xbf16, #tpu.memory_space<vmem>>, %arg27: memref<1x128xf32, #tpu.memory_space<vmem>>, %arg28: memref<1x128xf32, #tpu.memory_space<vmem>>, %arg29: memref<128x128xbf16, #tpu.memory_space<vmem>>, %arg30: memref<1x128xf32, #tpu.memory_space<vmem>>, %arg31: memref<1x128xf32, #tpu.memory_space<vmem>>, %arg32: memref<1x128xf32, #tpu.memory_space<vmem>>, %arg33: memref<1x128xf32, #tpu.memory_space<vmem>>, %arg34: memref<384x128xbf16, #tpu.memory_space<vmem>>, %arg35: memref<1x128xf32, #tpu.memory_space<vmem>>, %arg36: memref<1x128xf32, #tpu.memory_space<vmem>>, %arg37: memref<384x128xbf16, #tpu.memory_space<vmem>>, %arg38: memref<1x128xf32, #tpu.memory_space<vmem>>, %arg39: memref<1x128xf32, #tpu.memory_space<vmem>>, %arg40: memref<384x128xbf16, #tpu.memory_space<vmem>>, %arg41: memref<1x128xf32, #tpu.memory_space<vmem>>, %arg42: memref<1x128xf32, #tpu.memory_space<vmem>>, %arg43: memref<384x128xbf16, #tpu.memory_space<vmem>>, %arg44: memref<1x128xf32, #tpu.memory_space<vmem>>, %arg45: memref<1x128xf32, #tpu.memory_space<vmem>>, %arg46: memref<128x128xbf16, #tpu.memory_space<vmem>>, %arg47: memref<1x128xf32, #tpu.memory_space<vmem>>, %arg48: memref<1x128xf32, #tpu.memory_space<vmem>>, %arg49: memref<384x128xbf16, #tpu.memory_space<vmem>>, %arg50: memref<1x128xf32, #tpu.memory_space<vmem>>, %arg51: memref<1x128xf32, #tpu.memory_space<vmem>>, %arg52: memref<384x128xbf16, #tpu.memory_space<vmem>>, %arg53: memref<1x128xf32, #tpu.memory_space<vmem>>, %arg54: memref<1x128xf32, #tpu.memory_space<vmem>>, %arg55: memref<128x128xbf16, #tpu.memory_space<vmem>>, %arg56: memref<1x128xf32, #tpu.memory_space<vmem>>, %arg57: memref<1x128xf32, #tpu.memory_space<vmem>>, %arg58: memref<128x128xbf16, #tpu.memory_space<vmem>>, %arg59: memref<1x128xf32, #tpu.memory_space<vmem>>, %arg60: memref<1x40x128xf32, #tpu.memory_space<vmem>>, %arg61: memref<1x64x128xf32, #tpu.memory_space<vmem>>, %arg62: memref<80x128xf32, #tpu.memory_space<vmem>>) attributes {dimension_semantics = [#tpu.dimension_semantics<parallel>], iteration_bounds = array<i64: 2>, scalar_prefetch = 0 : i64, scratch_operands = 1 : i64, tpu.core_type = #tpu.core_type<tc>, window_params = [{transform_indices = @transform_0, window_bounds = array<i64: 1, 64, 1>}, {pipeline_mode = #tpu.pipeline_mode<synchronous>, transform_indices = @transform_1, window_bounds = array<i64: 1, 128>}, {pipeline_mode = #tpu.pipeline_mode<synchronous>, transform_indices = @transform_2, window_bounds = array<i64: 1, 128>}, {pipeline_mode = #tpu.pipeline_mode<synchronous>, transform_indices = @transform_3, window_bounds = array<i64: 1, 128>}, {pipeline_mode = #tpu.pipeline_mode<synchronous>, transform_indices = @transform_4, window_bounds = array<i64: 896, 128>}, {pipeline_mode = #tpu.pipeline_mode<synchronous>, transform_indices = @transform_5, window_bounds = array<i64: 1, 128>}, {pipeline_mode = #tpu.pipeline_mode<synchronous>, transform_indices = @transform_6, window_bounds = array<i64: 1, 128>}, {pipeline_mode = #tpu.pipeline_mode<synchronous>, transform_indices = @transform_7, window_bounds = array<i64: 896, 128>}, {pipeline_mode = #tpu.pipeline_mode<synchronous>, transform_indices = @transform_8, window_bounds = array<i64: 1, 128>}, {pipeline_mode = #tpu.pipeline_mode<synchronous>, transform_indices = @transform_9, window_bounds = array<i64: 1, 128>}, {pipeline_mode = #tpu.pipeline_mode<synchronous>, transform_indices = @transform_10, window_bounds = array<i64: 896, 128>}, {pipeline_mode = #tpu.pipeline_mode<synchronous>, transform_indices = @transform_11, window_bounds = array<i64: 1, 128>}, {pipeline_mode = #tpu.pipeline_mode<synchronous>, transform_indices = @transform_12, window_bounds = array<i64: 1, 128>}, {pipeline_mode = #tpu.pipeline_mode<synchronous>, transform_indices = @transform_13, window_bounds = array<i64: 896, 128>}, {pipeline_mode = #tpu.pipeline_mode<synchronous>, transform_indices = @transform_14, window_bounds = array<i64: 1, 128>}, {pipeline_mode = #tpu.pipeline_mode<synchronous>, transform_indices = @transform_15, window_bounds = array<i64: 1, 128>}, {pipeline_mode = #tpu.pipeline_mode<synchronous>, transform_indices = @transform_16, window_bounds = array<i64: 128, 128>}, {pipeline_mode = #tpu.pipeline_mode<synchronous>, transform_indices = @transform_17, window_bounds = array<i64: 1, 128>}, {pipeline_mode = #tpu.pipeline_mode<synchronous>, transform_indices = @transform_18, window_bounds = array<i64: 1, 128>}, {pipeline_mode = #tpu.pipeline_mode<synchronous>, transform_indices = @transform_19, window_bounds = array<i64: 896, 128>}, {pipeline_mode = #tpu.pipeline_mode<synchronous>, transform_indices = @transform_20, window_bounds = array<i64: 1, 128>}, {pipeline_mode = #tpu.pipeline_mode<synchronous>, transform_indices = @transform_21, window_bounds = array<i64: 1, 128>}, {pipeline_mode = #tpu.pipeline_mode<synchronous>, transform_indices = @transform_22, window_bounds = array<i64: 896, 128>}, {pipeline_mode = #tpu.pipeline_mode<synchronous>, transform_indices = @transform_23, window_bounds = array<i64: 1, 128>}, {pipeline_mode = #tpu.pipeline_mode<synchronous>, transform_indices = @transform_24, window_bounds = array<i64: 1, 128>}, {pipeline_mode = #tpu.pipeline_mode<synchronous>, transform_indices = @transform_25, window_bounds = array<i64: 128, 128>}, {pipeline_mode = #tpu.pipeline_mode<synchronous>, transform_indices = @transform_26, window_bounds = array<i64: 1, 128>}, {pipeline_mode = #tpu.pipeline_mode<synchronous>, transform_indices = @transform_27, window_bounds = array<i64: 1, 128>}, {pipeline_mode = #tpu.pipeline_mode<synchronous>, transform_indices = @transform_28, window_bounds = array<i64: 128, 128>}, {pipeline_mode = #tpu.pipeline_mode<synchronous>, transform_indices = @transform_29, window_bounds = array<i64: 1, 128>}, {pipeline_mode = #tpu.pipeline_mode<synchronous>, transform_indices = @transform_30, window_bounds = array<i64: 1, 128>}, {pipeline_mode = #tpu.pipeline_mode<synchronous>, transform_indices = @transform_31, window_bounds = array<i64: 1, 128>}, {pipeline_mode = #tpu.pipeline_mode<synchronous>, transform_indices = @transform_32, window_bounds = array<i64: 1, 128>}, {pipeline_mode = #tpu.pipeline_mode<synchronous>, transform_indices = @transform_33, window_bounds = array<i64: 384, 128>}, {pipeline_mode = #tpu.pipeline_mode<synchronous>, transform_indices = @transform_34, window_bounds = array<i64: 1, 128>}, {pipeline_mode = #tpu.pipeline_mode<synchronous>, transform_indices = @transform_35, window_bounds = array<i64: 1, 128>}, {pipeline_mode = #tpu.pipeline_mode<synchronous>, transform_indices = @transform_36, window_bounds = array<i64: 384, 128>}, {pipeline_mode = #tpu.pipeline_mode<synchronous>, transform_indices = @transform_37, window_bounds = array<i64: 1, 128>}, {pipeline_mode = #tpu.pipeline_mode<synchronous>, transform_indices = @transform_38, window_bounds = array<i64: 1, 128>}, {pipeline_mode = #tpu.pipeline_mode<synchronous>, transform_indices = @transform_39, window_bounds = array<i64: 384, 128>}, {pipeline_mode = #tpu.pipeline_mode<synchronous>, transform_indices = @transform_40, window_bounds = array<i64: 1, 128>}, {pipeline_mode = #tpu.pipeline_mode<synchronous>, transform_indices = @transform_41, window_bounds = array<i64: 1, 128>}, {pipeline_mode = #tpu.pipeline_mode<synchronous>, transform_indices = @transform_42, window_bounds = array<i64: 384, 128>}, {pipeline_mode = #tpu.pipeline_mode<synchronous>, transform_indices = @transform_43, window_bounds = array<i64: 1, 128>}, {pipeline_mode = #tpu.pipeline_mode<synchronous>, transform_indices = @transform_44, window_bounds = array<i64: 1, 128>}, {pipeline_mode = #tpu.pipeline_mode<synchronous>, transform_indices = @transform_45, window_bounds = array<i64: 128, 128>}, {pipeline_mode = #tpu.pipeline_mode<synchronous>, transform_indices = @transform_46, window_bounds = array<i64: 1, 128>}, {pipeline_mode = #tpu.pipeline_mode<synchronous>, transform_indices = @transform_47, window_bounds = array<i64: 1, 128>}, {pipeline_mode = #tpu.pipeline_mode<synchronous>, transform_indices = @transform_48, window_bounds = array<i64: 384, 128>}, {pipeline_mode = #tpu.pipeline_mode<synchronous>, transform_indices = @transform_49, window_bounds = array<i64: 1, 128>}, {pipeline_mode = #tpu.pipeline_mode<synchronous>, transform_indices = @transform_50, window_bounds = array<i64: 1, 128>}, {pipeline_mode = #tpu.pipeline_mode<synchronous>, transform_indices = @transform_51, window_bounds = array<i64: 384, 128>}, {pipeline_mode = #tpu.pipeline_mode<synchronous>, transform_indices = @transform_52, window_bounds = array<i64: 1, 128>}, {pipeline_mode = #tpu.pipeline_mode<synchronous>, transform_indices = @transform_53, window_bounds = array<i64: 1, 128>}, {pipeline_mode = #tpu.pipeline_mode<synchronous>, transform_indices = @transform_54, window_bounds = array<i64: 128, 128>}, {pipeline_mode = #tpu.pipeline_mode<synchronous>, transform_indices = @transform_55, window_bounds = array<i64: 1, 128>}, {pipeline_mode = #tpu.pipeline_mode<synchronous>, transform_indices = @transform_56, window_bounds = array<i64: 1, 128>}, {pipeline_mode = #tpu.pipeline_mode<synchronous>, transform_indices = @transform_57, window_bounds = array<i64: 128, 128>}, {pipeline_mode = #tpu.pipeline_mode<synchronous>, transform_indices = @transform_58, window_bounds = array<i64: 1, 128>}, {transform_indices = @transform_59, window_bounds = array<i64: 1, 40, 128>}, {transform_indices = @transform_60, window_bounds = array<i64: 1, 64, 128>}]} {
    %cst = arith.constant 0.000000e+00 : f32
    %0 = vector.broadcast %cst : f32 to vector<1x128xf32>
    %c0 = arith.constant 0 : index
    %c0_0 = arith.constant 0 : index
    %c0_1 = arith.constant 0 : index
    %1 = vector.load %arg1[%c0, %c0_0, %c0_1] : memref<1x64x1xf32, #tpu.memory_space<vmem>>, vector<1x64x1xf32>
    %2 = vector.shape_cast %1 : vector<1x64x1xf32> to vector<64x1xf32>
    %c0_2 = arith.constant 0 : index
    %c0_3 = arith.constant 0 : index
    %3 = vector.load %arg2[%c0_2, %c0_3] : memref<1x128xf32, #tpu.memory_space<vmem>>, vector<1x128xf32>
    %4 = vector.broadcast %2 : vector<64x1xf32> to vector<64x128xf32>
    %5 = vector.broadcast %3 : vector<1x128xf32> to vector<64x128xf32>
    %6 = arith.mulf %4, %5 : vector<64x128xf32>
    %c0_4 = arith.constant 0 : index
    %c0_5 = arith.constant 0 : index
    %7 = vector.load %arg3[%c0_4, %c0_5] : memref<1x128xf32, #tpu.memory_space<vmem>>, vector<1x128xf32>
    %8 = vector.broadcast %7 : vector<1x128xf32> to vector<64x128xf32>
    %9 = arith.mulf %6, %8 : vector<64x128xf32>
    %c0_6 = arith.constant 0 : index
    %c0_7 = arith.constant 0 : index
    %10 = vector.load %arg4[%c0_6, %c0_7] : memref<1x128xf32, #tpu.memory_space<vmem>>, vector<1x128xf32>
    %11 = vector.broadcast %10 : vector<1x128xf32> to vector<64x128xf32>
    %12 = arith.addf %9, %11 : vector<64x128xf32>
    %cst_8 = arith.constant 0.00999999977 : f32
    %13 = vector.broadcast %cst_8 : f32 to vector<64x128xf32>
    %14 = arith.mulf %13, %12 : vector<64x128xf32>
    %15 = arith.maximumf %12, %14 : vector<64x128xf32>
    %c7 = arith.constant 7 : index
    %c0_9 = arith.constant 0 : index
    %16 = vector.load %arg62[%c7, %c0_9] : memref<80x128xf32, #tpu.memory_space<vmem>>, vector<1x128xf32>
    tpu.vector_store %arg62[%c7, %c0_9], %0 {strides = array<i32>} : memref<80x128xf32, #tpu.memory_space<vmem>>, vector<1x128xf32>,
    %c72 = arith.constant 72 : index
    %c0_10 = arith.constant 0 : index
    %17 = vector.load %arg62[%c72, %c0_10] : memref<80x128xf32, #tpu.memory_space<vmem>>, vector<1x128xf32>
    tpu.vector_store %arg62[%c72, %c0_10], %0 {strides = array<i32>} : memref<80x128xf32, #tpu.memory_space<vmem>>, vector<1x128xf32>,
    %c8 = arith.constant 8 : index
    %c0_11 = arith.constant 0 : index
    %18 = vector.load %arg62[%c8, %c0_11] : memref<80x128xf32, #tpu.memory_space<vmem>>, vector<64x128xf32>
    tpu.vector_store %arg62[%c8, %c0_11], %15 {strides = array<i32>} : memref<80x128xf32, #tpu.memory_space<vmem>>, vector<64x128xf32>,
    %c7_12 = arith.constant 7 : index
    %c0_13 = arith.constant 0 : index
    %19 = vector.load %arg62[%c7_12, %c0_13] : memref<80x128xf32, #tpu.memory_space<vmem>>, vector<60x128xf32>
    %c8_14 = arith.constant 8 : index
    %c0_15 = arith.constant 0 : index
    %20 = vector.load %arg62[%c8_14, %c0_15] : memref<80x128xf32, #tpu.memory_space<vmem>>, vector<60x128xf32>
    %c9 = arith.constant 9 : index
    %c0_16 = arith.constant 0 : index
    %21 = vector.load %arg62[%c9, %c0_16] : memref<80x128xf32, #tpu.memory_space<vmem>>, vector<60x128xf32>
    %c10 = arith.constant 10 : index
    %c0_17 = arith.constant 0 : index
    %22 = vector.load %arg62[%c10, %c0_17] : memref<80x128xf32, #tpu.memory_space<vmem>>, vector<60x128xf32>
    %c11 = arith.constant 11 : index
    %c0_18 = arith.constant 0 : index
    %23 = vector.load %arg62[%c11, %c0_18] : memref<80x128xf32, #tpu.memory_space<vmem>>, vector<60x128xf32>
    %c12 = arith.constant 12 : index
    %c0_19 = arith.constant 0 : index
    %24 = vector.load %arg62[%c12, %c0_19] : memref<80x128xf32, #tpu.memory_space<vmem>>, vector<60x128xf32>
    %c13 = arith.constant 13 : index
    %c0_20 = arith.constant 0 : index
    %25 = vector.load %arg62[%c13, %c0_20] : memref<80x128xf32, #tpu.memory_space<vmem>>, vector<60x128xf32>
    %26 = tpu.concatenate %19, %20, %21, %22, %23, %24, %25 in 1 : vector<60x128xf32>, vector<60x128xf32>, vector<60x128xf32>, vector<60x128xf32>, vector<60x128xf32>, vector<60x128xf32>, vector<60x128xf32> -> vector<60x896xf32>
    %27 = arith.truncf %26 : vector<60x896xf32> to vector<60x896xbf16>
    %c0_21 = arith.constant 0 : index
    %c0_22 = arith.constant 0 : index
    %28 = vector.load %arg5[%c0_21, %c0_22] : memref<896x128xbf16, #tpu.memory_space<vmem>>, vector<896x128xbf16>
    %cst_23 = arith.constant dense<0.000000e+00> : vector<60x128xf32>
    %29 = tpu.matmul %27, %28, %cst_23 {dimension_numbers = #tpu.dot_dimension_numbers<[1], [0], [0], [1], [0, 0, 1, 1], [], []>} : vector<60x896xbf16>, vector<896x128xbf16>, vector<60x128xf32> -> vector<60x128xf32>
    %c0_24 = arith.constant 0 : index
    %c0_25 = arith.constant 0 : index
    %30 = vector.load %arg6[%c0_24, %c0_25] : memref<1x128xf32, #tpu.memory_space<vmem>>, vector<1x128xf32>
    %31 = vector.broadcast %30 : vector<1x128xf32> to vector<60x128xf32>
    %32 = arith.mulf %29, %31 : vector<60x128xf32>
    %c0_26 = arith.constant 0 : index
    %c0_27 = arith.constant 0 : index
    %33 = vector.load %arg7[%c0_26, %c0_27] : memref<1x128xf32, #tpu.memory_space<vmem>>, vector<1x128xf32>
    %34 = vector.broadcast %33 : vector<1x128xf32> to vector<60x128xf32>
    %35 = arith.addf %32, %34 : vector<60x128xf32>
    %cst_28 = arith.constant 0.00999999977 : f32
    %36 = vector.broadcast %cst_28 : f32 to vector<60x128xf32>
    %37 = arith.mulf %36, %35 : vector<60x128xf32>
    %38 = arith.maximumf %35, %37 : vector<60x128xf32>
    %c7_29 = arith.constant 7 : index
    %c0_30 = arith.constant 0 : index
    %39 = vector.load %arg62[%c7_29, %c0_30] : memref<80x128xf32, #tpu.memory_space<vmem>>, vector<1x128xf32>
    tpu.vector_store %arg62[%c7_29, %c0_30], %0 {strides = array<i32>} : memref<80x128xf32, #tpu.memory_space<vmem>>, vector<1x128xf32>,
    %c68 = arith.constant 68 : index
    %c0_31 = arith.constant 0 : index
    %40 = vector.load %arg62[%c68, %c0_31] : memref<80x128xf32, #tpu.memory_space<vmem>>, vector<1x128xf32>
    tpu.vector_store %arg62[%c68, %c0_31], %0 {strides = array<i32>} : memref<80x128xf32, #tpu.memory_space<vmem>>, vector<1x128xf32>,
    %c8_32 = arith.constant 8 : index
    %c0_33 = arith.constant 0 : index
    %41 = vector.load %arg62[%c8_32, %c0_33] : memref<80x128xf32, #tpu.memory_space<vmem>>, vector<60x128xf32>
    tpu.vector_store %arg62[%c8_32, %c0_33], %38 {strides = array<i32>} : memref<80x128xf32, #tpu.memory_space<vmem>>, vector<60x128xf32>,
    %c7_34 = arith.constant 7 : index
    %c0_35 = arith.constant 0 : index
    %42 = vector.load %arg62[%c7_34, %c0_35] : memref<80x128xf32, #tpu.memory_space<vmem>>, vector<56x128xf32>
    %c8_36 = arith.constant 8 : index
    %c0_37 = arith.constant 0 : index
    %43 = vector.load %arg62[%c8_36, %c0_37] : memref<80x128xf32, #tpu.memory_space<vmem>>, vector<56x128xf32>
    %c9_38 = arith.constant 9 : index
    %c0_39 = arith.constant 0 : index
    %44 = vector.load %arg62[%c9_38, %c0_39] : memref<80x128xf32, #tpu.memory_space<vmem>>, vector<56x128xf32>
    %c10_40 = arith.constant 10 : index
    %c0_41 = arith.constant 0 : index
    %45 = vector.load %arg62[%c10_40, %c0_41] : memref<80x128xf32, #tpu.memory_space<vmem>>, vector<56x128xf32>
    %c11_42 = arith.constant 11 : index
    %c0_43 = arith.constant 0 : index
    %46 = vector.load %arg62[%c11_42, %c0_43] : memref<80x128xf32, #tpu.memory_space<vmem>>, vector<56x128xf32>
    %c12_44 = arith.constant 12 : index
    %c0_45 = arith.constant 0 : index
    %47 = vector.load %arg62[%c12_44, %c0_45] : memref<80x128xf32, #tpu.memory_space<vmem>>, vector<56x128xf32>
    %c13_46 = arith.constant 13 : index
    %c0_47 = arith.constant 0 : index
    %48 = vector.load %arg62[%c13_46, %c0_47] : memref<80x128xf32, #tpu.memory_space<vmem>>, vector<56x128xf32>
    %49 = tpu.concatenate %42, %43, %44, %45, %46, %47, %48 in 1 : vector<56x128xf32>, vector<56x128xf32>, vector<56x128xf32>, vector<56x128xf32>, vector<56x128xf32>, vector<56x128xf32>, vector<56x128xf32> -> vector<56x896xf32>
    %50 = arith.truncf %49 : vector<56x896xf32> to vector<56x896xbf16>
    %c0_48 = arith.constant 0 : index
    %c0_49 = arith.constant 0 : index
    %51 = vector.load %arg8[%c0_48, %c0_49] : memref<896x128xbf16, #tpu.memory_space<vmem>>, vector<896x128xbf16>
    %cst_50 = arith.constant dense<0.000000e+00> : vector<56x128xf32>
    %52 = tpu.matmul %50, %51, %cst_50 {dimension_numbers = #tpu.dot_dimension_numbers<[1], [0], [0], [1], [0, 0, 1, 1], [], []>} : vector<56x896xbf16>, vector<896x128xbf16>, vector<56x128xf32> -> vector<56x128xf32>
    %c0_51 = arith.constant 0 : index
    %c0_52 = arith.constant 0 : index
    %53 = vector.load %arg9[%c0_51, %c0_52] : memref<1x128xf32, #tpu.memory_space<vmem>>, vector<1x128xf32>
    %54 = vector.broadcast %53 : vector<1x128xf32> to vector<56x128xf32>
    %55 = arith.mulf %52, %54 : vector<56x128xf32>
    %c0_53 = arith.constant 0 : index
    %c0_54 = arith.constant 0 : index
    %56 = vector.load %arg10[%c0_53, %c0_54] : memref<1x128xf32, #tpu.memory_space<vmem>>, vector<1x128xf32>
    %57 = vector.broadcast %56 : vector<1x128xf32> to vector<56x128xf32>
    %58 = arith.addf %55, %57 : vector<56x128xf32>
    %59 = vector.extract_strided_slice %15 {offsets = [0, 0], sizes = [56, 128], strides = [1, 1]} : vector<64x128xf32> to vector<56x128xf32>
    %60 = arith.addf %58, %59 : vector<56x128xf32>
    %cst_55 = arith.constant 0.00999999977 : f32
    %61 = vector.broadcast %cst_55 : f32 to vector<56x128xf32>
    %62 = arith.mulf %61, %60 : vector<56x128xf32>
    %63 = arith.maximumf %60, %62 : vector<56x128xf32>
    %c7_56 = arith.constant 7 : index
    %c0_57 = arith.constant 0 : index
    %64 = vector.load %arg62[%c7_56, %c0_57] : memref<80x128xf32, #tpu.memory_space<vmem>>, vector<1x128xf32>
    tpu.vector_store %arg62[%c7_56, %c0_57], %0 {strides = array<i32>} : memref<80x128xf32, #tpu.memory_space<vmem>>, vector<1x128xf32>,
    %c64 = arith.constant 64 : index
    %c0_58 = arith.constant 0 : index
    %65 = vector.load %arg62[%c64, %c0_58] : memref<80x128xf32, #tpu.memory_space<vmem>>, vector<1x128xf32>
    tpu.vector_store %arg62[%c64, %c0_58], %0 {strides = array<i32>} : memref<80x128xf32, #tpu.memory_space<vmem>>, vector<1x128xf32>,
    %c8_59 = arith.constant 8 : index
    %c0_60 = arith.constant 0 : index
    %66 = vector.load %arg62[%c8_59, %c0_60] : memref<80x128xf32, #tpu.memory_space<vmem>>, vector<56x128xf32>
    tpu.vector_store %arg62[%c8_59, %c0_60], %63 {strides = array<i32>} : memref<80x128xf32, #tpu.memory_space<vmem>>, vector<56x128xf32>,
    %c7_61 = arith.constant 7 : index
    %c0_62 = arith.constant 0 : index
    %67 = vector.load %arg62[%c7_61, %c0_62] : memref<80x128xf32, #tpu.memory_space<vmem>>, vector<52x128xf32>
    %c8_63 = arith.constant 8 : index
    %c0_64 = arith.constant 0 : index
    %68 = vector.load %arg62[%c8_63, %c0_64] : memref<80x128xf32, #tpu.memory_space<vmem>>, vector<52x128xf32>
    %c9_65 = arith.constant 9 : index
    %c0_66 = arith.constant 0 : index
    %69 = vector.load %arg62[%c9_65, %c0_66] : memref<80x128xf32, #tpu.memory_space<vmem>>, vector<52x128xf32>
    %c10_67 = arith.constant 10 : index
    %c0_68 = arith.constant 0 : index
    %70 = vector.load %arg62[%c10_67, %c0_68] : memref<80x128xf32, #tpu.memory_space<vmem>>, vector<52x128xf32>
    %c11_69 = arith.constant 11 : index
    %c0_70 = arith.constant 0 : index
    %71 = vector.load %arg62[%c11_69, %c0_70] : memref<80x128xf32, #tpu.memory_space<vmem>>, vector<52x128xf32>
    %c12_71 = arith.constant 12 : index
    %c0_72 = arith.constant 0 : index
    %72 = vector.load %arg62[%c12_71, %c0_72] : memref<80x128xf32, #tpu.memory_space<vmem>>, vector<52x128xf32>
    %c13_73 = arith.constant 13 : index
    %c0_74 = arith.constant 0 : index
    %73 = vector.load %arg62[%c13_73, %c0_74] : memref<80x128xf32, #tpu.memory_space<vmem>>, vector<52x128xf32>
    %74 = tpu.concatenate %67, %68, %69, %70, %71, %72, %73 in 1 : vector<52x128xf32>, vector<52x128xf32>, vector<52x128xf32>, vector<52x128xf32>, vector<52x128xf32>, vector<52x128xf32>, vector<52x128xf32> -> vector<52x896xf32>
    %75 = arith.truncf %74 : vector<52x896xf32> to vector<52x896xbf16>
    %c0_75 = arith.constant 0 : index
    %c0_76 = arith.constant 0 : index
    %76 = vector.load %arg11[%c0_75, %c0_76] : memref<896x128xbf16, #tpu.memory_space<vmem>>, vector<896x128xbf16>
    %cst_77 = arith.constant dense<0.000000e+00> : vector<52x128xf32>
    %77 = tpu.matmul %75, %76, %cst_77 {dimension_numbers = #tpu.dot_dimension_numbers<[1], [0], [0], [1], [0, 0, 1, 1], [], []>} : vector<52x896xbf16>, vector<896x128xbf16>, vector<52x128xf32> -> vector<52x128xf32>
    %c0_78 = arith.constant 0 : index
    %c0_79 = arith.constant 0 : index
    %78 = vector.load %arg12[%c0_78, %c0_79] : memref<1x128xf32, #tpu.memory_space<vmem>>, vector<1x128xf32>
    %79 = vector.broadcast %78 : vector<1x128xf32> to vector<52x128xf32>
    %80 = arith.mulf %77, %79 : vector<52x128xf32>
    %c0_80 = arith.constant 0 : index
    %c0_81 = arith.constant 0 : index
    %81 = vector.load %arg13[%c0_80, %c0_81] : memref<1x128xf32, #tpu.memory_space<vmem>>, vector<1x128xf32>
    %82 = vector.broadcast %81 : vector<1x128xf32> to vector<52x128xf32>
    %83 = arith.addf %80, %82 : vector<52x128xf32>
    %cst_82 = arith.constant 0.00999999977 : f32
    %84 = vector.broadcast %cst_82 : f32 to vector<52x128xf32>
    %85 = arith.mulf %84, %83 : vector<52x128xf32>
    %86 = arith.maximumf %83, %85 : vector<52x128xf32>
    %c7_83 = arith.constant 7 : index
    %c0_84 = arith.constant 0 : index
    %87 = vector.load %arg62[%c7_83, %c0_84] : memref<80x128xf32, #tpu.memory_space<vmem>>, vector<1x128xf32>
    tpu.vector_store %arg62[%c7_83, %c0_84], %0 {strides = array<i32>} : memref<80x128xf32, #tpu.memory_space<vmem>>, vector<1x128xf32>,
    %c60 = arith.constant 60 : index
    %c0_85 = arith.constant 0 : index
    %88 = vector.load %arg62[%c60, %c0_85] : memref<80x128xf32, #tpu.memory_space<vmem>>, vector<1x128xf32>
    tpu.vector_store %arg62[%c60, %c0_85], %0 {strides = array<i32>} : memref<80x128xf32, #tpu.memory_space<vmem>>, vector<1x128xf32>,
    %c8_86 = arith.constant 8 : index
    %c0_87 = arith.constant 0 : index
    %89 = vector.load %arg62[%c8_86, %c0_87] : memref<80x128xf32, #tpu.memory_space<vmem>>, vector<52x128xf32>
    tpu.vector_store %arg62[%c8_86, %c0_87], %86 {strides = array<i32>} : memref<80x128xf32, #tpu.memory_space<vmem>>, vector<52x128xf32>,
    %c7_88 = arith.constant 7 : index
    %c0_89 = arith.constant 0 : index
    %90 = vector.load %arg62[%c7_88, %c0_89] : memref<80x128xf32, #tpu.memory_space<vmem>>, vector<48x128xf32>
    %c8_90 = arith.constant 8 : index
    %c0_91 = arith.constant 0 : index
    %91 = vector.load %arg62[%c8_90, %c0_91] : memref<80x128xf32, #tpu.memory_space<vmem>>, vector<48x128xf32>
    %c9_92 = arith.constant 9 : index
    %c0_93 = arith.constant 0 : index
    %92 = vector.load %arg62[%c9_92, %c0_93] : memref<80x128xf32, #tpu.memory_space<vmem>>, vector<48x128xf32>
    %c10_94 = arith.constant 10 : index
    %c0_95 = arith.constant 0 : index
    %93 = vector.load %arg62[%c10_94, %c0_95] : memref<80x128xf32, #tpu.memory_space<vmem>>, vector<48x128xf32>
    %c11_96 = arith.constant 11 : index
    %c0_97 = arith.constant 0 : index
    %94 = vector.load %arg62[%c11_96, %c0_97] : memref<80x128xf32, #tpu.memory_space<vmem>>, vector<48x128xf32>
    %c12_98 = arith.constant 12 : index
    %c0_99 = arith.constant 0 : index
    %95 = vector.load %arg62[%c12_98, %c0_99] : memref<80x128xf32, #tpu.memory_space<vmem>>, vector<48x128xf32>
    %c13_100 = arith.constant 13 : index
    %c0_101 = arith.constant 0 : index
    %96 = vector.load %arg62[%c13_100, %c0_101] : memref<80x128xf32, #tpu.memory_space<vmem>>, vector<48x128xf32>
    %97 = tpu.concatenate %90, %91, %92, %93, %94, %95, %96 in 1 : vector<48x128xf32>, vector<48x128xf32>, vector<48x128xf32>, vector<48x128xf32>, vector<48x128xf32>, vector<48x128xf32>, vector<48x128xf32> -> vector<48x896xf32>
    %98 = arith.truncf %97 : vector<48x896xf32> to vector<48x896xbf16>
    %c0_102 = arith.constant 0 : index
    %c0_103 = arith.constant 0 : index
    %99 = vector.load %arg14[%c0_102, %c0_103] : memref<896x128xbf16, #tpu.memory_space<vmem>>, vector<896x128xbf16>
    %cst_104 = arith.constant dense<0.000000e+00> : vector<48x128xf32>
    %100 = tpu.matmul %98, %99, %cst_104 {dimension_numbers = #tpu.dot_dimension_numbers<[1], [0], [0], [1], [0, 0, 1, 1], [], []>} : vector<48x896xbf16>, vector<896x128xbf16>, vector<48x128xf32> -> vector<48x128xf32>
    %c0_105 = arith.constant 0 : index
    %c0_106 = arith.constant 0 : index
    %101 = vector.load %arg15[%c0_105, %c0_106] : memref<1x128xf32, #tpu.memory_space<vmem>>, vector<1x128xf32>
    %102 = vector.broadcast %101 : vector<1x128xf32> to vector<48x128xf32>
    %103 = arith.mulf %100, %102 : vector<48x128xf32>
    %c0_107 = arith.constant 0 : index
    %c0_108 = arith.constant 0 : index
    %104 = vector.load %arg16[%c0_107, %c0_108] : memref<1x128xf32, #tpu.memory_space<vmem>>, vector<1x128xf32>
    %105 = vector.broadcast %104 : vector<1x128xf32> to vector<48x128xf32>
    %106 = arith.addf %103, %105 : vector<48x128xf32>
    %107 = arith.truncf %63 : vector<56x128xf32> to vector<56x128xbf16>
    %c0_109 = arith.constant 0 : index
    %c0_110 = arith.constant 0 : index
    %108 = vector.load %arg17[%c0_109, %c0_110] : memref<128x128xbf16, #tpu.memory_space<vmem>>, vector<128x128xbf16>
    %cst_111 = arith.constant dense<0.000000e+00> : vector<56x128xf32>
    %109 = tpu.matmul %107, %108, %cst_111 {dimension_numbers = #tpu.dot_dimension_numbers<[1], [0], [0], [1], [0, 0, 1, 1], [], []>} : vector<56x128xbf16>, vector<128x128xbf16>, vector<56x128xf32> -> vector<56x128xf32>
    %c0_112 = arith.constant 0 : index
    %c0_113 = arith.constant 0 : index
    %110 = vector.load %arg18[%c0_112, %c0_113] : memref<1x128xf32, #tpu.memory_space<vmem>>, vector<1x128xf32>
    %111 = vector.broadcast %110 : vector<1x128xf32> to vector<56x128xf32>
    %112 = arith.mulf %109, %111 : vector<56x128xf32>
    %c0_114 = arith.constant 0 : index
    %c0_115 = arith.constant 0 : index
    %113 = vector.load %arg19[%c0_114, %c0_115] : memref<1x128xf32, #tpu.memory_space<vmem>>, vector<1x128xf32>
    %114 = vector.broadcast %113 : vector<1x128xf32> to vector<56x128xf32>
    %115 = arith.addf %112, %114 : vector<56x128xf32>
    %116 = vector.extract_strided_slice %115 {offsets = [0, 0], sizes = [48, 128], strides = [1, 1]} : vector<56x128xf32> to vector<48x128xf32>
    %117 = arith.addf %106, %116 : vector<48x128xf32>
    %cst_116 = arith.constant 0.00999999977 : f32
    %118 = vector.broadcast %cst_116 : f32 to vector<48x128xf32>
    %119 = arith.mulf %118, %117 : vector<48x128xf32>
    %120 = arith.maximumf %117, %119 : vector<48x128xf32>
    %c7_117 = arith.constant 7 : index
    %c0_118 = arith.constant 0 : index
    %121 = vector.load %arg62[%c7_117, %c0_118] : memref<80x128xf32, #tpu.memory_space<vmem>>, vector<1x128xf32>
    tpu.vector_store %arg62[%c7_117, %c0_118], %0 {strides = array<i32>} : memref<80x128xf32, #tpu.memory_space<vmem>>, vector<1x128xf32>,
    %c56 = arith.constant 56 : index
    %c0_119 = arith.constant 0 : index
    %122 = vector.load %arg62[%c56, %c0_119] : memref<80x128xf32, #tpu.memory_space<vmem>>, vector<1x128xf32>
    tpu.vector_store %arg62[%c56, %c0_119], %0 {strides = array<i32>} : memref<80x128xf32, #tpu.memory_space<vmem>>, vector<1x128xf32>,
    %c8_120 = arith.constant 8 : index
    %c0_121 = arith.constant 0 : index
    %123 = vector.load %arg62[%c8_120, %c0_121] : memref<80x128xf32, #tpu.memory_space<vmem>>, vector<48x128xf32>
    tpu.vector_store %arg62[%c8_120, %c0_121], %120 {strides = array<i32>} : memref<80x128xf32, #tpu.memory_space<vmem>>, vector<48x128xf32>,
    %c7_122 = arith.constant 7 : index
    %c0_123 = arith.constant 0 : index
    %124 = vector.load %arg62[%c7_122, %c0_123] : memref<80x128xf32, #tpu.memory_space<vmem>>, vector<44x128xf32>
    %c8_124 = arith.constant 8 : index
    %c0_125 = arith.constant 0 : index
    %125 = vector.load %arg62[%c8_124, %c0_125] : memref<80x128xf32, #tpu.memory_space<vmem>>, vector<44x128xf32>
    %c9_126 = arith.constant 9 : index
    %c0_127 = arith.constant 0 : index
    %126 = vector.load %arg62[%c9_126, %c0_127] : memref<80x128xf32, #tpu.memory_space<vmem>>, vector<44x128xf32>
    %c10_128 = arith.constant 10 : index
    %c0_129 = arith.constant 0 : index
    %127 = vector.load %arg62[%c10_128, %c0_129] : memref<80x128xf32, #tpu.memory_space<vmem>>, vector<44x128xf32>
    %c11_130 = arith.constant 11 : index
    %c0_131 = arith.constant 0 : index
    %128 = vector.load %arg62[%c11_130, %c0_131] : memref<80x128xf32, #tpu.memory_space<vmem>>, vector<44x128xf32>
    %c12_132 = arith.constant 12 : index
    %c0_133 = arith.constant 0 : index
    %129 = vector.load %arg62[%c12_132, %c0_133] : memref<80x128xf32, #tpu.memory_space<vmem>>, vector<44x128xf32>
    %c13_134 = arith.constant 13 : index
    %c0_135 = arith.constant 0 : index
    %130 = vector.load %arg62[%c13_134, %c0_135] : memref<80x128xf32, #tpu.memory_space<vmem>>, vector<44x128xf32>
    %131 = tpu.concatenate %124, %125, %126, %127, %128, %129, %130 in 1 : vector<44x128xf32>, vector<44x128xf32>, vector<44x128xf32>, vector<44x128xf32>, vector<44x128xf32>, vector<44x128xf32>, vector<44x128xf32> -> vector<44x896xf32>
    %132 = arith.truncf %131 : vector<44x896xf32> to vector<44x896xbf16>
    %c0_136 = arith.constant 0 : index
    %c0_137 = arith.constant 0 : index
    %133 = vector.load %arg20[%c0_136, %c0_137] : memref<896x128xbf16, #tpu.memory_space<vmem>>, vector<896x128xbf16>
    %cst_138 = arith.constant dense<0.000000e+00> : vector<44x128xf32>
    %134 = tpu.matmul %132, %133, %cst_138 {dimension_numbers = #tpu.dot_dimension_numbers<[1], [0], [0], [1], [0, 0, 1, 1], [], []>} : vector<44x896xbf16>, vector<896x128xbf16>, vector<44x128xf32> -> vector<44x128xf32>
    %c0_139 = arith.constant 0 : index
    %c0_140 = arith.constant 0 : index
    %135 = vector.load %arg21[%c0_139, %c0_140] : memref<1x128xf32, #tpu.memory_space<vmem>>, vector<1x128xf32>
    %136 = vector.broadcast %135 : vector<1x128xf32> to vector<44x128xf32>
    %137 = arith.mulf %134, %136 : vector<44x128xf32>
    %c0_141 = arith.constant 0 : index
    %c0_142 = arith.constant 0 : index
    %138 = vector.load %arg22[%c0_141, %c0_142] : memref<1x128xf32, #tpu.memory_space<vmem>>, vector<1x128xf32>
    %139 = vector.broadcast %138 : vector<1x128xf32> to vector<44x128xf32>
    %140 = arith.addf %137, %139 : vector<44x128xf32>
    %cst_143 = arith.constant 0.00999999977 : f32
    %141 = vector.broadcast %cst_143 : f32 to vector<44x128xf32>
    %142 = arith.mulf %141, %140 : vector<44x128xf32>
    %143 = arith.maximumf %140, %142 : vector<44x128xf32>
    %c7_144 = arith.constant 7 : index
    %c0_145 = arith.constant 0 : index
    %144 = vector.load %arg62[%c7_144, %c0_145] : memref<80x128xf32, #tpu.memory_space<vmem>>, vector<1x128xf32>
    tpu.vector_store %arg62[%c7_144, %c0_145], %0 {strides = array<i32>} : memref<80x128xf32, #tpu.memory_space<vmem>>, vector<1x128xf32>,
    %c52 = arith.constant 52 : index
    %c0_146 = arith.constant 0 : index
    %145 = vector.load %arg62[%c52, %c0_146] : memref<80x128xf32, #tpu.memory_space<vmem>>, vector<1x128xf32>
    tpu.vector_store %arg62[%c52, %c0_146], %0 {strides = array<i32>} : memref<80x128xf32, #tpu.memory_space<vmem>>, vector<1x128xf32>,
    %c8_147 = arith.constant 8 : index
    %c0_148 = arith.constant 0 : index
    %146 = vector.load %arg62[%c8_147, %c0_148] : memref<80x128xf32, #tpu.memory_space<vmem>>, vector<44x128xf32>
    tpu.vector_store %arg62[%c8_147, %c0_148], %143 {strides = array<i32>} : memref<80x128xf32, #tpu.memory_space<vmem>>, vector<44x128xf32>,
    %c7_149 = arith.constant 7 : index
    %c0_150 = arith.constant 0 : index
    %147 = vector.load %arg62[%c7_149, %c0_150] : memref<80x128xf32, #tpu.memory_space<vmem>>, vector<40x128xf32>
    %c8_151 = arith.constant 8 : index
    %c0_152 = arith.constant 0 : index
    %148 = vector.load %arg62[%c8_151, %c0_152] : memref<80x128xf32, #tpu.memory_space<vmem>>, vector<40x128xf32>
    %c9_153 = arith.constant 9 : index
    %c0_154 = arith.constant 0 : index
    %149 = vector.load %arg62[%c9_153, %c0_154] : memref<80x128xf32, #tpu.memory_space<vmem>>, vector<40x128xf32>
    %c10_155 = arith.constant 10 : index
    %c0_156 = arith.constant 0 : index
    %150 = vector.load %arg62[%c10_155, %c0_156] : memref<80x128xf32, #tpu.memory_space<vmem>>, vector<40x128xf32>
    %c11_157 = arith.constant 11 : index
    %c0_158 = arith.constant 0 : index
    %151 = vector.load %arg62[%c11_157, %c0_158] : memref<80x128xf32, #tpu.memory_space<vmem>>, vector<40x128xf32>
    %c12_159 = arith.constant 12 : index
    %c0_160 = arith.constant 0 : index
    %152 = vector.load %arg62[%c12_159, %c0_160] : memref<80x128xf32, #tpu.memory_space<vmem>>, vector<40x128xf32>
    %c13_161 = arith.constant 13 : index
    %c0_162 = arith.constant 0 : index
    %153 = vector.load %arg62[%c13_161, %c0_162] : memref<80x128xf32, #tpu.memory_space<vmem>>, vector<40x128xf32>
    %154 = tpu.concatenate %147, %148, %149, %150, %151, %152, %153 in 1 : vector<40x128xf32>, vector<40x128xf32>, vector<40x128xf32>, vector<40x128xf32>, vector<40x128xf32>, vector<40x128xf32>, vector<40x128xf32> -> vector<40x896xf32>
    %155 = arith.truncf %154 : vector<40x896xf32> to vector<40x896xbf16>
    %c0_163 = arith.constant 0 : index
    %c0_164 = arith.constant 0 : index
    %156 = vector.load %arg23[%c0_163, %c0_164] : memref<896x128xbf16, #tpu.memory_space<vmem>>, vector<896x128xbf16>
    %cst_165 = arith.constant dense<0.000000e+00> : vector<40x128xf32>
    %157 = tpu.matmul %155, %156, %cst_165 {dimension_numbers = #tpu.dot_dimension_numbers<[1], [0], [0], [1], [0, 0, 1, 1], [], []>} : vector<40x896xbf16>, vector<896x128xbf16>, vector<40x128xf32> -> vector<40x128xf32>
    %c0_166 = arith.constant 0 : index
    %c0_167 = arith.constant 0 : index
    %158 = vector.load %arg24[%c0_166, %c0_167] : memref<1x128xf32, #tpu.memory_space<vmem>>, vector<1x128xf32>
    %159 = vector.broadcast %158 : vector<1x128xf32> to vector<40x128xf32>
    %160 = arith.mulf %157, %159 : vector<40x128xf32>
    %c0_168 = arith.constant 0 : index
    %c0_169 = arith.constant 0 : index
    %161 = vector.load %arg25[%c0_168, %c0_169] : memref<1x128xf32, #tpu.memory_space<vmem>>, vector<1x128xf32>
    %162 = vector.broadcast %161 : vector<1x128xf32> to vector<40x128xf32>
    %163 = arith.addf %160, %162 : vector<40x128xf32>
    %164 = arith.truncf %120 : vector<48x128xf32> to vector<48x128xbf16>
    %c0_170 = arith.constant 0 : index
    %c0_171 = arith.constant 0 : index
    %165 = vector.load %arg26[%c0_170, %c0_171] : memref<128x128xbf16, #tpu.memory_space<vmem>>, vector<128x128xbf16>
    %cst_172 = arith.constant dense<0.000000e+00> : vector<48x128xf32>
    %166 = tpu.matmul %164, %165, %cst_172 {dimension_numbers = #tpu.dot_dimension_numbers<[1], [0], [0], [1], [0, 0, 1, 1], [], []>} : vector<48x128xbf16>, vector<128x128xbf16>, vector<48x128xf32> -> vector<48x128xf32>
    %c0_173 = arith.constant 0 : index
    %c0_174 = arith.constant 0 : index
    %167 = vector.load %arg27[%c0_173, %c0_174] : memref<1x128xf32, #tpu.memory_space<vmem>>, vector<1x128xf32>
    %168 = vector.broadcast %167 : vector<1x128xf32> to vector<48x128xf32>
    %169 = arith.mulf %166, %168 : vector<48x128xf32>
    %c0_175 = arith.constant 0 : index
    %c0_176 = arith.constant 0 : index
    %170 = vector.load %arg28[%c0_175, %c0_176] : memref<1x128xf32, #tpu.memory_space<vmem>>, vector<1x128xf32>
    %171 = vector.broadcast %170 : vector<1x128xf32> to vector<48x128xf32>
    %172 = arith.addf %169, %171 : vector<48x128xf32>
    %173 = vector.extract_strided_slice %172 {offsets = [0, 0], sizes = [40, 128], strides = [1, 1]} : vector<48x128xf32> to vector<40x128xf32>
    %174 = arith.addf %163, %173 : vector<40x128xf32>
    %cst_177 = arith.constant 0.00999999977 : f32
    %175 = vector.broadcast %cst_177 : f32 to vector<40x128xf32>
    %176 = arith.mulf %175, %174 : vector<40x128xf32>
    %177 = arith.maximumf %174, %176 : vector<40x128xf32>
    %178 = arith.truncf %177 : vector<40x128xf32> to vector<40x128xbf16>
    %c0_178 = arith.constant 0 : index
    %c0_179 = arith.constant 0 : index
    %179 = vector.load %arg29[%c0_178, %c0_179] : memref<128x128xbf16, #tpu.memory_space<vmem>>, vector<128x128xbf16>
    %cst_180 = arith.constant dense<0.000000e+00> : vector<40x128xf32>
    %180 = tpu.matmul %178, %179, %cst_180 {dimension_numbers = #tpu.dot_dimension_numbers<[1], [0], [0], [1], [0, 0, 1, 1], [], []>} : vector<40x128xbf16>, vector<128x128xbf16>, vector<40x128xf32> -> vector<40x128xf32>
    %c0_181 = arith.constant 0 : index
    %c0_182 = arith.constant 0 : index
    %181 = vector.load %arg30[%c0_181, %c0_182] : memref<1x128xf32, #tpu.memory_space<vmem>>, vector<1x128xf32>
    %182 = vector.broadcast %181 : vector<1x128xf32> to vector<40x128xf32>
    %183 = arith.addf %180, %182 : vector<40x128xf32>
    %c0_183 = arith.constant 0 : index
    %c0_184 = arith.constant 0 : index
    %c0_185 = arith.constant 0 : index
    %184 = vector.load %arg60[%c0_183, %c0_184, %c0_185] : memref<1x40x128xf32, #tpu.memory_space<vmem>>, vector<1x40x128xf32>
    %185 = vector.shape_cast %184 : vector<1x40x128xf32> to vector<40x128xf32>
    %186 = vector.shape_cast %183 : vector<40x128xf32> to vector<1x40x128xf32>
    tpu.vector_store %arg60[%c0_183, %c0_184, %c0_185], %186 {strides = array<i32>} : memref<1x40x128xf32, #tpu.memory_space<vmem>>, vector<1x40x128xf32>,
    %c0_186 = arith.constant 0 : index
    %c0_187 = arith.constant 0 : index
    %187 = vector.load %arg31[%c0_186, %c0_187] : memref<1x128xf32, #tpu.memory_space<vmem>>, vector<1x128xf32>
    %188 = vector.broadcast %2 : vector<64x1xf32> to vector<64x128xf32>
    %189 = vector.broadcast %187 : vector<1x128xf32> to vector<64x128xf32>
    %190 = arith.mulf %188, %189 : vector<64x128xf32>
    %c0_188 = arith.constant 0 : index
    %c0_189 = arith.constant 0 : index
    %191 = vector.load %arg32[%c0_188, %c0_189] : memref<1x128xf32, #tpu.memory_space<vmem>>, vector<1x128xf32>
    %192 = vector.broadcast %191 : vector<1x128xf32> to vector<64x128xf32>
    %193 = arith.mulf %190, %192 : vector<64x128xf32>
    %c0_190 = arith.constant 0 : index
    %c0_191 = arith.constant 0 : index
    %194 = vector.load %arg33[%c0_190, %c0_191] : memref<1x128xf32, #tpu.memory_space<vmem>>, vector<1x128xf32>
    %195 = vector.broadcast %194 : vector<1x128xf32> to vector<64x128xf32>
    %196 = arith.addf %193, %195 : vector<64x128xf32>
    %cst_192 = arith.constant 0.00999999977 : f32
    %197 = vector.broadcast %cst_192 : f32 to vector<64x128xf32>
    %198 = arith.mulf %197, %196 : vector<64x128xf32>
    %199 = arith.maximumf %196, %198 : vector<64x128xf32>
    %c7_193 = arith.constant 7 : index
    %c0_194 = arith.constant 0 : index
    %200 = vector.load %arg62[%c7_193, %c0_194] : memref<80x128xf32, #tpu.memory_space<vmem>>, vector<1x128xf32>
    tpu.vector_store %arg62[%c7_193, %c0_194], %0 {strides = array<i32>} : memref<80x128xf32, #tpu.memory_space<vmem>>, vector<1x128xf32>,
    %c72_195 = arith.constant 72 : index
    %c0_196 = arith.constant 0 : index
    %201 = vector.load %arg62[%c72_195, %c0_196] : memref<80x128xf32, #tpu.memory_space<vmem>>, vector<1x128xf32>
    tpu.vector_store %arg62[%c72_195, %c0_196], %0 {strides = array<i32>} : memref<80x128xf32, #tpu.memory_space<vmem>>, vector<1x128xf32>,
    %c8_197 = arith.constant 8 : index
    %c0_198 = arith.constant 0 : index
    %202 = vector.load %arg62[%c8_197, %c0_198] : memref<80x128xf32, #tpu.memory_space<vmem>>, vector<64x128xf32>
    tpu.vector_store %arg62[%c8_197, %c0_198], %199 {strides = array<i32>} : memref<80x128xf32, #tpu.memory_space<vmem>>, vector<64x128xf32>,
    %c7_199 = arith.constant 7 : index
    %c0_200 = arith.constant 0 : index
    %203 = vector.load %arg62[%c7_199, %c0_200] : memref<80x128xf32, #tpu.memory_space<vmem>>, vector<64x128xf32>
    %c8_201 = arith.constant 8 : index
    %c0_202 = arith.constant 0 : index
    %204 = vector.load %arg62[%c8_201, %c0_202] : memref<80x128xf32, #tpu.memory_space<vmem>>, vector<64x128xf32>
    %c9_203 = arith.constant 9 : index
    %c0_204 = arith.constant 0 : index
    %205 = vector.load %arg62[%c9_203, %c0_204] : memref<80x128xf32, #tpu.memory_space<vmem>>, vector<64x128xf32>
    %206 = tpu.concatenate %203, %204, %205 in 1 : vector<64x128xf32>, vector<64x128xf32>, vector<64x128xf32> -> vector<64x384xf32>
    %207 = arith.truncf %206 : vector<64x384xf32> to vector<64x384xbf16>
    %c0_205 = arith.constant 0 : index
    %c0_206 = arith.constant 0 : index
    %208 = vector.load %arg34[%c0_205, %c0_206] : memref<384x128xbf16, #tpu.memory_space<vmem>>, vector<384x128xbf16>
    %cst_207 = arith.constant dense<0.000000e+00> : vector<64x128xf32>
    %209 = tpu.matmul %207, %208, %cst_207 {dimension_numbers = #tpu.dot_dimension_numbers<[1], [0], [0], [1], [0, 0, 1, 1], [], []>} : vector<64x384xbf16>, vector<384x128xbf16>, vector<64x128xf32> -> vector<64x128xf32>
    %c0_208 = arith.constant 0 : index
    %c0_209 = arith.constant 0 : index
    %210 = vector.load %arg35[%c0_208, %c0_209] : memref<1x128xf32, #tpu.memory_space<vmem>>, vector<1x128xf32>
    %211 = vector.broadcast %210 : vector<1x128xf32> to vector<64x128xf32>
    %212 = arith.mulf %209, %211 : vector<64x128xf32>
    %c0_210 = arith.constant 0 : index
    %c0_211 = arith.constant 0 : index
    %213 = vector.load %arg36[%c0_210, %c0_211] : memref<1x128xf32, #tpu.memory_space<vmem>>, vector<1x128xf32>
    %214 = vector.broadcast %213 : vector<1x128xf32> to vector<64x128xf32>
    %215 = arith.addf %212, %214 : vector<64x128xf32>
    %cst_212 = arith.constant 0.00999999977 : f32
    %216 = vector.broadcast %cst_212 : f32 to vector<64x128xf32>
    %217 = arith.mulf %216, %215 : vector<64x128xf32>
    %218 = arith.maximumf %215, %217 : vector<64x128xf32>
    %c7_213 = arith.constant 7 : index
    %c0_214 = arith.constant 0 : index
    %219 = vector.load %arg62[%c7_213, %c0_214] : memref<80x128xf32, #tpu.memory_space<vmem>>, vector<1x128xf32>
    tpu.vector_store %arg62[%c7_213, %c0_214], %0 {strides = array<i32>} : memref<80x128xf32, #tpu.memory_space<vmem>>, vector<1x128xf32>,
    %c72_215 = arith.constant 72 : index
    %c0_216 = arith.constant 0 : index
    %220 = vector.load %arg62[%c72_215, %c0_216] : memref<80x128xf32, #tpu.memory_space<vmem>>, vector<1x128xf32>
    tpu.vector_store %arg62[%c72_215, %c0_216], %0 {strides = array<i32>} : memref<80x128xf32, #tpu.memory_space<vmem>>, vector<1x128xf32>,
    %c8_217 = arith.constant 8 : index
    %c0_218 = arith.constant 0 : index
    %221 = vector.load %arg62[%c8_217, %c0_218] : memref<80x128xf32, #tpu.memory_space<vmem>>, vector<64x128xf32>
    tpu.vector_store %arg62[%c8_217, %c0_218], %218 {strides = array<i32>} : memref<80x128xf32, #tpu.memory_space<vmem>>, vector<64x128xf32>,
    %c7_219 = arith.constant 7 : index
    %c0_220 = arith.constant 0 : index
    %222 = vector.load %arg62[%c7_219, %c0_220] : memref<80x128xf32, #tpu.memory_space<vmem>>, vector<64x128xf32>
    %c8_221 = arith.constant 8 : index
    %c0_222 = arith.constant 0 : index
    %223 = vector.load %arg62[%c8_221, %c0_222] : memref<80x128xf32, #tpu.memory_space<vmem>>, vector<64x128xf32>
    %c9_223 = arith.constant 9 : index
    %c0_224 = arith.constant 0 : index
    %224 = vector.load %arg62[%c9_223, %c0_224] : memref<80x128xf32, #tpu.memory_space<vmem>>, vector<64x128xf32>
    %225 = tpu.concatenate %222, %223, %224 in 1 : vector<64x128xf32>, vector<64x128xf32>, vector<64x128xf32> -> vector<64x384xf32>
    %226 = arith.truncf %225 : vector<64x384xf32> to vector<64x384xbf16>
    %c0_225 = arith.constant 0 : index
    %c0_226 = arith.constant 0 : index
    %227 = vector.load %arg37[%c0_225, %c0_226] : memref<384x128xbf16, #tpu.memory_space<vmem>>, vector<384x128xbf16>
    %cst_227 = arith.constant dense<0.000000e+00> : vector<64x128xf32>
    %228 = tpu.matmul %226, %227, %cst_227 {dimension_numbers = #tpu.dot_dimension_numbers<[1], [0], [0], [1], [0, 0, 1, 1], [], []>} : vector<64x384xbf16>, vector<384x128xbf16>, vector<64x128xf32> -> vector<64x128xf32>
    %c0_228 = arith.constant 0 : index
    %c0_229 = arith.constant 0 : index
    %229 = vector.load %arg38[%c0_228, %c0_229] : memref<1x128xf32, #tpu.memory_space<vmem>>, vector<1x128xf32>
    %230 = vector.broadcast %229 : vector<1x128xf32> to vector<64x128xf32>
    %231 = arith.mulf %228, %230 : vector<64x128xf32>
    %c0_230 = arith.constant 0 : index
    %c0_231 = arith.constant 0 : index
    %232 = vector.load %arg39[%c0_230, %c0_231] : memref<1x128xf32, #tpu.memory_space<vmem>>, vector<1x128xf32>
    %233 = vector.broadcast %232 : vector<1x128xf32> to vector<64x128xf32>
    %234 = arith.addf %231, %233 : vector<64x128xf32>
    %235 = arith.addf %234, %199 : vector<64x128xf32>
    %cst_232 = arith.constant 0.00999999977 : f32
    %236 = vector.broadcast %cst_232 : f32 to vector<64x128xf32>
    %237 = arith.mulf %236, %235 : vector<64x128xf32>
    %238 = arith.maximumf %235, %237 : vector<64x128xf32>
    %c7_233 = arith.constant 7 : index
    %c0_234 = arith.constant 0 : index
    %239 = vector.load %arg62[%c7_233, %c0_234] : memref<80x128xf32, #tpu.memory_space<vmem>>, vector<1x128xf32>
    tpu.vector_store %arg62[%c7_233, %c0_234], %0 {strides = array<i32>} : memref<80x128xf32, #tpu.memory_space<vmem>>, vector<1x128xf32>,
    %c72_235 = arith.constant 72 : index
    %c0_236 = arith.constant 0 : index
    %240 = vector.load %arg62[%c72_235, %c0_236] : memref<80x128xf32, #tpu.memory_space<vmem>>, vector<1x128xf32>
    tpu.vector_store %arg62[%c72_235, %c0_236], %0 {strides = array<i32>} : memref<80x128xf32, #tpu.memory_space<vmem>>, vector<1x128xf32>,
    %c8_237 = arith.constant 8 : index
    %c0_238 = arith.constant 0 : index
    %241 = vector.load %arg62[%c8_237, %c0_238] : memref<80x128xf32, #tpu.memory_space<vmem>>, vector<64x128xf32>
    tpu.vector_store %arg62[%c8_237, %c0_238], %238 {strides = array<i32>} : memref<80x128xf32, #tpu.memory_space<vmem>>, vector<64x128xf32>,
    %c7_239 = arith.constant 7 : index
    %c0_240 = arith.constant 0 : index
    %242 = vector.load %arg62[%c7_239, %c0_240] : memref<80x128xf32, #tpu.memory_space<vmem>>, vector<64x128xf32>
    %c8_241 = arith.constant 8 : index
    %c0_242 = arith.constant 0 : index
    %243 = vector.load %arg62[%c8_241, %c0_242] : memref<80x128xf32, #tpu.memory_space<vmem>>, vector<64x128xf32>
    %c9_243 = arith.constant 9 : index
    %c0_244 = arith.constant 0 : index
    %244 = vector.load %arg62[%c9_243, %c0_244] : memref<80x128xf32, #tpu.memory_space<vmem>>, vector<64x128xf32>
    %245 = tpu.concatenate %242, %243, %244 in 1 : vector<64x128xf32>, vector<64x128xf32>, vector<64x128xf32> -> vector<64x384xf32>
    %246 = arith.truncf %245 : vector<64x384xf32> to vector<64x384xbf16>
    %c0_245 = arith.constant 0 : index
    %c0_246 = arith.constant 0 : index
    %247 = vector.load %arg40[%c0_245, %c0_246] : memref<384x128xbf16, #tpu.memory_space<vmem>>, vector<384x128xbf16>
    %cst_247 = arith.constant dense<0.000000e+00> : vector<64x128xf32>
    %248 = tpu.matmul %246, %247, %cst_247 {dimension_numbers = #tpu.dot_dimension_numbers<[1], [0], [0], [1], [0, 0, 1, 1], [], []>} : vector<64x384xbf16>, vector<384x128xbf16>, vector<64x128xf32> -> vector<64x128xf32>
    %c0_248 = arith.constant 0 : index
    %c0_249 = arith.constant 0 : index
    %249 = vector.load %arg41[%c0_248, %c0_249] : memref<1x128xf32, #tpu.memory_space<vmem>>, vector<1x128xf32>
    %250 = vector.broadcast %249 : vector<1x128xf32> to vector<64x128xf32>
    %251 = arith.mulf %248, %250 : vector<64x128xf32>
    %c0_250 = arith.constant 0 : index
    %c0_251 = arith.constant 0 : index
    %252 = vector.load %arg42[%c0_250, %c0_251] : memref<1x128xf32, #tpu.memory_space<vmem>>, vector<1x128xf32>
    %253 = vector.broadcast %252 : vector<1x128xf32> to vector<64x128xf32>
    %254 = arith.addf %251, %253 : vector<64x128xf32>
    %cst_252 = arith.constant 0.00999999977 : f32
    %255 = vector.broadcast %cst_252 : f32 to vector<64x128xf32>
    %256 = arith.mulf %255, %254 : vector<64x128xf32>
    %257 = arith.maximumf %254, %256 : vector<64x128xf32>
    %c7_253 = arith.constant 7 : index
    %c0_254 = arith.constant 0 : index
    %258 = vector.load %arg62[%c7_253, %c0_254] : memref<80x128xf32, #tpu.memory_space<vmem>>, vector<1x128xf32>
    tpu.vector_store %arg62[%c7_253, %c0_254], %0 {strides = array<i32>} : memref<80x128xf32, #tpu.memory_space<vmem>>, vector<1x128xf32>,
    %c72_255 = arith.constant 72 : index
    %c0_256 = arith.constant 0 : index
    %259 = vector.load %arg62[%c72_255, %c0_256] : memref<80x128xf32, #tpu.memory_space<vmem>>, vector<1x128xf32>
    tpu.vector_store %arg62[%c72_255, %c0_256], %0 {strides = array<i32>} : memref<80x128xf32, #tpu.memory_space<vmem>>, vector<1x128xf32>,
    %c8_257 = arith.constant 8 : index
    %c0_258 = arith.constant 0 : index
    %260 = vector.load %arg62[%c8_257, %c0_258] : memref<80x128xf32, #tpu.memory_space<vmem>>, vector<64x128xf32>
    tpu.vector_store %arg62[%c8_257, %c0_258], %257 {strides = array<i32>} : memref<80x128xf32, #tpu.memory_space<vmem>>, vector<64x128xf32>,
    %c7_259 = arith.constant 7 : index
    %c0_260 = arith.constant 0 : index
    %261 = vector.load %arg62[%c7_259, %c0_260] : memref<80x128xf32, #tpu.memory_space<vmem>>, vector<64x128xf32>
    %c8_261 = arith.constant 8 : index
    %c0_262 = arith.constant 0 : index
    %262 = vector.load %arg62[%c8_261, %c0_262] : memref<80x128xf32, #tpu.memory_space<vmem>>, vector<64x128xf32>
    %c9_263 = arith.constant 9 : index
    %c0_264 = arith.constant 0 : index
    %263 = vector.load %arg62[%c9_263, %c0_264] : memref<80x128xf32, #tpu.memory_space<vmem>>, vector<64x128xf32>
    %264 = tpu.concatenate %261, %262, %263 in 1 : vector<64x128xf32>, vector<64x128xf32>, vector<64x128xf32> -> vector<64x384xf32>
    %265 = arith.truncf %264 : vector<64x384xf32> to vector<64x384xbf16>
    %c0_265 = arith.constant 0 : index
    %c0_266 = arith.constant 0 : index
    %266 = vector.load %arg43[%c0_265, %c0_266] : memref<384x128xbf16, #tpu.memory_space<vmem>>, vector<384x128xbf16>
    %cst_267 = arith.constant dense<0.000000e+00> : vector<64x128xf32>
    %267 = tpu.matmul %265, %266, %cst_267 {dimension_numbers = #tpu.dot_dimension_numbers<[1], [0], [0], [1], [0, 0, 1, 1], [], []>} : vector<64x384xbf16>, vector<384x128xbf16>, vector<64x128xf32> -> vector<64x128xf32>
    %c0_268 = arith.constant 0 : index
    %c0_269 = arith.constant 0 : index
    %268 = vector.load %arg44[%c0_268, %c0_269] : memref<1x128xf32, #tpu.memory_space<vmem>>, vector<1x128xf32>
    %269 = vector.broadcast %268 : vector<1x128xf32> to vector<64x128xf32>
    %270 = arith.mulf %267, %269 : vector<64x128xf32>
    %c0_270 = arith.constant 0 : index
    %c0_271 = arith.constant 0 : index
    %271 = vector.load %arg45[%c0_270, %c0_271] : memref<1x128xf32, #tpu.memory_space<vmem>>, vector<1x128xf32>
    %272 = vector.broadcast %271 : vector<1x128xf32> to vector<64x128xf32>
    %273 = arith.addf %270, %272 : vector<64x128xf32>
    %274 = arith.truncf %238 : vector<64x128xf32> to vector<64x128xbf16>
    %c0_272 = arith.constant 0 : index
    %c0_273 = arith.constant 0 : index
    %275 = vector.load %arg46[%c0_272, %c0_273] : memref<128x128xbf16, #tpu.memory_space<vmem>>, vector<128x128xbf16>
    %cst_274 = arith.constant dense<0.000000e+00> : vector<64x128xf32>
    %276 = tpu.matmul %274, %275, %cst_274 {dimension_numbers = #tpu.dot_dimension_numbers<[1], [0], [0], [1], [0, 0, 1, 1], [], []>} : vector<64x128xbf16>, vector<128x128xbf16>, vector<64x128xf32> -> vector<64x128xf32>
    %c0_275 = arith.constant 0 : index
    %c0_276 = arith.constant 0 : index
    %277 = vector.load %arg47[%c0_275, %c0_276] : memref<1x128xf32, #tpu.memory_space<vmem>>, vector<1x128xf32>
    %278 = vector.broadcast %277 : vector<1x128xf32> to vector<64x128xf32>
    %279 = arith.mulf %276, %278 : vector<64x128xf32>
    %c0_277 = arith.constant 0 : index
    %c0_278 = arith.constant 0 : index
    %280 = vector.load %arg48[%c0_277, %c0_278] : memref<1x128xf32, #tpu.memory_space<vmem>>, vector<1x128xf32>
    %281 = vector.broadcast %280 : vector<1x128xf32> to vector<64x128xf32>
    %282 = arith.addf %279, %281 : vector<64x128xf32>
    %283 = arith.addf %273, %282 : vector<64x128xf32>
    %cst_279 = arith.constant 0.00999999977 : f32
    %284 = vector.broadcast %cst_279 : f32 to vector<64x128xf32>
    %285 = arith.mulf %284, %283 : vector<64x128xf32>
    %286 = arith.maximumf %283, %285 : vector<64x128xf32>
    %c7_280 = arith.constant 7 : index
    %c0_281 = arith.constant 0 : index
    %287 = vector.load %arg62[%c7_280, %c0_281] : memref<80x128xf32, #tpu.memory_space<vmem>>, vector<1x128xf32>
    tpu.vector_store %arg62[%c7_280, %c0_281], %0 {strides = array<i32>} : memref<80x128xf32, #tpu.memory_space<vmem>>, vector<1x128xf32>,
    %c72_282 = arith.constant 72 : index
    %c0_283 = arith.constant 0 : index
    %288 = vector.load %arg62[%c72_282, %c0_283] : memref<80x128xf32, #tpu.memory_space<vmem>>, vector<1x128xf32>
    tpu.vector_store %arg62[%c72_282, %c0_283], %0 {strides = array<i32>} : memref<80x128xf32, #tpu.memory_space<vmem>>, vector<1x128xf32>,
    %c8_284 = arith.constant 8 : index
    %c0_285 = arith.constant 0 : index
    %289 = vector.load %arg62[%c8_284, %c0_285] : memref<80x128xf32, #tpu.memory_space<vmem>>, vector<64x128xf32>
    tpu.vector_store %arg62[%c8_284, %c0_285], %286 {strides = array<i32>} : memref<80x128xf32, #tpu.memory_space<vmem>>, vector<64x128xf32>,
    %c7_286 = arith.constant 7 : index
    %c0_287 = arith.constant 0 : index
    %290 = vector.load %arg62[%c7_286, %c0_287] : memref<80x128xf32, #tpu.memory_space<vmem>>, vector<64x128xf32>
    %c8_288 = arith.constant 8 : index
    %c0_289 = arith.constant 0 : index
    %291 = vector.load %arg62[%c8_288, %c0_289] : memref<80x128xf32, #tpu.memory_space<vmem>>, vector<64x128xf32>
    %c9_290 = arith.constant 9 : index
    %c0_291 = arith.constant 0 : index
    %292 = vector.load %arg62[%c9_290, %c0_291] : memref<80x128xf32, #tpu.memory_space<vmem>>, vector<64x128xf32>
    %293 = tpu.concatenate %290, %291, %292 in 1 : vector<64x128xf32>, vector<64x128xf32>, vector<64x128xf32> -> vector<64x384xf32>
    %294 = arith.truncf %293 : vector<64x384xf32> to vector<64x384xbf16>
    %c0_292 = arith.constant 0 : index
    %c0_293 = arith.constant 0 : index
    %295 = vector.load %arg49[%c0_292, %c0_293] : memref<384x128xbf16, #tpu.memory_space<vmem>>, vector<384x128xbf16>
    %cst_294 = arith.constant dense<0.000000e+00> : vector<64x128xf32>
    %296 = tpu.matmul %294, %295, %cst_294 {dimension_numbers = #tpu.dot_dimension_numbers<[1], [0], [0], [1], [0, 0, 1, 1], [], []>} : vector<64x384xbf16>, vector<384x128xbf16>, vector<64x128xf32> -> vector<64x128xf32>
    %c0_295 = arith.constant 0 : index
    %c0_296 = arith.constant 0 : index
    %297 = vector.load %arg50[%c0_295, %c0_296] : memref<1x128xf32, #tpu.memory_space<vmem>>, vector<1x128xf32>
    %298 = vector.broadcast %297 : vector<1x128xf32> to vector<64x128xf32>
    %299 = arith.mulf %296, %298 : vector<64x128xf32>
    %c0_297 = arith.constant 0 : index
    %c0_298 = arith.constant 0 : index
    %300 = vector.load %arg51[%c0_297, %c0_298] : memref<1x128xf32, #tpu.memory_space<vmem>>, vector<1x128xf32>
    %301 = vector.broadcast %300 : vector<1x128xf32> to vector<64x128xf32>
    %302 = arith.addf %299, %301 : vector<64x128xf32>
    %cst_299 = arith.constant 0.00999999977 : f32
    %303 = vector.broadcast %cst_299 : f32 to vector<64x128xf32>
    %304 = arith.mulf %303, %302 : vector<64x128xf32>
    %305 = arith.maximumf %302, %304 : vector<64x128xf32>
    %c7_300 = arith.constant 7 : index
    %c0_301 = arith.constant 0 : index
    %306 = vector.load %arg62[%c7_300, %c0_301] : memref<80x128xf32, #tpu.memory_space<vmem>>, vector<1x128xf32>
    tpu.vector_store %arg62[%c7_300, %c0_301], %0 {strides = array<i32>} : memref<80x128xf32, #tpu.memory_space<vmem>>, vector<1x128xf32>,
    %c72_302 = arith.constant 72 : index
    %c0_303 = arith.constant 0 : index
    %307 = vector.load %arg62[%c72_302, %c0_303] : memref<80x128xf32, #tpu.memory_space<vmem>>, vector<1x128xf32>
    tpu.vector_store %arg62[%c72_302, %c0_303], %0 {strides = array<i32>} : memref<80x128xf32, #tpu.memory_space<vmem>>, vector<1x128xf32>,
    %c8_304 = arith.constant 8 : index
    %c0_305 = arith.constant 0 : index
    %308 = vector.load %arg62[%c8_304, %c0_305] : memref<80x128xf32, #tpu.memory_space<vmem>>, vector<64x128xf32>
    tpu.vector_store %arg62[%c8_304, %c0_305], %305 {strides = array<i32>} : memref<80x128xf32, #tpu.memory_space<vmem>>, vector<64x128xf32>,
    %c7_306 = arith.constant 7 : index
    %c0_307 = arith.constant 0 : index
    %309 = vector.load %arg62[%c7_306, %c0_307] : memref<80x128xf32, #tpu.memory_space<vmem>>, vector<64x128xf32>
    %c8_308 = arith.constant 8 : index
    %c0_309 = arith.constant 0 : index
    %310 = vector.load %arg62[%c8_308, %c0_309] : memref<80x128xf32, #tpu.memory_space<vmem>>, vector<64x128xf32>
    %c9_310 = arith.constant 9 : index
    %c0_311 = arith.constant 0 : index
    %311 = vector.load %arg62[%c9_310, %c0_311] : memref<80x128xf32, #tpu.memory_space<vmem>>, vector<64x128xf32>
    %312 = tpu.concatenate %309, %310, %311 in 1 : vector<64x128xf32>, vector<64x128xf32>, vector<64x128xf32> -> vector<64x384xf32>
    %313 = arith.truncf %312 : vector<64x384xf32> to vector<64x384xbf16>
    %c0_312 = arith.constant 0 : index
    %c0_313 = arith.constant 0 : index
    %314 = vector.load %arg52[%c0_312, %c0_313] : memref<384x128xbf16, #tpu.memory_space<vmem>>, vector<384x128xbf16>
    %cst_314 = arith.constant dense<0.000000e+00> : vector<64x128xf32>
    %315 = tpu.matmul %313, %314, %cst_314 {dimension_numbers = #tpu.dot_dimension_numbers<[1], [0], [0], [1], [0, 0, 1, 1], [], []>} : vector<64x384xbf16>, vector<384x128xbf16>, vector<64x128xf32> -> vector<64x128xf32>
    %c0_315 = arith.constant 0 : index
    %c0_316 = arith.constant 0 : index
    %316 = vector.load %arg53[%c0_315, %c0_316] : memref<1x128xf32, #tpu.memory_space<vmem>>, vector<1x128xf32>
    %317 = vector.broadcast %316 : vector<1x128xf32> to vector<64x128xf32>
    %318 = arith.mulf %315, %317 : vector<64x128xf32>
    %c0_317 = arith.constant 0 : index
    %c0_318 = arith.constant 0 : index
    %319 = vector.load %arg54[%c0_317, %c0_318] : memref<1x128xf32, #tpu.memory_space<vmem>>, vector<1x128xf32>
    %320 = vector.broadcast %319 : vector<1x128xf32> to vector<64x128xf32>
    %321 = arith.addf %318, %320 : vector<64x128xf32>
    %322 = arith.truncf %286 : vector<64x128xf32> to vector<64x128xbf16>
    %c0_319 = arith.constant 0 : index
    %c0_320 = arith.constant 0 : index
    %323 = vector.load %arg55[%c0_319, %c0_320] : memref<128x128xbf16, #tpu.memory_space<vmem>>, vector<128x128xbf16>
    %cst_321 = arith.constant dense<0.000000e+00> : vector<64x128xf32>
    %324 = tpu.matmul %322, %323, %cst_321 {dimension_numbers = #tpu.dot_dimension_numbers<[1], [0], [0], [1], [0, 0, 1, 1], [], []>} : vector<64x128xbf16>, vector<128x128xbf16>, vector<64x128xf32> -> vector<64x128xf32>
    %c0_322 = arith.constant 0 : index
    %c0_323 = arith.constant 0 : index
    %325 = vector.load %arg56[%c0_322, %c0_323] : memref<1x128xf32, #tpu.memory_space<vmem>>, vector<1x128xf32>
    %326 = vector.broadcast %325 : vector<1x128xf32> to vector<64x128xf32>
    %327 = arith.mulf %324, %326 : vector<64x128xf32>
    %c0_324 = arith.constant 0 : index
    %c0_325 = arith.constant 0 : index
    %328 = vector.load %arg57[%c0_324, %c0_325] : memref<1x128xf32, #tpu.memory_space<vmem>>, vector<1x128xf32>
    %329 = vector.broadcast %328 : vector<1x128xf32> to vector<64x128xf32>
    %330 = arith.addf %327, %329 : vector<64x128xf32>
    %331 = arith.addf %321, %330 : vector<64x128xf32>
    %cst_326 = arith.constant 0.00999999977 : f32
    %332 = vector.broadcast %cst_326 : f32 to vector<64x128xf32>
    %333 = arith.mulf %332, %331 : vector<64x128xf32>
    %334 = arith.maximumf %331, %333 : vector<64x128xf32>
    %335 = arith.truncf %334 : vector<64x128xf32> to vector<64x128xbf16>
    %c0_327 = arith.constant 0 : index
    %c0_328 = arith.constant 0 : index
    %336 = vector.load %arg58[%c0_327, %c0_328] : memref<128x128xbf16, #tpu.memory_space<vmem>>, vector<128x128xbf16>
    %cst_329 = arith.constant dense<0.000000e+00> : vector<64x128xf32>
    %337 = tpu.matmul %335, %336, %cst_329 {dimension_numbers = #tpu.dot_dimension_numbers<[1], [0], [0], [1], [0, 0, 1, 1], [], []>} : vector<64x128xbf16>, vector<128x128xbf16>, vector<64x128xf32> -> vector<64x128xf32>
    %c0_330 = arith.constant 0 : index
    %c0_331 = arith.constant 0 : index
    %338 = vector.load %arg59[%c0_330, %c0_331] : memref<1x128xf32, #tpu.memory_space<vmem>>, vector<1x128xf32>
    %339 = vector.broadcast %338 : vector<1x128xf32> to vector<64x128xf32>
    %340 = arith.addf %337, %339 : vector<64x128xf32>
    %c0_332 = arith.constant 0 : index
    %c0_333 = arith.constant 0 : index
    %c0_334 = arith.constant 0 : index
    %341 = vector.load %arg61[%c0_332, %c0_333, %c0_334] : memref<1x64x128xf32, #tpu.memory_space<vmem>>, vector<1x64x128xf32>
    %342 = vector.shape_cast %341 : vector<1x64x128xf32> to vector<64x128xf32>
    %343 = vector.shape_cast %340 : vector<64x128xf32> to vector<1x64x128xf32>
    tpu.vector_store %arg61[%c0_332, %c0_333, %c0_334], %343 {strides = array<i32>} : memref<1x64x128xf32, #tpu.memory_space<vmem>>, vector<1x64x128xf32>,
    return
  }
  func.func @transform_0(%arg0: i32) -> (i32, i32, i32) {
    %c0_i32 = arith.constant 0 : i32
    %c0_i32_0 = arith.constant 0 : i32
    %c0_i32_1 = arith.constant 0 : i32
    return %arg0, %c0_i32, %c0_i32_0 : i32, i32, i32
  }
  func.func @transform_1(%arg0: i32) -> (i32, i32) {
    %c0_i32 = arith.constant 0 : i32
    %c0_i32_0 = arith.constant 0 : i32
    %c0_i32_1 = arith.constant 0 : i32
    return %c0_i32, %c0_i32_0 : i32, i32
  }
  func.func @transform_2(%arg0: i32) -> (i32, i32) {
    %c0_i32 = arith.constant 0 : i32
    %c0_i32_0 = arith.constant 0 : i32
    %c0_i32_1 = arith.constant 0 : i32
    return %c0_i32, %c0_i32_0 : i32, i32
  }
  func.func @transform_3(%arg0: i32) -> (i32, i32) {
    %c0_i32 = arith.constant 0 : i32
    %c0_i32_0 = arith.constant 0 : i32
    %c0_i32_1 = arith.constant 0 : i32
    return %c0_i32, %c0_i32_0 : i32, i32
  }
  func.func @transform_4(%arg0: i32) -> (i32, i32) {
    %c0_i32 = arith.constant 0 : i32
    %c0_i32_0 = arith.constant 0 : i32
    %c0_i32_1 = arith.constant 0 : i32
    return %c0_i32, %c0_i32_0 : i32, i32
  }
  func.func @transform_5(%arg0: i32) -> (i32, i32) {
    %c0_i32 = arith.constant 0 : i32
    %c0_i32_0 = arith.constant 0 : i32
    %c0_i32_1 = arith.constant 0 : i32
    return %c0_i32, %c0_i32_0 : i32, i32
  }
  func.func @transform_6(%arg0: i32) -> (i32, i32) {
    %c0_i32 = arith.constant 0 : i32
    %c0_i32_0 = arith.constant 0 : i32
    %c0_i32_1 = arith.constant 0 : i32
    return %c0_i32, %c0_i32_0 : i32, i32
  }
  func.func @transform_7(%arg0: i32) -> (i32, i32) {
    %c0_i32 = arith.constant 0 : i32
    %c0_i32_0 = arith.constant 0 : i32
    %c0_i32_1 = arith.constant 0 : i32
    return %c0_i32, %c0_i32_0 : i32, i32
  }
  func.func @transform_8(%arg0: i32) -> (i32, i32) {
    %c0_i32 = arith.constant 0 : i32
    %c0_i32_0 = arith.constant 0 : i32
    %c0_i32_1 = arith.constant 0 : i32
    return %c0_i32, %c0_i32_0 : i32, i32
  }
  func.func @transform_9(%arg0: i32) -> (i32, i32) {
    %c0_i32 = arith.constant 0 : i32
    %c0_i32_0 = arith.constant 0 : i32
    %c0_i32_1 = arith.constant 0 : i32
    return %c0_i32, %c0_i32_0 : i32, i32
  }
  func.func @transform_10(%arg0: i32) -> (i32, i32) {
    %c0_i32 = arith.constant 0 : i32
    %c0_i32_0 = arith.constant 0 : i32
    %c0_i32_1 = arith.constant 0 : i32
    return %c0_i32, %c0_i32_0 : i32, i32
  }
  func.func @transform_11(%arg0: i32) -> (i32, i32) {
    %c0_i32 = arith.constant 0 : i32
    %c0_i32_0 = arith.constant 0 : i32
    %c0_i32_1 = arith.constant 0 : i32
    return %c0_i32, %c0_i32_0 : i32, i32
  }
  func.func @transform_12(%arg0: i32) -> (i32, i32) {
    %c0_i32 = arith.constant 0 : i32
    %c0_i32_0 = arith.constant 0 : i32
    %c0_i32_1 = arith.constant 0 : i32
    return %c0_i32, %c0_i32_0 : i32, i32
  }
  func.func @transform_13(%arg0: i32) -> (i32, i32) {
    %c0_i32 = arith.constant 0 : i32
    %c0_i32_0 = arith.constant 0 : i32
    %c0_i32_1 = arith.constant 0 : i32
    return %c0_i32, %c0_i32_0 : i32, i32
  }
  func.func @transform_14(%arg0: i32) -> (i32, i32) {
    %c0_i32 = arith.constant 0 : i32
    %c0_i32_0 = arith.constant 0 : i32
    %c0_i32_1 = arith.constant 0 : i32
    return %c0_i32, %c0_i32_0 : i32, i32
  }
  func.func @transform_15(%arg0: i32) -> (i32, i32) {
    %c0_i32 = arith.constant 0 : i32
    %c0_i32_0 = arith.constant 0 : i32
    %c0_i32_1 = arith.constant 0 : i32
    return %c0_i32, %c0_i32_0 : i32, i32
  }
  func.func @transform_16(%arg0: i32) -> (i32, i32) {
    %c0_i32 = arith.constant 0 : i32
    %c0_i32_0 = arith.constant 0 : i32
    %c0_i32_1 = arith.constant 0 : i32
    return %c0_i32, %c0_i32_0 : i32, i32
  }
  func.func @transform_17(%arg0: i32) -> (i32, i32) {
    %c0_i32 = arith.constant 0 : i32
    %c0_i32_0 = arith.constant 0 : i32
    %c0_i32_1 = arith.constant 0 : i32
    return %c0_i32, %c0_i32_0 : i32, i32
  }
  func.func @transform_18(%arg0: i32) -> (i32, i32) {
    %c0_i32 = arith.constant 0 : i32
    %c0_i32_0 = arith.constant 0 : i32
    %c0_i32_1 = arith.constant 0 : i32
    return %c0_i32, %c0_i32_0 : i32, i32
  }
  func.func @transform_19(%arg0: i32) -> (i32, i32) {
    %c0_i32 = arith.constant 0 : i32
    %c0_i32_0 = arith.constant 0 : i32
    %c0_i32_1 = arith.constant 0 : i32
    return %c0_i32, %c0_i32_0 : i32, i32
  }
  func.func @transform_20(%arg0: i32) -> (i32, i32) {
    %c0_i32 = arith.constant 0 : i32
    %c0_i32_0 = arith.constant 0 : i32
    %c0_i32_1 = arith.constant 0 : i32
    return %c0_i32, %c0_i32_0 : i32, i32
  }
  func.func @transform_21(%arg0: i32) -> (i32, i32) {
    %c0_i32 = arith.constant 0 : i32
    %c0_i32_0 = arith.constant 0 : i32
    %c0_i32_1 = arith.constant 0 : i32
    return %c0_i32, %c0_i32_0 : i32, i32
  }
  func.func @transform_22(%arg0: i32) -> (i32, i32) {
    %c0_i32 = arith.constant 0 : i32
    %c0_i32_0 = arith.constant 0 : i32
    %c0_i32_1 = arith.constant 0 : i32
    return %c0_i32, %c0_i32_0 : i32, i32
  }
  func.func @transform_23(%arg0: i32) -> (i32, i32) {
    %c0_i32 = arith.constant 0 : i32
    %c0_i32_0 = arith.constant 0 : i32
    %c0_i32_1 = arith.constant 0 : i32
    return %c0_i32, %c0_i32_0 : i32, i32
  }
  func.func @transform_24(%arg0: i32) -> (i32, i32) {
    %c0_i32 = arith.constant 0 : i32
    %c0_i32_0 = arith.constant 0 : i32
    %c0_i32_1 = arith.constant 0 : i32
    return %c0_i32, %c0_i32_0 : i32, i32
  }
  func.func @transform_25(%arg0: i32) -> (i32, i32) {
    %c0_i32 = arith.constant 0 : i32
    %c0_i32_0 = arith.constant 0 : i32
    %c0_i32_1 = arith.constant 0 : i32
    return %c0_i32, %c0_i32_0 : i32, i32
  }
  func.func @transform_26(%arg0: i32) -> (i32, i32) {
    %c0_i32 = arith.constant 0 : i32
    %c0_i32_0 = arith.constant 0 : i32
    %c0_i32_1 = arith.constant 0 : i32
    return %c0_i32, %c0_i32_0 : i32, i32
  }
  func.func @transform_27(%arg0: i32) -> (i32, i32) {
    %c0_i32 = arith.constant 0 : i32
    %c0_i32_0 = arith.constant 0 : i32
    %c0_i32_1 = arith.constant 0 : i32
    return %c0_i32, %c0_i32_0 : i32, i32
  }
  func.func @transform_28(%arg0: i32) -> (i32, i32) {
    %c0_i32 = arith.constant 0 : i32
    %c0_i32_0 = arith.constant 0 : i32
    %c0_i32_1 = arith.constant 0 : i32
    return %c0_i32, %c0_i32_0 : i32, i32
  }
  func.func @transform_29(%arg0: i32) -> (i32, i32) {
    %c0_i32 = arith.constant 0 : i32
    %c0_i32_0 = arith.constant 0 : i32
    %c0_i32_1 = arith.constant 0 : i32
    return %c0_i32, %c0_i32_0 : i32, i32
  }
  func.func @transform_30(%arg0: i32) -> (i32, i32) {
    %c0_i32 = arith.constant 0 : i32
    %c0_i32_0 = arith.constant 0 : i32
    %c0_i32_1 = arith.constant 0 : i32
    return %c0_i32, %c0_i32_0 : i32, i32
  }
  func.func @transform_31(%arg0: i32) -> (i32, i32) {
    %c0_i32 = arith.constant 0 : i32
    %c0_i32_0 = arith.constant 0 : i32
    %c0_i32_1 = arith.constant 0 : i32
    return %c0_i32, %c0_i32_0 : i32, i32
  }
  func.func @transform_32(%arg0: i32) -> (i32, i32) {
    %c0_i32 = arith.constant 0 : i32
    %c0_i32_0 = arith.constant 0 : i32
    %c0_i32_1 = arith.constant 0 : i32
    return %c0_i32, %c0_i32_0 : i32, i32
  }
  func.func @transform_33(%arg0: i32) -> (i32, i32) {
    %c0_i32 = arith.constant 0 : i32
    %c0_i32_0 = arith.constant 0 : i32
    %c0_i32_1 = arith.constant 0 : i32
    return %c0_i32, %c0_i32_0 : i32, i32
  }
  func.func @transform_34(%arg0: i32) -> (i32, i32) {
    %c0_i32 = arith.constant 0 : i32
    %c0_i32_0 = arith.constant 0 : i32
    %c0_i32_1 = arith.constant 0 : i32
    return %c0_i32, %c0_i32_0 : i32, i32
  }
  func.func @transform_35(%arg0: i32) -> (i32, i32) {
    %c0_i32 = arith.constant 0 : i32
    %c0_i32_0 = arith.constant 0 : i32
    %c0_i32_1 = arith.constant 0 : i32
    return %c0_i32, %c0_i32_0 : i32, i32
  }
  func.func @transform_36(%arg0: i32) -> (i32, i32) {
    %c0_i32 = arith.constant 0 : i32
    %c0_i32_0 = arith.constant 0 : i32
    %c0_i32_1 = arith.constant 0 : i32
    return %c0_i32, %c0_i32_0 : i32, i32
  }
  func.func @transform_37(%arg0: i32) -> (i32, i32) {
    %c0_i32 = arith.constant 0 : i32
    %c0_i32_0 = arith.constant 0 : i32
    %c0_i32_1 = arith.constant 0 : i32
    return %c0_i32, %c0_i32_0 : i32, i32
  }
  func.func @transform_38(%arg0: i32) -> (i32, i32) {
    %c0_i32 = arith.constant 0 : i32
    %c0_i32_0 = arith.constant 0 : i32
    %c0_i32_1 = arith.constant 0 : i32
    return %c0_i32, %c0_i32_0 : i32, i32
  }
  func.func @transform_39(%arg0: i32) -> (i32, i32) {
    %c0_i32 = arith.constant 0 : i32
    %c0_i32_0 = arith.constant 0 : i32
    %c0_i32_1 = arith.constant 0 : i32
    return %c0_i32, %c0_i32_0 : i32, i32
  }
  func.func @transform_40(%arg0: i32) -> (i32, i32) {
    %c0_i32 = arith.constant 0 : i32
    %c0_i32_0 = arith.constant 0 : i32
    %c0_i32_1 = arith.constant 0 : i32
    return %c0_i32, %c0_i32_0 : i32, i32
  }
  func.func @transform_41(%arg0: i32) -> (i32, i32) {
    %c0_i32 = arith.constant 0 : i32
    %c0_i32_0 = arith.constant 0 : i32
    %c0_i32_1 = arith.constant 0 : i32
    return %c0_i32, %c0_i32_0 : i32, i32
  }
  func.func @transform_42(%arg0: i32) -> (i32, i32) {
    %c0_i32 = arith.constant 0 : i32
    %c0_i32_0 = arith.constant 0 : i32
    %c0_i32_1 = arith.constant 0 : i32
    return %c0_i32, %c0_i32_0 : i32, i32
  }
  func.func @transform_43(%arg0: i32) -> (i32, i32) {
    %c0_i32 = arith.constant 0 : i32
    %c0_i32_0 = arith.constant 0 : i32
    %c0_i32_1 = arith.constant 0 : i32
    return %c0_i32, %c0_i32_0 : i32, i32
  }
  func.func @transform_44(%arg0: i32) -> (i32, i32) {
    %c0_i32 = arith.constant 0 : i32
    %c0_i32_0 = arith.constant 0 : i32
    %c0_i32_1 = arith.constant 0 : i32
    return %c0_i32, %c0_i32_0 : i32, i32
  }
  func.func @transform_45(%arg0: i32) -> (i32, i32) {
    %c0_i32 = arith.constant 0 : i32
    %c0_i32_0 = arith.constant 0 : i32
    %c0_i32_1 = arith.constant 0 : i32
    return %c0_i32, %c0_i32_0 : i32, i32
  }
  func.func @transform_46(%arg0: i32) -> (i32, i32) {
    %c0_i32 = arith.constant 0 : i32
    %c0_i32_0 = arith.constant 0 : i32
    %c0_i32_1 = arith.constant 0 : i32
    return %c0_i32, %c0_i32_0 : i32, i32
  }
  func.func @transform_47(%arg0: i32) -> (i32, i32) {
    %c0_i32 = arith.constant 0 : i32
    %c0_i32_0 = arith.constant 0 : i32
    %c0_i32_1 = arith.constant 0 : i32
    return %c0_i32, %c0_i32_0 : i32, i32
  }
  func.func @transform_48(%arg0: i32) -> (i32, i32) {
    %c0_i32 = arith.constant 0 : i32
    %c0_i32_0 = arith.constant 0 : i32
    %c0_i32_1 = arith.constant 0 : i32
    return %c0_i32, %c0_i32_0 : i32, i32
  }
  func.func @transform_49(%arg0: i32) -> (i32, i32) {
    %c0_i32 = arith.constant 0 : i32
    %c0_i32_0 = arith.constant 0 : i32
    %c0_i32_1 = arith.constant 0 : i32
    return %c0_i32, %c0_i32_0 : i32, i32
  }
  func.func @transform_50(%arg0: i32) -> (i32, i32) {
    %c0_i32 = arith.constant 0 : i32
    %c0_i32_0 = arith.constant 0 : i32
    %c0_i32_1 = arith.constant 0 : i32
    return %c0_i32, %c0_i32_0 : i32, i32
  }
  func.func @transform_51(%arg0: i32) -> (i32, i32) {
    %c0_i32 = arith.constant 0 : i32
    %c0_i32_0 = arith.constant 0 : i32
    %c0_i32_1 = arith.constant 0 : i32
    return %c0_i32, %c0_i32_0 : i32, i32
  }
  func.func @transform_52(%arg0: i32) -> (i32, i32) {
    %c0_i32 = arith.constant 0 : i32
    %c0_i32_0 = arith.constant 0 : i32
    %c0_i32_1 = arith.constant 0 : i32
    return %c0_i32, %c0_i32_0 : i32, i32
  }
  func.func @transform_53(%arg0: i32) -> (i32, i32) {
    %c0_i32 = arith.constant 0 : i32
    %c0_i32_0 = arith.constant 0 : i32
    %c0_i32_1 = arith.constant 0 : i32
    return %c0_i32, %c0_i32_0 : i32, i32
  }
  func.func @transform_54(%arg0: i32) -> (i32, i32) {
    %c0_i32 = arith.constant 0 : i32
    %c0_i32_0 = arith.constant 0 : i32
    %c0_i32_1 = arith.constant 0 : i32
    return %c0_i32, %c0_i32_0 : i32, i32
  }
  func.func @transform_55(%arg0: i32) -> (i32, i32) {
    %c0_i32 = arith.constant 0 : i32
    %c0_i32_0 = arith.constant 0 : i32
    %c0_i32_1 = arith.constant 0 : i32
    return %c0_i32, %c0_i32_0 : i32, i32
  }
  func.func @transform_56(%arg0: i32) -> (i32, i32) {
    %c0_i32 = arith.constant 0 : i32
    %c0_i32_0 = arith.constant 0 : i32
    %c0_i32_1 = arith.constant 0 : i32
    return %c0_i32, %c0_i32_0 : i32, i32
  }
  func.func @transform_57(%arg0: i32) -> (i32, i32) {
    %c0_i32 = arith.constant 0 : i32
    %c0_i32_0 = arith.constant 0 : i32
    %c0_i32_1 = arith.constant 0 : i32
    return %c0_i32, %c0_i32_0 : i32, i32
  }
  func.func @transform_58(%arg0: i32) -> (i32, i32) {
    %c0_i32 = arith.constant 0 : i32
    %c0_i32_0 = arith.constant 0 : i32
    %c0_i32_1 = arith.constant 0 : i32
    return %c0_i32, %c0_i32_0 : i32, i32
  }
  func.func @transform_59(%arg0: i32) -> (i32, i32, i32) {
    %c0_i32 = arith.constant 0 : i32
    %c0_i32_0 = arith.constant 0 : i32
    %c0_i32_1 = arith.constant 0 : i32
    return %arg0, %c0_i32, %c0_i32_0 : i32, i32, i32
  }
  func.func @transform_60(%arg0: i32) -> (i32, i32, i32) {
    %c0_i32 = arith.constant 0 : i32
    %c0_i32_0 = arith.constant 0 : i32
    %c0_i32_1 = arith.constant 0 : i32
    return %arg0, %c0_i32, %c0_i32_0 : i32, i32, i32
  }
}

</mosaic_0001>

<bundles_post_ra>
// kernel: msfe_forward.1
= control target key start
LH: loop header
LB: loop body
LE: loop exit
PB: predicated region body
PF: predicated region fallthrough
CT: control target
= control target key end

     0   :  { %s13670_s6 = smov 1   ;;  %s13671_s10 = smov 2   ;;  %s15552_s0 = inlined_call_operand.smem [shape: u32[61], index: -1, kind: input, shape index: {}] }
   0x1   :  { %s13762_s5 = sld [smem:[%s15552_s0]]   ;;  %s13672_s14 = smov 3  }
   0x2   :  { %s13767_s9 = sld [smem:[%s15552_s0 + %s13670_s6]]   ;;  %s13673_s18 = smov 4  }
   0x3   :  { %s13772_s13 = sld [smem:[%s15552_s0 + %s13671_s10]]   ;;  %s13674_s22 = smov 5  }
   0x4   :  { %s13777_s17 = sld [smem:[%s15552_s0 + %s13672_s14]]   ;;  %s13675_s26 = smov 6  }
   0x5   :  { %s13782_s21 = sld [smem:[%s15552_s0 + %s13673_s18]]   ;;  %s13676_s30 = smov 7  }
   0x6   :  { %s13787_s25 = sld [smem:[%s15552_s0 + %s13674_s22]]   ;;  %s13677_s4 = smov 8  }
   0x7   :  { %15579 = sst [smem:[#allocation47_spill]] %s13762_s5  ;;  %s13678_s10 = smov 9  }
   0x8   :  { %15580 = sst [smem:[#allocation48_spill]] %s13767_s9  ;;  %s13679_s15 = smov 10  }
   0x9   :  { %15581 = sst [smem:[#allocation49_spill]] %s13772_s13  ;;  %s13680_s20 = smov 11  }
   0xa   :  { %15582 = sst [smem:[#allocation50_spill]] %s13777_s17  ;;  %s13682_s1 = smov 13  }
   0xb   :  { %s13792_s29 = sld [smem:[%s15552_s0 + %s13675_s26]]   ;;  %s13681_s26 = smov 12  }
   0xc   :  { %15583 = sst [smem:[#allocation51_spill]] %s13787_s25  ;;  %s13683_s7 = smov 14  }
   0xd   :  { %s13797_s3 = sld [smem:[%s15552_s0 + %s13676_s30]]   ;;  %s13685_s22 = smov 16  }
   0xe   :  { %s13802_s8 = sld [smem:[%s15552_s0 + %s13677_s4]]   ;;  %s13686_s28 = smov 17  }
   0xf   :  { %s13807_s14 = sld [smem:[%s15552_s0 + %s13678_s10]]  }
  0x10   :  { %s13812_s19 = sld [smem:[%s15552_s0 + %s13679_s15]]   ;;  %s13684_s15 = smov 15  }
  0x11   :  { %15584 = sst [smem:[#allocation52_spill]] %s13792_s29 }
  0x12   :  { %s13817_s24 = sld [smem:[%s15552_s0 + %s13680_s20]]  }
  0x13   :  { %15585 = sst [smem:[#allocation53_spill]] %s13797_s3 }
  0x14   :  { %15586 = sst [smem:[#allocation54_spill]] %s13802_s8 }
  0x15   :  { %15587 = sst [smem:[#allocation55_spill]] %s13807_s14 }
  0x16   :  { %s13822_s30 = sld [smem:[%s15552_s0 + %s13681_s26]]  }
  0x17   :  { %s13827_s6 = sld [smem:[%s15552_s0 + %s13682_s1]]  }
  0x18   :  { %15588 = sst [smem:[#allocation56_spill]] %s13817_s24 }
  0x19   :  { %s13832_s12 = sld [smem:[%s15552_s0 + %s13683_s7]]   ;;  %s13687_s7 = smov 18  }
  0x1a   :  { %s13837_s20 = sld [smem:[%s15552_s0 + %s13684_s15]]   ;;  %s13688_s15 = smov 19  }
  0x1b   :  { %s13842_s27 = sld [smem:[%s15552_s0 + %s13685_s22]]   ;;  %s13689_s22 = smov 20  }
  0x1c   :  { %15589 = sst [smem:[#allocation57_spill]] %s13822_s30 }
  0x1d   :  { %15590 = sst [smem:[#allocation58_spill]] %s13827_s6 }
  0x1e   :  { %s13847_s4 = sld [smem:[%s15552_s0 + %s13686_s28]]   ;;  %s13690_s28 = smov 21  }
  0x1f   :  { %15591 = sst [smem:[#allocation59_spill]] %s13832_s12 }
  0x20   :  { %15592 = sst [smem:[#allocation60_spill]] %s13837_s20 }
  0x21   :  { %15593 = sst [smem:[#allocation61_spill]] %s13842_s27 }
  0x22   :  { %s13852_s12 = sld [smem:[%s15552_s0 + %s13687_s7]]   ;;  %s13691_s7 = smov 22  }
  0x23   :  { %s13857_s20 = sld [smem:[%s15552_s0 + %s13688_s15]]   ;;  %s13692_s15 = smov 23  }
  0x24   :  { %15594 = sst [smem:[#allocation62_spill]] %s13847_s4 }
  0x25   :  { %s13862_s27 = sld [smem:[%s15552_s0 + %s13689_s22]]   ;;  %s13693_s22 = smov 24  }
  0x26   :  { %s13867_s4 = sld [smem:[%s15552_s0 + %s13690_s28]]   ;;  %s13694_s28 = smov 25  }
  0x27   :  { %s13877_s30 = sld [smem:[%s15552_s0 + %s13692_s15]]   ;;  %s13696_s15 = smov 27  }
  0x28   :  { %15595 = sst [smem:[#allocation63_spill]] %s13852_s12 }
  0x29   :  { %s13872_s12 = sld [smem:[%s15552_s0 + %s13691_s7]]   ;;  %s13695_s7 = smov 26  }
  0x2a   :  { %s13892_s24 = sld [smem:[%s15552_s0 + %s13695_s7]]   ;;  %s13699_s7 = smov 30  }
  0x2b   :  { %15596 = sst [smem:[#allocation64_spill]] %s13862_s27 }
  0x2c   :  { %15597 = sst [smem:[#allocation65_spill]] %s13867_s4 }
  0x2d   :  { %15599 = sst [smem:[#allocation67_spill]] %s13877_s30 }
  0x2e   :  { %s13882_s27 = sld [smem:[%s15552_s0 + %s13693_s22]]   ;;  %s13697_s22 = smov 28  }
  0x2f   :  { %15598 = sst [smem:[#allocation66_spill]] %s13872_s12 }
  0x30   :  { %s13887_s4 = sld [smem:[%s15552_s0 + %s13694_s28]]   ;;  %s13698_s28 = smov 29  }
  0x31   :  { %15602 = sst [smem:[#allocation70_spill]] %s13892_s24 }
  0x32   :  { %s13897_s30 = sld [smem:[%s15552_s0 + %s13696_s15]]   ;;  %s13700_s15 = smov 31  }
  0x33   :  { %s13912_s24 = sld [smem:[%s15552_s0 + %s13699_s7]]   ;;  %s13703_s7 = smov 34  }
  0x34   :  { %15600 = sst [smem:[#allocation68_spill]] %s13882_s27 }
  0x35   :  { %s13902_s27 = sld [smem:[%s15552_s0 + %s13697_s22]]   ;;  %s13701_s22 = smov 32  }
  0x36   :  { %15601 = sst [smem:[#allocation69_spill]] %s13887_s4 }
  0x37   :  { %s13907_s4 = sld [smem:[%s15552_s0 + %s13698_s28]]   ;;  %s13702_s28 = smov 33  }
  0x38   :  { %15603 = sst [smem:[#allocation71_spill]] %s13897_s30 }
  0x39   :  { %15605 = sst [smem:[#allocation73_spill]] %s13912_s24 }
  0x3a   :  { %s13917_s30 = sld [smem:[%s15552_s0 + %s13700_s15]]   ;;  %s13704_s15 = smov 35  }
  0x3b   :  { %s13922_s14 = sld [smem:[%s15552_s0 + %s13701_s22]]   ;;  %s13705_s22 = smov 36  }
  0x3c   :  { %s13932_s8 = sld [smem:[%s15552_s0 + %s13703_s7]]   ;;  %s13707_s7 = smov 38  }
  0x3d   :  { %15604 = sst [smem:[#allocation72_spill]] %s13907_s4 }
  0x3e   :  { %s13927_s4 = sld [smem:[%s15552_s0 + %s13702_s28]]   ;;  %s13706_s28 = smov 37  }
  0x3f   :  { %s13937_s29 = sld [smem:[%s15552_s0 + %s13704_s15]]   ;;  %s13708_s15 = smov 39  }
  0x40   :  { %15606 = sst [smem:[#allocation74_spill]] %s13917_s30 }
  0x41   :  { %15607 = sst [smem:[#allocation75_spill]] %s13922_s14 }
  0x42   :  { %15609 = sst [smem:[#allocation77_spill]] %s13932_s8 }
  0x43   :  { %s13942_s25 = sld [smem:[%s15552_s0 + %s13705_s22]]   ;;  %s13709_s22 = smov 40  }
  0x44   :  { %15608 = sst [smem:[#allocation76_spill]] %s13927_s4 }
  0x45   :  { %15610 = sst [smem:[#allocation78_spill]] %s13937_s29 }
  0x46   :  { %s13947_s14 = sld [smem:[%s15552_s0 + %s13706_s28]]   ;;  %s13710_s28 = smov 41  }
  0x47   :  { %s13952_s8 = sld [smem:[%s15552_s0 + %s13707_s7]]   ;;  %s13711_s7 = smov 42  }
  0x48   :  { %s13957_s29 = sld [smem:[%s15552_s0 + %s13708_s15]]   ;;  %s13712_s15 = smov 43  }
  0x49   :  { %s13962_s30 = sld [smem:[%s15552_s0 + %s13709_s22]]   ;;  %s13713_s22 = smov 44  }
  0x4a   :  { %s13977_s24 = sld [smem:[%s15552_s0 + %s13712_s15]]   ;;  %s13716_s15 = smov 47  }
  0x4c   :  { %15611 = sst [smem:[#allocation79_spill]] %s13947_s14 }
  0x4d   :  { %15612 = sst [smem:[#allocation80_spill]] %s13952_s8 }
  0x4e   :  { %s13967_s14 = sld [smem:[%s15552_s0 + %s13710_s28]]   ;;  %s13714_s28 = smov 45  }
  0x4f   :  { %15613 = sst [smem:[#allocation81_spill]] %s13962_s30 }
  0x50   :  { %s13972_s8 = sld [smem:[%s15552_s0 + %s13711_s7]]   ;;  %s13715_s7 = smov 46  }
  0x51   :  { %15616 = sst [smem:[#allocation84_spill]] %s13977_s24 }
  0x52   :  { %s13982_s30 = sld [smem:[%s15552_s0 + %s13713_s22]]   ;;  %s13717_s22 = smov 48  }
  0x53   :  { %s13992_s17 = sld [smem:[%s15552_s0 + %s13715_s7]]   ;;  %s13719_s7 = smov 50  }
  0x54   :  { %15614 = sst [smem:[#allocation82_spill]] %s13967_s14 }
  0x55   :  { %s13987_s14 = sld [smem:[%s15552_s0 + %s13714_s28]]   ;;  %s13718_s28 = smov 49  }
  0x56   :  { %15615 = sst [smem:[#allocation83_spill]] %s13972_s8 }
  0x57   :  { %s13997_s24 = sld [smem:[%s15552_s0 + %s13716_s15]]   ;;  %s13720_s15 = smov 51  }
  0x58   :  { %15617 = sst [smem:[#allocation85_spill]] %s13982_s30 }
  0x59   :  { %15618 = sst [smem:[#allocation86_spill]] %s13992_s17 }
  0x5a   :  { %s14002_s30 = sld [smem:[%s15552_s0 + %s13717_s22]]   ;;  %s13721_s22 = smov 52  }
  0x5b   :  { %s14007_s13 = sld [smem:[%s15552_s0 + %s13718_s28]]   ;;  %s13722_s28 = smov 53  }
  0x5c   :  { %s14012_s17 = sld [smem:[%s15552_s0 + %s13719_s7]]   ;;  %s13723_s7 = smov 54  }
  0x5d   :  { %15619 = sst [smem:[#allocation87_spill]] %s13997_s24 }
  0x5e   :  { %s14017_s24 = sld [smem:[%s15552_s0 + %s13720_s15]]   ;;  %s13724_s15 = smov 55  }
  0x5f   :  { %s14022_s9 = sld [smem:[%s15552_s0 + %s13721_s22]]   ;;  %s13725_s22 = smov 56  }
  0x60   :  { %15620 = sst [smem:[#allocation88_spill]] %s14002_s30 }
  0x61   :  { %15621 = sst [smem:[#allocation89_spill]] %s14007_s13 }
  0x62   :  { %15622 = sst [smem:[#allocation90_spill]] %s14012_s17 }
  0x63   :  { %s14027_s13 = sld [smem:[%s15552_s0 + %s13722_s28]]   ;;  %s13726_s28 = smov 57  }
  0x64   :  { %s14032_s17 = sld [smem:[%s15552_s0 + %s13723_s7]]   ;;  %s13727_s7 = smov 58  }
  0x65   :  { %15623 = sst [smem:[#allocation91_spill]] %s14022_s9 }
  0x66   :  { %s14037_s5 = sld [smem:[%s15552_s0 + %s13724_s15]]   ;;  %s13728_s15 = smov 59  }
  0x67   :  { %s14042_s9 = sld [smem:[%s15552_s0 + %s13725_s22]]   ;;  %s13729_s22 = smov 60  }
  0x68   :  { %s14062_s30 = sld [smem:[%s15552_s0 + %s13729_s22]]  }
  0x69   :  { %15624 = sst [smem:[#allocation92_spill]] %s14027_s13 }
  0x6a   :  { %15625 = sst [smem:[#allocation93_spill]] %s14032_s17 }
  0x6b   :  { %s14047_s13 = sld [smem:[%s15552_s0 + %s13726_s28]]  }
  0x6c   :  { %15626 = sst [smem:[#allocation94_spill]] %s14037_s5 }
  0x6d   :  { %15627 = sst [smem:[#allocation95_spill]] %s14042_s9 }
  0x6e   :  { %s14052_s17 = sld [smem:[%s15552_s0 + %s13727_s7]]  }
  0x6f   :  { %s14057_s5 = sld [smem:[%s15552_s0 + %s13728_s15]]  }
  0x70   :  { %15629 = sst [smem:[#allocation97_spill]] %s14062_s30 }
  0x75   :  { %15628 = sst [smem:[#allocation96_spill]] %s14057_s5 }
  0x76   :  { %127 = vsyncpa [#allocation4], 0 }
  0x77   :  { %128 = vsyncpa [#allocation7], 0 }
  0x78   :  { %129 = vsyncpa [#allocation10], 0 }
  0x79   :  { %130 = vsyncpa [#allocation13], 0 }
  0x7a   :  { %131 = vsyncpa [#allocation16], 0 }
  0x7b   :  { %132 = vsyncpa [#allocation19], 0 }
  0x7c   :  { %133 = vsyncpa [#allocation22], 0 }
  0x7d   :  { %134 = vsyncpa [#allocation25], 0 }
  0x7e   :  { %135 = vsyncpa [#allocation28], 0 }
  0x7f   :  { %136 = vsyncpa [#allocation31], 0 }
  0x80   :  { %137 = vsyncpa [#allocation5], 0 }
  0x81   :  { %139 = vsyncpa [#allocation5 + $0x1], 0 }
  0x82   :  { %140 = vsyncpa [#allocation34], 0 }
  0x83   :  { %142 = vsyncpa [#allocation34 + $0x1], 0  ;;  %s14064_s28 = smov 0   ;;  %s14066_s1 = smov 0  }
  0x84   :  { %s14068_s0 = smov 0   ;;  %s14070_s2 = smov 0  }
  0x85 LB: > { %s15630_s12 = sld [smem:[#allocation66_spill]]  ;;  %s14085_s7 = sadd.s32 4294967295, %s13668_s2   ;;  %s13660_s1 = sphi %s14066_s1, %s15705_s1   ;;  %s13656_s28 = sphi %s14064_s28, %s15704_s28   ;;  %s13668_s2 = sphi %s14070_s2, %s15701_s2   ;;  %s13664_s0 = sphi %s14068_s0, %s15703_s0  }
  0x86   : > { %s15631_s9 = sld [smem:[#allocation95_spill]]  ;;  %s9956_s10 = sadd.s32 4294967294, %s13668_s2  }
  0x87   : > { %s15632_s8 = sld [smem:[#allocation83_spill]]  ;;  %s14089_s11 = sadd.s32 1, %s13668_s2  }
  0x88   : > { %s15633_s6 = sld [smem:[#allocation58_spill]]  ;;  %s1399_s15 = sadd.s32 1, %s13664_s0 }
  0x89   : > { %s15634_s4 = sld [smem:[#allocation76_spill]]  ;;  %s1396_s16 = ssub.s32 %s13668_s2, %s14089_s11 }
  0x8a   : > { %s15635_s3 = sld [smem:[#allocation53_spill]]  ;;  %p1409_p0 = scmp.ne.s32.totalorder %s13664_s0, %s13660_s1 }
  0x8b   : > { %15636 = sst [smem:[#allocation98_spill]] %s13656_s28  ;;  %p1397_p1 = scmp.eq.s32.totalorder %s1396_s16, 0 }
  0x8c   : > { %15637 = sst [smem:[#allocation99_spill]] %s13664_s0  ;;  %p1410_p2 = scmp.eq.s32.totalorder %s14085_s7, 1 }
  0x8d   : > { %15638 = sst [smem:[#allocation100_spill]] %s13668_s2  ;;  %p1415_p3 = scmp.ne.s32.totalorder %s13660_s1, %s13656_s28 }
  0x8e   : > { %15639 = sst [smem:[#allocation101_spill]] %s14089_s11  ;;  %p1416_p4 = scmp.eq.s32.totalorder %s9956_s10, 1 }
  0x8f   : > { %s14100_s18 = scalar_select %p1397_p1, %s13664_s0, %s1399_s15  }
  0x90   : > { %p14102_p5 = por %p1410_p2, %p1409_p0  ;;  %p14106_p6 = por %p1416_p4, %p1415_p3 }
  0x91   : > { %15640 = sst [smem:[#allocation102_spill]] %s14100_s18  ;;  %p9957_p7 = scmp.ge.s32.totalorder %s13668_s2, 1 }
  0x92   : > { %s15641_s22 = scalar_select %p14102_p5, 1, 0 }
  0x93   : > { %s15643_s23 = scalar_select %p14106_p6, 1, 0 }
  0x94   : > { %15642 = sst [smem:[#allocation103_spill]] %s15641_s22  ;;  %p1449_p8 = scmp.lt.s32.totalorder %s13668_s2, 3 }
  0x95   : > { %15644 = sst [smem:[#allocation104_spill]] %s15643_s23  ;;  %p12795_p9 = scmp.eq.s32.totalorder %s14085_s7, 0 }
  0x96   : > { %p14113_p10 = pnand %p9957_p7, %p1449_p8  ;;  %s1489_s16 = sshll.u32 %s15635_s3, 4  ;;  %s1490_s16 = int_to_ptr.hbm [resolvable:$true] %s1489_s16 }
  0x97   : > { %s1529_s10 = sshll.u32 %s15633_s6, 4  ;;  %s13730_s18 = smov [#allocation6]   ;;  %s14127_s10 = int_to_ptr.hbm [resolvable:$true] %s1529_s10 }
  0x98   : > { %p12733_p11 = pneg %p14113_p10  ;;  %s1491_s0 = sshll.u32 %s13730_s18, 4  ;;  %s1492_s0 = int_to_ptr.vmem [resolvable:$true] %s1491_s0 }
  0x99   : > { %s12994_s11 = sshra.s32 %s1490_s16, 4  ;;  %s13001_s2 = scalar_lea.hbm %s15635_s3, 448  ;;  %s12995_s11 = int_to_ptr.hbm [resolvable:$true] %s12994_s11 }
  0x9a   : > { %p14123_p12 = pnand %p12795_p9, %p12733_p11  ;;  %s12996_s23 = scalar_lea.hbm %s12995_s11, 448 }
  0x9b   : > { %p12997_p13 = scmp.ne.s32.totalorder %s12995_s11, %s12996_s23  ;;  %p13002_p3 = scmp.lt.s32.totalorder %s12995_s11, %s15635_s3 }
  0x9c   : > { %p14131_p0 = pneg %p14123_p12  ;;  %p13003_p4 = scmp.lt.s32.totalorder %s13001_s2, %s12996_s23 }
  0x9e   : > { %p12999_p1 = pnand %p14131_p0, %p12997_p13  ;;  %p13004_p7 = por %p13003_p4, %p13002_p3 }
  0xa0   : > { %p13000_p2 = pneg %p12999_p1 }
  0xa2   : > { %p13005_p8 = pnand %p13004_p7, %p13000_p2 }
  0xa4   : > { %13008 = shalt.err (!%p13005_p8)
}
  0xa5   : > { %s13731_s18 = smov 64   ;;  %s13732_s30 = smov 4  }
  0xa6   : > { %12739 = dma.hbm_to_vmem [thread:$0]  (!%p14123_p12), %s1490_s16, 7168, %s1492_s0, [#allocation7], %s13731_s18, %s13731_s18, %s13732_s30  }
  0xa7   : > { %s13733_s22 = smov [#allocation9]   ;;  %s1578_s11 = sshll.u32 %s15630_s12, 4  ;;  %s14145_s11 = int_to_ptr.hbm [resolvable:$true] %s1578_s11 }
  0xa8   : > { %s1531_s5 = sshll.u32 %s13733_s22, 4  ;;  %s13024_s2 = sshra.s32 %s14127_s10, 4  ;;  %s1532_s5 = int_to_ptr.vmem [resolvable:$true] %s1531_s5  ;;  %s13025_s2 = int_to_ptr.hbm [resolvable:$true] %s13024_s2 }
  0xa9   : > { %s13026_s23 = scalar_lea.hbm %s13025_s2, 448  ;;  %s13031_s3 = scalar_lea.hbm %s15633_s6, 448 }
  0xaa   : > { %p13027_p11 = scmp.ne.s32.totalorder %s13025_s2, %s13026_s23  ;;  %p13032_p2 = scmp.lt.s32.totalorder %s13025_s2, %s15633_s6 }
  0xab   : > { %p13033_p3 = scmp.lt.s32.totalorder %s13031_s3, %s13026_s23 }
  0xac   : > { %p13029_p13 = pnand %p13027_p11, %p14131_p0 }
  0xad   : > { %p13034_p4 = por %p13033_p3, %p13032_p2 }
  0xae   : > { %p13030_p1 = pneg %p13029_p13 }
  0xb0   : > { %p13035_p7 = pnand %p13034_p4, %p13030_p1 }
  0xb2   : > { %13038 = shalt.err (!%p13035_p7)
}
  0xb3   : > { %12745 = dma.hbm_to_vmem [thread:$0]  (!%p14123_p12), %s14127_s10, 7168, %s1532_s5, [#allocation10], %s13731_s18, %s13731_s18, %s13732_s30  }
  0xb4   : > { %s1633_s0 = sshll.u32 %s15634_s4, 4  ;;  %s13734_s22 = smov [#allocation12]   ;;  %s14159_s0 = int_to_ptr.hbm [resolvable:$true] %s1633_s0 }
  0xb5   : > { %s1580_s16 = sshll.u32 %s13734_s22, 4  ;;  %s13054_s3 = sshra.s32 %s14145_s11, 4  ;;  %s1581_s16 = int_to_ptr.vmem [resolvable:$true] %s1580_s16  ;;  %s13055_s3 = int_to_ptr.hbm [resolvable:$true] %s13054_s3 }
  0xb6   : > { %s13056_s2 = scalar_lea.hbm %s13055_s3, 448  ;;  %s13061_s23 = scalar_lea.hbm %s15630_s12, 448 }
  0xb7   : > { %p13057_p8 = scmp.ne.s32.totalorder %s13055_s3, %s13056_s2  ;;  %p13062_p1 = scmp.lt.s32.totalorder %s13055_s3, %s15630_s12 }
  0xb8   : > { %p13063_p2 = scmp.lt.s32.totalorder %s13061_s23, %s13056_s2 }
  0xb9   : > { %p13059_p11 = pnand %p13057_p8, %p14131_p0 }
  0xba   : > { %p13064_p3 = por %p13063_p2, %p13062_p1 }
  0xbb   : > { %p13060_p13 = pneg %p13059_p11 }
  0xbd   : > { %p13065_p4 = pnand %p13064_p3, %p13060_p13 }
  0xbf   : > { %13068 = shalt.err (!%p13065_p4)
}
  0xc0   : > { %12751 = dma.hbm_to_vmem [thread:$0]  (!%p14123_p12), %s14145_s11, 7168, %s1581_s16, [#allocation13], %s13731_s18, %s13731_s18, %s13732_s30  }
  0xc1   : > { %s13735_s5 = smov [#allocation15]   ;;  %s1673_s22 = sshll.u32 %s13957_s29, 4  ;;  %s14173_s22 = int_to_ptr.hbm [resolvable:$true] %s1673_s22 }
  0xc2   : > { %s1635_s10 = sshll.u32 %s13735_s5, 4  ;;  %s13084_s3 = sshra.s32 %s14159_s0, 4  ;;  %s1636_s10 = int_to_ptr.vmem [resolvable:$true] %s1635_s10  ;;  %s13085_s3 = int_to_ptr.hbm [resolvable:$true] %s13084_s3 }
  0xc3   : > { %s13086_s2 = scalar_lea.hbm %s13085_s3, 192  ;;  %s13091_s23 = scalar_lea.hbm %s15634_s4, 192 }
  0xc4   : > { %p13087_p7 = scmp.ne.s32.totalorder %s13085_s3, %s13086_s2  ;;  %p13092_p13 = scmp.lt.s32.totalorder %s13085_s3, %s15634_s4 }
  0xc5   : > { %p13093_p1 = scmp.lt.s32.totalorder %s13091_s23, %s13086_s2 }
  0xc6   : > { %p13089_p8 = pnand %p13087_p7, %p14131_p0 }
  0xc7   : > { %p13094_p2 = por %p13093_p1, %p13092_p13 }
  0xc8   : > { %p13090_p11 = pneg %p13089_p8 }
  0xca   : > { %p13095_p3 = pnand %p13094_p2, %p13090_p11 }
  0xcc   : > { %13098 = shalt.err (!%p13095_p3)
}
  0xcd   : > { %12757 = dma.hbm_to_vmem [thread:$0]  (!%p14123_p12), %s14159_s0, 3072, %s1636_s10, [#allocation16], %s13731_s18, %s13731_s18, %s13732_s30  }
  0xce   : > { %s1713_s11 = sshll.u32 %s13987_s14, 4  ;;  %s13736_s16 = smov [#allocation18]   ;;  %s14187_s11 = int_to_ptr.hbm [resolvable:$true] %s1713_s11 }
  0xcf   : > { %s1675_s5 = sshll.u32 %s13736_s16, 4  ;;  %s13114_s3 = sshra.s32 %s14173_s22, 4  ;;  %s1676_s5 = int_to_ptr.vmem [resolvable:$true] %s1675_s5  ;;  %s13115_s3 = int_to_ptr.hbm [resolvable:$true] %s13114_s3 }
  0xd0   : > { %s13116_s2 = scalar_lea.hbm %s13115_s3, 192  ;;  %s13121_s23 = scalar_lea.hbm %s13957_s29, 192 }
  0xd1   : > { %p13117_p4 = scmp.ne.s32.totalorder %s13115_s3, %s13116_s2  ;;  %p13122_p11 = scmp.lt.s32.totalorder %s13115_s3, %s13957_s29 }
  0xd2   : > { %p13123_p13 = scmp.lt.s32.totalorder %s13121_s23, %s13116_s2 }
  0xd3   : > { %p13119_p7 = pnand %p13117_p4, %p14131_p0 }
  0xd4   : > { %p13124_p1 = por %p13123_p13, %p13122_p11 }
  0xd5   : > { %p13120_p8 = pneg %p13119_p7 }
  0xd7   : > { %p13125_p2 = pnand %p13124_p1, %p13120_p8 }
  0xd9   : > { %13128 = shalt.err (!%p13125_p2)
}
  0xda   : > { %12763 = dma.hbm_to_vmem [thread:$0]  (!%p14123_p12), %s14173_s22, 3072, %s1676_s5, [#allocation19], %s13731_s18, %s13731_s18, %s13732_s30  }
  0xdb   : > { %s13737_s0 = smov [#allocation21]   ;;  %s1753_s16 = sshll.u32 %s14017_s24, 4  ;;  %s14201_s16 = int_to_ptr.hbm [resolvable:$true] %s1753_s16 }
  0xdc   : > { %s1715_s10 = sshll.u32 %s13737_s0, 4  ;;  %s13144_s3 = sshra.s32 %s14187_s11, 4  ;;  %s1716_s10 = int_to_ptr.vmem [resolvable:$true] %s1715_s10  ;;  %s13145_s3 = int_to_ptr.hbm [resolvable:$true] %s13144_s3 }
  0xdd   : > { %s13146_s2 = scalar_lea.hbm %s13145_s3, 64  ;;  %s13151_s23 = scalar_lea.hbm %s13987_s14, 64 }
  0xde   : > { %p13147_p3 = scmp.ne.s32.totalorder %s13145_s3, %s13146_s2  ;;  %p13152_p8 = scmp.lt.s32.totalorder %s13145_s3, %s13987_s14 }
  0xdf   : > { %p13153_p11 = scmp.lt.s32.totalorder %s13151_s23, %s13146_s2 }
  0xe0   : > { %p13149_p4 = pnand %p13147_p3, %p14131_p0 }
  0xe1   : > { %p13154_p13 = por %p13153_p11, %p13152_p8 }
  0xe2   : > { %p13150_p7 = pneg %p13149_p4 }
  0xe4   : > { %p13155_p1 = pnand %p13154_p13, %p13150_p7 }
  0xe6   : > { %13158 = shalt.err (!%p13155_p1)
}
  0xe7   : > { %12769 = dma.hbm_to_vmem [thread:$0]  (!%p14123_p12), %s14187_s11, 1024, %s1716_s10, [#allocation22], %s13731_s18, %s13731_s18, %s13732_s30  }
  0xe8   : > { %s1791_s22 = sshll.u32 %s15631_s9, 4  ;;  %s13738_s5 = smov [#allocation24]   ;;  %s14215_s22 = int_to_ptr.hbm [resolvable:$true] %s1791_s22 }
  0xe9   : > { %s1755_s0 = sshll.u32 %s13738_s5, 4  ;;  %s13174_s3 = sshra.s32 %s14201_s16, 4  ;;  %s1756_s0 = int_to_ptr.vmem [resolvable:$true] %s1755_s0  ;;  %s13175_s3 = int_to_ptr.hbm [resolvable:$true] %s13174_s3 }
  0xea   : > { %s13176_s2 = scalar_lea.hbm %s13175_s3, 192  ;;  %s13181_s23 = scalar_lea.hbm %s14017_s24, 192 }
  0xeb   : > { %p13177_p2 = scmp.ne.s32.totalorder %s13175_s3, %s13176_s2  ;;  %p13182_p7 = scmp.lt.s32.totalorder %s13175_s3, %s14017_s24 }
  0xec   : > { %p13183_p8 = scmp.lt.s32.totalorder %s13181_s23, %s13176_s2 }
  0xed   : > { %p13179_p3 = pnand %p13177_p2, %p14131_p0 }
  0xee   : > { %p13184_p11 = por %p13183_p8, %p13182_p7 }
  0xef   : > { %p13180_p4 = pneg %p13179_p3 }
  0xf1   : > { %p13185_p13 = pnand %p13184_p11, %p13180_p4 }
  0xf3   : > { %13188 = shalt.err (!%p13185_p13)
}
  0xf4   : > { %12775 = dma.hbm_to_vmem [thread:$0]  (!%p14123_p12), %s14201_s16, 3072, %s1756_s0, [#allocation25], %s13731_s18, %s13731_s18, %s13732_s30  }
  0xf5   : > { %s13739_s11 = smov [#allocation27]   ;;  %s1469_s5 = sshll.u32 %s13782_s21, 4  ;;  %s14229_s5 = int_to_ptr.hbm [resolvable:$true] %s1469_s5 }
  0xf6   : > { %s1793_s10 = sshll.u32 %s13739_s11, 4  ;;  %s13204_s3 = sshra.s32 %s14215_s22, 4  ;;  %s1794_s10 = int_to_ptr.vmem [resolvable:$true] %s1793_s10  ;;  %s13205_s3 = int_to_ptr.hbm [resolvable:$true] %s13204_s3 }
  0xf7   : > { %s13206_s2 = scalar_lea.hbm %s13205_s3, 1  ;;  %s13211_s23 = scalar_lea.hbm %s15631_s9, 1 }
  0xf8   : > { %p13207_p1 = scmp.ne.s32.totalorder %s13205_s3, %s13206_s2  ;;  %p13212_p4 = scmp.lt.s32.totalorder %s13205_s3, %s15631_s9 }
  0xf9   : > { %p13213_p7 = scmp.lt.s32.totalorder %s13211_s23, %s13206_s2 }
  0xfa   : > { %p13209_p2 = pnand %p13207_p1, %p14131_p0 }
  0xfb   : > { %p13214_p8 = por %p13213_p7, %p13212_p4 }
  0xfc   : > { %p13210_p3 = pneg %p13209_p2 }
  0xfe   : > { %p13215_p11 = pnand %p13214_p8, %p13210_p3 }
 0x100   : > { %13218 = shalt.err (!%p13215_p11)
}
 0x101   : > { %12781 = dma.hbm_to_vmem [thread:$0]  (!%p14123_p12), %s14215_s22, 16, %s1794_s10, [#allocation28]  }
 0x102   : > { %s1509_s16 = sshll.u32 %s13812_s19, 4  ;;  %s13740_s0 = smov [#allocation3]   ;;  %s14240_s16 = int_to_ptr.hbm [resolvable:$true] %s1509_s16 }
 0x103   : > { %s1471_s11 = sshll.u32 %s13740_s0, 4  ;;  %s13234_s3 = sshra.s32 %s14229_s5, 4  ;;  %s1472_s11 = int_to_ptr.vmem [resolvable:$true] %s1471_s11  ;;  %s13235_s3 = int_to_ptr.hbm [resolvable:$true] %s13234_s3 }
 0x104   : > { %s13236_s2 = scalar_lea.hbm %s13235_s3, 448  ;;  %s13241_s23 = scalar_lea.hbm %s13782_s21, 448 }
 0x105   : > { %p13237_p13 = scmp.ne.s32.totalorder %s13235_s3, %s13236_s2  ;;  %p13242_p3 = scmp.lt.s32.totalorder %s13235_s3, %s13782_s21 }
 0x106   : > { %p13243_p4 = scmp.lt.s32.totalorder %s13241_s23, %s13236_s2 }
 0x107   : > { %p13239_p1 = pnand %p13237_p13, %p14131_p0 }
 0x108   : > { %p13244_p7 = por %p13243_p4, %p13242_p3 }
 0x109   : > { %p13240_p2 = pneg %p13239_p1 }
 0x10b   : > { %p13245_p8 = pnand %p13244_p7, %p13240_p2 }
 0x10d   : > { %13248 = shalt.err (!%p13245_p8)
}
 0x10e   : > { %12736 = dma.hbm_to_vmem [thread:$0]  (!%p14123_p12), %s14229_s5, 7168, %s1472_s11, [#allocation4], %s13731_s18, %s13731_s18, %s13732_s30  }
 0x10f   : > { %s13741_s22 = smov [#allocation8]   ;;  %s1558_s0 = sshll.u32 %s13857_s20, 4  ;;  %s14254_s0 = int_to_ptr.hbm [resolvable:$true] %s1558_s0 }
 0x110   : > { %s1511_s10 = sshll.u32 %s13741_s22, 4  ;;  %s13264_s3 = sshra.s32 %s14240_s16, 4  ;;  %s1512_s10 = int_to_ptr.vmem [resolvable:$true] %s1511_s10  ;;  %s13265_s3 = int_to_ptr.hbm [resolvable:$true] %s13264_s3 }
 0x111   : > { %s13266_s2 = scalar_lea.hbm %s13265_s3, 448  ;;  %s13271_s23 = scalar_lea.hbm %s13812_s19, 448 }
 0x112   : > { %p13267_p11 = scmp.ne.s32.totalorder %s13265_s3, %s13266_s2  ;;  %p13272_p2 = scmp.lt.s32.totalorder %s13265_s3, %s13812_s19 }
 0x113   : > { %p13273_p3 = scmp.lt.s32.totalorder %s13271_s23, %s13266_s2 }
 0x114   : > { %p13269_p13 = pnand %p13267_p11, %p14131_p0 }
 0x115   : > { %p13274_p4 = por %p13273_p3, %p13272_p2 }
 0x116   : > { %p13270_p1 = pneg %p13269_p13 }
 0x118   : > { %p13275_p7 = pnand %p13274_p4, %p13270_p1 }
 0x11a   : > { %13278 = shalt.err (!%p13275_p7)
}
 0x11b   : > { %12742 = dma.hbm_to_vmem [thread:$0]  (!%p14123_p12), %s14240_s16, 7168, %s1512_s10, [#allocation7], %s13731_s18, %s13731_s18, %s13732_s30  }
 0x11c   : > { %s1607_s5 = sshll.u32 %s13902_s27, 4  ;;  %s13742_s11 = smov [#allocation11]   ;;  %s14268_s5 = int_to_ptr.hbm [resolvable:$true] %s1607_s5 }
 0x11d   : > { %s1560_s22 = sshll.u32 %s13742_s11, 4  ;;  %s13294_s3 = sshra.s32 %s14254_s0, 4  ;;  %s1561_s22 = int_to_ptr.vmem [resolvable:$true] %s1560_s22  ;;  %s13295_s3 = int_to_ptr.hbm [resolvable:$true] %s13294_s3 }
 0x11e   : > { %s13296_s2 = scalar_lea.hbm %s13295_s3, 448  ;;  %s13301_s23 = scalar_lea.hbm %s13857_s20, 448 }
 0x11f   : > { %p13297_p8 = scmp.ne.s32.totalorder %s13295_s3, %s13296_s2  ;;  %p13302_p1 = scmp.lt.s32.totalorder %s13295_s3, %s13857_s20 }
 0x120   : > { %p13303_p2 = scmp.lt.s32.totalorder %s13301_s23, %s13296_s2 }
 0x121   : > { %p13299_p11 = pnand %p13297_p8, %p14131_p0 }
 0x122   : > { %p13304_p3 = por %p13303_p2, %p13302_p1 }
 0x123   : > { %p13300_p13 = pneg %p13299_p11 }
 0x125   : > { %p13305_p4 = pnand %p13304_p3, %p13300_p13 }
 0x127   : > { %13308 = shalt.err (!%p13305_p4)
}
 0x128   : > { %12748 = dma.hbm_to_vmem [thread:$0]  (!%p14123_p12), %s14254_s0, 7168, %s1561_s22, [#allocation10], %s13731_s18, %s13731_s18, %s13732_s30  }
 0x129   : > { %s13743_s16 = smov [#allocation14]   ;;  %s1653_s11 = sshll.u32 %s13942_s25, 4  ;;  %s14282_s11 = int_to_ptr.hbm [resolvable:$true] %s1653_s11 }
 0x12a   : > { %s1609_s10 = sshll.u32 %s13743_s16, 4  ;;  %s13324_s3 = sshra.s32 %s14268_s5, 4  ;;  %s1610_s10 = int_to_ptr.vmem [resolvable:$true] %s1609_s10  ;;  %s13325_s3 = int_to_ptr.hbm [resolvable:$true] %s13324_s3 }
 0x12b   : > { %s13326_s2 = scalar_lea.hbm %s13325_s3, 64  ;;  %s13331_s23 = scalar_lea.hbm %s13902_s27, 64 }
 0x12c   : > { %p13327_p7 = scmp.ne.s32.totalorder %s13325_s3, %s13326_s2  ;;  %p13332_p13 = scmp.lt.s32.totalorder %s13325_s3, %s13902_s27 }
 0x12d   : > { %p13333_p1 = scmp.lt.s32.totalorder %s13331_s23, %s13326_s2 }
 0x12e   : > { %p13329_p8 = pnand %p13327_p7, %p14131_p0 }
 0x12f   : > { %p13334_p2 = por %p13333_p1, %p13332_p13 }
 0x130   : > { %p13330_p11 = pneg %p13329_p8 }
 0x132   : > { %p13335_p3 = pnand %p13334_p2, %p13330_p11 }
 0x134   : > { %13338 = shalt.err (!%p13335_p3)
}
 0x135   : > { %12754 = dma.hbm_to_vmem [thread:$0]  (!%p14123_p12), %s14268_s5, 1024, %s1610_s10, [#allocation13], %s13731_s18, %s13731_s18, %s13732_s30  }
 0x136   : > { %s1693_s0 = sshll.u32 %s15632_s8, 4  ;;  %s13744_s22 = smov [#allocation17]   ;;  %s14296_s0 = int_to_ptr.hbm [resolvable:$true] %s1693_s0 }
 0x137   : > { %s1655_s16 = sshll.u32 %s13744_s22, 4  ;;  %s13354_s3 = sshra.s32 %s14282_s11, 4  ;;  %s1656_s16 = int_to_ptr.vmem [resolvable:$true] %s1655_s16  ;;  %s13355_s3 = int_to_ptr.hbm [resolvable:$true] %s13354_s3 }
 0x138   : > { %s13356_s2 = scalar_lea.hbm %s13355_s3, 192  ;;  %s13361_s23 = scalar_lea.hbm %s13942_s25, 192 }
 0x139   : > { %p13357_p4 = scmp.ne.s32.totalorder %s13355_s3, %s13356_s2  ;;  %p13362_p11 = scmp.lt.s32.totalorder %s13355_s3, %s13942_s25 }
 0x13a   : > { %p13363_p13 = scmp.lt.s32.totalorder %s13361_s23, %s13356_s2 }
 0x13b   : > { %p13359_p7 = pnand %p13357_p4, %p14131_p0 }
 0x13c   : > { %p13364_p1 = por %p13363_p13, %p13362_p11 }
 0x13d   : > { %p13360_p8 = pneg %p13359_p7 }
 0x13f   : > { %p13365_p2 = pnand %p13364_p1, %p13360_p8 }
 0x141   : > { %13368 = shalt.err (!%p13365_p2)
}
 0x142   : > { %s15648_s5 = sld [smem:[#allocation88_spill]]  ;;  %s13745_s10 = smov [#allocation20]  }
 0x143   : > { %12760 = dma.hbm_to_vmem [thread:$0]  (!%p14123_p12), %s14282_s11, 3072, %s1656_s16, [#allocation16], %s13731_s18, %s13731_s18, %s13732_s30  }
 0x144   : > { %s1695_s22 = sshll.u32 %s13745_s10, 4  ;;  %s13384_s3 = sshra.s32 %s14296_s0, 4  ;;  %s1696_s22 = int_to_ptr.vmem [resolvable:$true] %s1695_s22  ;;  %s13385_s3 = int_to_ptr.hbm [resolvable:$true] %s13384_s3 }
 0x145   : > { %s13386_s2 = scalar_lea.hbm %s13385_s3, 192  ;;  %s13391_s23 = scalar_lea.hbm %s15632_s8, 192 }
 0x146   : > { %p13387_p3 = scmp.ne.s32.totalorder %s13385_s3, %s13386_s2  ;;  %p13392_p8 = scmp.lt.s32.totalorder %s13385_s3, %s15632_s8 }
 0x147   : > { %p13393_p11 = scmp.lt.s32.totalorder %s13391_s23, %s13386_s2 }
 0x148   : > { %s1733_s4 = sshll.u32 %s15648_s5, 4  ;;  %p13389_p4 = pnand %p13387_p3, %p14131_p0  ;;  %s14310_s4 = int_to_ptr.hbm [resolvable:$true] %s1733_s4 }
 0x149   : > { %p13394_p13 = por %p13393_p11, %p13392_p8 }
 0x14a   : > { %p13390_p7 = pneg %p13389_p4 }
 0x14c   : > { %p13395_p1 = pnand %p13394_p13, %p13390_p7 }
 0x14e   : > { %13398 = shalt.err (!%p13395_p1)
}
 0x14f   : > { %s15649_s11 = sld [smem:[#allocation93_spill]]  ;;  %s13746_s10 = smov [#allocation23]  }
 0x150   : > { %12766 = dma.hbm_to_vmem [thread:$0]  (!%p14123_p12), %s14296_s0, 3072, %s1696_s22, [#allocation19], %s13731_s18, %s13731_s18, %s13732_s30  }
 0x151   : > { %s1735_s6 = sshll.u32 %s13746_s10, 4  ;;  %s13414_s3 = sshra.s32 %s14310_s4, 4  ;;  %s1736_s6 = int_to_ptr.vmem [resolvable:$true] %s1735_s6  ;;  %s13415_s3 = int_to_ptr.hbm [resolvable:$true] %s13414_s3 }
 0x152   : > { %s13416_s2 = scalar_lea.hbm %s13415_s3, 192  ;;  %s13421_s23 = scalar_lea.hbm %s15648_s5, 192 }
 0x153   : > { %p13417_p2 = scmp.ne.s32.totalorder %s13415_s3, %s13416_s2  ;;  %p13422_p7 = scmp.lt.s32.totalorder %s13415_s3, %s15648_s5 }
 0x154   : > { %p13423_p8 = scmp.lt.s32.totalorder %s13421_s23, %s13416_s2 }
 0x155   : > { %s1773_s16 = sshll.u32 %s15649_s11, 4  ;;  %p13419_p3 = pnand %p13417_p2, %p14131_p0  ;;  %s14324_s16 = int_to_ptr.hbm [resolvable:$true] %s1773_s16 }
 0x156   : > { %p13424_p11 = por %p13423_p8, %p13422_p7 }
 0x157   : > { %p13420_p4 = pneg %p13419_p3 }
 0x159   : > { %p13425_p13 = pnand %p13424_p11, %p13420_p4 }
 0x15b   : > { %13428 = shalt.err (!%p13425_p13)
}
 0x15c   : > { %12772 = dma.hbm_to_vmem [thread:$0]  (!%p14123_p12), %s14310_s4, 3072, %s1736_s6, [#allocation22], %s13731_s18, %s13731_s18, %s13732_s30  }
 0x15d   : > { %s13747_s0 = smov [#allocation26]   ;;  %s1802_s10 = sshll.u32 %s14047_s13, 4  ;;  %s14338_s10 = int_to_ptr.hbm [resolvable:$true] %s1802_s10 }
 0x15e   : > { %s1775_s22 = sshll.u32 %s13747_s0, 4  ;;  %s13444_s3 = sshra.s32 %s14324_s16, 4  ;;  %s1776_s22 = int_to_ptr.vmem [resolvable:$true] %s1775_s22  ;;  %s13445_s3 = int_to_ptr.hbm [resolvable:$true] %s13444_s3 }
 0x15f   : > { %s13446_s2 = scalar_lea.hbm %s13445_s3, 64  ;;  %s13451_s23 = scalar_lea.hbm %s15649_s11, 64 }
 0x160   : > { %p13447_p1 = scmp.ne.s32.totalorder %s13445_s3, %s13446_s2  ;;  %p13452_p4 = scmp.lt.s32.totalorder %s13445_s3, %s15649_s11 }
 0x161   : > { %p13453_p7 = scmp.lt.s32.totalorder %s13451_s23, %s13446_s2 }
 0x162   : > { %p13449_p2 = pnand %p13447_p1, %p14131_p0 }
 0x163   : > { %p13454_p8 = por %p13453_p7, %p13452_p4 }
 0x164   : > { %p13450_p3 = pneg %p13449_p2 }
 0x166   : > { %p13455_p11 = pnand %p13454_p8, %p13450_p3 }
 0x168   : > { %13458 = shalt.err (!%p13455_p11)
}
 0x169   : > { %12778 = dma.hbm_to_vmem [thread:$0]  (!%p14123_p12), %s14324_s16, 1024, %s1776_s22, [#allocation25], %s13731_s18, %s13731_s18, %s13732_s30  }
 0x16a   : > { %s1817_s6 = sshll.u32 %s14052_s17, 4  ;;  %s13748_s4 = smov [#allocation29]   ;;  %s14352_s6 = int_to_ptr.hbm [resolvable:$true] %s1817_s6 }
 0x16b   : > { %s1804_s0 = sshll.u32 %s13748_s4, 4  ;;  %s13474_s3 = sshra.s32 %s14338_s10, 4  ;;  %s1805_s0 = int_to_ptr.vmem [resolvable:$true] %s1804_s0  ;;  %s13475_s3 = int_to_ptr.hbm [resolvable:$true] %s13474_s3 }
 0x16c   : > { %s13476_s2 = scalar_lea.hbm %s13475_s3, 64  ;;  %s13481_s23 = scalar_lea.hbm %s14047_s13, 64 }
 0x16d   : > { %p13477_p13 = scmp.ne.s32.totalorder %s13475_s3, %s13476_s2  ;;  %p13482_p3 = scmp.lt.s32.totalorder %s13475_s3, %s14047_s13 }
 0x16e   : > { %p13483_p4 = scmp.lt.s32.totalorder %s13481_s23, %s13476_s2 }
 0x16f   : > { %p13479_p1 = pnand %p13477_p13, %p14131_p0 }
 0x170   : > { %p13484_p7 = por %p13483_p4, %p13482_p3 }
 0x171   : > { %p13480_p2 = pneg %p13479_p1 }
 0x173   : > { %p13485_p8 = pnand %p13484_p7, %p13480_p2 }
 0x175   : > { %13488 = shalt.err (!%p13485_p8)
}
 0x176   : > { %12784 = dma.hbm_to_vmem [thread:$0]  (!%p14123_p12), %s14338_s10, 1024, %s1805_s0, [#allocation28], %s13731_s18, %s13731_s18, %s13732_s30  }
 0x177   : > { %s13749_s16 = smov [#allocation30]   ;;  %s13504_s4 = sshra.s32 %s14352_s6, 4  ;;  %s13505_s4 = int_to_ptr.hbm [resolvable:$true] %s13504_s4 }
 0x178   : > { %s1819_s22 = sshll.u32 %s13749_s16, 4  ;;  %s13506_s3 = scalar_lea.hbm %s13505_s4, 1  ;;  %s1820_s22 = int_to_ptr.vmem [resolvable:$true] %s1819_s22 }
 0x179   : > { %p13507_p11 = scmp.ne.s32.totalorder %s13505_s4, %s13506_s3  ;;  %s13511_s2 = scalar_lea.hbm %s14052_s17, 1 }
 0x17a   : > { %p13512_p2 = scmp.lt.s32.totalorder %s13505_s4, %s14052_s17  ;;  %p13513_p3 = scmp.lt.s32.totalorder %s13511_s2, %s13506_s3 }
 0x17b   : > { %p13509_p13 = pnand %p13507_p11, %p14131_p0 }
 0x17c   : > { %p13514_p4 = por %p13513_p3, %p13512_p2 }
 0x17d   : > { %p13510_p1 = pneg %p13509_p13 }
 0x17f   : > { %p13515_p7 = pnand %p13514_p4, %p13510_p1 }
 0x181   : > { %13518 = shalt.err (!%p13515_p7)
}
 0x182   : > { %12787 = dma.hbm_to_vmem [thread:$0]  (!%p14123_p12), %s14352_s6, 16, %s1820_s22, [#allocation31]  }
 0x183   : > { %1840 = sbr.rel (%p14113_p10) target bundleno = 3021 (0xbcd), region = 256 }
 0x188   : > { %13607 = dma.done.wait (%p12795_p9), [#allocation4], 7168  }
 0x189   : > { %13609 = vsyncadd (%p12795_p9), [#allocation4], 4294960128 }
 0x18a   : > { %13611 = dma.done.wait (%p12795_p9), [#allocation7], 14336  }
 0x18b   : > { %13613 = vsyncadd (%p12795_p9), [#allocation7], 4294952960 }
 0x18c   : > { %13615 = dma.done.wait (%p12795_p9), [#allocation10], 14336  }
 0x18d   : > { %13617 = vsyncadd (%p12795_p9), [#allocation10], 4294952960 }
 0x18e   : > { %13619 = dma.done.wait (%p12795_p9), [#allocation13], 8192  }
 0x18f   : > { %13621 = vsyncadd (%p12795_p9), [#allocation13], 4294959104 }
 0x190   : > { %13623 = dma.done.wait (%p12795_p9), [#allocation16], 6144  }
 0x191   : > { %13625 = vsyncadd (%p12795_p9), [#allocation16], 4294961152 }
 0x192   : > { %13627 = dma.done.wait (%p12795_p9), [#allocation19], 6144  }
 0x193   : > { %13629 = vsyncadd (%p12795_p9), [#allocation19], 4294961152 }
 0x194   : > { %13631 = dma.done.wait (%p12795_p9), [#allocation22], 4096  }
 0x195   : > { %13633 = vsyncadd (%p12795_p9), [#allocation22], 4294963200 }
 0x196   : > { %13635 = dma.done.wait (%p12795_p9), [#allocation25], 4096  }
 0x197   : > { %13637 = vsyncadd (%p12795_p9), [#allocation25], 4294963200 }
 0x198   : > { %13639 = dma.done.wait (%p12795_p9), [#allocation28], 1040  }
 0x199   : > { %13641 = vsyncadd (%p12795_p9), [#allocation28], 4294966256 }
 0x19a   : > { %13643 = dma.done.wait (%p12795_p9), [#allocation31], 16  }
 0x19b   : > { %13645 = vsyncadd (%p12795_p9), [#allocation31], 4294967280  ;;  %s15650_s30 = sld [smem:[#allocation47_spill]]  ;;  %p2069_p10 = scmp.lt.s32.totalorder %s14085_s7, 1  ;;  %v13750_v0 = vmov 0   ;;  %v12125_v4 = vld [vmem:[#allocation3 + $0x38] sm:$0xff] }
 0x19c   : > { %12949 = vset.pattern.permute.xlu1 %v13750_v0  ;;  %12948 = vset.pattern.permute.xlu0 %v13750_v0  ;;  %v12133_v5 = vld [vmem:[#allocation3 + $0x78] sm:$0xff]  ;;  %v12132_v12 = vld [vmem:[#allocation3 + $0x70] sm:$0xff]  ;;  %v12131_v13 = vld [vmem:[#allocation3 + $0x68] sm:$0xff]  ;;  %s15651_s18 = sld [smem:[#allocation48_spill]]  ;;  %v13751_v20 = vmov 0.0  }
 0x19d   : > { %s2070_s28 = scalar_select %p2069_p10, %s14085_s7, 1  ;;  %12950 = vset.pattern.permute.xlu2 %v13750_v0  ;;  %v12141_v6 = vld [vmem:[#allocation3 + $0xb8] sm:$0xff]  ;;  %2716 = vmatpush.bf16.msra.mxu0 %v12125_v4  ;;  %v12124_v14 = vld [vmem:[#allocation3 + $0x30] sm:$0xff]  ;;  %v12123_v16 = vld [vmem:[#allocation3 + $0x28] sm:$0xff]  ;;  %2174 = vst [vmem:[#allocation2 + $0x7] sm:$0x1] %v13751_v20 }
 0x19e   : > { %2745 = vmatpush.bf16.msra.mxu1 %v12133_v5  ;;  %2774 = vmatpush.bf16.msra.mxu2 %v12141_v6  ;;  %v12140_v15 = vld [vmem:[#allocation3 + $0xb0] sm:$0xff]  ;;  %v12139_v17 = vld [vmem:[#allocation3 + $0xa8] sm:$0xff]  ;;  %v14418_v18 = vld [vmem:[#allocation3 + $0xf8] sm:$0xff]  ;;  %s15652_s10 = sld [smem:[#allocation49_spill]]  ;;  %2175 = vst [vmem:[#allocation2 + $0x48] sm:$0x1] %v13751_v20 }
 0x19f   : > { %s12117_s26 = sshll.u32 %s2070_s28, 6  ;;  %v12130_v19 = vld [vmem:[#allocation3 + $0x60] sm:$0xff]  ;;  %12647 = vmatpush.bf16.msra.mxu3 %v14418_v18  ;;  %s15653_s6 = sld [smem:[#allocation50_spill]]  ;;  %v12129_v22 = vld [vmem:[#allocation3 + $0x58] sm:$0xff]  ;;  %v14426_v26 = vld [vmem:[#allocation3 + $0xf0] sm:$0xff] }
 0x1a0   : > { %s15654_s0 = sld [smem:[#allocation73_spill]]  ;;  %v12122_v24 = vld [vmem:[#allocation3 + $0x20] sm:$0xff]  ;;  %v12128_v29 = vld [vmem:[#allocation3 + $0x50] sm:$0xff]  ;;  %v12121_v33 = vld [vmem:[#allocation3 + $0x18] sm:$0xff] }
 0x1a1   : > { %s2073_s15 = scalar_lea.vmem %s15650_s30, %s12117_s26  ;;  %2717 = vmatpush.bf16.msra.mxu0 %v12124_v14  ;;  %s15656_s16 = sld [smem:[#allocation74_spill]]  ;;  %v12138_v25 = vld [vmem:[#allocation3 + $0xa0] sm:$0xff]  ;;  %v12137_v34 = vld [vmem:[#allocation3 + $0x98] sm:$0xff]  ;;  %v14440_v35 = vld [vmem:[#allocation3 + $0xe8] sm:$0xff] }
 0x1a2   : > { %v2076_v1 = vld [vmem:[%s2073_s15 + $0x10] sm:$0xff]  ;;  %v2074_v2 = vld [vmem:[%s2073_s15] sm:$0xff]  ;;  %v2077_v7 = vld [vmem:[%s2073_s15 + $0x18] sm:$0xff]  ;;  %2746 = vmatpush.bf16.msra.mxu1 %v12132_v12  ;;  %2775 = vmatpush.bf16.msra.mxu2 %v12140_v15  ;;  %s15657_s22 = sld [smem:[#allocation75_spill]] }
 0x1a3   : > { %2095 = vperm.xlu1 %12949, %v2076_v1   ;;  %2085 = vperm.xlu0 %12948, %v2074_v2   ;;  %v2078_v3 = vld [vmem:[%s2073_s15 + $0x20] sm:$0xff]  ;;  %v2075_v8 = vld [vmem:[%s2073_s15 + $0x8] sm:$0xff]  ;;  %v2081_v10 = vld [vmem:[%s2073_s15 + $0x38] sm:$0xff]  ;;  %s15658_s4 = sld [smem:[#allocation51_spill]] }
 0x1a4   : > { %2105 = vperm.xlu2 %12950, %v2078_v3   ;;  %v2079_v9 = vld [vmem:[%s2073_s15 + $0x28] sm:$0xff]  ;;  %v2080_v11 = vld [vmem:[%s2073_s15 + $0x30] sm:$0xff]  ;;  %v14424_v23 = vld [vmem:[%s15651_s18] ss:$0 sm:$0xff]  ;;  %12648 = vmatpush.bf16.msra.mxu3 %v14426_v26  ;;  %s15659_s3 = sld [smem:[#allocation52_spill]] }
 0x1a5   : > { %2718 = vmatpush.bf16.msra.mxu0 %v12123_v16  ;;  %v14429_v27 = vld [vmem:[%s15652_s10] ss:$0 sm:$0xff]  ;;  %v12127_v39 = vld [vmem:[#allocation3 + $0x48] sm:$0xff]  ;;  %v14453_v47 = vld [vmem:[#allocation3 + $0xe0] sm:$0xff]  ;;  %s15660_s2 = sld [smem:[#allocation54_spill]] }
 0x1a6   : > { %2747 = vmatpush.bf16.msra.mxu1 %v12131_v13  ;;  %2776 = vmatpush.bf16.msra.mxu2 %v12139_v17  ;;  %s15655_s23 = smov %s15654_s0  ;;  %v14433_v30 = vld [vmem:[%s15653_s6] ss:$0 sm:$0xff]  ;;  %v12126_v51 = vld [vmem:[#allocation3 + $0x40] sm:$0xff]  ;;  %v12119_v53 = vld [vmem:[#allocation3 + $0x8] sm:$0xff]  ;;  %s15661_s30 = sld [smem:[#allocation55_spill]] }
 0x1a7   : > { %v14436_v31 = vld [vmem:[%s15654_s0] ss:$0 sm:$0xff]  ;;  %v12135_v54 = vld [vmem:[#allocation3 + $0x88] sm:$0xff]  ;;  %v14464_v55 = vld [vmem:[#allocation3 + $0xd8] sm:$0xff]  ;;  %s15662_s28 = sld [smem:[#allocation56_spill]] }
 0x1a8   : > { %v14443_v36 = vld [vmem:[%s15656_s16] ss:$0 sm:$0xff]  ;;  %12649 = vmatpush.bf16.msra.mxu3 %v14440_v35  ;;  %v12118_v58 = vld [vmem:[#allocation3] sm:$0xff]  ;;  %s15663_s26 = sld [smem:[#allocation57_spill]] }
 0x1a9   : > { %2719 = vmatpush.bf16.msra.mxu0 %v12122_v24  ;;  %v14448_v41 = vld [vmem:[%s15657_s22] ss:$0 sm:$0xff]  ;;  %v12134_v59 = vld [vmem:[#allocation3 + $0x80] sm:$0xff]  ;;  %s15664_s15 = sld [smem:[#allocation61_spill]] }
 0x1aa   : > { %2748 = vmatpush.bf16.msra.mxu1 %v12130_v19  ;;  %2777 = vmatpush.bf16.msra.mxu2 %v12138_v25  ;;  %v12120_v45 = vld [vmem:[#allocation3 + $0x10] sm:$0xff]  ;;  %v12142_v15 = vld [vmem:[#allocation3 + $0xc0] sm:$0xff]  ;;  %s15665_s18 = sld [smem:[#allocation59_spill]] }
 0x1ab   : > { %2100 = vperm.xlu1 %12949, %v2077_v7   ;;  %2090 = vperm.xlu0 %12948, %v2075_v8   ;;  %v12136_v46 = vld [vmem:[#allocation3 + $0x90] sm:$0xff]  ;;  %v14483_v8 = vld [vmem:[#allocation3 + $0xc8] sm:$0xff]  ;;  %s15666_s10 = sld [smem:[#allocation62_spill]] }
 0x1ac   : > { %2110 = vperm.xlu2 %12950, %v2079_v9   ;;  %12650 = vmatpush.bf16.msra.mxu3 %v14453_v47  ;;  %v14469_v60 = vld [vmem:[#allocation3 + $0xd0] sm:$0xff]  ;;  %s15667_s6 = sld [smem:[#allocation60_spill]] }
 0x1ad   : > { %2720 = vmatpush.bf16.msra.mxu0 %v12121_v33  ;;  %s15668_s0 = sld [smem:[#allocation63_spill]] }
 0x1ae   : > { %2749 = vmatpush.bf16.msra.mxu1 %v12129_v22  ;;  %2778 = vmatpush.bf16.msra.mxu2 %v12137_v34 }
 0x1b0   : > { %12651 = vmatpush.bf16.msra.mxu3 %v14464_v55 }
 0x1b1   : > { %2721 = vmatpush.bf16.msra.mxu0 %v12120_v45 }
 0x1b2   : > { %2750 = vmatpush.bf16.msra.mxu1 %v12128_v29  ;;  %2779 = vmatpush.bf16.msra.mxu2 %v12136_v46 }
 0x1b3   : > { %2120 = vperm.xlu1 %12949, %v2081_v10   ;;  %2115 = vperm.xlu0 %12948, %v2080_v11  }
 0x1b4   : > { %12652 = vmatpush.bf16.msra.mxu3 %v14469_v60 }
 0x1b5   : > { %2722 = vmatpush.bf16.msra.mxu0 %v12119_v53 }
 0x1b6   : > { %2751 = vmatpush.bf16.msra.mxu1 %v12127_v39  ;;  %2780 = vmatpush.bf16.msra.mxu2 %v12135_v54 }
 0x1b8   : > { %12653 = vmatpush.bf16.msra.mxu3 %v14483_v8 }
 0x1b9   : > { %2723 = vmatpush.bf16.msra.mxu0 %v12118_v58 }
 0x1ba   : > { %2752 = vmatpush.bf16.msra.mxu1 %v12126_v51  ;;  %2781 = vmatpush.bf16.msra.mxu2 %v12134_v59 }
 0x1bc   : > { %12654 = vmatpush.bf16.msra.mxu3 %v12142_v15 }
 0x1bd   : > { %2803 = vmatpush.bf16.msrb.mxu0 %v14418_v18 }
 0x1c1   : > { %2804 = vmatpush.bf16.msrb.mxu0 %v14426_v26 }
 0x1c5   : > { %2805 = vmatpush.bf16.msrb.mxu0 %v14440_v35 }
 0x1c9   : > { %2806 = vmatpush.bf16.msrb.mxu0 %v14453_v47 }
 0x1cd   : > { %2807 = vmatpush.bf16.msrb.mxu0 %v14464_v55 }
 0x1d1   : > { %2808 = vmatpush.bf16.msrb.mxu0 %v14469_v60  ;;  %v12165_v60 = vld [vmem:[#allocation3 + $0x178] sm:$0xff] }
 0x1d2   : > { %2861 = vmatpush.bf16.msrb.mxu1 %v12165_v60 }
 0x1d5   : > { %2809 = vmatpush.bf16.msrb.mxu0 %v14483_v8  ;;  %v12172_v8 = vld [vmem:[#allocation3 + $0x1b0] sm:$0xff] }
 0x1d9   : > { %2810 = vmatpush.bf16.msrb.mxu0 %v12142_v15  ;;  %v12171_v15 = vld [vmem:[#allocation3 + $0x1a8] sm:$0xff] }
 0x1fe   : > { %v2106_v21 = vpop.permute.xlu2 %2105 }
 0x1ff   : > { %v2130_v28 = vmul.f32 %v14424_v23, %v2106_v21  ;;  %v6980_v38 = vmul.f32 %v14436_v31, %v2106_v21 }
 0x201   : > { %v2142_v32 = vmul.f32 %v14429_v27, %v2130_v28  ;;  %v6992_v43 = vmul.f32 %v14443_v36, %v6980_v38 }
 0x203   : > { %v2154_v37 = vadd.f32 %v14433_v30, %v2142_v32  ;;  %v14458_v49 = vadd.f32 %v14448_v41, %v6992_v43 }
 0x205   : > { %v2162_v42 = vmul.f32 0.01, %v2154_v37 }
 0x206   : > { %v2111_v40 = vpop.permute.xlu2 %2110 }
 0x207   : > { %v2131_v44 = vmul.f32 %v14424_v23, %v2111_v40  ;;  %v14455_v48 = vmax.f32 %v2154_v37, %v2162_v42  ;;  %v6981_v3 = vmul.f32 %v14436_v31, %v2111_v40 }
 0x209   : > { %v2143_v50 = vmul.f32 %v14429_v27, %v2131_v44  ;;  %2180 = vst [vmem:[#allocation2 + $0x28] sm:$0xff] %v14455_v48  ;;  %v6993_v9 = vmul.f32 %v14443_v36, %v6981_v3 }
 0x20b   : > { %v2155_v52 = vadd.f32 %v14433_v30, %v2143_v50  ;;  %v14495_v14 = vadd.f32 %v14448_v41, %v6993_v9 }
 0x20d   : > { %v2163_v56 = vmul.f32 0.01, %v2155_v52 }
 0x20f   : > { %v14466_v57 = vmax.f32 %v2155_v52, %v2163_v56 }
 0x211   : > { %2181 = vst [vmem:[#allocation2 + $0x30] sm:$0xff] %v14466_v57 }
 0x215   : > { %v2096_v61 = vpop.permute.xlu1 %2095  ;;  %v2086_v62 = vpop.permute.xlu0 %2085 }
 0x216   : > { %v2128_v63 = vmul.f32 %v14424_v23, %v2096_v61  ;;  %v6978_v0 = vmul.f32 %v14436_v31, %v2096_v61  ;;  %v2126_v1 = vmul.f32 %v14424_v23, %v2086_v62  ;;  %v6976_v2 = vmul.f32 %v14436_v31, %v2086_v62  ;;  %v12173_v62 = vld [vmem:[#allocation3 + $0x1b8] sm:$0xff] }
 0x217   : > { %2890 = vmatpush.bf16.msrb.mxu2 %v12173_v62  ;;  %v12157_v62 = vld [vmem:[#allocation3 + $0x138] sm:$0xff] }
 0x218   : > { %v2140_v4 = vmul.f32 %v14429_v27, %v2128_v63  ;;  %v6990_v5 = vmul.f32 %v14443_v36, %v6978_v0  ;;  %v2138_v6 = vmul.f32 %v14429_v27, %v2126_v1  ;;  %v6988_v7 = vmul.f32 %v14443_v36, %v6976_v2  ;;  %v2212_v2 = vld [vmem:[#allocation2 + $0x2a] sm:$0xff] }
 0x21a   : > { %v2152_v10 = vadd.f32 %v14433_v30, %v2140_v4  ;;  %v14488_v11 = vadd.f32 %v14448_v41, %v6990_v5  ;;  %v2150_v12 = vadd.f32 %v14433_v30, %v2138_v6  ;;  %v14492_v13 = vadd.f32 %v14448_v41, %v6988_v7  ;;  %v12164_v7 = vld [vmem:[#allocation3 + $0x170] sm:$0xff] }
 0x21b   : > { %2862 = vmatpush.bf16.msrb.mxu1 %v12164_v7  ;;  %2891 = vmatpush.bf16.msrb.mxu2 %v12172_v8  ;;  %v12153_v7 = vld [vmem:[#allocation3 + $0x118] sm:$0xff]  ;;  %v12152_v8 = vld [vmem:[#allocation3 + $0x110] sm:$0xff] }
 0x21c   : > { %v2160_v16 = vmul.f32 0.01, %v2152_v10  ;;  %v2158_v17 = vmul.f32 0.01, %v2150_v12 }
 0x21d   : > { %v2101_v18 = vpop.permute.xlu1 %2100  ;;  %v2091_v19 = vpop.permute.xlu0 %2090 }
 0x21e   : > { %v14499_v21 = vmax.f32 %v2152_v10, %v2160_v16  ;;  %v14501_v22 = vmax.f32 %v2150_v12, %v2158_v17  ;;  %v2129_v24 = vmul.f32 %v14424_v23, %v2101_v18  ;;  %v6979_v25 = vmul.f32 %v14436_v31, %v2101_v18  ;;  %v12163_v12 = vld [vmem:[#allocation3 + $0x168] sm:$0xff] }
 0x21f   : > { %v2127_v28 = vmul.f32 %v14424_v23, %v2091_v19  ;;  %v6977_v29 = vmul.f32 %v14436_v31, %v2091_v19  ;;  %2863 = vmatpush.bf16.msrb.mxu1 %v12163_v12  ;;  %2892 = vmatpush.bf16.msrb.mxu2 %v12171_v15  ;;  %v12151_v12 = vld [vmem:[#allocation3 + $0x108] sm:$0xff]  ;;  %v12150_v15 = vld [vmem:[#allocation3 + $0x100] sm:$0xff] }
 0x220   : > { %2178 = vst [vmem:[#allocation2 + $0x18] sm:$0xff] %v14499_v21  ;;  %v2141_v32 = vmul.f32 %v14429_v27, %v2129_v24  ;;  %v6991_v26 = vmul.f32 %v14443_v36, %v6979_v25 }
 0x221   : > { %2176 = vst [vmem:[#allocation2 + $0x8] sm:$0xff] %v14501_v22  ;;  %v2139_v33 = vmul.f32 %v14429_v27, %v2127_v28  ;;  %v6989_v34 = vmul.f32 %v14443_v36, %v6977_v29  ;;  %v12162_v29 = vld [vmem:[#allocation3 + $0x160] sm:$0xff] }
 0x222   : > { %v2153_v37 = vadd.f32 %v14433_v30, %v2141_v32  ;;  %v14516_v38 = vadd.f32 %v14448_v41, %v6991_v26  ;;  %v12170_v26 = vld [vmem:[#allocation3 + $0x1a0] sm:$0xff] }
 0x223   : > { %v2151_v39 = vadd.f32 %v14433_v30, %v2139_v33  ;;  %v14520_v40 = vadd.f32 %v14448_v41, %v6989_v34  ;;  %2864 = vmatpush.bf16.msrb.mxu1 %v12162_v29  ;;  %v12161_v34 = vld [vmem:[#allocation3 + $0x158] sm:$0xff]  ;;  %2893 = vmatpush.bf16.msrb.mxu2 %v12170_v26 }
 0x224   : > { %v2161_v42 = vmul.f32 0.01, %v2153_v37 }
 0x225   : > { %v2159_v35 = vmul.f32 0.01, %v2151_v39  ;;  %v14523_v43 = vpop.permute.xlu1 %2120  ;;  %v2116_v44 = vpop.permute.xlu0 %2115 }
 0x226   : > { %v14525_v45 = vmax.f32 %v2153_v37, %v2161_v42  ;;  %v2133_v46 = vmul.f32 %v14424_v23, %v14523_v43  ;;  %v2132_v50 = vmul.f32 %v14424_v23, %v2116_v44  ;;  %v6982_v52 = vmul.f32 %v14436_v31, %v2116_v44  ;;  %v12160_v44 = vld [vmem:[#allocation3 + $0x150] sm:$0xff] }
 0x227   : > { %v14530_v51 = vmax.f32 %v2151_v39, %v2159_v35  ;;  %v12169_v39 = vld [vmem:[#allocation3 + $0x198] sm:$0xff]  ;;  %v2255_v42 = vpack.c.bf16 %v14466_v57, %v14455_v48  ;;  %2865 = vmatpush.bf16.msrb.mxu1 %v12161_v34 }
 0x228   : > { %v2184_v53 = vld [vmem:[#allocation2 + $0x7] sm:$0xff]  ;;  %2179 = vst [vmem:[#allocation2 + $0x20] sm:$0xff] %v14525_v45  ;;  %v2145_v47 = vmul.f32 %v14429_v27, %v2133_v46  ;;  %v2144_v54 = vmul.f32 %v14429_v27, %v2132_v50  ;;  %v6994_v56 = vmul.f32 %v14443_v36, %v6982_v52  ;;  %v2248_v5 = vpack.c.bf16 %v14525_v45, %v14499_v21  ;;  %v12159_v50 = vld [vmem:[#allocation3 + $0x148] sm:$0xff] }
 0x229   : > { %2959 = vst [vmem:[#allocation2 + $0x7] sm:$0x1] %v13751_v20  ;;  %v2241_v58 = vpack.c.bf16 %v14530_v51, %v14501_v22  ;;  %2894 = vmatpush.bf16.msrb.mxu2 %v12169_v39  ;;  %v12168_v46 = vld [vmem:[#allocation3 + $0x190] sm:$0xff]  ;;  %v12167_v52 = vld [vmem:[#allocation3 + $0x188] sm:$0xff] }
 0x22a   : > { %2177 = vst [vmem:[#allocation2 + $0x10] sm:$0xff] %v14530_v51  ;;  %v2157_v23 = vadd.f32 %v14433_v30, %v2145_v47  ;;  %v2156_v31 = vadd.f32 %v14433_v30, %v2144_v54  ;;  %v14545_v59 = vadd.f32 %v14448_v41, %v6994_v56  ;;  %v2189_v47 = vld [vmem:[#allocation2 + $0x2f] sm:$0xff] }
 0x22b   : > { %2753 = vmatmul.bf16.vlgmr.msra.gmra.mxu1 %v2241_v58  ;;  %v2204_v54 = vld [vmem:[#allocation2 + $0x29] sm:$0xff] }
 0x22c   : > { %v2165_v27 = vmul.f32 0.01, %v2157_v23  ;;  %v2164_v61 = vmul.f32 0.01, %v2156_v31  ;;  %2866 = vmatpush.bf16.msrb.mxu1 %v12160_v44  ;;  %v12158_v58 = vld [vmem:[#allocation3 + $0x140] sm:$0xff] }
 0x22d   : > { %2895 = vmatpush.bf16.msrb.mxu2 %v12168_v46  ;;  %v2228_v46 = vld [vmem:[#allocation2 + $0x2c] sm:$0xff] }
 0x22e   : > { %v2173_v36 = vmax.f32 %v2157_v23, %v2165_v27  ;;  %v14548_v63 = vmax.f32 %v2156_v31, %v2164_v61  ;;  %v12166_v31 = vld [vmem:[#allocation3 + $0x180] sm:$0xff] }
 0x22f   : > { %v2187_v19 = vld [vmem:[#allocation2 + $0x1f] sm:$0xff] }
 0x230   : > { %2183 = vst [vmem:[#allocation2 + $0x40] sm:$0xff] %v2173_v36  ;;  %v2202_v25 = vld [vmem:[#allocation2 + $0x19] sm:$0xff]  ;;  %v2203_v28 = vld [vmem:[#allocation2 + $0x21] sm:$0xff]  ;;  %2867 = vmatpush.bf16.msrb.mxu1 %v12159_v50 }
 0x231   : > { %2182 = vst [vmem:[#allocation2 + $0x38] sm:$0xff] %v14548_v63  ;;  %v2185_v55 = vld [vmem:[#allocation2 + $0xf] sm:$0xff]  ;;  %v2186_v24 = vld [vmem:[#allocation2 + $0x17] sm:$0xff]  ;;  %v2249_v33 = vpack.c.bf16 %v2203_v28, %v2202_v25  ;;  %2896 = vmatpush.bf16.msrb.mxu2 %v12167_v52  ;;  %v12156_v36 = vld [vmem:[#allocation3 + $0x130] sm:$0xff] }
 0x232   : > { %v2200_v30 = vld [vmem:[#allocation2 + $0x9] sm:$0xff]  ;;  %v2201_v0 = vld [vmem:[#allocation2 + $0x11] sm:$0xff]  ;;  %v2240_v41 = vpack.c.bf16 %v2185_v55, %v2184_v53  ;;  %v2247_v32 = vpack.c.bf16 %v2187_v19, %v2186_v24  ;;  %v2210_v34 = vld [vmem:[#allocation2 + $0x1a] sm:$0xff] }
 0x233   : > { %v2242_v1 = vpack.c.bf16 %v2201_v0, %v2200_v30  ;;  %v2188_v53 = vld [vmem:[#allocation2 + $0x27] sm:$0xff]  ;;  %v12155_v30 = vld [vmem:[#allocation3 + $0x128] sm:$0xff]  ;;  %v12154_v0 = vld [vmem:[#allocation3 + $0x120] sm:$0xff] }
 0x234   : > { %2724 = vmatmul.bf16.vlgmr.msra.gmra.mxu0 %v2240_v41  ;;  %v2254_v23 = vpack.c.bf16 %v2189_v47, %v2188_v53  ;;  %2868 = vmatpush.bf16.msrb.mxu1 %v12158_v58  ;;  %v2208_v19 = vld [vmem:[#allocation2 + $0xa] sm:$0xff]  ;;  %v2209_v24 = vld [vmem:[#allocation2 + $0x12] sm:$0xff]  ;;  %v2234_v39 = vld [vmem:[#allocation2 + $0x1d] sm:$0xff] }
 0x235   : > { %2782 = vmatmul.bf16.vlgmr.msra.gmra.mxu2 %v2242_v1  ;;  %2832 = vmatpush.bf16.msra.mxu0 %v12157_v62  ;;  %v2232_v25 = vld [vmem:[#allocation2 + $0xd] sm:$0xff]  ;;  %v2233_v28 = vld [vmem:[#allocation2 + $0x15] sm:$0xff]  ;;  %v2243_v29 = vpack.c.bf16 %v2209_v24, %v2208_v19  ;;  %v2227_v26 = vld [vmem:[#allocation2 + $0x24] sm:$0xff] }
 0x236   : > { %2897 = vmatpush.bf16.msrb.mxu2 %v12166_v31  ;;  %v2216_v53 = vld [vmem:[#allocation2 + $0xb] sm:$0xff]  ;;  %v2217_v47 = vld [vmem:[#allocation2 + $0x13] sm:$0xff]  ;;  %v2219_v62 = vld [vmem:[#allocation2 + $0x23] sm:$0xff] }
 0x237   : > { %v14552_v3 = vld [vmem:[#allocation2 + $0x45] sm:$0xf]  ;;  %v14559_v16 = vld [vmem:[#allocation2 + $0x41] sm:$0xf]  ;;  %v2244_v58 = vpack.c.bf16 %v2217_v47, %v2216_v53  ;;  %v12186_v53 = vld [vmem:[#allocation6 + $0x60] sm:$0xff] }
 0x238   : > { %7025 = vst [vmem:[#allocation2 + $0x48] sm:$0x1] %v13751_v20  ;;  %v2213_v4 = vld [vmem:[#allocation2 + $0x32] sm:$0xff]  ;;  %v2215_v9 = vld [vmem:[#allocation2 + $0x42] sm:$0xf]  ;;  %v2214_v37 = vld [vmem:[#allocation2 + $0x3a] sm:$0xff] }
 0x239   : > { %v2257_v6 = vpack.c.bf16 %v2213_v4, %v2212_v2  ;;  %v14557_v10 = vld [vmem:[#allocation2 + $0x3d] sm:$0xff]  ;;  %v2264_v35 = vpack.c.bf16 %v2215_v9, %v2214_v37  ;;  %v2205_v56 = vld [vmem:[#allocation2 + $0x31] sm:$0xff]  ;;  %2833 = vmatpush.bf16.msra.mxu0 %v12156_v36 }
 0x23a   : > { %v14561_v17 = vld [vmem:[#allocation2 + $0x44] sm:$0xf]  ;;  %v2256_v27 = vpack.c.bf16 %v2205_v56, %v2204_v54  ;;  %v2199_v61 = vld [vmem:[#allocation2 + $0x40] sm:$0xf]  ;;  %v2190_v41 = vld [vmem:[#allocation2 + $0x37] sm:$0xff] }
 0x23b   : > { %2758 = vmatmul.bf16.gmra.mxu1 %v2248_v5  ;;  %2821 = vmatmul.bf16.vlgmr.msra.gmra.mxu3 %v2257_v6  ;;  %v14563_v18 = vld [vmem:[#allocation2 + $0x43] sm:$0xf]  ;;  %v2262_v55 = vpack.c.bf16 %v2199_v61, %v14548_v63  ;;  %v2191_v1 = vld [vmem:[#allocation2 + $0x3f] sm:$0xf]  ;;  %v2224_v5 = vld [vmem:[#allocation2 + $0xc] sm:$0xff] }
 0x23c   : > { %2960 = vst [vmem:[#allocation2 + $0x44] sm:$0x1] %v13751_v20  ;;  %v2206_v2 = vld [vmem:[#allocation2 + $0x39] sm:$0xff]  ;;  %v2261_v60 = vpack.c.bf16 %v2191_v1, %v2190_v41  ;;  %v2211_v37 = vld [vmem:[#allocation2 + $0x22] sm:$0xff]  ;;  %v2236_v54 = vld [vmem:[#allocation2 + $0x2d] sm:$0xff] }
 0x23d   : > { %2834 = vmatpush.bf16.msra.mxu0 %v12155_v30  ;;  %v2263_v4 = vpack.c.bf16 %v14559_v16, %v2206_v2  ;;  %v2225_v6 = vld [vmem:[#allocation2 + $0x14] sm:$0xff]  ;;  %v2246_v16 = vpack.c.bf16 %v2233_v28, %v2232_v25  ;;  %v2230_v31 = vld [vmem:[#allocation2 + $0x3c] sm:$0xff]  ;;  %v2220_v30 = vld [vmem:[#allocation2 + $0x2b] sm:$0xff] }
 0x23e   : > { %v2245_v9 = vpack.c.bf16 %v2225_v6, %v2224_v5  ;;  %v2229_v50 = vld [vmem:[#allocation2 + $0x34] sm:$0xff]  ;;  %v12189_v25 = vld [vmem:[#allocation6 + $0x78] sm:$0xff]  ;;  %v12180_v47 = vld [vmem:[#allocation6 + $0x30] sm:$0xff] }
 0x23f   : > { %v2259_v52 = vpack.c.bf16 %v2229_v50, %v2228_v46  ;;  %v2237_v56 = vld [vmem:[#allocation2 + $0x35] sm:$0xff]  ;;  %v12197_v28 = vld [vmem:[#allocation6 + $0xb8] sm:$0xff] }
 0x240   : > { %v2218_v61 = vld [vmem:[#allocation2 + $0x1b] sm:$0xff]  ;;  %3550 = vmatpush.bf16.msra.mxu1 %v12197_v28  ;;  %v12181_v50 = vld [vmem:[#allocation6 + $0x38] sm:$0xff] }
 0x241   : > { %2835 = vmatpush.bf16.msra.mxu0 %v12154_v0  ;;  %v2251_v36 = vpack.c.bf16 %v2219_v62, %v2218_v61  ;;  %v2221_v0 = vld [vmem:[#allocation2 + $0x33] sm:$0xff]  ;;  %3494 = vmatpush.bf16.msrb.mxu3 %v12181_v50  ;;  %v12204_v62 = vld [vmem:[#allocation6 + $0xf0] sm:$0xff] }
 0x242   : > { %v2258_v1 = vpack.c.bf16 %v2221_v0, %v2220_v30  ;;  %v12178_v61 = vld [vmem:[#allocation6 + $0x20] sm:$0xff]  ;;  %v12177_v30 = vld [vmem:[#allocation6 + $0x18] sm:$0xff]  ;;  %v12203_v0 = vld [vmem:[#allocation6 + $0xe8] sm:$0xff] }
 0x243   : > { %v12176_v28 = vld [vmem:[#allocation6 + $0x10] sm:$0xff]  ;;  %v12175_v50 = vld [vmem:[#allocation6 + $0x8] sm:$0xff] }
 0x244   : > { %2729 = vmatmul.bf16.gmra.mxu0 %v2247_v32  ;;  %v2226_v32 = vld [vmem:[#allocation2 + $0x1c] sm:$0xff] }
 0x245   : > { %2787 = vmatmul.bf16.gmra.mxu2 %v2249_v33  ;;  %2836 = vmatpush.bf16.msra.mxu0 %v12153_v7  ;;  %v2252_v33 = vpack.c.bf16 %v2227_v26, %v2226_v32  ;;  %v12188_v32 = vld [vmem:[#allocation6 + $0x70] sm:$0xff] }
 0x246   : > { %v12196_v26 = vld [vmem:[#allocation6 + $0xb0] sm:$0xff]  ;;  %3495 = vmatpush.bf16.msrb.mxu3 %v12180_v47 }
 0x247   : > { %3551 = vmatpush.bf16.msra.mxu1 %v12196_v26  ;;  %v12193_v26 = vld [vmem:[#allocation6 + $0x98] sm:$0xff] }
 0x249   : > { %2837 = vmatpush.bf16.msra.mxu0 %v12152_v8 }
 0x24b   : > { %2763 = vmatmul.bf16.gmra.mxu1 %v2255_v42  ;;  %2826 = vmatmul.bf16.gmra.mxu3 %v2264_v35  ;;  %v2235_v42 = vld [vmem:[#allocation2 + $0x25] sm:$0xff]  ;;  %v2250_v35 = vpack.c.bf16 %v2211_v37, %v2210_v34 }
 0x24c   : > { %v2253_v44 = vpack.c.bf16 %v2235_v42, %v2234_v39  ;;  %v12187_v39 = vld [vmem:[#allocation6 + $0x68] sm:$0xff] }
 0x24d   : > { %2838 = vmatpush.bf16.msra.mxu0 %v12151_v12  ;;  %v12195_v42 = vld [vmem:[#allocation6 + $0xa8] sm:$0xff] }
 0x24e   : > { %3552 = vmatpush.bf16.msra.mxu1 %v12195_v42 }
 0x251   : > { %2839 = vmatpush.bf16.msra.mxu0 %v12150_v15 }
 0x254   : > { %2734 = vmatmul.bf16.gmra.mxu0 %v2254_v23  ;;  %v2260_v23 = vpack.c.bf16 %v2237_v56, %v2236_v54 }
 0x255   : > { %2792 = vmatmul.bf16.gmra.mxu2 %v2256_v27  ;;  %v2266_v27 = vpack.c.bf16 %v14561_v17, %v2230_v31  ;;  %v12205_v31 = vld [vmem:[#allocation6 + $0xf8] sm:$0xff] }
 0x256   : > { %3578 = vmatpush.bf16.msra.mxu2 %v12205_v31  ;;  %v12192_v31 = vld [vmem:[#allocation6 + $0x90] sm:$0xff] }
 0x25a   : > { %3579 = vmatpush.bf16.msra.mxu2 %v12204_v62 }
 0x25b   : > { %2768 = vmatmul.bf16.gmra.mxu1 %v2262_v55  ;;  %v2267_v55 = vpack.c.bf16 %v14552_v3, %v14557_v10 }
 0x25e   : > { %3580 = vmatpush.bf16.msra.mxu2 %v12203_v0 }
 0x264   : > { %2739 = vmatmul.bf16.gmra.mxu0 %v2261_v60 }
 0x265   : > { %2797 = vmatmul.bf16.gmra.mxu2 %v2263_v4  ;;  %v2222_v4 = vld [vmem:[#allocation2 + $0x3b] sm:$0xff] }
 0x266   : > { %v2265_v10 = vpack.c.bf16 %v14563_v18, %v2222_v4 }
 0x26b   : > { %2869 = vmatmul.bf16.vlgmr.msrb.gmra.mxu1 %v2245_v9 }
 0x274   : > { %2811 = vmatmul.bf16.vlgmr.msrb.gmra.mxu0 %v2243_v29 }
 0x275   : > { %2898 = vmatmul.bf16.vlgmr.msrb.gmra.mxu2 %v2246_v16  ;;  %3522 = vmatpush.bf16.msrb.mxu0 %v12189_v25 }
 0x279   : > { %3523 = vmatpush.bf16.msrb.mxu0 %v12188_v32  ;;  %v12202_v32 = vld [vmem:[#allocation6 + $0xe0] sm:$0xff] }
 0x27a   : > { %3581 = vmatpush.bf16.msra.mxu2 %v12202_v32  ;;  %v14638_v32 = vld [vmem:[%s15659_s3] ss:$0 sm:$0xff]  ;;  %s15670_s3 = sld [smem:[#allocation65_spill]] }
 0x27b   : > { %2874 = vmatmul.bf16.gmra.mxu1 %v2252_v33 }
 0x27d   : > { %3524 = vmatpush.bf16.msrb.mxu0 %v12187_v39  ;;  %v12182_v39 = vld [vmem:[#allocation6 + $0x40] sm:$0xff] }
 0x281   : > { %3525 = vmatpush.bf16.msrb.mxu0 %v12186_v53  ;;  %v12201_v53 = vld [vmem:[#allocation6 + $0xd8] sm:$0xff] }
 0x282   : > { %3582 = vmatpush.bf16.msra.mxu2 %v12201_v53 }
 0x284   : > { %2816 = vmatmul.bf16.gmra.mxu0 %v2250_v35 }
 0x285   : > { %2903 = vmatmul.bf16.gmra.mxu2 %v2253_v44 }
 0x28b   : > { %2879 = vmatmul.bf16.gmra.mxu1 %v2259_v52 }
 0x294   : > { %2840 = vmatmul.bf16.vlgmr.msra.gmra.mxu0 %v2244_v58  ;;  %v12179_v58 = vld [vmem:[#allocation6 + $0x28] sm:$0xff] }
 0x295   : > { %2908 = vmatmul.bf16.gmra.mxu2 %v2260_v23  ;;  %v12185_v23 = vld [vmem:[#allocation6 + $0x58] sm:$0xff]  ;;  %3496 = vmatpush.bf16.msrb.mxu3 %v12179_v58 }
 0x296   : > { %3526 = vmatpush.bf16.msrb.mxu0 %v12185_v23 }
 0x299   : > { %3497 = vmatpush.bf16.msrb.mxu3 %v12178_v61 }
 0x29b   : > { %2884 = vmatmul.bf16.gmra.mxu1 %v2266_v27 }
 0x29d   : > { %3498 = vmatpush.bf16.msrb.mxu3 %v12177_v30  ;;  %v12200_v30 = vld [vmem:[#allocation6 + $0xd0] sm:$0xff] }
 0x29e   : > { %3583 = vmatpush.bf16.msra.mxu2 %v12200_v30 }
 0x2a1   : > { %3499 = vmatpush.bf16.msrb.mxu3 %v12176_v28 }
 0x2a4   : > { %2845 = vmatmul.bf16.gmra.mxu0 %v2251_v36  ;;  %v12184_v36 = vld [vmem:[#allocation6 + $0x50] sm:$0xff] }
 0x2a5   : > { %2913 = vmatmul.bf16.gmra.mxu2 %v2267_v55  ;;  %3527 = vmatpush.bf16.msrb.mxu0 %v12184_v36  ;;  %v12174_v36 = vld [vmem:[#allocation6] sm:$0xff] }
 0x2a6   : > { %3500 = vmatpush.bf16.msrb.mxu3 %v12175_v50 }
 0x2a8   : > { %v14575_v2 = vpop.f32.mrf.mxu1 }
 0x2aa   : > { %3501 = vmatpush.bf16.msrb.mxu3 %v12174_v36 }
 0x2b0   : > { %v14581_v5 = vpop.f32.mrf.mxu1 }
 0x2b1   : > { %v14573_v41 = vpop.f32.mrf.mxu0 }
 0x2b2   : > { %v2755_v42 = vadd.f32 %v14575_v2, %v14573_v41 }
 0x2b4   : > { %2850 = vmatmul.bf16.gmra.mxu0 %v2258_v1  ;;  %v12183_v1 = vld [vmem:[#allocation6 + $0x48] sm:$0xff] }
 0x2b5   : > { %3528 = vmatpush.bf16.msrb.mxu0 %v12183_v1  ;;  %v12191_v1 = vld [vmem:[#allocation6 + $0x88] sm:$0xff] }
 0x2b8   : > { %v14577_v60 = vpop.f32.mrf.mxu2  ;;  %v14588_v7 = vpop.f32.mrf.mxu1 }
 0x2b9   : > { %v14579_v17 = vpop.f32.mrf.mxu0  ;;  %3529 = vmatpush.bf16.msrb.mxu0 %v12182_v39  ;;  %v2784_v47 = vadd.f32 %v14577_v60, %v2755_v42  ;;  %v14634_v60 = vld [vmem:[%s15658_s4] ss:$0 sm:$0xff]  ;;  %s15669_s4 = sld [smem:[#allocation64_spill]] }
 0x2ba   : > { %v2757_v41 = vadd.f32 %v14581_v5, %v14579_v17  ;;  %v12190_v17 = vld [vmem:[#allocation6 + $0x80] sm:$0xff] }
 0x2bb   : > { %v12198_v5 = vld [vmem:[#allocation6 + $0xc0] sm:$0xff] }
 0x2c0   : > { %v14583_v6 = vpop.f32.mrf.mxu2  ;;  %v14596_v15 = vpop.f32.mrf.mxu1 }
 0x2c1   : > { %v14585_v3 = vpop.f32.mrf.mxu0 }
 0x2c4   : > { %2855 = vmatmul.bf16.gmra.mxu0 %v2265_v10  ;;  %v12194_v10 = vld [vmem:[#allocation6 + $0xa0] sm:$0xff] }
 0x2c5   : > { %3553 = vmatpush.bf16.msra.mxu1 %v12194_v10  ;;  %v12199_v10 = vld [vmem:[#allocation6 + $0xc8] sm:$0xff] }
 0x2c6   : > { %3584 = vmatpush.bf16.msra.mxu2 %v12199_v10 }
 0x2c8   : > { %v14592_v9 = vpop.f32.mrf.mxu2  ;;  %v14602_v18 = vpop.f32.mrf.mxu1 }
 0x2c9   : > { %v14590_v8 = vpop.f32.mrf.mxu0  ;;  %3554 = vmatpush.bf16.msra.mxu1 %v12193_v26 }
 0x2ca   : > { %3585 = vmatpush.bf16.msra.mxu2 %v12198_v5  ;;  %v12212_v5 = vld [vmem:[#allocation6 + $0x130] sm:$0xff] }
 0x2cd   : > { %3555 = vmatpush.bf16.msra.mxu1 %v12192_v31 }
 0x2d0   : > { %v14598_v19 = vpop.f32.mrf.mxu2  ;;  %v14608_v33 = vpop.f32.mrf.mxu1 }
 0x2d1   : > { %v14594_v12 = vpop.f32.mrf.mxu0  ;;  %3556 = vmatpush.bf16.msra.mxu1 %v12191_v1 }
 0x2d5   : > { %3557 = vmatpush.bf16.msra.mxu1 %v12190_v17 }
 0x2d8   : > { %v14604_v29 = vpop.f32.mrf.mxu2  ;;  %v14614_v35 = vpop.f32.mrf.mxu1 }
 0x2d9   : > { %v14600_v24 = vpop.f32.mrf.mxu0 }
 0x2e0   : > { %v14610_v34 = vpop.f32.mrf.mxu2  ;;  %v14620_v54 = vpop.f32.mrf.mxu1 }
 0x2e1   : > { %v14606_v16 = vpop.f32.mrf.mxu0 }
 0x2e8   : > { %v14616_v46 = vpop.f32.mrf.mxu2  ;;  %v2870_v55 = vpop.f32.mrf.mxu1 }
 0x2e9   : > { %v14612_v37 = vpop.f32.mrf.mxu0 }
 0x2f0   : > { %v14622_v56 = vpop.f32.mrf.mxu2  ;;  %v2872_v58 = vpop.f32.mrf.mxu1 }
 0x2f1   : > { %v2812_v44 = vpop.f32.mrf.mxu0 }
 0x2f2   : > { %v2813_v23 = vadd.f32 %v2812_v44, %v2784_v47  ;;  %v2786_v44 = vadd.f32 %v14583_v6, %v2757_v41  ;;  %v2760_v6 = vadd.f32 %v14588_v7, %v14585_v3  ;;  %v2762_v3 = vadd.f32 %v14596_v15, %v14590_v8 }
 0x2f3   : > { %v2765_v15 = vadd.f32 %v14602_v18, %v14594_v12  ;;  %v2767_v18 = vadd.f32 %v14608_v33, %v14600_v24 }
 0x2f8   : > { %v2899_v4 = vpop.f32.mrf.mxu2  ;;  %v2875_v42 = vpop.f32.mrf.mxu1 }
 0x2f9   : > { %v14618_v52 = vpop.f32.mrf.mxu0 }
 0x2fa   : > { %v2815_v26 = vadd.f32 %v14618_v52, %v2786_v44  ;;  %v2789_v52 = vadd.f32 %v14592_v9, %v2760_v6 }
 0x300   : > { %v2901_v61 = vpop.f32.mrf.mxu2  ;;  %v2877_v10 = vpop.f32.mrf.mxu1 }
 0x301   : > { %v14624_v27 = vpop.f32.mrf.mxu0 }
 0x302   : > { %v2818_v36 = vadd.f32 %v14624_v27, %v2789_v52 }
 0x308   : > { %v2904_v47 = vpop.f32.mrf.mxu2 }
 0x309   : > { %v14626_v25 = vpop.f32.mrf.mxu0 }
 0x310   : > { %v2906_v9 = vpop.f32.mrf.mxu2 }
 0x311   : > { %v2841_v62 = vpop.f32.mrf.mxu0 }
 0x312   : > { %v2842_v0 = vadd.f32 %v2841_v62, %v2813_v23 }
 0x314   : > { %v2871_v2 = vadd.f32 %v2870_v55, %v2842_v0  ;;  %v12213_v0 = vld [vmem:[#allocation6 + $0x138] sm:$0xff] }
 0x315   : > { %3606 = vmatpush.bf16.msra.mxu3 %v12213_v0 }
 0x316   : > { %v2900_v28 = vadd.f32 %v2899_v4, %v2871_v2 }
 0x318   : > { %v2923_v39 = vmul.f32 %v14634_v60, %v2900_v28 }
 0x319   : > { %v2843_v50 = vpop.f32.mrf.mxu0  ;;  %3607 = vmatpush.bf16.msra.mxu3 %v12212_v5 }
 0x31a   : > { %v2935_v55 = vadd.f32 %v14638_v32, %v2923_v39  ;;  %v2844_v53 = vadd.f32 %v2843_v50, %v2815_v26  ;;  %v2822_v26 = vpop.f32.mrf.mxu3 }
 0x31c   : > { %v2943_v4 = vmul.f32 0.01, %v2935_v55  ;;  %v2873_v23 = vadd.f32 %v2872_v58, %v2844_v53  ;;  %v12229_v53 = vld [vmem:[#allocation6 + $0x1b8] sm:$0xff] }
 0x31d   : > { %3662 = vmatpush.bf16.msrb.mxu1 %v12229_v53  ;;  %v12210_v53 = vld [vmem:[#allocation6 + $0x120] sm:$0xff] }
 0x31e   : > { %v2951_v31 = vmax.f32 %v2935_v55, %v2943_v4  ;;  %v2902_v62 = vadd.f32 %v2901_v61, %v2873_v23  ;;  %v2791_v61 = vadd.f32 %v14598_v19, %v2762_v3  ;;  %v12221_v55 = vld [vmem:[#allocation6 + $0x178] sm:$0xff]  ;;  %v2880_v4 = vpop.f32.mrf.mxu1 }
 0x31f   : > { %3634 = vmatpush.bf16.msra.mxu0 %v12221_v55 }
 0x320   : > { %2961 = vst [vmem:[#allocation2 + $0x8] sm:$0xff] %v2951_v31  ;;  %v2924_v30 = vmul.f32 %v14634_v60, %v2902_v62  ;;  %v2820_v39 = vadd.f32 %v14626_v25, %v2791_v61  ;;  %v2794_v25 = vadd.f32 %v14604_v29, %v2765_v15  ;;  %v12219_v61 = vld [vmem:[#allocation6 + $0x168] sm:$0xff] }
 0x321   : > { %v2846_v41 = vpop.f32.mrf.mxu0 }
 0x322   : > { %v2936_v2 = vadd.f32 %v14638_v32, %v2924_v30  ;;  %v2847_v1 = vadd.f32 %v2846_v41, %v2818_v36  ;;  %v2823_v36 = vadd.f32 %v2822_v26, %v2794_v25  ;;  %v12211_v41 = vld [vmem:[#allocation6 + $0x128] sm:$0xff]  ;;  %v2824_v29 = vpop.f32.mrf.mxu3  ;;  %v2770_v25 = vadd.f32 %v14614_v35, %v14606_v16 }
 0x323   : > { %3608 = vmatpush.bf16.msra.mxu3 %v12211_v41 }
 0x324   : > { %v2944_v7 = vmul.f32 0.01, %v2936_v2  ;;  %v2876_v58 = vadd.f32 %v2875_v42, %v2847_v1  ;;  %v12228_v1 = vld [vmem:[#allocation6 + $0x1b0] sm:$0xff] }
 0x325   : > { %3663 = vmatpush.bf16.msrb.mxu1 %v12228_v1  ;;  %v12208_v1 = vld [vmem:[#allocation6 + $0x110] sm:$0xff] }
 0x326   : > { %v2952_v44 = vmax.f32 %v2936_v2, %v2944_v7  ;;  %v2905_v27 = vadd.f32 %v2904_v47, %v2876_v58  ;;  %v12220_v2 = vld [vmem:[#allocation6 + $0x170] sm:$0xff]  ;;  %v2796_v7 = vadd.f32 %v14610_v34, %v2767_v18 }
 0x327   : > { %v2969_v28 = vld [vmem:[#allocation2 + $0x7] sm:$0xff]  ;;  %3635 = vmatpush.bf16.msra.mxu0 %v12220_v2  ;;  %3609 = vmatpush.bf16.msra.mxu3 %v12210_v53 }
 0x328   : > { %3733 = vst [vmem:[#allocation2 + $0x7] sm:$0x1] %v13751_v20  ;;  %v2925_v50 = vmul.f32 %v14634_v60, %v2905_v27  ;;  %v3019_v17 = vpack.c.bf16 %v2952_v44, %v2951_v31  ;;  %v2909_v31 = vpop.f32.mrf.mxu2  ;;  %v2882_v27 = vpop.f32.mrf.mxu1 }
 0x329   : > { %2962 = vst [vmem:[#allocation2 + $0x10] sm:$0xff] %v2952_v44  ;;  %v2848_v8 = vpop.f32.mrf.mxu0 }
 0x32a   : > { %v2937_v19 = vadd.f32 %v14638_v32, %v2925_v50  ;;  %v2849_v42 = vadd.f32 %v2848_v8, %v2820_v39  ;;  %3530 = vmatmul.bf16.vlgmr.msrb.gmra.mxu0 %v3019_v17  ;;  %v12227_v8 = vld [vmem:[#allocation6 + $0x1a8] sm:$0xff] }
 0x32b   : > { %3636 = vmatpush.bf16.msra.mxu0 %v12219_v61  ;;  %3664 = vmatpush.bf16.msrb.mxu1 %v12227_v8 }
 0x32c   : > { %v2945_v47 = vmul.f32 0.01, %v2937_v19  ;;  %v2878_v6 = vadd.f32 %v2877_v10, %v2849_v42  ;;  %v12218_v42 = vld [vmem:[#allocation6 + $0x160] sm:$0xff] }
 0x32e   : > { %v2953_v23 = vmax.f32 %v2937_v19, %v2945_v47  ;;  %v2907_v52 = vadd.f32 %v2906_v9, %v2878_v6 }
 0x32f   : > { %3637 = vmatpush.bf16.msra.mxu0 %v12218_v42 }
 0x330   : > { %2963 = vst [vmem:[#allocation2 + $0x18] sm:$0xff] %v2953_v23  ;;  %v2926_v62 = vmul.f32 %v14634_v60, %v2907_v52  ;;  %v2970_v12 = vld [vmem:[#allocation2 + $0xf] sm:$0xff]  ;;  %v2911_v15 = vpop.f32.mrf.mxu2  ;;  %v2827_v52 = vpop.f32.mrf.mxu3 }
 0x331   : > { %v2851_v30 = vpop.f32.mrf.mxu0  ;;  %v3018_v0 = vpack.c.bf16 %v2970_v12, %v2969_v28  ;;  %v2983_v33 = vld [vmem:[#allocation2 + $0x9] sm:$0xff]  ;;  %v2825_v28 = vadd.f32 %v2824_v29, %v2796_v7  ;;  %v2772_v29 = vadd.f32 %v14620_v54, %v14612_v37  ;;  %v12216_v7 = vld [vmem:[#allocation6 + $0x150] sm:$0xff] }
 0x332   : > { %v2938_v10 = vadd.f32 %v14638_v32, %v2926_v62  ;;  %v2852_v3 = vadd.f32 %v2851_v30, %v2823_v36  ;;  %v2990_v39 = vld [vmem:[#allocation2 + $0xa] sm:$0xff] }
 0x333   : > { %3502 = vmatmul.bf16.vlgmr.msrb.gmra.mxu3 %v3018_v0  ;;  %v12226_v36 = vld [vmem:[#allocation6 + $0x1a0] sm:$0xff]  ;;  %v12217_v12 = vld [vmem:[#allocation6 + $0x158] sm:$0xff]  ;;  %v2801_v61 = vadd.f32 %v14622_v56, %v2772_v29 }
 0x334   : > { %v2946_v58 = vmul.f32 0.01, %v2938_v10  ;;  %v2881_v9 = vadd.f32 %v2880_v4, %v2852_v3  ;;  %v12209_v4 = vld [vmem:[#allocation6 + $0x118] sm:$0xff]  ;;  %3665 = vmatpush.bf16.msrb.mxu1 %v12226_v36  ;;  %3638 = vmatpush.bf16.msra.mxu0 %v12217_v12 }
 0x335   : > { %3610 = vmatpush.bf16.msra.mxu3 %v12209_v4 }
 0x336   : > { %v2954_v44 = vmax.f32 %v2938_v10, %v2946_v58  ;;  %v2910_v24 = vadd.f32 %v2909_v31, %v2881_v9  ;;  %v2799_v31 = vadd.f32 %v14616_v46, %v2770_v25  ;;  %v12225_v46 = vld [vmem:[#allocation6 + $0x198] sm:$0xff]  ;;  %v2885_v10 = vpop.f32.mrf.mxu1 }
 0x337   : > { %v2984_v26 = vld [vmem:[#allocation2 + $0x11] sm:$0xff] }
 0x338   : > { %v2991_v50 = vld [vmem:[#allocation2 + $0x12] sm:$0xff]  ;;  %2964 = vst [vmem:[#allocation2 + $0x20] sm:$0xff] %v2954_v44  ;;  %v2927_v17 = vmul.f32 %v14634_v60, %v2910_v24  ;;  %v3020_v34 = vpack.c.bf16 %v2984_v26, %v2983_v33  ;;  %v3026_v55 = vpack.c.bf16 %v2954_v44, %v2953_v23  ;;  %v2828_v41 = vadd.f32 %v2827_v52, %v2799_v31  ;;  %v2914_v44 = vpop.f32.mrf.mxu2  ;;  %v2829_v26 = vpop.f32.mrf.mxu3 }
 0x339   : > { %v3021_v5 = vpack.c.bf16 %v2991_v50, %v2990_v39  ;;  %v2853_v19 = vpop.f32.mrf.mxu0  ;;  %v2971_v16 = vld [vmem:[#allocation2 + $0x17] sm:$0xff]  ;;  %3611 = vmatpush.bf16.msra.mxu3 %v12208_v1  ;;  %3666 = vmatpush.bf16.msrb.mxu1 %v12225_v46  ;;  %v2830_v50 = vadd.f32 %v2829_v26, %v2801_v61 }
 0x33a   : > { %v2939_v47 = vadd.f32 %v14638_v32, %v2927_v17  ;;  %v2854_v6 = vadd.f32 %v2853_v19, %v2825_v28  ;;  %3558 = vmatmul.bf16.vlgmr.msra.gmra.mxu1 %v3020_v34  ;;  %3535 = vmatmul.bf16.gmra.mxu0 %v3026_v55  ;;  %v12224_v28 = vld [vmem:[#allocation6 + $0x190] sm:$0xff] }
 0x33b   : > { %3586 = vmatmul.bf16.vlgmr.msra.gmra.mxu2 %v3021_v5  ;;  %3639 = vmatpush.bf16.msra.mxu0 %v12216_v7 }
 0x33c   : > { %v2947_v23 = vmul.f32 0.01, %v2939_v47  ;;  %v2883_v62 = vadd.f32 %v2882_v27, %v2854_v6  ;;  %v12207_v27 = vld [vmem:[#allocation6 + $0x108] sm:$0xff] }
 0x33d   : > { %3612 = vmatpush.bf16.msra.mxu3 %v12207_v27  ;;  %3667 = vmatpush.bf16.msrb.mxu1 %v12224_v28  ;;  %v12223_v6 = vld [vmem:[#allocation6 + $0x188] sm:$0xff] }
 0x33e   : > { %v2955_v18 = vmax.f32 %v2939_v47, %v2947_v23  ;;  %v2912_v30 = vadd.f32 %v2911_v15, %v2883_v62  ;;  %v12215_v15 = vld [vmem:[#allocation6 + $0x148] sm:$0xff]  ;;  %v12206_v47 = vld [vmem:[#allocation6 + $0x100] sm:$0xff]  ;;  %v2887_v4 = vpop.f32.mrf.mxu1 }
 0x33f   : > { %v2972_v35 = vld [vmem:[#allocation2 + $0x1f] sm:$0xff]  ;;  %3640 = vmatpush.bf16.msra.mxu0 %v12215_v15  ;;  %v12214_v23 = vld [vmem:[#allocation6 + $0x140] sm:$0xff] }
 0x340   : > { %2965 = vst [vmem:[#allocation2 + $0x28] sm:$0xff] %v2955_v18  ;;  %v2928_v0 = vmul.f32 %v14634_v60, %v2912_v30  ;;  %v3025_v2 = vpack.c.bf16 %v2972_v35, %v2971_v16  ;;  %v2985_v54 = vld [vmem:[#allocation2 + $0x19] sm:$0xff]  ;;  %v2916_v62 = vpop.f32.mrf.mxu2 }
 0x341   : > { %v2856_v3 = vpop.f32.mrf.mxu0  ;;  %v2992_v34 = vld [vmem:[#allocation2 + $0x1a] sm:$0xff]  ;;  %3613 = vmatpush.bf16.msra.mxu3 %v12206_v47  ;;  %3668 = vmatpush.bf16.msrb.mxu1 %v12223_v6 }
 0x342   : > { %v2940_v58 = vadd.f32 %v14638_v32, %v2928_v0  ;;  %v2857_v9 = vadd.f32 %v2856_v3, %v2828_v41  ;;  %v12222_v41 = vld [vmem:[#allocation6 + $0x180] sm:$0xff] }
 0x343   : > { %3507 = vmatmul.bf16.gmra.mxu3 %v3025_v2  ;;  %3641 = vmatpush.bf16.msra.mxu0 %v12214_v23  ;;  %v3005_v28 = vld [vmem:[#allocation2 + $0x14] sm:$0xff] }
 0x344   : > { %v2948_v24 = vmul.f32 0.01, %v2940_v58  ;;  %v2886_v33 = vadd.f32 %v2885_v10, %v2857_v9 }
 0x345   : > { %3669 = vmatpush.bf16.msrb.mxu1 %v12222_v41 }
 0x346   : > { %v2956_v39 = vmax.f32 %v2940_v58, %v2948_v24  ;;  %v2915_v37 = vadd.f32 %v2914_v44, %v2886_v33 }
 0x347   : > { %v2986_v17 = vld [vmem:[#allocation2 + $0x21] sm:$0xff] }
 0x348   : > { %v2993_v5 = vld [vmem:[#allocation2 + $0x22] sm:$0xff]  ;;  %2966 = vst [vmem:[#allocation2 + $0x30] sm:$0xff] %v2956_v39  ;;  %v2929_v56 = vmul.f32 %v14634_v60, %v2915_v37  ;;  %v3027_v55 = vpack.c.bf16 %v2986_v17, %v2985_v54  ;;  %v3033_v8 = vpack.c.bf16 %v2956_v39, %v2955_v18  ;;  %v3004_v37 = vld [vmem:[#allocation2 + $0xc] sm:$0xff] }
 0x349   : > { %v3028_v53 = vpack.c.bf16 %v2993_v5, %v2992_v34  ;;  %v2858_v19 = vpop.f32.mrf.mxu0  ;;  %v2973_v18 = vld [vmem:[#allocation2 + $0x27] sm:$0xff]  ;;  %v3023_v54 = vpack.c.bf16 %v3005_v28, %v3004_v37  ;;  %v3012_v5 = vld [vmem:[#allocation2 + $0x15] sm:$0xff] }
 0x34a   : > { %v2941_v42 = vadd.f32 %v14638_v32, %v2929_v56  ;;  %v2859_v25 = vadd.f32 %v2858_v19, %v2830_v50  ;;  %3563 = vmatmul.bf16.gmra.mxu1 %v3027_v55  ;;  %3540 = vmatmul.bf16.gmra.mxu0 %v3033_v8  ;;  %v2998_v50 = vld [vmem:[#allocation2 + $0x13] sm:$0xff]  ;;  %v2997_v17 = vld [vmem:[#allocation2 + $0xb] sm:$0xff]  ;;  %v3006_v8 = vld [vmem:[#allocation2 + $0x1c] sm:$0xff] }
 0x34b   : > { %3591 = vmatmul.bf16.gmra.mxu2 %v3028_v53  ;;  %v3022_v34 = vpack.c.bf16 %v2998_v50, %v2997_v17  ;;  %v3007_v56 = vld [vmem:[#allocation2 + $0x24] sm:$0xff]  ;;  %v3011_v55 = vld [vmem:[#allocation2 + $0xd] sm:$0xff]  ;;  %v12243_v37 = vld [vmem:[#allocation8 + $0x68] sm:$0xff] }
 0x34c   : > { %v2949_v52 = vmul.f32 0.01, %v2941_v42  ;;  %v2888_v31 = vadd.f32 %v2887_v4, %v2859_v25  ;;  %v3024_v53 = vpack.c.bf16 %v3012_v5, %v3011_v55  ;;  %v3030_v15 = vpack.c.bf16 %v3007_v56, %v3006_v8  ;;  %v3000_v19 = vld [vmem:[#allocation2 + $0x23] sm:$0xff]  ;;  %v12234_v5 = vld [vmem:[#allocation8 + $0x20] sm:$0xff]  ;;  %v12251_v55 = vld [vmem:[#allocation8 + $0xa8] sm:$0xff] }
 0x34d   : > { %v3014_v47 = vld [vmem:[#allocation2 + $0x25] sm:$0xff]  ;;  %v3013_v4 = vld [vmem:[#allocation2 + $0x1d] sm:$0xff]  ;;  %v12242_v56 = vld [vmem:[#allocation8 + $0x60] sm:$0xff] }
 0x34e   : > { %v2957_v36 = vmax.f32 %v2941_v42, %v2949_v52  ;;  %v2917_v12 = vadd.f32 %v2916_v62, %v2888_v31  ;;  %v2999_v42 = vld [vmem:[#allocation2 + $0x1b] sm:$0xff]  ;;  %v3031_v52 = vpack.c.bf16 %v3014_v47, %v3013_v4 }
 0x34f   : > { %v2974_v30 = vld [vmem:[#allocation2 + $0x2f] sm:$0xff]  ;;  %v3029_v25 = vpack.c.bf16 %v3000_v19, %v2999_v42 }
 0x350   : > { %2967 = vst [vmem:[#allocation2 + $0x38] sm:$0xff] %v2957_v36  ;;  %v2930_v16 = vmul.f32 %v14634_v60, %v2917_v12  ;;  %v3032_v35 = vpack.c.bf16 %v2974_v30, %v2973_v18  ;;  %v2987_v46 = vld [vmem:[#allocation2 + $0x29] sm:$0xff]  ;;  %v3040_v9 = vpack.c.bf16 %v2957_v36, %v2957_v36 }
 0x351   : > { %v2994_v10 = vld [vmem:[#allocation2 + $0x2a] sm:$0xff] }
 0x352   : > { %v2942_v0 = vadd.f32 %v14638_v32, %v2930_v16  ;;  %v3008_v31 = vld [vmem:[#allocation2 + $0x2c] sm:$0xff] }
 0x353   : > { %3512 = vmatmul.bf16.gmra.mxu3 %v3032_v35  ;;  %v3001_v36 = vld [vmem:[#allocation2 + $0x2b] sm:$0xff] }
 0x354   : > { %v2950_v2 = vmul.f32 0.01, %v2942_v0  ;;  %v3015_v30 = vld [vmem:[#allocation2 + $0x2d] sm:$0xff] }
 0x356   : > { %v2958_v1 = vmax.f32 %v2942_v0, %v2950_v2 }
 0x357   : > { %v2988_v29 = vld [vmem:[#allocation2 + $0x31] sm:$0xff] }
 0x358   : > { %v2995_v3 = vld [vmem:[#allocation2 + $0x32] sm:$0xff]  ;;  %2968 = vst [vmem:[#allocation2 + $0x40] sm:$0xf] %v2958_v1  ;;  %v3034_v7 = vpack.c.bf16 %v2988_v29, %v2987_v46 }
 0x359   : > { %v3035_v58 = vpack.c.bf16 %v2995_v3, %v2994_v10  ;;  %v2975_v60 = vld [vmem:[#allocation2 + $0x37] sm:$0xff]  ;;  %v12237_v3 = vld [vmem:[#allocation8 + $0x38] sm:$0xff] }
 0x35a   : > { %3568 = vmatmul.bf16.gmra.mxu1 %v3034_v7  ;;  %3545 = vmatmul.bf16.gmra.mxu0 %v3040_v9  ;;  %v3039_v27 = vpack.c.bf16 %v2975_v60, %v2975_v60  ;;  %v3009_v6 = vld [vmem:[#allocation2 + $0x34] sm:$0xff]  ;;  %v12245_v7 = vld [vmem:[#allocation8 + $0x78] sm:$0xff] }
 0x35b   : > { %3596 = vmatmul.bf16.gmra.mxu2 %v3035_v58  ;;  %v3037_v23 = vpack.c.bf16 %v3009_v6, %v3008_v31  ;;  %v3002_v62 = vld [vmem:[#allocation2 + $0x33] sm:$0xff]  ;;  %4295 = vmatpush.bf16.msrb.mxu3 %v12245_v7  ;;  %v12261_v31 = vld [vmem:[#allocation8 + $0xf8] sm:$0xff] }
 0x35c   : > { %v3036_v12 = vpack.c.bf16 %v3002_v62, %v3001_v36  ;;  %v3016_v18 = vld [vmem:[#allocation2 + $0x35] sm:$0xff]  ;;  %4267 = vmatpush.bf16.msrb.mxu2 %v12237_v3  ;;  %4351 = vmatpush.bf16.msra.mxu1 %v12261_v31 }
 0x35d   : > { %v3038_v16 = vpack.c.bf16 %v3016_v18, %v3015_v30  ;;  %v12250_v18 = vld [vmem:[#allocation8 + $0xa0] sm:$0xff]  ;;  %v12240_v30 = vld [vmem:[#allocation8 + $0x50] sm:$0xff] }
 0x35f   : > { %v2989_v61 = vld [vmem:[#allocation2 + $0x39] sm:$0xff] }
 0x360   : > { %v2996_v44 = vld [vmem:[#allocation2 + $0x3a] sm:$0xff]  ;;  %v3041_v26 = vpack.c.bf16 %v2989_v61, %v2989_v61 }
 0x361   : > { %v3003_v32 = vld [vmem:[#allocation2 + $0x3b] sm:$0xff]  ;;  %v3042_v39 = vpack.c.bf16 %v2996_v44, %v2996_v44 }
 0x362   : > { %v3010_v24 = vld [vmem:[#allocation2 + $0x3c] sm:$0xff]  ;;  %v3043_v0 = vpack.c.bf16 %v3003_v32, %v3003_v32 }
 0x363   : > { %v3017_v33 = vld [vmem:[#allocation2 + $0x3d] sm:$0xff]  ;;  %3517 = vmatmul.bf16.gmra.mxu3 %v3039_v27  ;;  %v3044_v35 = vpack.c.bf16 %v3010_v24, %v3010_v24  ;;  %v12253_v24 = vld [vmem:[#allocation8 + $0xb8] sm:$0xff] }
 0x364   : > { %3734 = vst [vmem:[#allocation2 + $0x40] sm:$0x1] %v13751_v20  ;;  %v3045_v2 = vpack.c.bf16 %v3017_v33, %v3017_v33  ;;  %v12236_v44 = vld [vmem:[#allocation8 + $0x30] sm:$0xff]  ;;  %4323 = vmatpush.bf16.msrb.mxu0 %v12253_v24 }
 0x365   : > { %v12244_v32 = vld [vmem:[#allocation8 + $0x70] sm:$0xff]  ;;  %4268 = vmatpush.bf16.msrb.mxu2 %v12236_v44 }
 0x366   : > { %4296 = vmatpush.bf16.msrb.mxu3 %v12244_v32  ;;  %v12232_v24 = vld [vmem:[#allocation8 + $0x10] sm:$0xff] }
 0x36a   : > { %3573 = vmatmul.bf16.gmra.mxu1 %v3041_v26  ;;  %3642 = vmatmul.bf16.vlgmr.msra.gmra.mxu0 %v3023_v54  ;;  %v12252_v54 = vld [vmem:[#allocation8 + $0xb0] sm:$0xff] }
 0x36b   : > { %3601 = vmatmul.bf16.gmra.mxu2 %v3042_v39  ;;  %v12235_v39 = vld [vmem:[#allocation8 + $0x28] sm:$0xff]  ;;  %4297 = vmatpush.bf16.msrb.mxu3 %v12243_v37  ;;  %v12258_v37 = vld [vmem:[#allocation8 + $0xe0] sm:$0xff] }
 0x36c   : > { %4269 = vmatpush.bf16.msrb.mxu2 %v12235_v39  ;;  %4324 = vmatpush.bf16.msrb.mxu0 %v12252_v54  ;;  %v12249_v39 = vld [vmem:[#allocation8 + $0x98] sm:$0xff] }
 0x36f   : > { %4298 = vmatpush.bf16.msrb.mxu3 %v12242_v56 }
 0x370   : > { %4270 = vmatpush.bf16.msrb.mxu2 %v12234_v5  ;;  %4325 = vmatpush.bf16.msrb.mxu0 %v12251_v55  ;;  %v12238_v5 = vld [vmem:[#allocation8 + $0x40] sm:$0xff]  ;;  %v12231_v55 = vld [vmem:[#allocation8 + $0x8] sm:$0xff] }
 0x373   : > { %3614 = vmatmul.bf16.vlgmr.msra.gmra.mxu3 %v3022_v34 }
 0x374   : > { %4326 = vmatpush.bf16.msrb.mxu0 %v12250_v18 }
 0x378   : > { %4327 = vmatpush.bf16.msrb.mxu0 %v12249_v39  ;;  %v12255_v39 = vld [vmem:[#allocation8 + $0xc8] sm:$0xff] }
 0x37a   : > { %3670 = vmatmul.bf16.vlgmr.msrb.gmra.mxu1 %v3024_v53  ;;  %3647 = vmatmul.bf16.gmra.mxu0 %v3030_v15 }
 0x383   : > { %3619 = vmatmul.bf16.gmra.mxu3 %v3029_v25 }
 0x38a   : > { %3675 = vmatmul.bf16.gmra.mxu1 %v3031_v52  ;;  %3652 = vmatmul.bf16.gmra.mxu0 %v3037_v23  ;;  %v12241_v52 = vld [vmem:[#allocation8 + $0x58] sm:$0xff] }
 0x38b   : > { %4299 = vmatpush.bf16.msrb.mxu3 %v12241_v52 }
 0x38f   : > { %4300 = vmatpush.bf16.msrb.mxu3 %v12240_v30  ;;  %v12248_v30 = vld [vmem:[#allocation8 + $0x90] sm:$0xff] }
 0x390   : > { %4328 = vmatpush.bf16.msrb.mxu0 %v12248_v30 }
 0x393   : > { %3624 = vmatmul.bf16.gmra.mxu3 %v3036_v12  ;;  %v12233_v12 = vld [vmem:[#allocation8 + $0x18] sm:$0xff] }
 0x394   : > { %4271 = vmatpush.bf16.msrb.mxu2 %v12233_v12 }
 0x398   : > { %4272 = vmatpush.bf16.msrb.mxu2 %v12232_v24  ;;  %v12247_v24 = vld [vmem:[#allocation8 + $0x88] sm:$0xff] }
 0x399   : > { %4329 = vmatpush.bf16.msrb.mxu0 %v12247_v24 }
 0x39a   : > { %3680 = vmatmul.bf16.gmra.mxu1 %v3038_v16  ;;  %3657 = vmatmul.bf16.gmra.mxu0 %v3044_v35  ;;  %v12260_v35 = vld [vmem:[#allocation8 + $0xf0] sm:$0xff] }
 0x39b   : > { %4352 = vmatpush.bf16.msra.mxu1 %v12260_v35  ;;  %v12230_v35 = vld [vmem:[#allocation8] sm:$0xff] }
 0x39c   : > { %4273 = vmatpush.bf16.msrb.mxu2 %v12231_v55 }
 0x3a0   : > { %4274 = vmatpush.bf16.msrb.mxu2 %v12230_v35 }
 0x3a3   : > { %3629 = vmatmul.bf16.gmra.mxu3 %v3043_v0  ;;  %v12259_v0 = vld [vmem:[#allocation8 + $0xe8] sm:$0xff] }
 0x3a4   : > { %4353 = vmatpush.bf16.msra.mxu1 %v12259_v0  ;;  %v12256_v0 = vld [vmem:[#allocation8 + $0xd0] sm:$0xff] }
 0x3a7   : > { %v14679_v41 = vpop.f32.mrf.mxu0 }
 0x3a8   : > { %4354 = vmatpush.bf16.msra.mxu1 %v12258_v37 }
 0x3aa   : > { %3685 = vmatmul.bf16.gmra.mxu1 %v3045_v2  ;;  %v12239_v2 = vld [vmem:[#allocation8 + $0x48] sm:$0xff] }
 0x3ab   : > { %4301 = vmatpush.bf16.msrb.mxu3 %v12239_v2 }
 0x3af   : > { %v14681_v1 = vpop.f32.mrf.mxu0  ;;  %4302 = vmatpush.bf16.msrb.mxu3 %v12238_v5 }
 0x3b6   : > { %v14683_v46 = vpop.f32.mrf.mxu3 }
 0x3b7   : > { %v14685_v29 = vpop.f32.mrf.mxu1  ;;  %v14687_v10 = vpop.f32.mrf.mxu0  ;;  %v3532_v44 = vadd.f32 %v14679_v41, %v14683_v46 }
 0x3b9   : > { %v3560_v56 = vadd.f32 %v14685_v29, %v3532_v44 }
 0x3be   : > { %v14689_v58 = vpop.f32.mrf.mxu2  ;;  %v14691_v9 = vpop.f32.mrf.mxu3 }
 0x3bf   : > { %v14693_v60 = vpop.f32.mrf.mxu1  ;;  %v14695_v61 = vpop.f32.mrf.mxu0  ;;  %v3588_v52 = vadd.f32 %v14689_v58, %v3560_v56  ;;  %v3534_v46 = vadd.f32 %v14681_v1, %v14691_v9 }
 0x3c1   : > { %v3562_v58 = vadd.f32 %v14693_v60, %v3534_v46  ;;  %v12246_v60 = vld [vmem:[#allocation8 + $0x80] sm:$0xff] }
 0x3c2   : > { %4330 = vmatpush.bf16.msrb.mxu0 %v12246_v60  ;;  %v12276_v60 = vld [vmem:[#allocation8 + $0x170] sm:$0xff] }
 0x3c6   : > { %v14697_v33 = vpop.f32.mrf.mxu2  ;;  %v14699_v27 = vpop.f32.mrf.mxu3 }
 0x3c7   : > { %v14701_v28 = vpop.f32.mrf.mxu1  ;;  %v14703_v26 = vpop.f32.mrf.mxu0  ;;  %v3590_v1 = vadd.f32 %v14697_v33, %v3562_v58  ;;  %v12277_v58 = vld [vmem:[#allocation8 + $0x178] sm:$0xff] }
 0x3c8   : > { %4407 = vmatpush.bf16.msra.mxu3 %v12277_v58 }
 0x3cc   : > { %4408 = vmatpush.bf16.msra.mxu3 %v12276_v60  ;;  %v12273_v60 = vld [vmem:[#allocation8 + $0x158] sm:$0xff] }
 0x3ce   : > { %v14705_v50 = vpop.f32.mrf.mxu2  ;;  %v14707_v17 = vpop.f32.mrf.mxu3 }
 0x3cf   : > { %v14709_v34 = vpop.f32.mrf.mxu1  ;;  %v14711_v53 = vpop.f32.mrf.mxu0  ;;  %v3539_v35 = vadd.f32 %v14695_v61, %v14707_v17 }
 0x3d6   : > { %v14713_v8 = vpop.f32.mrf.mxu2  ;;  %v14715_v15 = vpop.f32.mrf.mxu3 }
 0x3d7   : > { %v14717_v19 = vpop.f32.mrf.mxu1  ;;  %v14719_v42 = vpop.f32.mrf.mxu0 }
 0x3de   : > { %v14721_v25 = vpop.f32.mrf.mxu2  ;;  %v14723_v47 = vpop.f32.mrf.mxu3 }
 0x3df   : > { %v14725_v6 = vpop.f32.mrf.mxu1  ;;  %v3548_v4 = vpop.f32.mrf.mxu0 }
 0x3e0   : > { %v12257_v4 = vld [vmem:[#allocation8 + $0xd8] sm:$0xff] }
 0x3e1   : > { %4355 = vmatpush.bf16.msra.mxu1 %v12257_v4  ;;  %v12254_v4 = vld [vmem:[#allocation8 + $0xc0] sm:$0xff] }
 0x3e5   : > { %4356 = vmatpush.bf16.msra.mxu1 %v12256_v0 }
 0x3e6   : > { %v14727_v23 = vpop.f32.mrf.mxu2  ;;  %v14729_v62 = vpop.f32.mrf.mxu3 }
 0x3e7   : > { %v14731_v36 = vpop.f32.mrf.mxu1  ;;  %v3643_v16 = vpop.f32.mrf.mxu0 }
 0x3e9   : > { %4357 = vmatpush.bf16.msra.mxu1 %v12255_v39 }
 0x3ed   : > { %4358 = vmatpush.bf16.msra.mxu1 %v12254_v4  ;;  %v12285_v4 = vld [vmem:[#allocation8 + $0x1b8] sm:$0xff] }
 0x3ee   : > { %v14733_v3 = vpop.f32.mrf.mxu2  ;;  %v3520_v7 = vpop.f32.mrf.mxu3  ;;  %4435 = vmatpush.bf16.msra.mxu0 %v12285_v4  ;;  %v12282_v4 = vld [vmem:[#allocation8 + $0x1a0] sm:$0xff] }
 0x3ef   : > { %v3576_v32 = vpop.f32.mrf.mxu1  ;;  %v3645_v54 = vpop.f32.mrf.mxu0  ;;  %v14742_v7 = vld [vmem:[%s15660_s2] ss:$0 sm:$0xff]  ;;  %s15671_s2 = sld [smem:[#allocation69_spill]] }
 0x3f0   : > { %v14746_v32 = vld [vmem:[%s15661_s30] ss:$0 sm:$0xff] }
 0x3f5   : > { %s15672_s30 = smov %s15671_s2 }
 0x3f6   : > { %v3604_v31 = vpop.f32.mrf.mxu2  ;;  %v3615_v41 = vpop.f32.mrf.mxu3 }
 0x3f7   : > { %v3616_v12 = vadd.f32 %v3615_v41, %v3588_v52  ;;  %v3671_v18 = vpop.f32.mrf.mxu1  ;;  %v3648_v2 = vpop.f32.mrf.mxu0 }
 0x3f9   : > { %v3644_v29 = vadd.f32 %v3643_v16, %v3616_v12  ;;  %v3537_v16 = vadd.f32 %v14687_v10, %v14699_v27 }
 0x3fb   : > { %v3672_v44 = vadd.f32 %v3671_v18, %v3644_v29  ;;  %v3565_v33 = vadd.f32 %v14701_v28, %v3537_v16  ;;  %v12269_v29 = vld [vmem:[#allocation8 + $0x138] sm:$0xff] }
 0x3fc   : > { %4379 = vmatpush.bf16.msra.mxu2 %v12269_v29 }
 0x3fd   : > { %v3694_v9 = vmul.f32 %v14742_v7, %v3672_v44  ;;  %v3593_v18 = vadd.f32 %v14705_v50, %v3565_v33  ;;  %v3567_v50 = vadd.f32 %v14709_v34, %v3539_v35  ;;  %v12268_v34 = vld [vmem:[#allocation8 + $0x130] sm:$0xff] }
 0x3fe   : > { %v3617_v37 = vpop.f32.mrf.mxu3 }
 0x3ff   : > { %v3705_v5 = vadd.f32 %v14746_v32, %v3694_v9  ;;  %v3618_v56 = vadd.f32 %v3617_v37, %v3590_v1  ;;  %v3673_v55 = vpop.f32.mrf.mxu1  ;;  %v3650_v52 = vpop.f32.mrf.mxu0  ;;  %v3595_v9 = vadd.f32 %v14713_v8, %v3567_v50 }
 0x400   : > { %4380 = vmatpush.bf16.msra.mxu2 %v12268_v34 }
 0x401   : > { %v3712_v31 = vadd.f32 %v3705_v5, %v14501_v22  ;;  %v3646_v41 = vadd.f32 %v3645_v54, %v3618_v56  ;;  %v3542_v5 = vadd.f32 %v14703_v26, %v14715_v15 }
 0x403   : > { %v3719_v46 = vmul.f32 0.01, %v3712_v31  ;;  %v3674_v12 = vadd.f32 %v3673_v55, %v3646_v41  ;;  %v3570_v26 = vadd.f32 %v14717_v19, %v3542_v5  ;;  %v12275_v19 = vld [vmem:[#allocation8 + $0x168] sm:$0xff] }
 0x404   : > { %4409 = vmatpush.bf16.msra.mxu3 %v12275_v19 }
 0x405   : > { %v3726_v30 = vmax.f32 %v3712_v31, %v3719_v46  ;;  %v3695_v10 = vmul.f32 %v14742_v7, %v3674_v12  ;;  %v3598_v46 = vadd.f32 %v14721_v25, %v3570_v26  ;;  %v12264_v26 = vld [vmem:[#allocation8 + $0x110] sm:$0xff] }
 0x406   : > { %v3620_v27 = vpop.f32.mrf.mxu3 }
 0x407   : > { %3735 = vst [vmem:[#allocation2 + $0x8] sm:$0xff] %v3726_v30  ;;  %v3706_v0 = vadd.f32 %v14746_v32, %v3695_v10  ;;  %v3621_v22 = vadd.f32 %v3620_v27, %v3593_v18  ;;  %v3676_v54 = vpop.f32.mrf.mxu1  ;;  %v3653_v44 = vpop.f32.mrf.mxu0 }
 0x409   : > { %v3713_v28 = vadd.f32 %v3706_v0, %v14530_v51  ;;  %v3649_v24 = vadd.f32 %v3648_v2, %v3621_v22  ;;  %v12267_v22 = vld [vmem:[#allocation8 + $0x128] sm:$0xff] }
 0x40a   : > { %4381 = vmatpush.bf16.msra.mxu2 %v12267_v22 }
 0x40b   : > { %v3720_v39 = vmul.f32 0.01, %v3713_v28  ;;  %v3677_v1 = vadd.f32 %v3676_v54, %v3649_v24  ;;  %v12284_v54 = vld [vmem:[#allocation8 + $0x1b0] sm:$0xff] }
 0x40c   : > { %4436 = vmatpush.bf16.msra.mxu0 %v12284_v54  ;;  %v12271_v54 = vld [vmem:[#allocation8 + $0x148] sm:$0xff] }
 0x40d   : > { %v3727_v61 = vmax.f32 %v3713_v28, %v3720_v39  ;;  %v3696_v17 = vmul.f32 %v14742_v7, %v3677_v1  ;;  %v12274_v28 = vld [vmem:[#allocation8 + $0x160] sm:$0xff] }
 0x40e   : > { %v3622_v37 = vpop.f32.mrf.mxu3  ;;  %v3742_v16 = vld [vmem:[#allocation2 + $0x7] sm:$0xff]  ;;  %4410 = vmatpush.bf16.msra.mxu3 %v12274_v28 }
 0x40f   : > { %v14766_v56 = vpack.c.bf16 %v3727_v61, %v3726_v30  ;;  %3736 = vst [vmem:[#allocation2 + $0x10] sm:$0xff] %v3727_v61  ;;  %v3707_v51 = vadd.f32 %v14746_v32, %v3696_v17  ;;  %v3623_v2 = vadd.f32 %v3622_v37, %v3595_v9  ;;  %v3678_v55 = vpop.f32.mrf.mxu1  ;;  %v3655_v31 = vpop.f32.mrf.mxu0 }
 0x410   : > { %4499 = vst [vmem:[#allocation2 + $0x7] sm:$0x1] %v13751_v20 }
 0x411   : > { %v3714_v8 = vadd.f32 %v3707_v51, %v14499_v21  ;;  %v3651_v41 = vadd.f32 %v3650_v52, %v3623_v2  ;;  %4303 = vmatmul.bf16.vlgmr.msrb.gmra.mxu3 %v14766_v56  ;;  %v3544_v21 = vadd.f32 %v14711_v53, %v14723_v47  ;;  %v12266_v53 = vld [vmem:[#allocation8 + $0x120] sm:$0xff]  ;;  %v12283_v47 = vld [vmem:[#allocation8 + $0x1a8] sm:$0xff]  ;;  %v12265_v51 = vld [vmem:[#allocation8 + $0x118] sm:$0xff] }
 0x412   : > { %4382 = vmatpush.bf16.msra.mxu2 %v12266_v53  ;;  %4437 = vmatpush.bf16.msra.mxu0 %v12283_v47 }
 0x413   : > { %v3721_v15 = vmul.f32 0.01, %v3714_v8  ;;  %v3679_v33 = vadd.f32 %v3678_v55, %v3651_v41  ;;  %v3572_v24 = vadd.f32 %v14725_v6, %v3544_v21  ;;  %4411 = vmatpush.bf16.msra.mxu3 %v12273_v60 }
 0x415   : > { %v3728_v12 = vmax.f32 %v3714_v8, %v3721_v15  ;;  %v3697_v18 = vmul.f32 %v14742_v7, %v3679_v33  ;;  %v3600_v1 = vadd.f32 %v14727_v23, %v3572_v24 }
 0x416   : > { %v3625_v30 = vpop.f32.mrf.mxu3  ;;  %v3743_v10 = vld [vmem:[#allocation2 + $0xf] sm:$0xff]  ;;  %4383 = vmatpush.bf16.msra.mxu2 %v12265_v51  ;;  %4438 = vmatpush.bf16.msra.mxu0 %v12282_v4  ;;  %v12279_v51 = vld [vmem:[#allocation8 + $0x188] sm:$0xff] }
 0x417   : > { %3737 = vst [vmem:[#allocation2 + $0x18] sm:$0xff] %v3728_v12  ;;  %v3708_v52 = vadd.f32 %v14746_v32, %v3697_v18  ;;  %v3626_v27 = vadd.f32 %v3625_v30, %v3598_v46  ;;  %v3681_v35 = vpop.f32.mrf.mxu1  ;;  %v3791_v0 = vpack.c.bf16 %v3743_v10, %v3742_v16  ;;  %v14778_v29 = vpop.f32.mrf.mxu0  ;;  %v3756_v17 = vld [vmem:[#allocation2 + $0x9] sm:$0xff]  ;;  %v12272_v18 = vld [vmem:[#allocation8 + $0x150] sm:$0xff] }
 0x418   : > { %v3763_v37 = vld [vmem:[#allocation2 + $0xa] sm:$0xff]  ;;  %4412 = vmatpush.bf16.msra.mxu3 %v12272_v18 }
 0x419   : > { %v3715_v25 = vadd.f32 %v3708_v52, %v14525_v45  ;;  %v3654_v58 = vadd.f32 %v3653_v44, %v3626_v27  ;;  %4275 = vmatmul.bf16.vlgmr.msrb.gmra.mxu2 %v3791_v0  ;;  %v3547_v45 = vadd.f32 %v14719_v42, %v14729_v62  ;;  %v12281_v30 = vld [vmem:[#allocation8 + $0x198] sm:$0xff]  ;;  %v12278_v4 = vld [vmem:[#allocation8 + $0x180] sm:$0xff] }
 0x41a   : > { %4384 = vmatpush.bf16.msra.mxu2 %v12264_v26  ;;  %4439 = vmatpush.bf16.msra.mxu0 %v12281_v30 }
 0x41b   : > { %v3722_v50 = vmul.f32 0.01, %v3715_v25  ;;  %v3682_v39 = vadd.f32 %v3681_v35, %v3654_v58  ;;  %v3575_v15 = vadd.f32 %v14731_v36, %v3547_v45  ;;  %v12270_v45 = vld [vmem:[#allocation8 + $0x140] sm:$0xff] }
 0x41c   : > { %4413 = vmatpush.bf16.msra.mxu3 %v12271_v54  ;;  %v3777_v54 = vld [vmem:[#allocation2 + $0xc] sm:$0xff] }
 0x41d   : > { %v3729_v9 = vmax.f32 %v3715_v25, %v3722_v50  ;;  %v3698_v61 = vmul.f32 %v14742_v7, %v3682_v39  ;;  %v12280_v25 = vld [vmem:[#allocation8 + $0x190] sm:$0xff] }
 0x41e   : > { %v3627_v44 = vpop.f32.mrf.mxu3  ;;  %v3757_v16 = vld [vmem:[#allocation2 + $0x11] sm:$0xff]  ;;  %4440 = vmatpush.bf16.msra.mxu0 %v12280_v25 }
 0x41f   : > { %v3764_v5 = vld [vmem:[#allocation2 + $0x12] sm:$0xff]  ;;  %3738 = vst [vmem:[#allocation2 + $0x20] sm:$0xff] %v3729_v9  ;;  %v3709_v6 = vadd.f32 %v14746_v32, %v3698_v61  ;;  %v3628_v2 = vadd.f32 %v3627_v44, %v3600_v1  ;;  %v3683_v23 = vpop.f32.mrf.mxu1  ;;  %v3793_v55 = vpack.c.bf16 %v3757_v16, %v3756_v17  ;;  %v3660_v8 = vpop.f32.mrf.mxu0  ;;  %v14787_v41 = vpack.c.bf16 %v3729_v9, %v3728_v12  ;;  %v12991_v44 = vld [vmem:[%s15655_s23] ss:$0 sm:$0xff] }
 0x420   : > { %v3794_v34 = vpack.c.bf16 %v3764_v5, %v3763_v37  ;;  %v3603_v12 = vadd.f32 %v14733_v3, %v3575_v15  ;;  %v3744_v21 = vld [vmem:[#allocation2 + $0x17] sm:$0xff]  ;;  %v6983_v16 = vmul.f32 %v12991_v44, %v14523_v43  ;;  %4414 = vmatpush.bf16.msra.mxu3 %v12270_v45 }
 0x421   : > { %v3716_v42 = vadd.f32 %v3709_v6, %v14455_v48  ;;  %v3656_v62 = vadd.f32 %v3655_v31, %v3628_v2  ;;  %4331 = vmatmul.bf16.vlgmr.msrb.gmra.mxu0 %v3793_v55  ;;  %4308 = vmatmul.bf16.gmra.mxu3 %v14787_v41  ;;  %v12263_v3 = vld [vmem:[#allocation8 + $0x108] sm:$0xff]  ;;  %v12262_v5 = vld [vmem:[#allocation8 + $0x100] sm:$0xff]  ;;  %v12992_v6 = vld [vmem:[%s15656_s16] ss:$0 sm:$0xff] }
 0x422   : > { %4359 = vmatmul.bf16.vlgmr.msra.gmra.mxu1 %v3794_v34  ;;  %4385 = vmatpush.bf16.msra.mxu2 %v12263_v3  ;;  %v6995_v2 = vmul.f32 %v12992_v6, %v6983_v16 }
 0x423   : > { %v3723_v33 = vmul.f32 0.01, %v3716_v42  ;;  %v3684_v46 = vadd.f32 %v3683_v23, %v3656_v62  ;;  %4441 = vmatpush.bf16.msra.mxu0 %v12279_v51 }
 0x425   : > { %v3730_v10 = vmax.f32 %v3716_v42, %v3723_v33  ;;  %v3699_v48 = vmul.f32 %v14742_v7, %v3684_v46 }
 0x426   : > { %v3630_v31 = vpop.f32.mrf.mxu3  ;;  %v3745_v52 = vld [vmem:[#allocation2 + $0x1f] sm:$0xff]  ;;  %4386 = vmatpush.bf16.msra.mxu2 %v12262_v5 }
 0x427   : > { %3739 = vst [vmem:[#allocation2 + $0x28] sm:$0xff] %v3730_v10  ;;  %v3710_v27 = vadd.f32 %v14746_v32, %v3699_v48  ;;  %v3631_v35 = vadd.f32 %v3630_v31, %v3603_v12  ;;  %v3686_v36 = vpop.f32.mrf.mxu1  ;;  %v3798_v0 = vpack.c.bf16 %v3745_v52, %v3744_v21  ;;  %v3758_v24 = vld [vmem:[#allocation2 + $0x19] sm:$0xff]  ;;  %4442 = vmatpush.bf16.msra.mxu0 %v12278_v4 }
 0x428   : > { %v3765_v1 = vld [vmem:[#allocation2 + $0x1a] sm:$0xff] }
 0x429   : > { %v3717_v22 = vadd.f32 %v3710_v27, %v14466_v57  ;;  %v3659_v19 = vadd.f32 %v14778_v29, %v3631_v35  ;;  %4280 = vmatmul.bf16.gmra.mxu2 %v3798_v0  ;;  %v3786_v44 = vld [vmem:[#allocation2 + $0x1d] sm:$0xff] }
 0x42b   : > { %v3724_v58 = vmul.f32 0.01, %v3717_v22  ;;  %v3687_v28 = vadd.f32 %v3686_v36, %v3659_v19 }
 0x42d   : > { %v3731_v53 = vmax.f32 %v3717_v22, %v3724_v58  ;;  %v3700_v47 = vmul.f32 %v14742_v7, %v3687_v28  ;;  %v3778_v22 = vld [vmem:[#allocation2 + $0x14] sm:$0xff]  ;;  %v3770_v28 = vld [vmem:[#allocation2 + $0xb] sm:$0xff] }
 0x42e   : > { %v3632_v50 = vpop.f32.mrf.mxu3  ;;  %v3759_v39 = vld [vmem:[#allocation2 + $0x21] sm:$0xff]  ;;  %v3796_v25 = vpack.c.bf16 %v3778_v22, %v3777_v54  ;;  %v3771_v58 = vld [vmem:[#allocation2 + $0x13] sm:$0xff] }
 0x42f   : > { %v3766_v57 = vld [vmem:[#allocation2 + $0x22] sm:$0xff]  ;;  %3740 = vst [vmem:[#allocation2 + $0x30] sm:$0xff] %v3731_v53  ;;  %v3711_v29 = vadd.f32 %v14746_v32, %v3700_v47  ;;  %v3688_v9 = vpop.f32.mrf.mxu1  ;;  %v3800_v61 = vpack.c.bf16 %v3759_v39, %v3758_v24  ;;  %v14799_v37 = vpack.c.bf16 %v3731_v53, %v3730_v10  ;;  %v3795_v53 = vpack.c.bf16 %v3771_v58, %v3770_v28  ;;  %v3785_v47 = vld [vmem:[#allocation2 + $0x15] sm:$0xff]  ;;  %v3784_v50 = vld [vmem:[#allocation2 + $0xd] sm:$0xff] }
 0x430   : > { %v3801_v17 = vpack.c.bf16 %v3766_v57, %v3765_v1  ;;  %v3746_v55 = vld [vmem:[#allocation2 + $0x27] sm:$0xff]  ;;  %v3797_v39 = vpack.c.bf16 %v3785_v47, %v3784_v50  ;;  %v3779_v1 = vld [vmem:[#allocation2 + $0x1c] sm:$0xff] }
 0x431   : > { %v3718_v7 = vadd.f32 %v3711_v29, %v14548_v63  ;;  %4336 = vmatmul.bf16.gmra.mxu0 %v3800_v61  ;;  %4313 = vmatmul.bf16.gmra.mxu3 %v14799_v37  ;;  %v12993_v63 = vld [vmem:[%s15657_s22] ss:$0 sm:$0xff]  ;;  %v3780_v24 = vld [vmem:[#allocation2 + $0x24] sm:$0xff] }
 0x432   : > { %4364 = vmatmul.bf16.gmra.mxu1 %v3801_v17  ;;  %v7007_v60 = vadd.f32 %v12993_v63, %v6995_v2  ;;  %v3803_v57 = vpack.c.bf16 %v3780_v24, %v3779_v1  ;;  %v3773_v29 = vld [vmem:[#allocation2 + $0x23] sm:$0xff]  ;;  %v3772_v9 = vld [vmem:[#allocation2 + $0x1b] sm:$0xff] }
 0x433   : > { %v3725_v32 = vmul.f32 0.01, %v3718_v7  ;;  %v3802_v61 = vpack.c.bf16 %v3773_v29, %v3772_v9  ;;  %v3787_v17 = vld [vmem:[#allocation2 + $0x25] sm:$0xff]  ;;  %v12299_v24 = vld [vmem:[#allocation9 + $0x68] sm:$0xff] }
 0x434   : > { %v7015_v8 = vmul.f32 0.01, %v7007_v60  ;;  %v3804_v16 = vpack.c.bf16 %v3787_v17, %v3786_v44  ;;  %v12289_v47 = vld [vmem:[#allocation9 + $0x18] sm:$0xff] }
 0x435   : > { %v14806_v23 = vmax.f32 %v3718_v7, %v3725_v32  ;;  %v12309_v9 = vld [vmem:[#allocation9 + $0xb8] sm:$0xff] }
 0x436   : > { %v3747_v34 = vld [vmem:[#allocation2 + $0x2f] sm:$0xff]  ;;  %v14810_v31 = vmax.f32 %v7007_v60, %v7015_v8  ;;  %5067 = vmatpush.bf16.msrb.mxu3 %v12309_v9 }
 0x437   : > { %3741 = vst [vmem:[#allocation2 + $0x38] sm:$0xff] %v14806_v23  ;;  %v3805_v43 = vpack.c.bf16 %v3747_v34, %v3746_v55  ;;  %v3760_v42 = vld [vmem:[#allocation2 + $0x29] sm:$0xff] }
 0x438   : > { %v3767_v26 = vld [vmem:[#allocation2 + $0x2a] sm:$0xff] }
 0x439   : > { %4285 = vmatmul.bf16.gmra.mxu2 %v3805_v43  ;;  %v3781_v7 = vld [vmem:[#allocation2 + $0x2c] sm:$0xff] }
 0x43a   : > { %v3774_v32 = vld [vmem:[#allocation2 + $0x2b] sm:$0xff] }
 0x43b   : > { %v3788_v2 = vld [vmem:[#allocation2 + $0x2d] sm:$0xff] }
 0x43c   : > { %v12297_v17 = vld [vmem:[#allocation9 + $0x58] sm:$0xff] }
 0x43d   : > { %v12337_v9 = vld [vmem:[#allocation9 + $0x198] sm:$0xff] }
 0x43e   : > { %v3761_v62 = vld [vmem:[#allocation2 + $0x31] sm:$0xff]  ;;  %v3762_v12 = vld [vmem:[#allocation2 + $0x39] sm:$0xf]  ;;  %v3790_v27 = vld [vmem:[#allocation2 + $0x3d] sm:$0xf] }
 0x43f   : > { %v3768_v15 = vld [vmem:[#allocation2 + $0x32] sm:$0xff]  ;;  %v3807_v33 = vpack.c.bf16 %v3761_v62, %v3760_v42  ;;  %v3769_v10 = vld [vmem:[#allocation2 + $0x3a] sm:$0xf]  ;;  %7033 = vst [vmem:[#allocation2 + $0x40] sm:$0xff] %v14810_v31  ;;  %v3814_v19 = vpack.c.bf16 %v3762_v12, %v3762_v12  ;;  %v3818_v63 = vpack.c.bf16 %v3790_v27, %v3790_v27  ;;  %v12293_v42 = vld [vmem:[#allocation9 + $0x38] sm:$0xff] }
 0x440   : > { %v3808_v46 = vpack.c.bf16 %v3768_v15, %v3767_v26  ;;  %v3755_v18 = vld [vmem:[#allocation2 + $0x38] sm:$0xf]  ;;  %v3783_v52 = vld [vmem:[#allocation2 + $0x3c] sm:$0xf]  ;;  %v3815_v3 = vpack.c.bf16 %v3769_v10, %v3769_v10  ;;  %5019 = vmatpush.bf16.msrb.mxu1 %v12293_v42 }
 0x441   : > { %v3813_v30 = vpack.c.bf16 %v3755_v18, %v3755_v18  ;;  %v3789_v48 = vld [vmem:[#allocation2 + $0x35] sm:$0xff]  ;;  %4341 = vmatmul.bf16.gmra.mxu0 %v3807_v33  ;;  %v3817_v34 = vpack.c.bf16 %v3783_v52, %v3783_v52 }
 0x442   : > { %4369 = vmatmul.bf16.gmra.mxu1 %v3808_v46  ;;  %v3776_v21 = vld [vmem:[#allocation2 + $0x3b] sm:$0xf]  ;;  %v3748_v35 = vld [vmem:[#allocation2 + $0x37] sm:$0xf]  ;;  %v3811_v55 = vpack.c.bf16 %v3789_v48, %v3788_v2  ;;  %v12292_v46 = vld [vmem:[#allocation9 + $0x30] sm:$0xff] }
 0x443   : > { %4318 = vmatmul.bf16.gmra.mxu3 %v3813_v30  ;;  %4500 = vst [vmem:[#allocation2 + $0x3c] sm:$0x1] %v13751_v20  ;;  %v3812_v36 = vpack.c.bf16 %v3748_v35, %v3748_v35  ;;  %v3782_v45 = vld [vmem:[#allocation2 + $0x34] sm:$0xff]  ;;  %v3816_v43 = vpack.c.bf16 %v3776_v21, %v3776_v21 }
 0x444   : > { %v3810_v5 = vpack.c.bf16 %v3782_v45, %v3781_v7  ;;  %v3775_v51 = vld [vmem:[#allocation2 + $0x33] sm:$0xff]  ;;  %5020 = vmatpush.bf16.msrb.mxu1 %v12292_v46  ;;  %v12288_v45 = vld [vmem:[#allocation9 + $0x10] sm:$0xff] }
 0x445   : > { %v3809_v6 = vpack.c.bf16 %v3775_v51, %v3774_v32  ;;  %v12291_v48 = vld [vmem:[#allocation9 + $0x28] sm:$0xff]  ;;  %v12290_v35 = vld [vmem:[#allocation9 + $0x20] sm:$0xff]  ;;  %v12340_v7 = vld [vmem:[#allocation9 + $0x1b0] sm:$0xff] }
 0x446   : > { %v14814_v0 = vld [vmem:[#allocation2 + $0x41] sm:$0xff]  ;;  %v12307_v2 = vld [vmem:[#allocation9 + $0xa8] sm:$0xff]  ;;  %v12306_v46 = vld [vmem:[#allocation9 + $0xa0] sm:$0xff] }
 0x447   : > { %7390 = vst [vmem:[#allocation2 + $0x48] sm:$0x1] %v13751_v20 }
 0x448   : > { %5021 = vmatpush.bf16.msrb.mxu1 %v12291_v48  ;;  %v12338_v48 = vld [vmem:[#allocation9 + $0x1a0] sm:$0xff] }
 0x449   : > { %4290 = vmatmul.bf16.gmra.mxu2 %v3812_v36 }
 0x44c   : > { %5022 = vmatpush.bf16.msrb.mxu1 %v12290_v35  ;;  %v12294_v35 = vld [vmem:[#allocation9 + $0x40] sm:$0xff] }
 0x450   : > { %5023 = vmatpush.bf16.msrb.mxu1 %v12289_v47 }
 0x451   : > { %4346 = vmatmul.bf16.gmra.mxu0 %v3814_v19 }
 0x452   : > { %4374 = vmatmul.bf16.gmra.mxu1 %v3815_v3  ;;  %v12301_v3 = vld [vmem:[#allocation9 + $0x78] sm:$0xff] }
 0x453   : > { %4415 = vmatmul.bf16.vlgmr.msra.gmra.mxu3 %v3796_v25  ;;  %5043 = vmatpush.bf16.msrb.mxu2 %v12301_v3  ;;  %v12300_v25 = vld [vmem:[#allocation9 + $0x70] sm:$0xff] }
 0x454   : > { %5024 = vmatpush.bf16.msrb.mxu1 %v12288_v45  ;;  %v12304_v45 = vld [vmem:[#allocation9 + $0x90] sm:$0xff] }
 0x457   : > { %5044 = vmatpush.bf16.msrb.mxu2 %v12300_v25 }
 0x459   : > { %4387 = vmatmul.bf16.vlgmr.msra.gmra.mxu2 %v3795_v53 }
 0x45b   : > { %5045 = vmatpush.bf16.msrb.mxu2 %v12299_v24 }
 0x461   : > { %4443 = vmatmul.bf16.vlgmr.msra.gmra.mxu0 %v3797_v39  ;;  %v12298_v39 = vld [vmem:[#allocation9 + $0x60] sm:$0xff] }
 0x462   : > { %5046 = vmatpush.bf16.msrb.mxu2 %v12298_v39  ;;  %v12305_v39 = vld [vmem:[#allocation9 + $0x98] sm:$0xff] }
 0x463   : > { %4420 = vmatmul.bf16.gmra.mxu3 %v3803_v57 }
 0x466   : > { %5047 = vmatpush.bf16.msrb.mxu2 %v12297_v17 }
 0x469   : > { %4392 = vmatmul.bf16.gmra.mxu2 %v3802_v61  ;;  %v12341_v61 = vld [vmem:[#allocation9 + $0x1b8] sm:$0xff] }
 0x46a   : > { %5163 = vmatpush.bf16.msrb.mxu0 %v12341_v61  ;;  %v12286_v61 = vld [vmem:[#allocation9] sm:$0xff] }
 0x46e   : > { %5164 = vmatpush.bf16.msrb.mxu0 %v12340_v7 }
 0x471   : > { %4448 = vmatmul.bf16.gmra.mxu0 %v3804_v16  ;;  %v12308_v16 = vld [vmem:[#allocation9 + $0xb0] sm:$0xff] }
 0x472   : > { %5068 = vmatpush.bf16.msrb.mxu3 %v12308_v16  ;;  %v12336_v16 = vld [vmem:[#allocation9 + $0x190] sm:$0xff] }
 0x473   : > { %4425 = vmatmul.bf16.gmra.mxu3 %v3810_v5  ;;  %v12296_v5 = vld [vmem:[#allocation9 + $0x50] sm:$0xff] }
 0x474   : > { %5048 = vmatpush.bf16.msrb.mxu2 %v12296_v5 }
 0x476   : > { %5069 = vmatpush.bf16.msrb.mxu3 %v12307_v2 }
 0x479   : > { %4397 = vmatmul.bf16.gmra.mxu2 %v3809_v6 }
 0x47a   : > { %5070 = vmatpush.bf16.msrb.mxu3 %v12306_v46  ;;  %v12317_v46 = vld [vmem:[#allocation9 + $0xf8] sm:$0xff] }
 0x47e   : > { %5071 = vmatpush.bf16.msrb.mxu3 %v12305_v39 }
 0x481   : > { %4453 = vmatmul.bf16.gmra.mxu0 %v3811_v55  ;;  %v12339_v55 = vld [vmem:[#allocation9 + $0x1a8] sm:$0xff] }
 0x482   : > { %5165 = vmatpush.bf16.msrb.mxu0 %v12339_v55  ;;  %5072 = vmatpush.bf16.msrb.mxu3 %v12304_v45  ;;  %v14881_v55 = vld [vmem:[%s15662_s28] ss:$0 sm:$0xff]  ;;  %s15673_s28 = sld [smem:[#allocation67_spill]] }
 0x483   : > { %4430 = vmatmul.bf16.gmra.mxu3 %v3817_v34  ;;  %v12295_v34 = vld [vmem:[#allocation9 + $0x48] sm:$0xff]  ;;  %v12316_v45 = vld [vmem:[#allocation9 + $0xf0] sm:$0xff] }
 0x484   : > { %5049 = vmatpush.bf16.msrb.mxu2 %v12295_v34  ;;  %v12335_v34 = vld [vmem:[#allocation9 + $0x188] sm:$0xff] }
 0x486   : > { %5166 = vmatpush.bf16.msrb.mxu0 %v12338_v48 }
 0x488   : > { %5050 = vmatpush.bf16.msrb.mxu2 %v12294_v35  ;;  %v12334_v35 = vld [vmem:[#allocation9 + $0x180] sm:$0xff] }
 0x489   : > { %4402 = vmatmul.bf16.gmra.mxu2 %v3816_v43 }
 0x48a   : > { %5167 = vmatpush.bf16.msrb.mxu0 %v12337_v9 }
 0x48e   : > { %5168 = vmatpush.bf16.msrb.mxu0 %v12336_v16 }
 0x491   : > { %4458 = vmatmul.bf16.gmra.mxu0 %v3818_v63  ;;  %v12287_v63 = vld [vmem:[#allocation9 + $0x8] sm:$0xff] }
 0x492   : > { %5025 = vmatpush.bf16.msrb.mxu1 %v12287_v63  ;;  %5169 = vmatpush.bf16.msrb.mxu0 %v12335_v34  ;;  %v12323_v34 = vld [vmem:[#allocation9 + $0x128] sm:$0xff] }
 0x494   : > { %v14817_v60 = vpop.f32.mrf.mxu3 }
 0x496   : > { %5026 = vmatpush.bf16.msrb.mxu1 %v12286_v61  ;;  %5170 = vmatpush.bf16.msrb.mxu0 %v12334_v35 }
 0x49a   : > { %5091 = vmatpush.bf16.msra.mxu1 %v12317_v46 }
 0x49c   : > { %v14819_v4 = vpop.f32.mrf.mxu2  ;;  %v14821_v8 = vpop.f32.mrf.mxu3 }
 0x49d   : > { %v4305_v43 = vadd.f32 %v14817_v60, %v14819_v4 }
 0x49e   : > { %v14823_v62 = vpop.f32.mrf.mxu0  ;;  %5092 = vmatpush.bf16.msra.mxu1 %v12316_v45 }
 0x49f   : > { %v14825_v26 = vpop.f32.mrf.mxu1  ;;  %v4333_v24 = vadd.f32 %v14823_v62, %v4305_v43 }
 0x4a1   : > { %v4361_v60 = vadd.f32 %v14825_v26, %v4333_v24  ;;  %v12303_v26 = vld [vmem:[#allocation9 + $0x88] sm:$0xff] }
 0x4a2   : > { %5073 = vmatpush.bf16.msrb.mxu3 %v12303_v26 }
 0x4a4   : > { %v14827_v15 = vpop.f32.mrf.mxu2  ;;  %v14829_v33 = vpop.f32.mrf.mxu3 }
 0x4a5   : > { %v4307_v4 = vadd.f32 %v14821_v8, %v14827_v15  ;;  %v14884_v8 = vld [vmem:[%s15663_s26] ss:$0 sm:$0xff]  ;;  %s15674_s26 = sld [smem:[#allocation70_spill]] }
 0x4a6   : > { %v14831_v18 = vpop.f32.mrf.mxu0 }
 0x4a7   : > { %v14833_v30 = vpop.f32.mrf.mxu1 }
 0x4ac   : > { %v14835_v12 = vpop.f32.mrf.mxu2  ;;  %v14837_v10 = vpop.f32.mrf.mxu3 }
 0x4ad   : > { %v4310_v63 = vadd.f32 %v14829_v33, %v14835_v12 }
 0x4ae   : > { %v14839_v21 = vpop.f32.mrf.mxu0 }
 0x4af   : > { %v14841_v52 = vpop.f32.mrf.mxu1  ;;  %v4338_v39 = vadd.f32 %v14839_v21, %v4310_v63 }
 0x4b4   : > { %v14843_v27 = vpop.f32.mrf.mxu2  ;;  %v14845_v36 = vpop.f32.mrf.mxu3 }
 0x4b5   : > { %v4312_v61 = vadd.f32 %v14837_v10, %v14843_v27 }
 0x4b6   : > { %v14847_v22 = vpop.f32.mrf.mxu0 }
 0x4b7   : > { %v14849_v19 = vpop.f32.mrf.mxu1 }
 0x4bc   : > { %v14851_v54 = vpop.f32.mrf.mxu2  ;;  %v14853_v58 = vpop.f32.mrf.mxu3 }
 0x4be   : > { %v14855_v28 = vpop.f32.mrf.mxu0 }
 0x4bf   : > { %v14857_v53 = vpop.f32.mrf.mxu1 }
 0x4c4   : > { %v14859_v50 = vpop.f32.mrf.mxu2 }
 0x4c6   : > { %v14861_v1 = vpop.f32.mrf.mxu3  ;;  %v14863_v57 = vpop.f32.mrf.mxu0 }
 0x4c7   : > { %v14865_v29 = vpop.f32.mrf.mxu1 }
 0x4cc   : > { %v14867_v44 = vpop.f32.mrf.mxu2 }
 0x4ce   : > { %v4321_v51 = vpop.f32.mrf.mxu3  ;;  %v14869_v32 = vpop.f32.mrf.mxu0 }
 0x4cf   : > { %v14871_v6 = vpop.f32.mrf.mxu1  ;;  %v4335_v51 = vadd.f32 %v14831_v18, %v4307_v4  ;;  %v12302_v18 = vld [vmem:[#allocation9 + $0x80] sm:$0xff]  ;;  %v4366_v4 = vadd.f32 %v14841_v52, %v4338_v39  ;;  %v12321_v39 = vld [vmem:[#allocation9 + $0x118] sm:$0xff] }
 0x4d0   : > { %5074 = vmatpush.bf16.msrb.mxu3 %v12302_v18 }
 0x4d1   : > { %v4363_v15 = vadd.f32 %v14833_v30, %v4335_v51 }
 0x4d4   : > { %v4293_v42 = vpop.f32.mrf.mxu2 }
 0x4d6   : > { %v4416_v3 = vpop.f32.mrf.mxu3  ;;  %v4349_v25 = vpop.f32.mrf.mxu0 }
 0x4d7   : > { %v4377_v47 = vpop.f32.mrf.mxu1 }
 0x4dc   : > { %v4388_v17 = vpop.f32.mrf.mxu2 }
 0x4dd   : > { %v4389_v7 = vadd.f32 %v4388_v17, %v4361_v60  ;;  %v12325_v60 = vld [vmem:[#allocation9 + $0x138] sm:$0xff] }
 0x4de   : > { %v4418_v5 = vpop.f32.mrf.mxu3  ;;  %v4444_v62 = vpop.f32.mrf.mxu0  ;;  %5115 = vmatpush.bf16.msra.mxu2 %v12325_v60  ;;  %v4317_v60 = vadd.f32 %v14853_v58, %v14859_v50 }
 0x4df   : > { %v4417_v2 = vadd.f32 %v4416_v3, %v4389_v7  ;;  %v12324_v7 = vld [vmem:[#allocation9 + $0x130] sm:$0xff] }
 0x4e0   : > { %v4345_v58 = vadd.f32 %v14863_v57, %v4317_v60 }
 0x4e1   : > { %v4445_v43 = vadd.f32 %v4444_v62, %v4417_v2  ;;  %v4340_v2 = vadd.f32 %v14847_v22, %v4312_v61  ;;  %v12322_v22 = vld [vmem:[#allocation9 + $0x120] sm:$0xff] }
 0x4e2   : > { %5116 = vmatpush.bf16.msra.mxu2 %v12324_v7 }
 0x4e3   : > { %v4467_v42 = vmul.f32 %v14881_v55, %v4445_v43  ;;  %v4368_v27 = vadd.f32 %v14849_v19, %v4340_v2 }
 0x4e4   : > { %v4390_v48 = vpop.f32.mrf.mxu2 }
 0x4e5   : > { %v4478_v3 = vadd.f32 %v14884_v8, %v4467_v42  ;;  %v4391_v25 = vadd.f32 %v4390_v48, %v4363_v15  ;;  %v4315_v15 = vadd.f32 %v14845_v36, %v14851_v54  ;;  %v12315_v48 = vld [vmem:[#allocation9 + $0xe8] sm:$0xff] }
 0x4e6   : > { %v4421_v47 = vpop.f32.mrf.mxu3  ;;  %v4446_v24 = vpop.f32.mrf.mxu0  ;;  %5117 = vmatpush.bf16.msra.mxu2 %v12323_v34  ;;  %5093 = vmatpush.bf16.msra.mxu1 %v12315_v48 }
 0x4e7   : > { %v4485_v30 = vmul.f32 0.01, %v4478_v3  ;;  %v4419_v9 = vadd.f32 %v4418_v5, %v4391_v25  ;;  %v4343_v36 = vadd.f32 %v14855_v28, %v4315_v15  ;;  %v12332_v28 = vld [vmem:[#allocation9 + $0x170] sm:$0xff]  ;;  %v4320_v15 = vadd.f32 %v14861_v1, %v14867_v44 }
 0x4e9   : > { %v4492_v33 = vmax.f32 %v4478_v3, %v4485_v30  ;;  %v4447_v12 = vadd.f32 %v4446_v24, %v4419_v9  ;;  %v12333_v24 = vld [vmem:[#allocation9 + $0x178] sm:$0xff] }
 0x4ea   : > { %5118 = vmatpush.bf16.msra.mxu2 %v12322_v22  ;;  %5139 = vmatpush.bf16.msra.mxu3 %v12333_v24 }
 0x4eb   : > { %4501 = vst [vmem:[#allocation2 + $0x8] sm:$0xff] %v4492_v33  ;;  %v4468_v17 = vmul.f32 %v14881_v55, %v4447_v12  ;;  %v4371_v12 = vadd.f32 %v14857_v53, %v4343_v36  ;;  %v12331_v53 = vld [vmem:[#allocation9 + $0x168] sm:$0xff] }
 0x4ec   : > { %v4393_v16 = vpop.f32.mrf.mxu2  ;;  %v12311_v36 = vld [vmem:[#allocation9 + $0xc8] sm:$0xff] }
 0x4ed   : > { %v4479_v62 = vadd.f32 %v14884_v8, %v4468_v17  ;;  %v4394_v21 = vadd.f32 %v4393_v16, %v4366_v4  ;;  %v12314_v17 = vld [vmem:[#allocation9 + $0xe0] sm:$0xff]  ;;  %v12320_v16 = vld [vmem:[#allocation9 + $0x110] sm:$0xff] }
 0x4ee   : > { %v4423_v51 = vpop.f32.mrf.mxu3  ;;  %v4449_v5 = vpop.f32.mrf.mxu0  ;;  %5119 = vmatpush.bf16.msra.mxu2 %v12321_v39  ;;  %5094 = vmatpush.bf16.msra.mxu1 %v12314_v17  ;;  %v12329_v39 = vld [vmem:[#allocation9 + $0x158] sm:$0xff] }
 0x4ef   : > { %v4486_v26 = vmul.f32 0.01, %v4479_v62  ;;  %v4422_v52 = vadd.f32 %v4421_v47, %v4394_v21  ;;  %5140 = vmatpush.bf16.msra.mxu3 %v12332_v28 }
 0x4f1   : > { %v4493_v43 = vmax.f32 %v4479_v62, %v4486_v26  ;;  %v4450_v10 = vadd.f32 %v4449_v5, %v4422_v52  ;;  %v12319_v26 = vld [vmem:[#allocation9 + $0x108] sm:$0xff] }
 0x4f2   : > { %v4508_v42 = vld [vmem:[#allocation2 + $0x7] sm:$0xff]  ;;  %5120 = vmatpush.bf16.msra.mxu2 %v12320_v16 }
 0x4f3   : > { %4502 = vst [vmem:[#allocation2 + $0x10] sm:$0xff] %v4493_v43  ;;  %v4469_v63 = vmul.f32 %v14881_v55, %v4450_v10  ;;  %v4551_v46 = vpack.c.bf16 %v4493_v43, %v4492_v33  ;;  %5141 = vmatpush.bf16.msra.mxu3 %v12331_v53 }
 0x4f4   : > { %v4395_v18 = vpop.f32.mrf.mxu2  ;;  %5340 = vst [vmem:[#allocation2 + $0x7] sm:$0x1] %v13751_v20 }
 0x4f5   : > { %v4480_v35 = vadd.f32 %v14884_v8, %v4469_v63  ;;  %v4396_v3 = vadd.f32 %v4395_v18, %v4368_v27  ;;  %5051 = vmatmul.bf16.vlgmr.msrb.gmra.mxu2 %v4551_v46  ;;  %v4373_v27 = vadd.f32 %v14865_v29, %v4345_v58 }
 0x4f6   : > { %v4426_v25 = vpop.f32.mrf.mxu3  ;;  %v4451_v19 = vpop.f32.mrf.mxu0  ;;  %5121 = vmatpush.bf16.msra.mxu2 %v12319_v26 }
 0x4f7   : > { %v4487_v54 = vmul.f32 0.01, %v4480_v35  ;;  %v4424_v47 = vadd.f32 %v4423_v51, %v4396_v3  ;;  %v12313_v51 = vld [vmem:[#allocation9 + $0xd8] sm:$0xff] }
 0x4f8   : > { %5095 = vmatpush.bf16.msra.mxu1 %v12313_v51  ;;  %v12348_v51 = vld [vmem:[%s15664_s15 + $0x30] sm:$0xff] }
 0x4f9   : > { %v4494_v30 = vmax.f32 %v4480_v35, %v4487_v54  ;;  %v4452_v9 = vadd.f32 %v4451_v19, %v4424_v47  ;;  %v12330_v35 = vld [vmem:[#allocation9 + $0x160] sm:$0xff]  ;;  %v4348_v54 = vadd.f32 %v14869_v32, %v4320_v15  ;;  %v12328_v32 = vld [vmem:[#allocation9 + $0x150] sm:$0xff] }
 0x4fa   : > { %v4509_v33 = vld [vmem:[#allocation2 + $0xf] sm:$0xff]  ;;  %5142 = vmatpush.bf16.msra.mxu3 %v12330_v35 }
 0x4fb   : > { %4503 = vst [vmem:[#allocation2 + $0x18] sm:$0xff] %v4494_v30  ;;  %v4470_v4 = vmul.f32 %v14881_v55, %v4452_v9  ;;  %v4550_v61 = vpack.c.bf16 %v4509_v33, %v4508_v42  ;;  %v4520_v43 = vld [vmem:[#allocation2 + $0x9] sm:$0xff]  ;;  %v12312_v42 = vld [vmem:[#allocation9 + $0xd0] sm:$0xff] }
 0x4fc   : > { %v4398_v45 = vpop.f32.mrf.mxu2  ;;  %v4544_v10 = vld [vmem:[#allocation2 + $0xd] sm:$0xff]  ;;  %5096 = vmatpush.bf16.msra.mxu1 %v12312_v42 }
 0x4fd   : > { %v4481_v7 = vadd.f32 %v14884_v8, %v4470_v4  ;;  %v4399_v62 = vadd.f32 %v4398_v45, %v4371_v12  ;;  %5027 = vmatmul.bf16.vlgmr.msrb.gmra.mxu1 %v4550_v61  ;;  %v12310_v12 = vld [vmem:[#allocation9 + $0xc0] sm:$0xff]  ;;  %v4376_v4 = vadd.f32 %v14871_v6, %v4348_v54  ;;  %v12327_v6 = vld [vmem:[#allocation9 + $0x148] sm:$0xff] }
 0x4fe   : > { %v4428_v21 = vpop.f32.mrf.mxu3  ;;  %v4454_v50 = vpop.f32.mrf.mxu0  ;;  %5143 = vmatpush.bf16.msra.mxu3 %v12329_v39 }
 0x4ff   : > { %v4488_v5 = vmul.f32 0.01, %v4481_v7  ;;  %v4427_v2 = vadd.f32 %v4426_v25, %v4399_v62  ;;  %v12318_v25 = vld [vmem:[#allocation9 + $0x100] sm:$0xff]  ;;  %v12349_v62 = vld [vmem:[%s15664_s15 + $0x38] sm:$0xff] }
 0x500   : > { %5122 = vmatpush.bf16.msra.mxu2 %v12318_v25  ;;  %5097 = vmatpush.bf16.msra.mxu1 %v12311_v36  ;;  %v12346_v25 = vld [vmem:[%s15664_s15 + $0x20] sm:$0xff] }
 0x501   : > { %v4495_v52 = vmax.f32 %v4481_v7, %v4488_v5  ;;  %v4455_v34 = vadd.f32 %v4454_v50, %v4427_v2 }
 0x502   : > { %v4521_v63 = vld [vmem:[#allocation2 + $0x11] sm:$0xff]  ;;  %5144 = vmatpush.bf16.msra.mxu3 %v12328_v32 }
 0x503   : > { %v4545_v57 = vld [vmem:[#allocation2 + $0x15] sm:$0xff]  ;;  %4504 = vst [vmem:[#allocation2 + $0x20] sm:$0xff] %v4495_v52  ;;  %v4471_v46 = vmul.f32 %v14881_v55, %v4455_v34  ;;  %v4552_v48 = vpack.c.bf16 %v4521_v63, %v4520_v43  ;;  %v4558_v22 = vpack.c.bf16 %v4495_v52, %v4494_v30 }
 0x504   : > { %v4556_v18 = vpack.c.bf16 %v4545_v57, %v4544_v10  ;;  %v4400_v3 = vpop.f32.mrf.mxu2  ;;  %v4510_v60 = vld [vmem:[#allocation2 + $0x17] sm:$0xff]  ;;  %5098 = vmatpush.bf16.msra.mxu1 %v12310_v12 }
 0x505   : > { %v4482_v29 = vadd.f32 %v14884_v8, %v4471_v46  ;;  %v4401_v19 = vadd.f32 %v4400_v3, %v4373_v27  ;;  %5075 = vmatmul.bf16.vlgmr.msrb.gmra.mxu3 %v4552_v48  ;;  %5056 = vmatmul.bf16.gmra.mxu2 %v4558_v22  ;;  %v12326_v57 = vld [vmem:[#allocation9 + $0x140] sm:$0xff]  ;;  %v12347_v46 = vld [vmem:[%s15664_s15 + $0x28] sm:$0xff] }
 0x506   : > { %5171 = vmatmul.bf16.vlgmr.msrb.gmra.mxu0 %v4556_v18  ;;  %v4431_v1 = vpop.f32.mrf.mxu3  ;;  %v4456_v44 = vpop.f32.mrf.mxu0  ;;  %5145 = vmatpush.bf16.msra.mxu3 %v12327_v6  ;;  %v4527_v12 = vld [vmem:[#allocation2 + $0x12] sm:$0xff] }
 0x507   : > { %v4489_v47 = vmul.f32 0.01, %v4482_v29  ;;  %v4429_v24 = vadd.f32 %v4428_v21, %v4401_v19  ;;  %v4532_v19 = vld [vmem:[#allocation2 + $0xb] sm:$0xff]  ;;  %v4539_v32 = vld [vmem:[#allocation2 + $0x14] sm:$0xff] }
 0x508   : > { %5275 = vmatpush.bf16.msrb.mxu1 %v12349_v62 }
 0x509   : > { %v4496_v30 = vmax.f32 %v4482_v29, %v4489_v47  ;;  %v4457_v9 = vadd.f32 %v4456_v44, %v4429_v24 }
 0x50a   : > { %v4511_v33 = vld [vmem:[#allocation2 + $0x1f] sm:$0xff]  ;;  %5146 = vmatpush.bf16.msra.mxu3 %v12326_v57 }
 0x50b   : > { %4505 = vst [vmem:[#allocation2 + $0x28] sm:$0xff] %v4496_v30  ;;  %v4472_v61 = vmul.f32 %v14881_v55, %v4457_v9  ;;  %v4557_v17 = vpack.c.bf16 %v4511_v33, %v4510_v60  ;;  %v4522_v2 = vld [vmem:[#allocation2 + $0x19] sm:$0xff]  ;;  %v12344_v33 = vld [vmem:[%s15664_s15 + $0x10] sm:$0xff] }
 0x50c   : > { %v4403_v28 = vpop.f32.mrf.mxu2  ;;  %v4546_v52 = vld [vmem:[#allocation2 + $0x1d] sm:$0xff]  ;;  %5276 = vmatpush.bf16.msrb.mxu1 %v12348_v51 }
 0x50d   : > { %v4483_v45 = vadd.f32 %v14884_v8, %v4472_v61  ;;  %v4404_v16 = vadd.f32 %v4403_v28, %v4376_v4  ;;  %5032 = vmatmul.bf16.gmra.mxu1 %v4557_v17  ;;  %v12345_v60 = vld [vmem:[%s15664_s15 + $0x18] sm:$0xff]  ;;  %v4526_v4 = vld [vmem:[#allocation2 + $0xa] sm:$0xff] }
 0x50e   : > { %v4433_v7 = vpop.f32.mrf.mxu3  ;;  %v4459_v21 = vpop.f32.mrf.mxu0  ;;  %v4553_v61 = vpack.c.bf16 %v4527_v12, %v4526_v4  ;;  %v12343_v17 = vld [vmem:[%s15664_s15 + $0x8] sm:$0xff]  ;;  %v12362_v12 = vld [vmem:[#allocation11 + $0x60] sm:$0xff] }
 0x50f   : > { %v4490_v58 = vmul.f32 0.01, %v4483_v45  ;;  %v4432_v50 = vadd.f32 %v4431_v1, %v4404_v16  ;;  %v4534_v7 = vld [vmem:[#allocation2 + $0x1b] sm:$0xff] }
 0x510   : > { %5277 = vmatpush.bf16.msrb.mxu1 %v12347_v46  ;;  %v5210_v46 = vpack.c.bf16 %v14806_v23, %v14806_v23  ;;  %v12357_v23 = vld [vmem:[#allocation11 + $0x38] sm:$0xff] }
 0x511   : > { %v4497_v53 = vmax.f32 %v4483_v45, %v4490_v58  ;;  %v4460_v5 = vadd.f32 %v4459_v21, %v4432_v50  ;;  %v4538_v45 = vld [vmem:[#allocation2 + $0xc] sm:$0xff]  ;;  %v12342_v21 = vld [vmem:[%s15664_s15] sm:$0xff]  ;;  %5859 = vmatpush.bf16.msrb.mxu2 %v12357_v23 }
 0x512   : > { %v4523_v26 = vld [vmem:[#allocation2 + $0x21] sm:$0xff]  ;;  %v4555_v16 = vpack.c.bf16 %v4539_v32, %v4538_v45  ;;  %v12371_v45 = vld [vmem:[#allocation11 + $0xa8] sm:$0xff] }
 0x513   : > { %v4547_v34 = vld [vmem:[#allocation2 + $0x25] sm:$0xff]  ;;  %4506 = vst [vmem:[#allocation2 + $0x30] sm:$0xff] %v4497_v53  ;;  %v4473_v43 = vmul.f32 %v14881_v55, %v4460_v5  ;;  %v4559_v10 = vpack.c.bf16 %v4523_v26, %v4522_v2  ;;  %v4565_v15 = vpack.c.bf16 %v4497_v53, %v4496_v30  ;;  %v4528_v50 = vld [vmem:[#allocation2 + $0x1a] sm:$0xff] }
 0x514   : > { %v4563_v27 = vpack.c.bf16 %v4547_v34, %v4546_v52  ;;  %v4405_v63 = vpop.f32.mrf.mxu2  ;;  %v4512_v55 = vld [vmem:[#allocation2 + $0x27] sm:$0xff]  ;;  %5278 = vmatpush.bf16.msrb.mxu1 %v12346_v25  ;;  %v4540_v53 = vld [vmem:[#allocation2 + $0x1c] sm:$0xff] }
 0x515   : > { %v4484_v42 = vadd.f32 %v14884_v8, %v4473_v43  ;;  %5080 = vmatmul.bf16.gmra.mxu3 %v4559_v10  ;;  %5061 = vmatmul.bf16.gmra.mxu2 %v4565_v15  ;;  %v4533_v8 = vld [vmem:[#allocation2 + $0x13] sm:$0xff]  ;;  %v4535_v28 = vld [vmem:[#allocation2 + $0x23] sm:$0xff] }
 0x516   : > { %5176 = vmatmul.bf16.gmra.mxu0 %v4563_v27  ;;  %v4461_v48 = vpop.f32.mrf.mxu0  ;;  %v4554_v9 = vpack.c.bf16 %v4533_v8, %v4532_v19  ;;  %v4561_v62 = vpack.c.bf16 %v4535_v28, %v4534_v7  ;;  %v4529_v58 = vld [vmem:[#allocation2 + $0x22] sm:$0xff] }
 0x517   : > { %v4491_v18 = vmul.f32 0.01, %v4484_v42  ;;  %v4560_v6 = vpack.c.bf16 %v4529_v58, %v4528_v50  ;;  %v4541_v51 = vld [vmem:[#allocation2 + $0x24] sm:$0xff] }
 0x518   : > { %5279 = vmatpush.bf16.msrb.mxu1 %v12345_v60  ;;  %v4562_v5 = vpack.c.bf16 %v4541_v51, %v4540_v53  ;;  %v12356_v19 = vld [vmem:[#allocation11 + $0x30] sm:$0xff]  ;;  %v12403_v51 = vld [vmem:[#allocation11 + $0x1a8] sm:$0xff] }
 0x519   : > { %v4498_v22 = vmax.f32 %v4484_v42, %v4491_v18  ;;  %5860 = vmatpush.bf16.msrb.mxu2 %v12356_v19  ;;  %v12404_v7 = vld [vmem:[#allocation11 + $0x1b0] sm:$0xff]  ;;  %v12359_v53 = vld [vmem:[#allocation11 + $0x48] sm:$0xff]  ;;  %v12401_v19 = vld [vmem:[#allocation11 + $0x198] sm:$0xff] }
 0x51a   : > { %v4513_v35 = vld [vmem:[#allocation2 + $0x2f] sm:$0xff] }
 0x51b   : > { %4507 = vst [vmem:[#allocation2 + $0x38] sm:$0xf] %v4498_v22  ;;  %v4564_v3 = vpack.c.bf16 %v4513_v35, %v4512_v55  ;;  %v4524_v29 = vld [vmem:[#allocation2 + $0x29] sm:$0xff] }
 0x51c   : > { %v4548_v44 = vld [vmem:[#allocation2 + $0x2d] sm:$0xff]  ;;  %5280 = vmatpush.bf16.msrb.mxu1 %v12344_v33 }
 0x51d   : > { %5037 = vmatmul.bf16.gmra.mxu1 %v4564_v3  ;;  %v4536_v2 = vld [vmem:[#allocation2 + $0x2b] sm:$0xff] }
 0x51e   : > { %v4530_v52 = vld [vmem:[#allocation2 + $0x2a] sm:$0xff] }
 0x51f   : > { %v4542_v43 = vld [vmem:[#allocation2 + $0x2c] sm:$0xff] }
 0x520   : > { %5281 = vmatpush.bf16.msrb.mxu1 %v12343_v17  ;;  %v12354_v33 = vld [vmem:[#allocation11 + $0x20] sm:$0xff]  ;;  %v12361_v17 = vld [vmem:[#allocation11 + $0x58] sm:$0xff] }
 0x522   : > { %v4525_v1 = vld [vmem:[#allocation2 + $0x31] sm:$0xff] }
 0x523   : > { %v4549_v36 = vld [vmem:[#allocation2 + $0x35] sm:$0xff]  ;;  %v4566_v54 = vpack.c.bf16 %v4525_v1, %v4524_v29  ;;  %v12365_v29 = vld [vmem:[#allocation11 + $0x78] sm:$0xff] }
 0x524   : > { %v4570_v47 = vpack.c.bf16 %v4549_v36, %v4548_v44  ;;  %v4531_v24 = vld [vmem:[#allocation2 + $0x32] sm:$0xff]  ;;  %5282 = vmatpush.bf16.msrb.mxu1 %v12342_v21  ;;  %5883 = vmatpush.bf16.msrb.mxu3 %v12365_v29  ;;  %v12364_v44 = vld [vmem:[#allocation11 + $0x70] sm:$0xff] }
 0x525   : > { %v4537_v39 = vld [vmem:[#allocation2 + $0x33] sm:$0xff]  ;;  %5085 = vmatmul.bf16.gmra.mxu3 %v4566_v54  ;;  %5123 = vmatmul.bf16.vlgmr.msra.gmra.mxu2 %v4554_v9  ;;  %v4567_v34 = vpack.c.bf16 %v4531_v24, %v4530_v52  ;;  %v12373_v54 = vld [vmem:[#allocation11 + $0xb8] sm:$0xff] }
 0x526   : > { %v4543_v30 = vld [vmem:[#allocation2 + $0x34] sm:$0xff]  ;;  %5181 = vmatmul.bf16.gmra.mxu0 %v4570_v47  ;;  %v4568_v26 = vpack.c.bf16 %v4537_v39, %v4536_v2  ;;  %v12372_v39 = vld [vmem:[#allocation11 + $0xb0] sm:$0xff] }
 0x527   : > { %5341 = vst [vmem:[#allocation2 + $0x38] sm:$0x1] %v13751_v20  ;;  %v4569_v10 = vpack.c.bf16 %v4543_v30, %v4542_v43  ;;  %v12355_v47 = vld [vmem:[#allocation11 + $0x28] sm:$0xff]  ;;  %5907 = vmatpush.bf16.msra.mxu0 %v12373_v54  ;;  %v12370_v52 = vld [vmem:[#allocation11 + $0xa0] sm:$0xff] }
 0x528   : > { %5884 = vmatpush.bf16.msrb.mxu3 %v12364_v44  ;;  %v12363_v24 = vld [vmem:[#allocation11 + $0x68] sm:$0xff]  ;;  %5861 = vmatpush.bf16.msrb.mxu2 %v12355_v47  ;;  %v12402_v43 = vld [vmem:[#allocation11 + $0x1a0] sm:$0xff]  ;;  %v12368_v47 = vld [vmem:[#allocation11 + $0x90] sm:$0xff] }
 0x529   : > { %v12351_v29 = vld [vmem:[#allocation11 + $0x8] sm:$0xff] }
 0x52b   : > { %5908 = vmatpush.bf16.msra.mxu0 %v12372_v39  ;;  %v12400_v39 = vld [vmem:[#allocation11 + $0x190] sm:$0xff] }
 0x52c   : > { %5885 = vmatpush.bf16.msrb.mxu3 %v12363_v24  ;;  %5862 = vmatpush.bf16.msrb.mxu2 %v12354_v33  ;;  %v12350_v24 = vld [vmem:[#allocation11] sm:$0xff] }
 0x52d   : > { %5099 = vmatmul.bf16.vlgmr.msra.gmra.mxu1 %v4553_v61  ;;  %v12405_v61 = vld [vmem:[#allocation11 + $0x1b8] sm:$0xff] }
 0x52e   : > { %6003 = vmatpush.bf16.msra.mxu1 %v12405_v61 }
 0x52f   : > { %5909 = vmatpush.bf16.msra.mxu0 %v12371_v45  ;;  %v14988_v45 = vld [vmem:[%s15667_s6] ss:$0 sm:$0xff]  ;;  %s15677_s6 = sld [smem:[#allocation77_spill]] }
 0x530   : > { %5886 = vmatpush.bf16.msrb.mxu3 %v12362_v12 }
 0x532   : > { %6004 = vmatpush.bf16.msra.mxu1 %v12404_v7 }
 0x533   : > { %5910 = vmatpush.bf16.msra.mxu0 %v12370_v52 }
 0x534   : > { %5887 = vmatpush.bf16.msrb.mxu3 %v12361_v17  ;;  %v14983_v17 = vld [vmem:[%s15666_s10] ss:$0 sm:$0xff]  ;;  %s15676_s10 = sld [smem:[#allocation71_spill]] }
 0x535   : > { %5147 = vmatmul.bf16.vlgmr.msra.gmra.mxu3 %v4555_v16  ;;  %5128 = vmatmul.bf16.gmra.mxu2 %v4561_v62  ;;  %v12353_v16 = vld [vmem:[#allocation11 + $0x18] sm:$0xff]  ;;  %v12360_v62 = vld [vmem:[#allocation11 + $0x50] sm:$0xff] }
 0x536   : > { %5863 = vmatpush.bf16.msrb.mxu2 %v12353_v16  ;;  %6005 = vmatpush.bf16.msra.mxu1 %v12403_v51  ;;  %v14991_v16 = vld [vmem:[%s15668_s0] ss:$0 sm:$0xff]  ;;  %s15678_s0 = sld [smem:[#allocation78_spill]] }
 0x538   : > { %5888 = vmatpush.bf16.msrb.mxu3 %v12360_v62  ;;  %v12367_v62 = vld [vmem:[#allocation11 + $0x88] sm:$0xff] }
 0x53a   : > { %6006 = vmatpush.bf16.msra.mxu1 %v12402_v43 }
 0x53c   : > { %5889 = vmatpush.bf16.msrb.mxu3 %v12359_v53  ;;  %v12381_v53 = vld [vmem:[#allocation11 + $0xf8] sm:$0xff] }
 0x53d   : > { %5104 = vmatmul.bf16.gmra.mxu1 %v4560_v6 }
 0x53e   : > { %6007 = vmatpush.bf16.msra.mxu1 %v12401_v19 }
 0x542   : > { %6008 = vmatpush.bf16.msra.mxu1 %v12400_v39 }
 0x545   : > { %5152 = vmatmul.bf16.gmra.mxu3 %v4562_v5  ;;  %5133 = vmatmul.bf16.gmra.mxu2 %v4568_v26 }
 0x54d   : > { %5109 = vmatmul.bf16.gmra.mxu1 %v4567_v34  ;;  %v12352_v34 = vld [vmem:[#allocation11 + $0x10] sm:$0xff] }
 0x54e   : > { %5864 = vmatpush.bf16.msrb.mxu2 %v12352_v34 }
 0x552   : > { %5865 = vmatpush.bf16.msrb.mxu2 %v12351_v29 }
 0x555   : > { %5157 = vmatmul.bf16.gmra.mxu3 %v4569_v10  ;;  %v12358_v10 = vld [vmem:[#allocation11 + $0x40] sm:$0xff] }
 0x556   : > { %5890 = vmatpush.bf16.msrb.mxu3 %v12358_v10  ;;  %5866 = vmatpush.bf16.msrb.mxu2 %v12350_v24 }
 0x55a   : > { %5931 = vmatpush.bf16.msra.mxu2 %v12381_v53 }
 0x55d   : > { %5283 = vmatmul.bf16.vlgmr.msrb.gmra.mxu1 %v14766_v56 }
 0x56d   : > { %5288 = vmatmul.bf16.gmra.mxu1 %v14787_v41 }
 0x578   : > { %v5052_v63 = vpop.f32.mrf.mxu2 }
 0x57a   : > { %v5028_v27 = vpop.f32.mrf.mxu1 }
 0x57b   : > { %v5053_v21 = vadd.f32 %v5052_v63, %v5028_v27 }
 0x57d   : > { %5293 = vmatmul.bf16.gmra.mxu1 %v14799_v37 }
 0x580   : > { %v14940_v48 = vpop.f32.mrf.mxu2 }
 0x582   : > { %v14934_v15 = vpop.f32.mrf.mxu1 }
 0x583   : > { %v5172_v58 = vpop.f32.mrf.mxu0  ;;  %v5055_v27 = vadd.f32 %v14940_v48, %v14934_v15  ;;  %v14978_v48 = vld [vmem:[%s15665_s18] ss:$0 sm:$0xff]  ;;  %s15675_s18 = sld [smem:[#allocation68_spill]] }
 0x588   : > { %v5076_v57 = vpop.f32.mrf.mxu3  ;;  %v14948_v22 = vpop.f32.mrf.mxu2 }
 0x589   : > { %v5077_v50 = vadd.f32 %v5076_v57, %v5053_v21  ;;  %v12369_v57 = vld [vmem:[#allocation11 + $0x98] sm:$0xff] }
 0x58a   : > { %v14936_v42 = vpop.f32.mrf.mxu1  ;;  %5911 = vmatpush.bf16.msra.mxu0 %v12369_v57 }
 0x58b   : > { %v5174_v44 = vpop.f32.mrf.mxu0 }
 0x58d   : > { %5298 = vmatmul.bf16.gmra.mxu1 %v5210_v46 }
 0x58e   : > { %5912 = vmatpush.bf16.msra.mxu0 %v12368_v47  ;;  %v12397_v47 = vld [vmem:[#allocation11 + $0x178] sm:$0xff] }
 0x590   : > { %v14942_v18 = vpop.f32.mrf.mxu3  ;;  %v14954_v35 = vpop.f32.mrf.mxu2 }
 0x591   : > { %v5079_v46 = vadd.f32 %v14942_v18, %v5055_v27  ;;  %v5058_v18 = vadd.f32 %v14948_v22, %v14936_v42  ;;  %v12399_v42 = vld [vmem:[#allocation11 + $0x188] sm:$0xff] }
 0x592   : > { %v14944_v56 = vpop.f32.mrf.mxu1  ;;  %5913 = vmatpush.bf16.msra.mxu0 %v12367_v62  ;;  %6009 = vmatpush.bf16.msra.mxu1 %v12399_v42 }
 0x593   : > { %v5060_v52 = vadd.f32 %v14954_v35, %v14944_v56 }
 0x598   : > { %v14950_v37 = vpop.f32.mrf.mxu3  ;;  %v14958_v8 = vpop.f32.mrf.mxu2 }
 0x59a   : > { %v14946_v41 = vpop.f32.mrf.mxu1 }
 0x59b   : > { %v5063_v24 = vadd.f32 %v14958_v8, %v14946_v41 }
 0x5a0   : > { %v14956_v3 = vpop.f32.mrf.mxu3  ;;  %v14962_v30 = vpop.f32.mrf.mxu2 }
 0x5a2   : > { %v14952_v55 = vpop.f32.mrf.mxu1 }
 0x5a8   : > { %v14960_v1 = vpop.f32.mrf.mxu3  ;;  %v5124_v32 = vpop.f32.mrf.mxu2 }
 0x5aa   : > { %v5100_v25 = vpop.f32.mrf.mxu1 }
 0x5ab   : > { %v5101_v5 = vadd.f32 %v5100_v25, %v5077_v50 }
 0x5ad   : > { %v5125_v63 = vadd.f32 %v5124_v32, %v5101_v5  ;;  %v12389_v5 = vld [vmem:[#allocation11 + $0x138] sm:$0xff] }
 0x5ae   : > { %5955 = vmatpush.bf16.msra.mxu3 %v12389_v5 }
 0x5b0   : > { %v14964_v9 = vpop.f32.mrf.mxu3  ;;  %v5126_v2 = vpop.f32.mrf.mxu2 }
 0x5b2   : > { %v5102_v36 = vpop.f32.mrf.mxu1 }
 0x5b3   : > { %v5103_v54 = vadd.f32 %v5102_v36, %v5079_v46  ;;  %v5082_v36 = vadd.f32 %v14950_v37, %v5058_v18 }
 0x5b5   : > { %v5127_v33 = vadd.f32 %v5126_v2, %v5103_v54  ;;  %v12366_v2 = vld [vmem:[#allocation11 + $0x80] sm:$0xff] }
 0x5b6   : > { %5914 = vmatpush.bf16.msra.mxu0 %v12366_v2  ;;  %v12378_v2 = vld [vmem:[#allocation11 + $0xe0] sm:$0xff] }
 0x5b8   : > { %v5148_v28 = vpop.f32.mrf.mxu3  ;;  %v5129_v12 = vpop.f32.mrf.mxu2 }
 0x5b9   : > { %v5149_v23 = vadd.f32 %v5148_v28, %v5125_v63 }
 0x5ba   : > { %v14966_v60 = vpop.f32.mrf.mxu1  ;;  %5979 = vmatpush.bf16.msrb.mxu0 %v12397_v47 }
 0x5bb   : > { %v5173_v15 = vadd.f32 %v5172_v58, %v5149_v23  ;;  %v5106_v22 = vadd.f32 %v14966_v60, %v5082_v36  ;;  %v5177_v58 = vpop.f32.mrf.mxu0  ;;  %v5084_v60 = vadd.f32 %v14956_v3, %v5060_v52  ;;  %v12388_v3 = vld [vmem:[#allocation11 + $0x130] sm:$0xff] }
 0x5bc   : > { %5956 = vmatpush.bf16.msra.mxu3 %v12388_v3 }
 0x5bd   : > { %v5191_v32 = vmul.f32 %v14978_v48, %v5173_v15  ;;  %v5130_v34 = vadd.f32 %v5129_v12, %v5106_v22  ;;  %v12380_v15 = vld [vmem:[#allocation11 + $0xf0] sm:$0xff] }
 0x5be   : > { %5932 = vmatpush.bf16.msra.mxu2 %v12380_v15 }
 0x5bf   : > { %v5201_v37 = vadd.f32 %v14988_v45, %v5191_v32 }
 0x5c0   : > { %v5150_v26 = vpop.f32.mrf.mxu3  ;;  %v5131_v27 = vpop.f32.mrf.mxu2 }
 0x5c1   : > { %v5151_v28 = vadd.f32 %v5150_v26, %v5127_v33  ;;  %v12398_v26 = vld [vmem:[#allocation11 + $0x180] sm:$0xff] }
 0x5c2   : > { %v14968_v4 = vpop.f32.mrf.mxu1  ;;  %6010 = vmatpush.bf16.msra.mxu1 %v12398_v26 }
 0x5c3   : > { %v5175_v50 = vadd.f32 %v5174_v44, %v5151_v28  ;;  %v5108_v29 = vadd.f32 %v14968_v4, %v5084_v60  ;;  %v5179_v39 = vpop.f32.mrf.mxu0  ;;  %v5087_v4 = vadd.f32 %v14960_v1, %v5063_v24 }
 0x5c5   : > { %v5192_v10 = vmul.f32 %v14978_v48, %v5175_v50  ;;  %v5132_v18 = vadd.f32 %v5131_v27, %v5108_v29  ;;  %v12379_v50 = vld [vmem:[#allocation11 + $0xe8] sm:$0xff]  ;;  %v12385_v29 = vld [vmem:[#allocation11 + $0x118] sm:$0xff] }
 0x5c6   : > { %5933 = vmatpush.bf16.msra.mxu2 %v12379_v50 }
 0x5c7   : > { %v5202_v44 = vadd.f32 %v14988_v45, %v5192_v10 }
 0x5c8   : > { %v5153_v61 = vpop.f32.mrf.mxu3 }
 0x5c9   : > { %v5154_v63 = vadd.f32 %v5153_v61, %v5130_v34  ;;  %v12386_v34 = vld [vmem:[#allocation11 + $0x120] sm:$0xff] }
 0x5ca   : > { %v14970_v6 = vpop.f32.mrf.mxu1  ;;  %5934 = vmatpush.bf16.msra.mxu2 %v12378_v2 }
 0x5cb   : > { %v5178_v35 = vadd.f32 %v5177_v58, %v5154_v63  ;;  %v5111_v32 = vadd.f32 %v14970_v6, %v5087_v4  ;;  %v5065_v6 = vadd.f32 %v14962_v30, %v14952_v55  ;;  %v5182_v60 = vpop.f32.mrf.mxu0 }
 0x5cd   : > { %v5193_v12 = vmul.f32 %v14978_v48, %v5178_v35  ;;  %v5089_v26 = vadd.f32 %v14964_v9, %v5065_v6  ;;  %v12377_v9 = vld [vmem:[#allocation11 + $0xd8] sm:$0xff] }
 0x5ce   : > { %5935 = vmatpush.bf16.msra.mxu2 %v12377_v9 }
 0x5cf   : > { %v5203_v1 = vadd.f32 %v14988_v45, %v5193_v12  ;;  %v12393_v12 = vld [vmem:[#allocation11 + $0x158] sm:$0xff] }
 0x5d0   : > { %v5155_v57 = vpop.f32.mrf.mxu3 }
 0x5d1   : > { %v5156_v61 = vadd.f32 %v5155_v57, %v5132_v18  ;;  %v12384_v18 = vld [vmem:[#allocation11 + $0x110] sm:$0xff] }
 0x5d2   : > { %v14975_v25 = vpop.f32.mrf.mxu1 }
 0x5d3   : > { %v5180_v22 = vadd.f32 %v5179_v39, %v5156_v61  ;;  %v5113_v55 = vadd.f32 %v14975_v25, %v5089_v26  ;;  %v12394_v25 = vld [vmem:[#allocation11 + $0x160] sm:$0xff]  ;;  %v12376_v39 = vld [vmem:[#allocation11 + $0xd0] sm:$0xff]  ;;  %v5184_v61 = vpop.f32.mrf.mxu0 }
 0x5d4   : > { %5936 = vmatpush.bf16.msra.mxu2 %v12376_v39 }
 0x5d5   : > { %v5194_v10 = vmul.f32 %v14978_v48, %v5180_v22  ;;  %v12375_v22 = vld [vmem:[#allocation11 + $0xc8] sm:$0xff] }
 0x5d7   : > { %v5204_v35 = vadd.f32 %v14988_v45, %v5194_v10 }
 0x5d8   : > { %v5158_v62 = vpop.f32.mrf.mxu3  ;;  %5937 = vmatpush.bf16.msra.mxu2 %v12375_v22 }
 0x5da   : > { %v5284_v7 = vpop.f32.mrf.mxu1 }
 0x5db   : > { %v5306_v21 = vmul.f32 %v14983_v17, %v5284_v7  ;;  %v5134_v7 = vpop.f32.mrf.mxu2 }
 0x5dc   : > { %v5135_v53 = vadd.f32 %v5134_v7, %v5111_v32 }
 0x5dd   : > { %v5316_v51 = vadd.f32 %v14991_v16, %v5306_v21 }
 0x5de   : > { %v5159_v52 = vadd.f32 %v5158_v62, %v5135_v53  ;;  %v12392_v53 = vld [vmem:[#allocation11 + $0x150] sm:$0xff] }
 0x5df   : > { %v5322_v43 = vadd.f32 %v5316_v51, %v5201_v37  ;;  %v12387_v37 = vld [vmem:[#allocation11 + $0x128] sm:$0xff]  ;;  %v12396_v51 = vld [vmem:[#allocation11 + $0x170] sm:$0xff] }
 0x5e0   : > { %5957 = vmatpush.bf16.msra.mxu3 %v12387_v37  ;;  %5980 = vmatpush.bf16.msrb.mxu0 %v12396_v51  ;;  %v12383_v51 = vld [vmem:[#allocation11 + $0x108] sm:$0xff] }
 0x5e1   : > { %v5328_v46 = vmul.f32 0.01, %v5322_v43 }
 0x5e2   : > { %v5286_v23 = vpop.f32.mrf.mxu1 }
 0x5e3   : > { %v5334_v19 = vmax.f32 %v5322_v43, %v5328_v46  ;;  %v5307_v56 = vmul.f32 %v14983_v17, %v5286_v23  ;;  %v12395_v43 = vld [vmem:[#allocation11 + $0x168] sm:$0xff]  ;;  %v5183_v46 = vadd.f32 %v5182_v60, %v5159_v52  ;;  %v12382_v52 = vld [vmem:[#allocation11 + $0x100] sm:$0xff] }
 0x5e4   : > { %5958 = vmatpush.bf16.msra.mxu3 %v12386_v34  ;;  %5981 = vmatpush.bf16.msrb.mxu0 %v12395_v43  ;;  %v12391_v43 = vld [vmem:[#allocation11 + $0x148] sm:$0xff] }
 0x5e5   : > { %5342 = vst [vmem:[#allocation2 + $0x8] sm:$0xff] %v5334_v19  ;;  %v5317_v54 = vadd.f32 %v14991_v16, %v5307_v56  ;;  %v5160_v56 = vpop.f32.mrf.mxu3  ;;  %v5195_v47 = vmul.f32 %v14978_v48, %v5183_v46  ;;  %v12390_v46 = vld [vmem:[#allocation11 + $0x140] sm:$0xff] }
 0x5e7   : > { %v5323_v33 = vadd.f32 %v5317_v54, %v5202_v44 }
 0x5e8   : > { %5959 = vmatpush.bf16.msra.mxu3 %v12385_v29  ;;  %5982 = vmatpush.bf16.msrb.mxu0 %v12394_v25 }
 0x5e9   : > { %v5329_v36 = vmul.f32 0.01, %v5323_v33 }
 0x5ea   : > { %v5289_v28 = vpop.f32.mrf.mxu1 }
 0x5eb   : > { %v5335_v42 = vmax.f32 %v5323_v33, %v5329_v36  ;;  %v5308_v41 = vmul.f32 %v14983_v17, %v5289_v28 }
 0x5ec   : > { %v5348_v8 = vld [vmem:[#allocation2 + $0x7] sm:$0xff]  ;;  %5960 = vmatpush.bf16.msra.mxu3 %v12384_v18  ;;  %5983 = vmatpush.bf16.msrb.mxu0 %v12393_v12 }
 0x5ed   : > { %v15011_v21 = vpack.c.bf16 %v5335_v42, %v5334_v19  ;;  %5343 = vst [vmem:[#allocation2 + $0x10] sm:$0xff] %v5335_v42  ;;  %v5318_v58 = vadd.f32 %v14991_v16, %v5308_v41  ;;  %v5136_v19 = vpop.f32.mrf.mxu2  ;;  %v5205_v42 = vadd.f32 %v14988_v45, %v5195_v47 }
 0x5ee   : > { %6059 = vst [vmem:[#allocation2 + $0x7] sm:$0x1] %v13751_v20  ;;  %v5137_v15 = vadd.f32 %v5136_v19, %v5113_v55 }
 0x5ef   : > { %v5324_v5 = vadd.f32 %v5318_v58, %v5203_v1  ;;  %5891 = vmatmul.bf16.vlgmr.msrb.gmra.mxu3 %v15011_v21 }
 0x5f0   : > { %v5161_v24 = vadd.f32 %v5160_v56, %v5137_v15  ;;  %5961 = vmatpush.bf16.msra.mxu3 %v12383_v51  ;;  %5984 = vmatpush.bf16.msrb.mxu0 %v12392_v53 }
 0x5f1   : > { %v5330_v27 = vmul.f32 0.01, %v5324_v5 }
 0x5f2   : > { %v5291_v30 = vpop.f32.mrf.mxu1  ;;  %v5185_v62 = vadd.f32 %v5184_v61, %v5161_v24 }
 0x5f3   : > { %v5336_v63 = vmax.f32 %v5324_v5, %v5330_v27  ;;  %v5309_v57 = vmul.f32 %v14983_v17, %v5291_v30  ;;  %v12374_v5 = vld [vmem:[#allocation11 + $0xc0] sm:$0xff] }
 0x5f4   : > { %v5349_v23 = vld [vmem:[#allocation2 + $0xf] sm:$0xff]  ;;  %v5196_v2 = vmul.f32 %v14978_v48, %v5185_v62  ;;  %5938 = vmatpush.bf16.msra.mxu2 %v12374_v5  ;;  %5962 = vmatpush.bf16.msra.mxu3 %v12382_v52 }
 0x5f5   : > { %5344 = vst [vmem:[#allocation2 + $0x18] sm:$0xff] %v5336_v63  ;;  %v5319_v44 = vadd.f32 %v14991_v16, %v5309_v57  ;;  %v5390_v54 = vpack.c.bf16 %v5349_v23, %v5348_v8  ;;  %v5360_v28 = vld [vmem:[#allocation2 + $0x9] sm:$0xff]  ;;  %5985 = vmatpush.bf16.msrb.mxu0 %v12391_v43 }
 0x5f6   : > { %v5384_v7 = vld [vmem:[#allocation2 + $0xd] sm:$0xff]  ;;  %v5206_v30 = vadd.f32 %v14988_v45, %v5196_v2 }
 0x5f7   : > { %v5325_v3 = vadd.f32 %v5319_v44, %v5204_v35  ;;  %5867 = vmatmul.bf16.vlgmr.msrb.gmra.mxu2 %v5390_v54  ;;  %v7014_v54 = vmul.f32 0.01, %v14545_v59 }
 0x5f9   : > { %v5331_v33 = vmul.f32 0.01, %v5325_v3  ;;  %5986 = vmatpush.bf16.msrb.mxu0 %v12390_v46  ;;  %v15046_v15 = vmax.f32 %v14545_v59, %v7014_v54  ;;  %v12429_v54 = vld [vmem:[#allocation12 + $0xb8] sm:$0xff] }
 0x5fa   : > { %v5294_v4 = vpop.f32.mrf.mxu1 }
 0x5fb   : > { %v5337_v36 = vmax.f32 %v5325_v3, %v5331_v33  ;;  %v5310_v32 = vmul.f32 %v14983_v17, %v5294_v4 }
 0x5fc   : > { %v5361_v41 = vld [vmem:[#allocation2 + $0x11] sm:$0xff] }
 0x5fd   : > { %v5385_v8 = vld [vmem:[#allocation2 + $0x15] sm:$0xff]  ;;  %5345 = vst [vmem:[#allocation2 + $0x20] sm:$0xff] %v5337_v36  ;;  %v5320_v1 = vadd.f32 %v14991_v16, %v5310_v32  ;;  %v5392_v58 = vpack.c.bf16 %v5361_v41, %v5360_v28  ;;  %v15029_v37 = vpack.c.bf16 %v5337_v36, %v5336_v63  ;;  %v5366_v41 = vld [vmem:[#allocation2 + $0xa] sm:$0xff] }
 0x5fe   : > { %v5396_v50 = vpack.c.bf16 %v5385_v8, %v5384_v7  ;;  %v5350_v27 = vld [vmem:[#allocation2 + $0x17] sm:$0xff]  ;;  %v5372_v8 = vld [vmem:[#allocation2 + $0xb] sm:$0xff] }
 0x5ff   : > { %v5326_v6 = vadd.f32 %v5320_v1, %v5205_v42  ;;  %5915 = vmatmul.bf16.vlgmr.msra.gmra.mxu0 %v5392_v58  ;;  %5896 = vmatmul.bf16.gmra.mxu3 %v15029_v37  ;;  %v5367_v62 = vld [vmem:[#allocation2 + $0x12] sm:$0xff] }
 0x600   : > { %6011 = vmatmul.bf16.vlgmr.msra.gmra.mxu1 %v5396_v50  ;;  %v5373_v42 = vld [vmem:[#allocation2 + $0x13] sm:$0xff]  ;;  %v5393_v22 = vpack.c.bf16 %v5367_v62, %v5366_v41  ;;  %6617 = vmatpush.bf16.msra.mxu0 %v12429_v54  ;;  %v12436_v62 = vld [vmem:[#allocation12 + $0xf0] sm:$0xff] }
 0x601   : > { %v5332_v26 = vmul.f32 0.01, %v5326_v6  ;;  %v5394_v1 = vpack.c.bf16 %v5373_v42, %v5372_v8  ;;  %v5379_v58 = vld [vmem:[#allocation2 + $0x14] sm:$0xff]  ;;  %v5378_v50 = vld [vmem:[#allocation2 + $0xc] sm:$0xff] }
 0x602   : > { %v5296_v34 = vpop.f32.mrf.mxu1  ;;  %v5395_v51 = vpack.c.bf16 %v5379_v58, %v5378_v50  ;;  %v12427_v42 = vld [vmem:[#allocation12 + $0xa8] sm:$0xff]  ;;  %v12410_v8 = vld [vmem:[#allocation12 + $0x20] sm:$0xff]  ;;  %v12409_v58 = vld [vmem:[#allocation12 + $0x18] sm:$0xff] }
 0x603   : > { %v15033_v60 = vmax.f32 %v5326_v6, %v5332_v26  ;;  %v5311_v10 = vmul.f32 %v14983_v17, %v5296_v34  ;;  %v12415_v50 = vld [vmem:[#allocation12 + $0x48] sm:$0xff] }
 0x604   : > { %v5351_v55 = vld [vmem:[#allocation2 + $0x1f] sm:$0xff] }
 0x605   : > { %5346 = vst [vmem:[#allocation2 + $0x28] sm:$0xff] %v15033_v60  ;;  %v5321_v63 = vadd.f32 %v14991_v16, %v5311_v10  ;;  %v5397_v48 = vpack.c.bf16 %v5351_v55, %v5350_v27  ;;  %v5362_v17 = vld [vmem:[#allocation2 + $0x19] sm:$0xff] }
 0x606   : > { %v5386_v56 = vld [vmem:[#allocation2 + $0x1d] sm:$0xff] }
 0x607   : > { %v5327_v57 = vadd.f32 %v5321_v63, %v5206_v30  ;;  %5872 = vmatmul.bf16.gmra.mxu2 %v5397_v48  ;;  %v5368_v5 = vld [vmem:[#allocation2 + $0x1a] sm:$0xff] }
 0x608   : > { %v5374_v2 = vld [vmem:[#allocation2 + $0x1b] sm:$0xff] }
 0x609   : > { %v5333_v23 = vmul.f32 0.01, %v5327_v57  ;;  %v5380_v43 = vld [vmem:[#allocation2 + $0x1c] sm:$0xff] }
 0x60a   : > { %v5299_v9 = vpop.f32.mrf.mxu1 }
 0x60b   : > { %v15039_v29 = vmax.f32 %v5327_v57, %v5333_v23 }
 0x60c   : > { %v5363_v19 = vld [vmem:[#allocation2 + $0x21] sm:$0xff] }
 0x60d   : > { %v5387_v35 = vld [vmem:[#allocation2 + $0x25] sm:$0xff]  ;;  %5347 = vst [vmem:[#allocation2 + $0x30] sm:$0xff] %v15039_v29  ;;  %v5399_v45 = vpack.c.bf16 %v5363_v19, %v5362_v17  ;;  %v6752_v16 = vpack.c.bf16 %v15039_v29, %v15033_v60 }
 0x60e   : > { %v5403_v44 = vpack.c.bf16 %v5387_v35, %v5386_v56  ;;  %v5352_v3 = vld [vmem:[#allocation2 + $0x27] sm:$0xff] }
 0x60f   : > { %5920 = vmatmul.bf16.gmra.mxu0 %v5399_v45  ;;  %v5369_v6 = vld [vmem:[#allocation2 + $0x22] sm:$0xff] }
 0x610   : > { %6016 = vmatmul.bf16.gmra.mxu1 %v5403_v44  ;;  %v5375_v53 = vld [vmem:[#allocation2 + $0x23] sm:$0xff]  ;;  %v5400_v26 = vpack.c.bf16 %v5369_v6, %v5368_v5  ;;  %v12434_v5 = vld [vmem:[#allocation12 + $0xe0] sm:$0xff] }
 0x611   : > { %v5401_v52 = vpack.c.bf16 %v5375_v53, %v5374_v2  ;;  %v5381_v34 = vld [vmem:[#allocation2 + $0x24] sm:$0xff]  ;;  %v12426_v53 = vld [vmem:[#allocation12 + $0xa0] sm:$0xff] }
 0x612   : > { %v5300_v25 = vpop.f32.mrf.mxu1  ;;  %v5402_v10 = vpack.c.bf16 %v5381_v34, %v5380_v43  ;;  %v12421_v17 = vld [vmem:[#allocation12 + $0x78] sm:$0xff]  ;;  %v12420_v44 = vld [vmem:[#allocation12 + $0x70] sm:$0xff] }
 0x613   : > { %6594 = vmatpush.bf16.msrb.mxu3 %v12421_v17  ;;  %v12413_v35 = vld [vmem:[#allocation12 + $0x38] sm:$0xff]  ;;  %v12424_v17 = vld [vmem:[#allocation12 + $0x90] sm:$0xff] }
 0x614   : > { %v5353_v47 = vld [vmem:[#allocation2 + $0x2f] sm:$0xf]  ;;  %v5389_v33 = vld [vmem:[#allocation2 + $0x35] sm:$0xf]  ;;  %6571 = vmatpush.bf16.msrb.mxu2 %v12413_v35 }
 0x615   : > { %v5359_v24 = vld [vmem:[#allocation2 + $0x30] sm:$0xf]  ;;  %v5404_v39 = vpack.c.bf16 %v5353_v47, %v5352_v3  ;;  %7032 = vst [vmem:[#allocation2 + $0x38] sm:$0xff] %v15046_v15  ;;  %v5383_v32 = vld [vmem:[#allocation2 + $0x34] sm:$0xf]  ;;  %v12437_v25 = vld [vmem:[#allocation12 + $0xf8] sm:$0xff] }
 0x616   : > { %v5405_v18 = vpack.c.bf16 %v5359_v24, %v15033_v60  ;;  %v5365_v4 = vld [vmem:[#allocation2 + $0x31] sm:$0xf]  ;;  %v5364_v59 = vld [vmem:[#allocation2 + $0x29] sm:$0xff]  ;;  %v12412_v3 = vld [vmem:[#allocation12 + $0x30] sm:$0xff]  ;;  %6640 = vmatpush.bf16.msrb.mxu1 %v12437_v25 }
 0x617   : > { %v5388_v12 = vld [vmem:[#allocation2 + $0x2d] sm:$0xff]  ;;  %5877 = vmatmul.bf16.gmra.mxu2 %v5404_v39  ;;  %v5406_v28 = vpack.c.bf16 %v5365_v4, %v5364_v59  ;;  %6595 = vmatpush.bf16.msrb.mxu3 %v12420_v44 }
 0x618   : > { %5901 = vmatmul.bf16.gmra.mxu3 %v5405_v18  ;;  %v5371_v61 = vld [vmem:[#allocation2 + $0x32] sm:$0xf]  ;;  %v5410_v7 = vpack.c.bf16 %v5389_v33, %v5388_v12  ;;  %v5370_v27 = vld [vmem:[#allocation2 + $0x2a] sm:$0xff]  ;;  %6572 = vmatpush.bf16.msrb.mxu2 %v12412_v3  ;;  %v12419_v18 = vld [vmem:[#allocation12 + $0x68] sm:$0xff] }
 0x619   : > { %v5377_v36 = vld [vmem:[#allocation2 + $0x33] sm:$0xf]  ;;  %v5376_v55 = vld [vmem:[#allocation2 + $0x2b] sm:$0xff]  ;;  %v5407_v30 = vpack.c.bf16 %v5371_v61, %v5370_v27  ;;  %v12428_v33 = vld [vmem:[#allocation12 + $0xb0] sm:$0xff] }
 0x61a   : > { %6060 = vst [vmem:[#allocation2 + $0x34] sm:$0x1] %v13751_v20  ;;  %v5408_v63 = vpack.c.bf16 %v5377_v36, %v5376_v55  ;;  %v5382_v48 = vld [vmem:[#allocation2 + $0x2c] sm:$0xff]  ;;  %6618 = vmatpush.bf16.msra.mxu0 %v12428_v33  ;;  %6641 = vmatpush.bf16.msrb.mxu1 %v12436_v62  ;;  %v12407_v55 = vld [vmem:[#allocation12 + $0x8] sm:$0xff]  ;;  %v15087_v3 = vld [vmem:[%s15669_s4] ss:$0 sm:$0xff] }
 0x61b   : > { %v5409_v57 = vpack.c.bf16 %v5383_v32, %v5382_v48  ;;  %6596 = vmatpush.bf16.msrb.mxu3 %v12419_v18  ;;  %v12418_v36 = vld [vmem:[#allocation12 + $0x60] sm:$0xff]  ;;  %v12411_v32 = vld [vmem:[#allocation12 + $0x28] sm:$0xff]  ;;  %v12417_v59 = vld [vmem:[#allocation12 + $0x58] sm:$0xff]  ;;  %s15679_s4 = sld [smem:[#allocation72_spill]] }
 0x61c   : > { %6573 = vmatpush.bf16.msrb.mxu2 %v12411_v32  ;;  %v12433_v27 = vld [vmem:[#allocation12 + $0xd8] sm:$0xff]  ;;  %v12406_v35 = vld [vmem:[#allocation12] sm:$0xff]  ;;  %v12423_v18 = vld [vmem:[#allocation12 + $0x88] sm:$0xff] }
 0x61d   : > { %v12431_v33 = vld [vmem:[#allocation12 + $0xc8] sm:$0xff] }
 0x61e   : > { %6619 = vmatpush.bf16.msra.mxu0 %v12427_v42 }
 0x61f   : > { %5925 = vmatmul.bf16.gmra.mxu0 %v5406_v28  ;;  %6597 = vmatpush.bf16.msrb.mxu3 %v12418_v36 }
 0x620   : > { %6021 = vmatmul.bf16.gmra.mxu1 %v5410_v7  ;;  %6574 = vmatpush.bf16.msrb.mxu2 %v12410_v8 }
 0x622   : > { %6620 = vmatpush.bf16.msra.mxu0 %v12426_v53 }
 0x623   : > { %6598 = vmatpush.bf16.msrb.mxu3 %v12417_v59  ;;  %v15091_v59 = vld [vmem:[%s15670_s3] ss:$0 sm:$0xff]  ;;  %s15307_s3 = sand.u32 1, %s13660_s1  }
 0x624   : > { %6575 = vmatpush.bf16.msrb.mxu2 %v12409_v58  ;;  %s9590_s5 = scalar_lea.sflag [#allocation5], %s15307_s3 }
 0x627   : > { %5939 = vmatmul.bf16.vlgmr.msra.gmra.mxu2 %v5393_v22  ;;  %v12416_v22 = vld [vmem:[#allocation12 + $0x50] sm:$0xff] }
 0x628   : > { %5963 = vmatmul.bf16.vlgmr.msra.gmra.mxu3 %v5394_v1  ;;  %v12435_v1 = vld [vmem:[#allocation12 + $0xe8] sm:$0xff] }
 0x629   : > { %6599 = vmatpush.bf16.msrb.mxu3 %v12416_v22  ;;  %6642 = vmatpush.bf16.msrb.mxu1 %v12435_v1  ;;  %v12422_v22 = vld [vmem:[#allocation12 + $0x80] sm:$0xff] }
 0x62a   : > { %v12430_v1 = vld [vmem:[#allocation12 + $0xc0] sm:$0xff] }
 0x62d   : > { %6600 = vmatpush.bf16.msrb.mxu3 %v12415_v50  ;;  %6643 = vmatpush.bf16.msrb.mxu1 %v12434_v5 }
 0x62f   : > { %5987 = vmatmul.bf16.vlgmr.msrb.gmra.mxu0 %v5395_v51 }
 0x631   : > { %6644 = vmatpush.bf16.msrb.mxu1 %v12433_v27 }
 0x637   : > { %5944 = vmatmul.bf16.gmra.mxu2 %v5400_v26  ;;  %v12408_v26 = vld [vmem:[#allocation12 + $0x10] sm:$0xff] }
 0x638   : > { %5968 = vmatmul.bf16.gmra.mxu3 %v5401_v52  ;;  %v12414_v52 = vld [vmem:[#allocation12 + $0x40] sm:$0xff]  ;;  %6576 = vmatpush.bf16.msrb.mxu2 %v12408_v26  ;;  %v12453_v26 = vld [vmem:[#allocation12 + $0x178] sm:$0xff] }
 0x639   : > { %6601 = vmatpush.bf16.msrb.mxu3 %v12414_v52 }
 0x63c   : > { %6577 = vmatpush.bf16.msrb.mxu2 %v12407_v55 }
 0x63d   : > { %6686 = vmatpush.bf16.msra.mxu3 %v12453_v26 }
 0x63f   : > { %5992 = vmatmul.bf16.gmra.mxu0 %v5402_v10  ;;  %v12425_v10 = vld [vmem:[#allocation12 + $0x98] sm:$0xff] }
 0x640   : > { %6621 = vmatpush.bf16.msra.mxu0 %v12425_v10  ;;  %6578 = vmatpush.bf16.msrb.mxu2 %v12406_v35  ;;  %v12451_v35 = vld [vmem:[#allocation12 + $0x168] sm:$0xff] }
 0x644   : > { %6622 = vmatpush.bf16.msra.mxu0 %v12424_v17 }
 0x647   : > { %5949 = vmatmul.bf16.gmra.mxu2 %v5407_v30 }
 0x648   : > { %5973 = vmatmul.bf16.gmra.mxu3 %v5408_v63  ;;  %6623 = vmatpush.bf16.msra.mxu0 %v12423_v18 }
 0x64c   : > { %6624 = vmatpush.bf16.msra.mxu0 %v12422_v22 }
 0x64f   : > { %5997 = vmatmul.bf16.gmra.mxu0 %v5409_v57 }
 0x672   : > { %v5892_v46 = vpop.f32.mrf.mxu3 }
 0x67a   : > { %v5868_v23 = vpop.f32.mrf.mxu2  ;;  %v15053_v19 = vpop.f32.mrf.mxu3 }
 0x67b   : > { %v5893_v34 = vadd.f32 %v5892_v46, %v5868_v23  ;;  %v12432_v23 = vld [vmem:[#allocation12 + $0xd0] sm:$0xff] }
 0x67c   : > { %v15051_v9 = vpop.f32.mrf.mxu0  ;;  %6645 = vmatpush.bf16.msrb.mxu1 %v12432_v23 }
 0x67d   : > { %v6012_v43 = vpop.f32.mrf.mxu1  ;;  %v5917_v30 = vadd.f32 %v15051_v9, %v5893_v34 }
 0x680   : > { %6646 = vmatpush.bf16.msrb.mxu1 %v12431_v33 }
 0x682   : > { %v15055_v56 = vpop.f32.mrf.mxu2  ;;  %v15059_v47 = vpop.f32.mrf.mxu3 }
 0x683   : > { %v5895_v44 = vadd.f32 %v15053_v19, %v15055_v56 }
 0x684   : > { %v15057_v45 = vpop.f32.mrf.mxu0  ;;  %6647 = vmatpush.bf16.msrb.mxu1 %v12430_v1  ;;  %v12460_v1 = vld [vmem:[#allocation12 + $0x1b0] sm:$0xff] }
 0x685   : > { %v6014_v25 = vpop.f32.mrf.mxu1  ;;  %v5919_v36 = vadd.f32 %v15057_v45, %v5895_v44 }
 0x68a   : > { %v15061_v24 = vpop.f32.mrf.mxu2  ;;  %v15067_v12 = vpop.f32.mrf.mxu3 }
 0x68b   : > { %v5898_v58 = vadd.f32 %v15059_v47, %v15061_v24  ;;  %v12445_v24 = vld [vmem:[#allocation12 + $0x138] sm:$0xff] }
 0x68c   : > { %v15063_v39 = vpop.f32.mrf.mxu0  ;;  %6663 = vmatpush.bf16.msra.mxu2 %v12445_v24 }
 0x68d   : > { %v5922_v52 = vadd.f32 %v15063_v39, %v5898_v58  ;;  %v6017_v34 = vpop.f32.mrf.mxu1  ;;  %v12450_v58 = vld [vmem:[#allocation12 + $0x160] sm:$0xff] }
 0x692   : > { %v15065_v4 = vpop.f32.mrf.mxu2 }
 0x694   : > { %v15069_v61 = vpop.f32.mrf.mxu0 }
 0x69a   : > { %v15071_v28 = vpop.f32.mrf.mxu2 }
 0x69b   : > { %v15073_v7 = vpop.f32.mrf.mxu3 }
 0x69c   : > { %v15075_v41 = vpop.f32.mrf.mxu0 }
 0x6a2   : > { %v15077_v51 = vpop.f32.mrf.mxu2 }
 0x6a3   : > { %v15079_v6 = vpop.f32.mrf.mxu3 }
 0x6a4   : > { %v15081_v2 = vpop.f32.mrf.mxu0 }
 0x6aa   : > { %v5940_v63 = vpop.f32.mrf.mxu2 }
 0x6ab   : > { %v5964_v48 = vpop.f32.mrf.mxu3  ;;  %v5941_v57 = vadd.f32 %v5940_v63, %v5917_v30 }
 0x6ac   : > { %v5988_v46 = vpop.f32.mrf.mxu0 }
 0x6ad   : > { %v5965_v54 = vadd.f32 %v5964_v48, %v5941_v57  ;;  %v12452_v48 = vld [vmem:[#allocation12 + $0x170] sm:$0xff]  ;;  %v5900_v57 = vadd.f32 %v15067_v12, %v15065_v4 }
 0x6ae   : > { %6687 = vmatpush.bf16.msra.mxu3 %v12452_v48 }
 0x6af   : > { %v5989_v9 = vadd.f32 %v5988_v46, %v5965_v54  ;;  %v5924_v44 = vadd.f32 %v15069_v61, %v5900_v57  ;;  %v5903_v61 = vadd.f32 %v15073_v7, %v15071_v28 }
 0x6b1   : > { %v6013_v32 = vadd.f32 %v6012_v43, %v5989_v9  ;;  %v5927_v28 = vadd.f32 %v15075_v41, %v5903_v61  ;;  %v12440_v61 = vld [vmem:[#allocation12 + $0x110] sm:$0xff] }
 0x6b2   : > { %v5942_v62 = vpop.f32.mrf.mxu2  ;;  %6688 = vmatpush.bf16.msra.mxu3 %v12451_v35  ;;  %v12448_v35 = vld [vmem:[#allocation12 + $0x150] sm:$0xff] }
 0x6b3   : > { %v5966_v42 = vpop.f32.mrf.mxu3  ;;  %v6031_v19 = vmul.f32 %v15087_v3, %v6013_v32  ;;  %v5943_v56 = vadd.f32 %v5942_v62, %v5919_v36  ;;  %v12461_v32 = vld [vmem:[#allocation12 + $0x1b8] sm:$0xff]  ;;  %v12469_v62 = vld [vmem:[%s15671_s2 + $0x38] sm:$0xff]  ;;  %s12655_s2 = smul.u32 40, %s15307_s3 }
 0x6b4   : > { %v5990_v8 = vpop.f32.mrf.mxu0  ;;  %6709 = vmatpush.bf16.msrb.mxu0 %v12461_v32  ;;  %6817 = vmatpush.bf16.msra.mxu1 %v12469_v62  ;;  %v12447_v62 = vld [vmem:[#allocation12 + $0x148] sm:$0xff] }
 0x6b5   : > { %v6041_v50 = vadd.f32 %v15091_v59, %v6031_v19  ;;  %v5967_v53 = vadd.f32 %v5966_v42, %v5943_v56  ;;  %v12444_v42 = vld [vmem:[#allocation12 + $0x130] sm:$0xff]  ;;  %v6019_v19 = vpop.f32.mrf.mxu1 }
 0x6b6   : > { %6664 = vmatpush.bf16.msra.mxu2 %v12444_v42  ;;  %6689 = vmatpush.bf16.msra.mxu3 %v12450_v58 }
 0x6b7   : > { %v6047_v45 = vmul.f32 0.01, %v6041_v50  ;;  %v5991_v5 = vadd.f32 %v5990_v8, %v5967_v53  ;;  %v12468_v53 = vld [vmem:[%s15672_s30 + $0x30] sm:$0xff] }
 0x6b8   : > { %6710 = vmatpush.bf16.msrb.mxu0 %v12460_v1  ;;  %6818 = vmatpush.bf16.msra.mxu1 %v12468_v53 }
 0x6b9   : > { %v6053_v43 = vmax.f32 %v6041_v50, %v6047_v45  ;;  %v6015_v10 = vadd.f32 %v6014_v25, %v5991_v5  ;;  %v7008_v50 = vmul.f32 0.01, %v14492_v13  ;;  %v12443_v45 = vld [vmem:[#allocation12 + $0x128] sm:$0xff] }
 0x6ba   : > { %v5945_v27 = vpop.f32.mrf.mxu2  ;;  %6665 = vmatpush.bf16.msra.mxu2 %v12443_v45 }
 0x6bb   : > { %v5969_v55 = vpop.f32.mrf.mxu3  ;;  %6061 = vst [vmem:[#allocation2 + $0x8] sm:$0xff] %v6053_v43  ;;  %v6032_v30 = vmul.f32 %v15087_v3, %v6015_v10  ;;  %v5946_v47 = vadd.f32 %v5945_v27, %v5922_v52  ;;  %v12449_v52 = vld [vmem:[#allocation12 + $0x158] sm:$0xff]  ;;  %v12442_v27 = vld [vmem:[#allocation12 + $0x120] sm:$0xff] }
 0x6bc   : > { %v5993_v63 = vpop.f32.mrf.mxu0  ;;  %v12467_v10 = vld [vmem:[%s15672_s30 + $0x28] sm:$0xff]  ;;  %6690 = vmatpush.bf16.msra.mxu3 %v12449_v52 }
 0x6bd   : > { %v6042_v17 = vadd.f32 %v15091_v59, %v6032_v30  ;;  %v5970_v46 = vadd.f32 %v5969_v55, %v5946_v47  ;;  %v15116_v55 = vmax.f32 %v14492_v13, %v7008_v50  ;;  %6819 = vmatpush.bf16.msra.mxu1 %v12467_v10 }
 0x6be   : > { %6666 = vmatpush.bf16.msra.mxu2 %v12442_v27 }
 0x6bf   : > { %v6048_v39 = vmul.f32 0.01, %v6042_v17  ;;  %v5994_v23 = vadd.f32 %v5993_v63, %v5970_v46 }
 0x6c0   : > { %6691 = vmatpush.bf16.msra.mxu3 %v12448_v35 }
 0x6c1   : > { %v6054_v54 = vmax.f32 %v6042_v17, %v6048_v39  ;;  %v6018_v25 = vadd.f32 %v6017_v34, %v5994_v23 }
 0x6c2   : > { %v5947_v9 = vpop.f32.mrf.mxu2  ;;  %v6067_v33 = vld [vmem:[#allocation2 + $0x7] sm:$0xff] }
 0x6c3   : > { %v5971_v18 = vpop.f32.mrf.mxu3  ;;  %6062 = vst [vmem:[#allocation2 + $0x10] sm:$0xff] %v6054_v54  ;;  %v6033_v4 = vmul.f32 %v15087_v3, %v6018_v25  ;;  %v5948_v12 = vadd.f32 %v5947_v9, %v5924_v44  ;;  %v6103_v36 = vpack.c.bf16 %v6054_v54, %v6053_v43  ;;  %v12459_v43 = vld [vmem:[#allocation12 + $0x1a8] sm:$0xff]  ;;  %v5905_v44 = vadd.f32 %v15079_v6, %v15077_v51  ;;  %v12458_v9 = vld [vmem:[#allocation12 + $0x1a0] sm:$0xff] }
 0x6c4   : > { %v5995_v56 = vpop.f32.mrf.mxu0  ;;  %7024 = vst [vmem:[#allocation2 + $0x7] sm:$0x1] %v13751_v20  ;;  %6711 = vmatpush.bf16.msrb.mxu0 %v12459_v43  ;;  %6692 = vmatpush.bf16.msra.mxu3 %v12447_v62  ;;  %v12446_v43 = vld [vmem:[#allocation12 + $0x140] sm:$0xff] }
 0x6c5   : > { %v6043_v8 = vadd.f32 %v15091_v59, %v6033_v4  ;;  %v5972_v22 = vadd.f32 %v5971_v18, %v5948_v12  ;;  %6602 = vmatmul.bf16.vlgmr.msrb.gmra.mxu3 %v6103_v36  ;;  %v7009_v18 = vmul.f32 0.01, %v14520_v40  ;;  %v12466_v4 = vld [vmem:[%s15672_s30 + $0x20] sm:$0xff]  ;;  %v12441_v12 = vld [vmem:[#allocation12 + $0x118] sm:$0xff]  ;;  %v5929_v51 = vadd.f32 %v15081_v2, %v5905_v44  ;;  %v12455_v44 = vld [vmem:[#allocation12 + $0x188] sm:$0xff] }
 0x6c6   : > { %6820 = vmatpush.bf16.msra.mxu1 %v12466_v4  ;;  %6667 = vmatpush.bf16.msra.mxu2 %v12441_v12 }
 0x6c7   : > { %v6049_v5 = vmul.f32 0.01, %v6043_v8  ;;  %v5996_v26 = vadd.f32 %v5995_v56, %v5972_v22  ;;  %v12465_v56 = vld [vmem:[%s15672_s30 + $0x18] sm:$0xff] }
 0x6c8   : > { %6712 = vmatpush.bf16.msrb.mxu0 %v12458_v9  ;;  %6693 = vmatpush.bf16.msra.mxu3 %v12446_v43  ;;  %v12501_v43 = vld [vmem:[#allocation15 + $0xb8] sm:$0xff] }
 0x6c9   : > { %v15112_v7 = vmax.f32 %v6043_v8, %v6049_v5  ;;  %v6020_v34 = vadd.f32 %v6019_v19, %v5996_v26  ;;  %v12457_v19 = vld [vmem:[#allocation12 + $0x198] sm:$0xff]  ;;  %v15135_v8 = vmax.f32 %v14520_v40, %v7009_v18 }
 0x6ca   : > { %v5950_v30 = vpop.f32.mrf.mxu2  ;;  %v6068_v24 = vld [vmem:[#allocation2 + $0xf] sm:$0xff]  ;;  %6821 = vmatpush.bf16.msra.mxu1 %v12465_v56  ;;  %6668 = vmatpush.bf16.msra.mxu2 %v12440_v61  ;;  %v12462_v56 = vld [vmem:[%s15672_s30] sm:$0xff] }
 0x6cb   : > { %v5974_v47 = vpop.f32.mrf.mxu3  ;;  %v6077_v63 = vld [vmem:[#allocation2 + $0x9] sm:$0xff]  ;;  %6063 = vst [vmem:[#allocation2 + $0x18] sm:$0xff] %v15112_v7  ;;  %v6034_v41 = vmul.f32 %v15087_v3, %v6020_v34  ;;  %v5951_v57 = vadd.f32 %v5950_v30, %v5927_v28  ;;  %v6102_v17 = vpack.c.bf16 %v6068_v24, %v6067_v33  ;;  %v6022_v33 = vpop.f32.mrf.mxu1 }
 0x6cc   : > { %v6082_v48 = vld [vmem:[#allocation2 + $0xa] sm:$0xff]  ;;  %v5998_v23 = vpop.f32.mrf.mxu0  ;;  %6713 = vmatpush.bf16.msrb.mxu0 %v12457_v19 }
 0x6cd   : > { %v15120_v46 = vld [vmem:[#allocation2 + $0xb] sm:$0xff]  ;;  %v6044_v54 = vadd.f32 %v15091_v59, %v6034_v41  ;;  %v5975_v25 = vadd.f32 %v5974_v47, %v5951_v57  ;;  %6579 = vmatmul.bf16.vlgmr.msrb.gmra.mxu2 %v6102_v17  ;;  %v7010_v47 = vmul.f32 0.01, %v14488_v11  ;;  %v12439_v57 = vld [vmem:[#allocation12 + $0x108] sm:$0xff] }
 0x6ce   : > { %v15122_v39 = vld [vmem:[#allocation2 + $0xc] sm:$0xff]  ;;  %6669 = vmatpush.bf16.msra.mxu2 %v12439_v57 }
 0x6cf   : > { %v15124_v13 = vld [vmem:[#allocation2 + $0xd] sm:$0xff]  ;;  %v6050_v36 = vmul.f32 0.01, %v6044_v54  ;;  %v5999_v32 = vadd.f32 %v5998_v23, %v5975_v25  ;;  %v15154_v9 = vmax.f32 %v14488_v11, %v7010_v47  ;;  %v12483_v47 = vld [vmem:[#allocation15 + $0x28] sm:$0xff] }
 0x6d0   : > { %7026 = vst [vmem:[#allocation2 + $0x8] sm:$0xff] %v15116_v55  ;;  %v12464_v41 = vld [vmem:[%s15672_s30 + $0x10] sm:$0xff]  ;;  %v12463_v25 = vld [vmem:[%s15672_s30 + $0x8] sm:$0xff] }
 0x6d1   : > { %v6056_v6 = vmax.f32 %v6044_v54, %v6050_v36  ;;  %v6023_v42 = vadd.f32 %v6022_v33, %v5999_v32  ;;  %v12438_v54 = vld [vmem:[#allocation12 + $0x100] sm:$0xff]  ;;  %6822 = vmatpush.bf16.msra.mxu1 %v12464_v41 }
 0x6d2   : > { %v5952_v22 = vpop.f32.mrf.mxu2  ;;  %v6078_v1 = vld [vmem:[#allocation2 + $0x11] sm:$0xff]  ;;  %6670 = vmatpush.bf16.msra.mxu2 %v12438_v54 }
 0x6d3   : > { %v6083_v58 = vld [vmem:[#allocation2 + $0x12] sm:$0xff]  ;;  %6064 = vst [vmem:[#allocation2 + $0x20] sm:$0xff] %v6056_v6  ;;  %v6035_v53 = vmul.f32 %v15087_v3, %v6023_v42  ;;  %v5953_v45 = vadd.f32 %v5952_v22, %v5929_v51  ;;  %v6104_v2 = vpack.c.bf16 %v6078_v1, %v6077_v63  ;;  %v5976_v40 = vpop.f32.mrf.mxu3  ;;  %v6110_v34 = vpack.c.bf16 %v6056_v6, %v15112_v7  ;;  %v12456_v63 = vld [vmem:[#allocation12 + $0x190] sm:$0xff]  ;;  %v6024_v17 = vpop.f32.mrf.mxu1  ;;  %v12485_v6 = vld [vmem:[#allocation15 + $0x38] sm:$0xff] }
 0x6d4   : > { %v6069_v50 = vld [vmem:[#allocation2 + $0x17] sm:$0xff]  ;;  %v6105_v5 = vpack.c.bf16 %v6083_v58, %v6082_v48  ;;  %v6000_v24 = vpop.f32.mrf.mxu0  ;;  %6714 = vmatpush.bf16.msrb.mxu0 %v12456_v63  ;;  %v7011_v42 = vmul.f32 0.01, %v14516_v38  ;;  %7262 = vmatpush.bf16.msrb.mxu3 %v12485_v6  ;;  %v12480_v6 = vld [vmem:[#allocation15 + $0x10] sm:$0xff] }
 0x6d5   : > { %v15138_v26 = vld [vmem:[#allocation2 + $0x13] sm:$0xff]  ;;  %v6045_v10 = vadd.f32 %v15091_v59, %v6035_v53  ;;  %v5977_v27 = vadd.f32 %v5976_v40, %v5953_v45  ;;  %6625 = vmatmul.bf16.vlgmr.msra.gmra.mxu0 %v6104_v2  ;;  %6607 = vmatmul.bf16.gmra.mxu3 %v6110_v34  ;;  %v12493_v34 = vld [vmem:[#allocation15 + $0x78] sm:$0xff] }
 0x6d6   : > { %v15140_v52 = vld [vmem:[#allocation2 + $0x14] sm:$0xff]  ;;  %6648 = vmatmul.bf16.vlgmr.msrb.gmra.mxu1 %v6105_v5  ;;  %v15168_v22 = vmax.f32 %v14516_v38, %v7011_v42  ;;  %v12484_v38 = vld [vmem:[#allocation15 + $0x30] sm:$0xff]  ;;  %v12489_v42 = vld [vmem:[#allocation15 + $0x58] sm:$0xff] }
 0x6d7   : > { %v15142_v28 = vld [vmem:[#allocation2 + $0x15] sm:$0xff]  ;;  %v15147_v30 = vld [vmem:[#allocation2 + $0x7] sm:$0xff]  ;;  %v6051_v7 = vmul.f32 0.01, %v6045_v10  ;;  %v6001_v48 = vadd.f32 %v6000_v24, %v5977_v27  ;;  %6823 = vmatpush.bf16.msra.mxu1 %v12463_v25  ;;  %v7013_v27 = vmul.f32 0.01, %v14495_v14 }
 0x6d8   : > { %7027 = vst [vmem:[#allocation2 + $0x10] sm:$0xff] %v15135_v8  ;;  %6715 = vmatpush.bf16.msrb.mxu0 %v12455_v44  ;;  %7263 = vmatpush.bf16.msrb.mxu3 %v12484_v38  ;;  %v12492_v24 = vld [vmem:[#allocation15 + $0x70] sm:$0xff]  ;;  %v12482_v54 = vld [vmem:[#allocation15 + $0x20] sm:$0xff]  ;;  %v12499_v25 = vld [vmem:[#allocation15 + $0xa8] sm:$0xff]  ;;  %v7062_v60 = vpack.c.bf16 %v15168_v22, %v15154_v9 }
 0x6d9   : > { %7389 = vst [vmem:[#allocation2 + $0x7] sm:$0x1] %v13751_v20  ;;  %v6057_v23 = vmax.f32 %v6045_v10, %v6051_v7  ;;  %v6025_v35 = vadd.f32 %v6024_v17, %v6001_v48  ;;  %v7012_v10 = vmul.f32 0.01, %v14458_v49  ;;  %v15185_v57 = vmax.f32 %v14495_v14, %v7013_v27  ;;  %v12500_v44 = vld [vmem:[#allocation15 + $0xb0] sm:$0xff] }
 0x6da   : > { %v6070_v18 = vld [vmem:[#allocation2 + $0x1f] sm:$0xff] }
 0x6db   : > { %v6079_v33 = vld [vmem:[#allocation2 + $0x19] sm:$0xff]  ;;  %6065 = vst [vmem:[#allocation2 + $0x28] sm:$0xff] %v6057_v23  ;;  %v6036_v12 = vmul.f32 %v15087_v3, %v6025_v35  ;;  %v6109_v36 = vpack.c.bf16 %v6070_v18, %v6069_v50  ;;  %v12454_v3 = vld [vmem:[#allocation12 + $0x180] sm:$0xff]  ;;  %6824 = vmatpush.bf16.msra.mxu1 %v12462_v56  ;;  %v6117_v40 = vpack.c.bf16 %v6057_v23, %v6057_v23 }
 0x6dc   : > { %v6084_v4 = vld [vmem:[#allocation2 + $0x1a] sm:$0xff]  ;;  %6716 = vmatpush.bf16.msrb.mxu0 %v12454_v3  ;;  %v15180_v63 = vmax.f32 %v14458_v49, %v7012_v10  ;;  %7264 = vmatpush.bf16.msrb.mxu3 %v12483_v47  ;;  %v12497_v3 = vld [vmem:[#allocation15 + $0x98] sm:$0xff] }
 0x6dd   : > { %v15157_v32 = vld [vmem:[#allocation2 + $0x1b] sm:$0xff]  ;;  %v6046_v11 = vadd.f32 %v15091_v59, %v6036_v12  ;;  %6584 = vmatmul.bf16.gmra.mxu2 %v6109_v36  ;;  %v12490_v12 = vld [vmem:[#allocation15 + $0x60] sm:$0xff] }
 0x6de   : > { %v15159_v62 = vld [vmem:[#allocation2 + $0x1c] sm:$0xff]  ;;  %v12498_v36 = vld [vmem:[#allocation15 + $0xa0] sm:$0xff] }
 0x6df   : > { %v15161_v51 = vld [vmem:[#allocation2 + $0x1d] sm:$0xff]  ;;  %v6052_v19 = vmul.f32 0.01, %v6046_v11  ;;  %7320 = vmatpush.bf16.msrb.mxu1 %v12501_v43 }
 0x6e0   : > { %7028 = vst [vmem:[#allocation2 + $0x18] sm:$0xff] %v15154_v9  ;;  %7291 = vmatpush.bf16.msra.mxu0 %v12493_v34  ;;  %v12491_v49 = vld [vmem:[#allocation15 + $0x68] sm:$0xff]  ;;  %7265 = vmatpush.bf16.msrb.mxu3 %v12482_v54 }
 0x6e1   : > { %v6058_v61 = vmax.f32 %v6046_v11, %v6052_v19  ;;  %v6106_v11 = vpack.c.bf16 %v15138_v26, %v15120_v46  ;;  %v12479_v19 = vld [vmem:[#allocation15 + $0x8] sm:$0xff]  ;;  %v12496_v46 = vld [vmem:[#allocation15 + $0x90] sm:$0xff] }
 0x6e2   : > { %v6080_v1 = vld [vmem:[#allocation2 + $0x21] sm:$0xff]  ;;  %v12487_v26 = vld [vmem:[#allocation15 + $0x48] sm:$0xff] }
 0x6e3   : > { %v6085_v58 = vld [vmem:[#allocation2 + $0x22] sm:$0xff]  ;;  %6066 = vst [vmem:[#allocation2 + $0x30] sm:$0xf] %v6058_v61  ;;  %v6111_v59 = vpack.c.bf16 %v6080_v1, %v6079_v33  ;;  %7321 = vmatpush.bf16.msrb.mxu1 %v12500_v44  ;;  %v6107_v33 = vpack.c.bf16 %v15140_v52, %v15122_v39  ;;  %v6108_v52 = vpack.c.bf16 %v15142_v28, %v15124_v13  ;;  %v12478_v61 = vld [vmem:[#allocation15] sm:$0xff]  ;;  %v12495_v1 = vld [vmem:[#allocation15 + $0x88] sm:$0xff] }
 0x6e4   : > { %v6071_v50 = vld [vmem:[#allocation2 + $0x27] sm:$0xff]  ;;  %v6112_v53 = vpack.c.bf16 %v6085_v58, %v6084_v4  ;;  %7292 = vmatpush.bf16.msra.mxu0 %v12492_v24  ;;  %v12486_v58 = vld [vmem:[#allocation15 + $0x40] sm:$0xff]  ;;  %v7065_v44 = vpack.c.bf16 %v15185_v57, %v15180_v63 }
 0x6e5   : > { %v15170_v45 = vld [vmem:[#allocation2 + $0x23] sm:$0xff]  ;;  %6630 = vmatmul.bf16.gmra.mxu0 %v6111_v59  ;;  %6612 = vmatmul.bf16.gmra.mxu3 %v6117_v40  ;;  %v6116_v17 = vpack.c.bf16 %v6071_v50, %v6071_v50  ;;  %v12494_v13 = vld [vmem:[#allocation15 + $0x80] sm:$0xff] }
 0x6e6   : > { %v15172_v2 = vld [vmem:[#allocation2 + $0x24] sm:$0xff]  ;;  %6653 = vmatmul.bf16.gmra.mxu1 %v6112_v53  ;;  %v6113_v50 = vpack.c.bf16 %v15170_v45, %v15157_v32  ;;  %v7035_v59 = vld [vmem:[#allocation2 + $0xf] sm:$0xff] }
 0x6e7   : > { %v15174_v5 = vld [vmem:[#allocation2 + $0x25] sm:$0xff]  ;;  %7322 = vmatpush.bf16.msrb.mxu1 %v12499_v25  ;;  %v6114_v56 = vpack.c.bf16 %v15172_v2, %v15159_v62  ;;  %v7058_v53 = vpack.c.bf16 %v7035_v59, %v15147_v30  ;;  %v7059_v2 = vpack.c.bf16 %v15135_v8, %v15116_v55  ;;  %v7036_v40 = vld [vmem:[#allocation2 + $0x17] sm:$0xff] }
 0x6e8   : > { %7029 = vst [vmem:[#allocation2 + $0x20] sm:$0xff] %v15168_v22  ;;  %7293 = vmatpush.bf16.msra.mxu0 %v12491_v49  ;;  %v12481_v4 = vld [vmem:[#allocation15 + $0x18] sm:$0xff]  ;;  %v12488_v39 = vld [vmem:[#allocation15 + $0x50] sm:$0xff]  ;;  %v6115_v28 = vpack.c.bf16 %v15174_v5, %v15161_v51  ;;  %v7051_v51 = vld [vmem:[#allocation2 + $0x11] sm:$0xff] }
 0x6e9   : > { %7266 = vmatpush.bf16.msrb.mxu3 %v12481_v4  ;;  %v7041_v49 = vld [vmem:[#allocation2 + $0x3f] sm:$0xff] }
 0x6ea   : > { %v6081_v7 = vld [vmem:[#allocation2 + $0x29] sm:$0xff]  ;;  %v12472_v59 = vld [vmem:[#allocation14 + $0x10] sm:$0xff] }
 0x6eb   : > { %v6086_v48 = vld [vmem:[#allocation2 + $0x2a] sm:$0xff]  ;;  %v6118_v14 = vpack.c.bf16 %v6081_v7, %v6081_v7  ;;  %7323 = vmatpush.bf16.msrb.mxu1 %v12498_v36  ;;  %v12475_v36 = vld [vmem:[#allocation14 + $0x28] sm:$0xff] }
 0x6ec   : > { %v15182_v41 = vld [vmem:[#allocation2 + $0x2b] sm:$0xff]  ;;  %v6119_v18 = vpack.c.bf16 %v6086_v48, %v6086_v48  ;;  %7294 = vmatpush.bf16.msra.mxu0 %v12490_v12 }
 0x6ed   : > { %v6096_v23 = vld [vmem:[#allocation2 + $0x2c] sm:$0xff]  ;;  %6589 = vmatmul.bf16.gmra.mxu2 %v6116_v17  ;;  %7267 = vmatpush.bf16.msrb.mxu3 %v12480_v6  ;;  %v6120_v62 = vpack.c.bf16 %v15182_v41, %v15182_v41  ;;  %v7048_v6 = vld [vmem:[#allocation2 + $0x38] sm:$0xff] }
 0x6ee   : > { %v15187_v35 = vld [vmem:[#allocation2 + $0x2d] sm:$0xff] }
 0x6ef   : > { %7030 = vst [vmem:[#allocation2 + $0x28] sm:$0xff] %v15180_v63  ;;  %7324 = vmatpush.bf16.msrb.mxu1 %v12497_v3  ;;  %v6122_v32 = vpack.c.bf16 %v15187_v35, %v15187_v35  ;;  %v7037_v45 = vld [vmem:[#allocation2 + $0x1f] sm:$0xff]  ;;  %v12477_v17 = vld [vmem:[#allocation14 + $0x38] sm:$0xff] }
 0x6f0   : > { %7031 = vst [vmem:[#allocation2 + $0x30] sm:$0xff] %v15185_v57  ;;  %7295 = vmatpush.bf16.msra.mxu0 %v12489_v42  ;;  %v7061_v38 = vpack.c.bf16 %v7037_v45, %v7036_v40  ;;  %v7052_v10 = vld [vmem:[#allocation2 + $0x19] sm:$0xff]  ;;  %6944 = vmatpush.bf16.msrb.mxu2 %v12477_v17  ;;  %v12470_v40 = vld [vmem:[#allocation14] sm:$0xff] }
 0x6f1   : > { %7268 = vmatpush.bf16.msrb.mxu3 %v12479_v19  ;;  %v7056_v42 = vld [vmem:[#allocation2 + $0x39] sm:$0xff] }
 0x6f2   : > { %v15244_v17 = vld [vmem:[%s15674_s26] ss:$0 sm:$0xff]  ;;  %s15680_s26 = sld [smem:[#allocation79_spill]] }
 0x6f3   : > { %7325 = vmatpush.bf16.msrb.mxu1 %v12496_v46 }
 0x6f4   : > { %7296 = vmatpush.bf16.msra.mxu0 %v12488_v39 }
 0x6f5   : > { %6635 = vmatmul.bf16.gmra.mxu0 %v6118_v14  ;;  %6694 = vmatmul.bf16.vlgmr.msra.gmra.mxu3 %v6107_v33  ;;  %v12476_v14 = vld [vmem:[#allocation14 + $0x30] sm:$0xff] }
 0x6f6   : > { %6658 = vmatmul.bf16.gmra.mxu1 %v6119_v18  ;;  %7269 = vmatpush.bf16.msrb.mxu3 %v12478_v61  ;;  %v7053_v34 = vld [vmem:[#allocation2 + $0x21] sm:$0xff]  ;;  %v7069_v61 = vpack.c.bf16 %v14814_v0, %v7056_v42 }
 0x6f7   : > { %7326 = vmatpush.bf16.msrb.mxu1 %v12495_v1  ;;  %v7038_v30 = vld [vmem:[#allocation2 + $0x27] sm:$0xff]  ;;  %v7039_v43 = vld [vmem:[#allocation2 + $0x2f] sm:$0xff]  ;;  %v7063_v29 = vpack.c.bf16 %v7053_v34, %v7052_v10  ;;  %v7040_v41 = vld [vmem:[#allocation2 + $0x37] sm:$0xff]  ;;  %6945 = vmatpush.bf16.msrb.mxu2 %v12476_v14 }
 0x6f8   : > { %7297 = vmatpush.bf16.msra.mxu0 %v12487_v26  ;;  %v7054_v24 = vld [vmem:[#allocation2 + $0x29] sm:$0xff]  ;;  %v7055_v7 = vld [vmem:[#allocation2 + $0x31] sm:$0xff]  ;;  %v7067_v25 = vpack.c.bf16 %v7041_v49, %v7040_v41  ;;  %v12516_v34 = vld [vmem:[#allocation17 + $0x70] sm:$0xff] }
 0x6f9   : > { %v7066_v54 = vpack.c.bf16 %v7055_v7, %v7054_v24  ;;  %v15241_v41 = vld [vmem:[%s15673_s28] ss:$0 sm:$0xff]  ;;  %s15311_s28 = scalar_lea.vmem [#allocation32], %s12655_s2  ;;  %s15686_s2 = sld [smem:[#allocation87_spill]] }
 0x6fa   : > { %v15248_v14 = vld [vmem:[%s15675_s18] ss:$0 sm:$0xff]  ;;  %s15681_s18 = sld [smem:[#allocation80_spill]] }
 0x6fb   : > { %7327 = vmatpush.bf16.msrb.mxu1 %v12494_v13  ;;  %6946 = vmatpush.bf16.msrb.mxu2 %v12475_v36  ;;  %v12473_v13 = vld [vmem:[#allocation14 + $0x18] sm:$0xff]  ;;  %v15252_v36 = vld [vmem:[%s15676_s10] ss:$0 sm:$0xff]  ;;  %s15682_s10 = sld [smem:[#allocation81_spill]] }
 0x6fc   : > { %7298 = vmatpush.bf16.msra.mxu0 %v12486_v58 }
 0x6fd   : > { %6671 = vmatmul.bf16.vlgmr.msra.gmra.mxu2 %v6106_v11 }
 0x705   : > { %6717 = vmatmul.bf16.vlgmr.msrb.gmra.mxu0 %v6108_v52  ;;  %6699 = vmatmul.bf16.gmra.mxu3 %v6114_v56  ;;  %v7049_v52 = vld [vmem:[#allocation2 + $0x40] sm:$0xff] }
 0x706   : > { %6825 = vmatmul.bf16.vlgmr.msra.gmra.mxu1 %v15011_v21  ;;  %v6121_v21 = vpack.c.bf16 %v6096_v23, %v6096_v23  ;;  %v7068_v56 = vpack.c.bf16 %v7049_v52, %v7048_v6 }
 0x70d   : > { %6676 = vmatmul.bf16.gmra.mxu2 %v6113_v50  ;;  %v12474_v50 = vld [vmem:[#allocation14 + $0x20] sm:$0xff] }
 0x70e   : > { %6947 = vmatpush.bf16.msrb.mxu2 %v12474_v50  ;;  %v12514_v50 = vld [vmem:[#allocation17 + $0x60] sm:$0xff] }
 0x712   : > { %6948 = vmatpush.bf16.msrb.mxu2 %v12473_v13  ;;  %v12523_v13 = vld [vmem:[#allocation17 + $0xa8] sm:$0xff] }
 0x715   : > { %6722 = vmatmul.bf16.gmra.mxu0 %v6115_v28  ;;  %6704 = vmatmul.bf16.gmra.mxu3 %v6121_v21 }
 0x716   : > { %6830 = vmatmul.bf16.gmra.mxu1 %v15029_v37  ;;  %v7050_v37 = vld [vmem:[#allocation2 + $0x9] sm:$0xff]  ;;  %6949 = vmatpush.bf16.msrb.mxu2 %v12472_v59 }
 0x717   : > { %v7060_v5 = vpack.c.bf16 %v7051_v51, %v7050_v37  ;;  %v12517_v37 = vld [vmem:[#allocation17 + $0x78] sm:$0xff] }
 0x718   : > { %7656 = vmatpush.bf16.msra.mxu3 %v12517_v37 }
 0x71c   : > { %7657 = vmatpush.bf16.msra.mxu3 %v12516_v34 }
 0x71d   : > { %6681 = vmatmul.bf16.gmra.mxu2 %v6120_v62 }
 0x725   : > { %6727 = vmatmul.bf16.gmra.mxu0 %v6122_v32  ;;  %7270 = vmatmul.bf16.vlgmr.msrb.gmra.mxu3 %v7058_v53  ;;  %v12471_v32 = vld [vmem:[#allocation14 + $0x8] sm:$0xff] }
 0x726   : > { %6835 = vmatmul.bf16.gmra.mxu1 %v6752_v16  ;;  %v7064_v16 = vpack.c.bf16 %v7039_v43, %v7038_v30  ;;  %6950 = vmatpush.bf16.msrb.mxu2 %v12471_v32  ;;  %v12525_v30 = vld [vmem:[#allocation17 + $0xb8] sm:$0xff] }
 0x727   : > { %7685 = vmatpush.bf16.msrb.mxu0 %v12525_v30 }
 0x72a   : > { %6951 = vmatpush.bf16.msrb.mxu2 %v12470_v40 }
 0x735   : > { %7299 = vmatmul.bf16.vlgmr.msra.gmra.mxu0 %v7059_v2  ;;  %7275 = vmatmul.bf16.gmra.mxu3 %v7061_v38 }
 0x736   : > { %7328 = vmatmul.bf16.vlgmr.msrb.gmra.mxu1 %v7060_v5 }
 0x745   : > { %7304 = vmatmul.bf16.gmra.mxu0 %v7062_v60  ;;  %7280 = vmatmul.bf16.gmra.mxu3 %v7064_v16 }
 0x746   : > { %7333 = vmatmul.bf16.gmra.mxu1 %v7063_v29 }
 0x748   : > { %v6603_v27 = vpop.f32.mrf.mxu3 }
 0x750   : > { %v6580_v47 = vpop.f32.mrf.mxu2  ;;  %v6605_v48 = vpop.f32.mrf.mxu3 }
 0x751   : > { %v6604_v53 = vadd.f32 %v6603_v27, %v6580_v47 }
 0x752   : > { %v6626_v23 = vpop.f32.mrf.mxu0 }
 0x753   : > { %v6649_v35 = vpop.f32.mrf.mxu1  ;;  %v6627_v38 = vadd.f32 %v6626_v23, %v6604_v53  ;;  %v12507_v53 = vld [vmem:[#allocation17 + $0x28] sm:$0xff] }
 0x755   : > { %7309 = vmatmul.bf16.gmra.mxu0 %v7065_v44  ;;  %7285 = vmatmul.bf16.gmra.mxu3 %v7067_v25  ;;  %v6650_v43 = vadd.f32 %v6649_v35, %v6627_v38  ;;  %v12509_v44 = vld [vmem:[#allocation17 + $0x38] sm:$0xff]  ;;  %v12524_v35 = vld [vmem:[#allocation17 + $0xb0] sm:$0xff] }
 0x756   : > { %7338 = vmatmul.bf16.gmra.mxu1 %v7066_v54  ;;  %v12515_v54 = vld [vmem:[#allocation17 + $0x68] sm:$0xff]  ;;  %7627 = vmatpush.bf16.msra.mxu2 %v12509_v44 }
 0x757   : > { %7658 = vmatpush.bf16.msra.mxu3 %v12515_v54  ;;  %7686 = vmatpush.bf16.msrb.mxu0 %v12524_v35 }
 0x758   : > { %v6582_v18 = vpop.f32.mrf.mxu2  ;;  %v6608_v33 = vpop.f32.mrf.mxu3 }
 0x759   : > { %v6606_v10 = vadd.f32 %v6605_v48, %v6582_v18 }
 0x75a   : > { %v6628_v4 = vpop.f32.mrf.mxu0 }
 0x75b   : > { %v6651_v12 = vpop.f32.mrf.mxu1  ;;  %v6629_v24 = vadd.f32 %v6628_v4, %v6606_v10  ;;  %7659 = vmatpush.bf16.msra.mxu3 %v12514_v50  ;;  %7687 = vmatpush.bf16.msrb.mxu0 %v12523_v13  ;;  %v12521_v50 = vld [vmem:[#allocation17 + $0x98] sm:$0xff] }
 0x75d   : > { %v6652_v48 = vadd.f32 %v6651_v12, %v6629_v24 }
 0x760   : > { %v6585_v11 = vpop.f32.mrf.mxu2  ;;  %v15219_v3 = vpop.f32.mrf.mxu3 }
 0x761   : > { %v6609_v49 = vadd.f32 %v6608_v33, %v6585_v11  ;;  %v12508_v11 = vld [vmem:[#allocation17 + $0x30] sm:$0xff] }
 0x762   : > { %v15221_v19 = vpop.f32.mrf.mxu0  ;;  %7628 = vmatpush.bf16.msra.mxu2 %v12508_v11 }
 0x763   : > { %v15223_v39 = vpop.f32.mrf.mxu1 }
 0x765   : > { %7314 = vmatmul.bf16.gmra.mxu0 %v7068_v56 }
 0x766   : > { %7343 = vmatmul.bf16.gmra.mxu1 %v7069_v61  ;;  %v6632_v61 = vadd.f32 %v15221_v19, %v6609_v49  ;;  %v12522_v19 = vld [vmem:[#allocation17 + $0xa0] sm:$0xff]  ;;  %7629 = vmatpush.bf16.msra.mxu2 %v12507_v53 }
 0x767   : > { %7688 = vmatpush.bf16.msrb.mxu0 %v12522_v19 }
 0x768   : > { %v15226_v46 = vpop.f32.mrf.mxu2  ;;  %v15228_v26 = vpop.f32.mrf.mxu3  ;;  %v6655_v37 = vadd.f32 %v15223_v39, %v6632_v61 }
 0x76a   : > { %v15230_v1 = vpop.f32.mrf.mxu0 }
 0x76b   : > { %v15232_v58 = vpop.f32.mrf.mxu1  ;;  %7689 = vmatpush.bf16.msrb.mxu0 %v12521_v50 }
 0x770   : > { %v15234_v28 = vpop.f32.mrf.mxu2  ;;  %v6615_v21 = vpop.f32.mrf.mxu3 }
 0x771   : > { %v6614_v24 = vadd.f32 %v15228_v26, %v15234_v28 }
 0x772   : > { %v15236_v62 = vpop.f32.mrf.mxu0 }
 0x773   : > { %v15238_v0 = vpop.f32.mrf.mxu1 }
 0x778   : > { %v6592_v51 = vpop.f32.mrf.mxu2  ;;  %v6695_v45 = vpop.f32.mrf.mxu3 }
 0x779   : > { %v12513_v51 = vld [vmem:[#allocation17 + $0x58] sm:$0xff] }
 0x77a   : > { %v6638_v2 = vpop.f32.mrf.mxu0  ;;  %7660 = vmatpush.bf16.msra.mxu3 %v12513_v51 }
 0x77b   : > { %v6661_v5 = vpop.f32.mrf.mxu1 }
 0x780   : > { %v6672_v60 = vpop.f32.mrf.mxu2  ;;  %v6697_v16 = vpop.f32.mrf.mxu3 }
 0x781   : > { %v6673_v29 = vadd.f32 %v6672_v60, %v6650_v43 }
 0x782   : > { %v6718_v27 = vpop.f32.mrf.mxu0 }
 0x783   : > { %v6826_v47 = vpop.f32.mrf.mxu1  ;;  %v6696_v7 = vadd.f32 %v6695_v45, %v6673_v29  ;;  %v6611_v45 = vadd.f32 %v15219_v3, %v15226_v46 }
 0x784   : > { %v6844_v4 = vmul.f32 %v15244_v17, %v6826_v47 }
 0x785   : > { %v6719_v23 = vadd.f32 %v6718_v27, %v6696_v7  ;;  %v6634_v10 = vadd.f32 %v15230_v1, %v6611_v45 }
 0x786   : > { %v6853_v21 = vadd.f32 %v15252_v36, %v6844_v4  ;;  %v6637_v4 = vadd.f32 %v15236_v62, %v6614_v24  ;;  %v12519_v24 = vld [vmem:[#allocation17 + $0x88] sm:$0xff] }
 0x787   : > { %v6736_v25 = vmul.f32 %v15241_v41, %v6719_v23  ;;  %v6657_v47 = vadd.f32 %v15232_v58, %v6634_v10  ;;  %v12520_v10 = vld [vmem:[#allocation17 + $0x90] sm:$0xff] }
 0x788   : > { %v6674_v18 = vpop.f32.mrf.mxu2  ;;  %v6700_v42 = vpop.f32.mrf.mxu3  ;;  %7690 = vmatpush.bf16.msrb.mxu0 %v12520_v10 }
 0x789   : > { %v6675_v6 = vadd.f32 %v6674_v18, %v6652_v48  ;;  %v6745_v33 = vadd.f32 %v15248_v14, %v6736_v25 }
 0x78a   : > { %v6720_v52 = vpop.f32.mrf.mxu0 }
 0x78b   : > { %v6828_v56 = vpop.f32.mrf.mxu1  ;;  %v6698_v12 = vadd.f32 %v6697_v16, %v6675_v6  ;;  %v6858_v2 = vadd.f32 %v6853_v21, %v6745_v33  ;;  %v12506_v33 = vld [vmem:[#allocation17 + $0x20] sm:$0xff] }
 0x78c   : > { %v6845_v32 = vmul.f32 %v15244_v17, %v6828_v56  ;;  %7630 = vmatpush.bf16.msra.mxu2 %v12506_v33  ;;  %7691 = vmatpush.bf16.msrb.mxu0 %v12519_v24 }
 0x78d   : > { %v6721_v59 = vadd.f32 %v6720_v52, %v6698_v12  ;;  %v6863_v46 = vmul.f32 0.01, %v6858_v2  ;;  %v6660_v52 = vadd.f32 %v15238_v0, %v6637_v4  ;;  %v12512_v12 = vld [vmem:[#allocation17 + $0x50] sm:$0xff] }
 0x78e   : > { %v6854_v34 = vadd.f32 %v15252_v36, %v6845_v32  ;;  %v12505_v32 = vld [vmem:[#allocation17 + $0x18] sm:$0xff]  ;;  %7661 = vmatpush.bf16.msra.mxu3 %v12512_v12 }
 0x78f   : > { %v6737_v5 = vmul.f32 %v15241_v41, %v6721_v59  ;;  %v6868_v7 = vmax.f32 %v6858_v2, %v6863_v46 }
 0x790   : > { %v6677_v40 = vpop.f32.mrf.mxu2  ;;  %v6702_v43 = vpop.f32.mrf.mxu3  ;;  %7631 = vmatpush.bf16.msra.mxu2 %v12505_v32 }
 0x791   : > { %v6746_v38 = vadd.f32 %v15248_v14, %v6737_v5  ;;  %v6678_v30 = vadd.f32 %v6677_v40, %v6655_v37  ;;  %v12511_v37 = vld [vmem:[#allocation17 + $0x48] sm:$0xff] }
 0x792   : > { %v6723_v60 = vpop.f32.mrf.mxu0  ;;  %7662 = vmatpush.bf16.msra.mxu3 %v12511_v37 }
 0x793   : > { %v6831_v3 = vpop.f32.mrf.mxu1  ;;  %v6859_v29 = vadd.f32 %v6854_v34, %v6746_v38  ;;  %v6701_v39 = vadd.f32 %v6700_v42, %v6678_v30 }
 0x794   : > { %v6846_v1 = vmul.f32 %v15244_v17, %v6831_v3  ;;  %v12510_v3 = vld [vmem:[#allocation17 + $0x40] sm:$0xff] }
 0x795   : > { %v6864_v16 = vmul.f32 0.01, %v6859_v29  ;;  %v6724_v27 = vadd.f32 %v6723_v60, %v6701_v39 }
 0x796   : > { %v6855_v26 = vadd.f32 %v15252_v36, %v6846_v1  ;;  %7663 = vmatpush.bf16.msra.mxu3 %v12510_v3  ;;  %v15283_v1 = vld [vmem:[%s15677_s6] ss:$0 sm:$0xff]  ;;  %s15683_s6 = sld [smem:[#allocation82_spill]] }
 0x797   : > { %v6869_v23 = vmax.f32 %v6859_v29, %v6864_v16  ;;  %v6738_v44 = vmul.f32 %v15241_v41, %v6724_v27 }
 0x798   : > { %v6679_v54 = vpop.f32.mrf.mxu2  ;;  %v6705_v49 = vpop.f32.mrf.mxu3 }
 0x799   : > { %v6873_v35 = vpack.c.bf16 %v6869_v23, %v6868_v7  ;;  %v6680_v48 = vadd.f32 %v6679_v54, %v6657_v47  ;;  %v6747_v6 = vadd.f32 %v15248_v14, %v6738_v44  ;;  %v12502_v7 = vld [vmem:[#allocation17] sm:$0xff] }
 0x79a   : > { %v6725_v25 = vpop.f32.mrf.mxu0 }
 0x79b   : > { %v6833_v18 = vpop.f32.mrf.mxu1  ;;  %v6703_v58 = vadd.f32 %v6702_v43, %v6680_v48  ;;  %6952 = vmatmul.bf16.vlgmr.msrb.gmra.mxu2 %v6873_v35  ;;  %v6860_v56 = vadd.f32 %v6855_v26, %v6747_v6  ;;  %v12504_v43 = vld [vmem:[#allocation17 + $0x10] sm:$0xff] }
 0x79c   : > { %v6847_v42 = vmul.f32 %v15244_v17, %v6833_v18  ;;  %7632 = vmatpush.bf16.msra.mxu2 %v12504_v43  ;;  %v12518_v18 = vld [vmem:[#allocation17 + $0x80] sm:$0xff] }
 0x79d   : > { %v6726_v28 = vadd.f32 %v6725_v25, %v6703_v58  ;;  %v6865_v0 = vmul.f32 0.01, %v6860_v56  ;;  %7692 = vmatpush.bf16.msrb.mxu0 %v12518_v18 }
 0x79e   : > { %v6856_v13 = vadd.f32 %v15252_v36, %v6847_v42 }
 0x79f   : > { %v6739_v61 = vmul.f32 %v15241_v41, %v6726_v28  ;;  %v6870_v34 = vmax.f32 %v6860_v56, %v6865_v0 }
 0x7a0   : > { %v6682_v11 = vpop.f32.mrf.mxu2  ;;  %v6707_v59 = vpop.f32.mrf.mxu3 }
 0x7a1   : > { %v6748_v62 = vadd.f32 %v15248_v14, %v6739_v61  ;;  %v6683_v21 = vadd.f32 %v6682_v11, %v6660_v52 }
 0x7a2   : > { %v6728_v53 = vpop.f32.mrf.mxu0 }
 0x7a3   : > { %v6836_v51 = vpop.f32.mrf.mxu1  ;;  %v6861_v45 = vadd.f32 %v6856_v13, %v6748_v62  ;;  %v6706_v19 = vadd.f32 %v6705_v49, %v6683_v21  ;;  %v15286_v49 = vld [vmem:[%s15678_s0] ss:$0 sm:$0xff]  ;;  %s15684_s0 = sld [smem:[#allocation86_spill]] }
 0x7a4   : > { %v6848_v38 = vmul.f32 %v15244_v17, %v6836_v51  ;;  %v12503_v17 = vld [vmem:[#allocation17 + $0x8] sm:$0xff] }
 0x7a5   : > { %v6866_v2 = vmul.f32 0.01, %v6861_v45  ;;  %v6729_v5 = vadd.f32 %v6728_v53, %v6706_v19  ;;  %7633 = vmatpush.bf16.msra.mxu2 %v12503_v17 }
 0x7a7   : > { %v6740_v40 = vmul.f32 %v15241_v41, %v6729_v5  ;;  %v6871_v30 = vmax.f32 %v6861_v45, %v6866_v2  ;;  %v6857_v41 = vadd.f32 %v15252_v36, %v6848_v38 }
 0x7a8   : > { %v6684_v60 = vpop.f32.mrf.mxu2  ;;  %v7271_v39 = vpop.f32.mrf.mxu3 }
 0x7a9   : > { %v6749_v46 = vadd.f32 %v15248_v14, %v6740_v40  ;;  %v6874_v29 = vpack.c.bf16 %v6871_v30, %v6870_v34  ;;  %7634 = vmatpush.bf16.msra.mxu2 %v12502_v7 }
 0x7aa   : > { %v6730_v16 = vpop.f32.mrf.mxu0 }
 0x7ab   : > { %v6838_v27 = vpop.f32.mrf.mxu1  ;;  %6957 = vmatmul.bf16.gmra.mxu2 %v6874_v29  ;;  %v6862_v47 = vadd.f32 %v6857_v41, %v6749_v46 }
 0x7ad   : > { %v6867_v44 = vmul.f32 0.01, %v6862_v47 }
 0x7af   : > { %v6872_v36 = vmax.f32 %v6862_v47, %v6867_v44 }
 0x7b0   : > { %v7273_v23 = vpop.f32.mrf.mxu3 }
 0x7b1   : > { %v6875_v6 = vpack.c.bf16 %v6872_v36, %v6872_v36 }
 0x7b2   : > { %v7300_v14 = vpop.f32.mrf.mxu0 }
 0x7b3   : > { %v7329_v54 = vpop.f32.mrf.mxu1  ;;  %v7301_v35 = vadd.f32 %v7300_v14, %v7271_v39 }
 0x7b5   : > { %v7330_v48 = vadd.f32 %v7329_v54, %v7301_v35 }
 0x7b7   : > { %v7353_v25 = vmul.f32 %v15283_v1, %v7330_v48 }
 0x7b8   : > { %v7276_v58 = vpop.f32.mrf.mxu3 }
 0x7b9   : > { %v7365_v4 = vadd.f32 %v15286_v49, %v7353_v25 }
 0x7ba   : > { %v7302_v26 = vpop.f32.mrf.mxu0 }
 0x7bb   : > { %v7331_v28 = vpop.f32.mrf.mxu1  ;;  %v7373_v42 = vmul.f32 0.01, %v7365_v4  ;;  %v7303_v52 = vadd.f32 %v7302_v26, %v7273_v23  ;;  %6962 = vmatmul.bf16.gmra.mxu2 %v6875_v6 }
 0x7bd   : > { %v7381_v56 = vmax.f32 %v7365_v4, %v7373_v42  ;;  %v7332_v61 = vadd.f32 %v7331_v28, %v7303_v52 }
 0x7bf   : > { %7391 = vst [vmem:[#allocation2 + $0x8] sm:$0xff] %v7381_v56  ;;  %v7354_v33 = vmul.f32 %v15283_v1, %v7332_v61 }
 0x7c0   : > { %v7278_v11 = vpop.f32.mrf.mxu3 }
 0x7c1   : > { %v7366_v12 = vadd.f32 %v15286_v49, %v7354_v33 }
 0x7c2   : > { %v7305_v50 = vpop.f32.mrf.mxu0 }
 0x7c3   : > { %v7334_v62 = vpop.f32.mrf.mxu1  ;;  %v7374_v13 = vmul.f32 0.01, %v7366_v12  ;;  %v7306_v21 = vadd.f32 %v7305_v50, %v7276_v58 }
 0x7c5   : > { %v7382_v59 = vmax.f32 %v7366_v12, %v7374_v13  ;;  %v7335_v32 = vadd.f32 %v7334_v62, %v7306_v21 }
 0x7c6   : > { %v7399_v51 = vld [vmem:[#allocation2 + $0x7] sm:$0xff] }
 0x7c7   : > { %7392 = vst [vmem:[#allocation2 + $0x10] sm:$0xff] %v7382_v59  ;;  %v7355_v53 = vmul.f32 %v15283_v1, %v7335_v32  ;;  %v7424_v0 = vpack.c.bf16 %v7382_v59, %v7381_v56 }
 0x7c8   : > { %7762 = vst [vmem:[#allocation2 + $0x7] sm:$0x1] %v13751_v20  ;;  %v7281_v40 = vpop.f32.mrf.mxu3 }
 0x7c9   : > { %v7367_v45 = vadd.f32 %v15286_v49, %v7355_v53  ;;  %7664 = vmatmul.bf16.vlgmr.msra.gmra.mxu3 %v7424_v0 }
 0x7ca   : > { %v7307_v19 = vpop.f32.mrf.mxu0 }
 0x7cb   : > { %v7336_v37 = vpop.f32.mrf.mxu1  ;;  %v7375_v2 = vmul.f32 0.01, %v7367_v45  ;;  %v7308_v5 = vadd.f32 %v7307_v19, %v7278_v11 }
 0x7cd   : > { %v7383_v38 = vmax.f32 %v7367_v45, %v7375_v2  ;;  %v7337_v34 = vadd.f32 %v7336_v37, %v7308_v5 }
 0x7ce   : > { %v7400_v30 = vld [vmem:[#allocation2 + $0xf] sm:$0xff] }
 0x7cf   : > { %7393 = vst [vmem:[#allocation2 + $0x18] sm:$0xff] %v7383_v38  ;;  %v7356_v43 = vmul.f32 %v15283_v1, %v7337_v34  ;;  %v7423_v10 = vpack.c.bf16 %v7400_v30, %v7399_v51  ;;  %v7415_v17 = vld [vmem:[#allocation2 + $0x9] sm:$0xff] }
 0x7d0   : > { %v7283_v41 = vpop.f32.mrf.mxu3 }
 0x7d1   : > { %v7368_v60 = vadd.f32 %v15286_v49, %v7356_v43  ;;  %7635 = vmatmul.bf16.vlgmr.msra.gmra.mxu2 %v7423_v10 }
 0x7d2   : > { %v7310_v3 = vpop.f32.mrf.mxu0 }
 0x7d3   : > { %v7339_v46 = vpop.f32.mrf.mxu1  ;;  %v7376_v29 = vmul.f32 0.01, %v7368_v60  ;;  %v7311_v39 = vadd.f32 %v7310_v3, %v7281_v40 }
 0x7d5   : > { %v7384_v16 = vmax.f32 %v7368_v60, %v7376_v29  ;;  %v7340_v27 = vadd.f32 %v7339_v46, %v7311_v39 }
 0x7d6   : > { %v7416_v47 = vld [vmem:[#allocation2 + $0x11] sm:$0xff] }
 0x7d7   : > { %7394 = vst [vmem:[#allocation2 + $0x20] sm:$0xff] %v7384_v16  ;;  %v7357_v24 = vmul.f32 %v15283_v1, %v7340_v27  ;;  %v7425_v7 = vpack.c.bf16 %v7416_v47, %v7415_v17  ;;  %v7427_v23 = vpack.c.bf16 %v7384_v16, %v7383_v38  ;;  %v7401_v18 = vld [vmem:[#allocation2 + $0x17] sm:$0xff]  ;;  %v12549_v17 = vld [vmem:[#allocation18 + $0xb8] sm:$0xff]  ;;  %v12975_v47 = vld [vmem:[%s15679_s4] ss:$0 sm:$0xff]  ;;  %s15685_s4 = sld [smem:[#allocation84_spill]] }
 0x7d8   : > { %v7286_v26 = vpop.f32.mrf.mxu3  ;;  %8058 = vmatpush.bf16.msrb.mxu3 %v12549_v17 }
 0x7d9   : > { %v7369_v44 = vadd.f32 %v15286_v49, %v7357_v24  ;;  %7693 = vmatmul.bf16.vlgmr.msrb.gmra.mxu0 %v7425_v7  ;;  %7669 = vmatmul.bf16.gmra.mxu3 %v7427_v23  ;;  %v12533_v23 = vld [vmem:[#allocation18 + $0x38] sm:$0xff] }
 0x7da   : > { %v7312_v14 = vpop.f32.mrf.mxu0  ;;  %8000 = vmatpush.bf16.msra.mxu1 %v12533_v23 }
 0x7db   : > { %v7341_v54 = vpop.f32.mrf.mxu1  ;;  %v7377_v35 = vmul.f32 0.01, %v7369_v44  ;;  %v7313_v48 = vadd.f32 %v7312_v14, %v7283_v41  ;;  %v12541_v41 = vld [vmem:[#allocation18 + $0x78] sm:$0xff]  ;;  %v12548_v14 = vld [vmem:[#allocation18 + $0xb0] sm:$0xff] }
 0x7dc   : > { %8029 = vmatpush.bf16.msrb.mxu2 %v12541_v41  ;;  %8059 = vmatpush.bf16.msrb.mxu3 %v12548_v14 }
 0x7dd   : > { %v7385_v36 = vmax.f32 %v7369_v44, %v7377_v35  ;;  %v7342_v25 = vadd.f32 %v7341_v54, %v7313_v48  ;;  %v12540_v44 = vld [vmem:[#allocation18 + $0x70] sm:$0xff]  ;;  %v12539_v48 = vld [vmem:[#allocation18 + $0x68] sm:$0xff] }
 0x7de   : > { %v7402_v4 = vld [vmem:[#allocation2 + $0x1f] sm:$0xff] }
 0x7df   : > { %7395 = vst [vmem:[#allocation2 + $0x28] sm:$0xff] %v7385_v36  ;;  %v7358_v6 = vmul.f32 %v15283_v1, %v7342_v25  ;;  %v7426_v58 = vpack.c.bf16 %v7402_v4, %v7401_v18  ;;  %v7417_v11 = vld [vmem:[#allocation2 + $0x19] sm:$0xff]  ;;  %v12538_v4 = vld [vmem:[#allocation18 + $0x60] sm:$0xff] }
 0x7e0   : > { %v7288_v32 = vpop.f32.mrf.mxu3  ;;  %8030 = vmatpush.bf16.msrb.mxu2 %v12540_v44  ;;  %v12532_v35 = vld [vmem:[#allocation18 + $0x30] sm:$0xff]  ;;  %v12531_v18 = vld [vmem:[#allocation18 + $0x28] sm:$0xff] }
 0x7e1   : > { %v7370_v28 = vadd.f32 %v15286_v49, %v7358_v6  ;;  %7640 = vmatmul.bf16.gmra.mxu2 %v7426_v58  ;;  %8001 = vmatpush.bf16.msra.mxu1 %v12532_v35 }
 0x7e2   : > { %v7315_v42 = vpop.f32.mrf.mxu0 }
 0x7e3   : > { %v7344_v52 = vpop.f32.mrf.mxu1  ;;  %v7378_v56 = vmul.f32 0.01, %v7370_v28  ;;  %v7316_v61 = vadd.f32 %v7315_v42, %v7286_v26  ;;  %v12546_v26 = vld [vmem:[#allocation18 + $0xa0] sm:$0xff] }
 0x7e4   : > { %8031 = vmatpush.bf16.msrb.mxu2 %v12539_v48 }
 0x7e5   : > { %v7386_v33 = vmax.f32 %v7370_v28, %v7378_v56  ;;  %v7345_v12 = vadd.f32 %v7344_v52, %v7316_v61  ;;  %8002 = vmatpush.bf16.msra.mxu1 %v12531_v18  ;;  %v12537_v61 = vld [vmem:[#allocation18 + $0x58] sm:$0xff] }
 0x7e6   : > { %v7418_v50 = vld [vmem:[#allocation2 + $0x21] sm:$0xff] }
 0x7e7   : > { %7396 = vst [vmem:[#allocation2 + $0x30] sm:$0xff] %v7386_v33  ;;  %v7359_v62 = vmul.f32 %v15283_v1, %v7345_v12  ;;  %v7428_v13 = vpack.c.bf16 %v7418_v50, %v7417_v11  ;;  %v7430_v21 = vpack.c.bf16 %v7386_v33, %v7385_v36  ;;  %v7403_v2 = vld [vmem:[#allocation2 + $0x27] sm:$0xff]  ;;  %v12547_v36 = vld [vmem:[#allocation18 + $0xa8] sm:$0xff]  ;;  %v12530_v33 = vld [vmem:[#allocation18 + $0x20] sm:$0xff] }
 0x7e8   : > { %8060 = vmatpush.bf16.msrb.mxu3 %v12547_v36  ;;  %8032 = vmatpush.bf16.msrb.mxu2 %v12538_v4  ;;  %v12545_v12 = vld [vmem:[#allocation18 + $0x98] sm:$0xff]  ;;  %v12536_v11 = vld [vmem:[#allocation18 + $0x50] sm:$0xff] }
 0x7e9   : > { %v7371_v59 = vadd.f32 %v15286_v49, %v7359_v62  ;;  %7698 = vmatmul.bf16.gmra.mxu0 %v7428_v13  ;;  %7674 = vmatmul.bf16.gmra.mxu3 %v7430_v21  ;;  %v12529_v62 = vld [vmem:[#allocation18 + $0x18] sm:$0xff]  ;;  %v12535_v13 = vld [vmem:[#allocation18 + $0x48] sm:$0xff]  ;;  %v12544_v21 = vld [vmem:[#allocation18 + $0x90] sm:$0xff] }
 0x7ea   : > { %v7317_v53 = vpop.f32.mrf.mxu0  ;;  %8003 = vmatpush.bf16.msra.mxu1 %v12530_v33 }
 0x7eb   : > { %v7379_v51 = vmul.f32 0.01, %v7371_v59  ;;  %v7318_v0 = vadd.f32 %v7317_v53, %v7288_v32  ;;  %v7346_v45 = vpop.f32.mrf.mxu1  ;;  %v12528_v32 = vld [vmem:[#allocation18 + $0x10] sm:$0xff]  ;;  %v12534_v53 = vld [vmem:[#allocation18 + $0x40] sm:$0xff] }
 0x7ec   : > { %8061 = vmatpush.bf16.msrb.mxu3 %v12546_v26  ;;  %8033 = vmatpush.bf16.msrb.mxu2 %v12537_v61 }
 0x7ed   : > { %v7387_v19 = vmax.f32 %v7371_v59, %v7379_v51  ;;  %v7347_v37 = vadd.f32 %v7346_v45, %v7318_v0  ;;  %v12527_v51 = vld [vmem:[#allocation18 + $0x8] sm:$0xff] }
 0x7ee   : > { %v7404_v5 = vld [vmem:[#allocation2 + $0x2f] sm:$0xff]  ;;  %8004 = vmatpush.bf16.msra.mxu1 %v12529_v62  ;;  %v12543_v0 = vld [vmem:[#allocation18 + $0x88] sm:$0xff] }
 0x7ef   : > { %7397 = vst [vmem:[#allocation2 + $0x38] sm:$0xff] %v7387_v19  ;;  %v7360_v40 = vmul.f32 %v15283_v1, %v7347_v37  ;;  %v7429_v38 = vpack.c.bf16 %v7404_v5, %v7403_v2  ;;  %v7419_v10 = vld [vmem:[#allocation2 + $0x29] sm:$0xff]  ;;  %v15319_v5 = vld [vmem:[%s15680_s26] ss:$0 sm:$0xff]  ;;  %s15687_s26 = sld [smem:[#allocation85_spill]] }
 0x7f0   : > { %8062 = vmatpush.bf16.msrb.mxu3 %v12545_v12  ;;  %8034 = vmatpush.bf16.msrb.mxu2 %v12536_v11  ;;  %v12526_v37 = vld [vmem:[#allocation18] sm:$0xff] }
 0x7f1   : > { %v7372_v34 = vadd.f32 %v15286_v49, %v7360_v40  ;;  %7645 = vmatmul.bf16.gmra.mxu2 %v7429_v38 }
 0x7f2   : > { %8005 = vmatpush.bf16.msra.mxu1 %v12528_v32 }
 0x7f3   : > { %v7380_v30 = vmul.f32 0.01, %v7372_v34 }
 0x7f4   : > { %8035 = vmatpush.bf16.msrb.mxu2 %v12535_v13  ;;  %8063 = vmatpush.bf16.msrb.mxu3 %v12544_v21 }
 0x7f5   : > { %v7388_v43 = vmax.f32 %v7372_v34, %v7380_v30  ;;  %v15322_v34 = vld [vmem:[%s15681_s18] ss:$0 sm:$0xff]  ;;  %s15688_s18 = sld [smem:[#allocation89_spill]] }
 0x7f6   : > { %v7420_v60 = vld [vmem:[#allocation2 + $0x31] sm:$0xff]  ;;  %8006 = vmatpush.bf16.msra.mxu1 %v12527_v51 }
 0x7f7   : > { %7398 = vst [vmem:[#allocation2 + $0x40] sm:$0xff] %v7388_v43  ;;  %v7431_v3 = vpack.c.bf16 %v7420_v60, %v7419_v10  ;;  %v7433_v46 = vpack.c.bf16 %v7388_v43, %v7387_v19  ;;  %v7405_v29 = vld [vmem:[#allocation2 + $0x37] sm:$0xff] }
 0x7f8   : > { %8036 = vmatpush.bf16.msrb.mxu2 %v12534_v53  ;;  %8064 = vmatpush.bf16.msrb.mxu3 %v12543_v0  ;;  %v12542_v10 = vld [vmem:[#allocation18 + $0x80] sm:$0xff] }
 0x7f9   : > { %7703 = vmatmul.bf16.gmra.mxu0 %v7431_v3  ;;  %7679 = vmatmul.bf16.gmra.mxu3 %v7433_v46 }
 0x7fa   : > { %8007 = vmatpush.bf16.msra.mxu1 %v12526_v37 }
 0x7fc   : > { %8065 = vmatpush.bf16.msrb.mxu3 %v12542_v10 }
 0x7fe   : > { %v7406_v39 = vld [vmem:[#allocation2 + $0x3f] sm:$0xff] }
 0x7ff   : > { %v7422_v16 = vld [vmem:[#allocation2 + $0x41] sm:$0xff]  ;;  %v7432_v27 = vpack.c.bf16 %v7406_v39, %v7405_v29  ;;  %v7421_v1 = vld [vmem:[#allocation2 + $0x39] sm:$0xff] }
 0x800   : > { %7763 = vst [vmem:[#allocation2 + $0x48] sm:$0x1] %v13751_v20  ;;  %v7434_v49 = vpack.c.bf16 %v7422_v16, %v7421_v1 }
 0x801   : > { %7650 = vmatmul.bf16.gmra.mxu2 %v7432_v27 }
 0x809   : > { %7708 = vmatmul.bf16.gmra.mxu0 %v7434_v49 }
 0x81e   : > { %v6953_v24 = vpop.f32.mrf.mxu2 }
 0x81f   : > { %v6954_v7 = vadd.f32 %v12975_v47, %v6953_v24 }
 0x821   : > { %6967 = vst [vmem:[%s15311_s28] sm:$0xff] %v6954_v7 }
 0x826   : > { %v6955_v54 = vpop.f32.mrf.mxu2 }
 0x827   : > { %v6956_v25 = vadd.f32 %v12975_v47, %v6955_v54 }
 0x829   : > { %6968 = vst [vmem:[%s15311_s28 + $0x8] sm:$0xff] %v6956_v25 }
 0x82e   : > { %v6958_v6 = vpop.f32.mrf.mxu2 }
 0x82f   : > { %v6959_v58 = vadd.f32 %v12975_v47, %v6958_v6 }
 0x831   : > { %6969 = vst [vmem:[%s15311_s28 + $0x10] sm:$0xff] %v6959_v58 }
 0x836   : > { %v6960_v28 = vpop.f32.mrf.mxu2 }
 0x837   : > { %v6961_v42 = vadd.f32 %v12975_v47, %v6960_v28 }
 0x839   : > { %6970 = vst [vmem:[%s15311_s28 + $0x18] sm:$0xff] %v6961_v42 }
 0x83e   : > { %v6963_v52 = vpop.f32.mrf.mxu2 }
 0x83f   : > { %v6964_v56 = vadd.f32 %v12975_v47, %v6963_v52 }
 0x841   : > { %6971 = vst [vmem:[%s15311_s28 + $0x20] sm:$0xff] %v6964_v56 }
 0x846   : > { %v6965_v50 = vpop.f32.mrf.mxu2 }
 0x84c   : > { %v7665_v59 = vpop.f32.mrf.mxu3 }
 0x854   : > { %v7636_v45 = vpop.f32.mrf.mxu2  ;;  %v7667_v19 = vpop.f32.mrf.mxu3 }
 0x855   : > { %v7666_v2 = vadd.f32 %v7665_v59, %v7636_v45 }
 0x856   : > { %v7694_v40 = vpop.f32.mrf.mxu0 }
 0x857   : > { %v7695_v38 = vadd.f32 %v7694_v40, %v7666_v2  ;;  %v12581_v2 = vld [vmem:[#allocation21 + $0x38] sm:$0xff] }
 0x858   : > { %8544 = vmatpush.bf16.msra.mxu3 %v12581_v2  ;;  %v12556_v2 = vld [vmem:[#allocation20 + $0x30] sm:$0xff] }
 0x859   : > { %v7718_v30 = vmul.f32 %v15319_v5, %v7695_v38 }
 0x85b   : > { %v7730_v43 = vadd.f32 %v15322_v34, %v7718_v30 }
 0x85c   : > { %v7638_v60 = vpop.f32.mrf.mxu2  ;;  %v7670_v3 = vpop.f32.mrf.mxu3 }
 0x85d   : > { %v7738_v46 = vadd.f32 %v7730_v43, %v15116_v55  ;;  %v7668_v29 = vadd.f32 %v7667_v19, %v7638_v60  ;;  %v12580_v43 = vld [vmem:[#allocation21 + $0x30] sm:$0xff] }
 0x85e   : > { %v7696_v39 = vpop.f32.mrf.mxu0  ;;  %8545 = vmatpush.bf16.msra.mxu3 %v12580_v43  ;;  %v12563_v43 = vld [vmem:[#allocation20 + $0x68] sm:$0xff] }
 0x85f   : > { %v7746_v16 = vmul.f32 0.01, %v7738_v46  ;;  %v7697_v27 = vadd.f32 %v7696_v39, %v7668_v29 }
 0x861   : > { %v7754_v1 = vmax.f32 %v7738_v46, %v7746_v16  ;;  %v7719_v49 = vmul.f32 %v15319_v5, %v7697_v27 }
 0x863   : > { %7764 = vst [vmem:[#allocation2 + $0x8] sm:$0xff] %v7754_v1  ;;  %v7731_v41 = vadd.f32 %v15322_v34, %v7719_v49  ;;  %v12579_v49 = vld [vmem:[#allocation21 + $0x28] sm:$0xff] }
 0x864   : > { %v7641_v17 = vpop.f32.mrf.mxu2  ;;  %v7672_v47 = vpop.f32.mrf.mxu3  ;;  %8546 = vmatpush.bf16.msra.mxu3 %v12579_v49  ;;  %v12558_v49 = vld [vmem:[#allocation20 + $0x40] sm:$0xff] }
 0x865   : > { %v7739_v24 = vadd.f32 %v7731_v41, %v15135_v8  ;;  %v7671_v7 = vadd.f32 %v7670_v3, %v7641_v17 }
 0x866   : > { %v7699_v23 = vpop.f32.mrf.mxu0 }
 0x867   : > { %v7747_v44 = vmul.f32 0.01, %v7739_v24  ;;  %v7700_v14 = vadd.f32 %v7699_v23, %v7671_v7 }
 0x869   : > { %v7755_v55 = vmax.f32 %v7739_v24, %v7747_v44  ;;  %v7720_v54 = vmul.f32 %v15319_v5, %v7700_v14  ;;  %v12578_v24 = vld [vmem:[#allocation21 + $0x20] sm:$0xff] }
 0x86a   : > { %v7772_v36 = vld [vmem:[#allocation2 + $0x7] sm:$0xff]  ;;  %8547 = vmatpush.bf16.msra.mxu3 %v12578_v24  ;;  %v12567_v24 = vld [vmem:[#allocation20 + $0x88] sm:$0xff] }
 0x86b   : > { %v15331_v35 = vpack.c.bf16 %v7755_v55, %v7754_v1  ;;  %7765 = vst [vmem:[#allocation2 + $0x10] sm:$0xff] %v7755_v55  ;;  %v7732_v48 = vadd.f32 %v15322_v34, %v7720_v54 }
 0x86c   : > { %v7643_v25 = vpop.f32.mrf.mxu2  ;;  %8127 = vst [vmem:[#allocation2 + $0x7] sm:$0x1] %v13751_v20  ;;  %v7675_v6 = vpop.f32.mrf.mxu3 }
 0x86d   : > { %v7740_v18 = vadd.f32 %v7732_v48, %v15154_v9  ;;  %v7673_v4 = vadd.f32 %v7672_v47, %v7643_v25  ;;  %8037 = vmatmul.bf16.vlgmr.msrb.gmra.mxu2 %v15331_v35 }
 0x86e   : > { %v7701_v8 = vpop.f32.mrf.mxu0 }
 0x86f   : > { %v7748_v58 = vmul.f32 0.01, %v7740_v18  ;;  %v7702_v26 = vadd.f32 %v7701_v8, %v7673_v4  ;;  %v12577_v4 = vld [vmem:[#allocation21 + $0x18] sm:$0xff] }
 0x870   : > { %8548 = vmatpush.bf16.msra.mxu3 %v12577_v4 }
 0x871   : > { %v7756_v28 = vmax.f32 %v7740_v18, %v7748_v58  ;;  %v7721_v42 = vmul.f32 %v15319_v5, %v7702_v26  ;;  %v12576_v26 = vld [vmem:[#allocation21 + $0x10] sm:$0xff] }
 0x872   : > { %v7773_v52 = vld [vmem:[#allocation2 + $0xf] sm:$0xff] }
 0x873   : > { %7766 = vst [vmem:[#allocation2 + $0x18] sm:$0xff] %v7756_v28  ;;  %v7733_v56 = vadd.f32 %v15322_v34, %v7721_v42  ;;  %v7796_v61 = vpack.c.bf16 %v7773_v52, %v7772_v36  ;;  %v7788_v32 = vld [vmem:[#allocation2 + $0x9] sm:$0xff] }
 0x874   : > { %v7646_v33 = vpop.f32.mrf.mxu2  ;;  %v7677_v13 = vpop.f32.mrf.mxu3  ;;  %8549 = vmatpush.bf16.msra.mxu3 %v12576_v26 }
 0x875   : > { %v7741_v12 = vadd.f32 %v7733_v56, %v15168_v22  ;;  %v7676_v11 = vadd.f32 %v7675_v6, %v7646_v33  ;;  %8008 = vmatmul.bf16.vlgmr.msra.gmra.mxu1 %v7796_v61 }
 0x876   : > { %v7704_v9 = vpop.f32.mrf.mxu0 }
 0x877   : > { %v7749_v50 = vmul.f32 0.01, %v7741_v12  ;;  %v7705_v62 = vadd.f32 %v7704_v9, %v7676_v11  ;;  %v12574_v9 = vld [vmem:[#allocation21] sm:$0xff] }
 0x879   : > { %v7757_v21 = vmax.f32 %v7741_v12, %v7749_v50  ;;  %v7722_v59 = vmul.f32 %v15319_v5, %v7705_v62 }
 0x87a   : > { %v7789_v53 = vld [vmem:[#allocation2 + $0x11] sm:$0xff] }
 0x87b   : > { %7767 = vst [vmem:[#allocation2 + $0x20] sm:$0xff] %v7757_v21  ;;  %v7734_v51 = vadd.f32 %v15322_v34, %v7722_v59  ;;  %v7798_v0 = vpack.c.bf16 %v7789_v53, %v7788_v32  ;;  %v15342_v45 = vpack.c.bf16 %v7757_v21, %v7756_v28  ;;  %v7774_v46 = vld [vmem:[#allocation2 + $0x17] sm:$0xff] }
 0x87c   : > { %v7648_v19 = vpop.f32.mrf.mxu2  ;;  %v7680_v3 = vpop.f32.mrf.mxu3 }
 0x87d   : > { %v7742_v22 = vadd.f32 %v7734_v51, %v15180_v63  ;;  %v7678_v37 = vadd.f32 %v7677_v13, %v7648_v19  ;;  %8066 = vmatmul.bf16.vlgmr.msrb.gmra.mxu3 %v7798_v0  ;;  %8042 = vmatmul.bf16.gmra.mxu2 %v15342_v45  ;;  %v12573_v0 = vld [vmem:[#allocation20 + $0xb8] sm:$0xff] }
 0x87e   : > { %v7706_v40 = vpop.f32.mrf.mxu0  ;;  %v12557_v19 = vld [vmem:[#allocation20 + $0x38] sm:$0xff]  ;;  %8423 = vmatpush.bf16.msra.mxu2 %v12573_v0 }
 0x87f   : > { %v7750_v38 = vmul.f32 0.01, %v7742_v22  ;;  %v7707_v30 = vadd.f32 %v7706_v40, %v7678_v37  ;;  %8365 = vmatpush.bf16.msra.mxu0 %v12557_v19  ;;  %v12572_v37 = vld [vmem:[#allocation20 + $0xb0] sm:$0xff] }
 0x880   : > { %v12564_v40 = vld [vmem:[#allocation20 + $0x70] sm:$0xff] }
 0x881   : > { %v7758_v10 = vmax.f32 %v7742_v22, %v7750_v38  ;;  %v7723_v60 = vmul.f32 %v15319_v5, %v7707_v30  ;;  %v12565_v22 = vld [vmem:[#allocation20 + $0x78] sm:$0xff]  ;;  %v12571_v38 = vld [vmem:[#allocation20 + $0xa8] sm:$0xff] }
 0x882   : > { %v7775_v29 = vld [vmem:[#allocation2 + $0x1f] sm:$0xff]  ;;  %8394 = vmatpush.bf16.msrb.mxu1 %v12565_v22  ;;  %8424 = vmatpush.bf16.msra.mxu2 %v12572_v37 }
 0x883   : > { %7768 = vst [vmem:[#allocation2 + $0x28] sm:$0xff] %v7758_v10  ;;  %v7735_v39 = vadd.f32 %v15322_v34, %v7723_v60  ;;  %v7799_v63 = vpack.c.bf16 %v7775_v29, %v7774_v46  ;;  %v7790_v44 = vld [vmem:[#allocation2 + $0x19] sm:$0xff]  ;;  %8366 = vmatpush.bf16.msra.mxu0 %v12556_v2  ;;  %v12561_v60 = vld [vmem:[#allocation20 + $0x58] sm:$0xff] }
 0x884   : > { %v7651_v16 = vpop.f32.mrf.mxu2  ;;  %v7682_v36 = vpop.f32.mrf.mxu3  ;;  %v12555_v30 = vld [vmem:[#allocation20 + $0x28] sm:$0xff]  ;;  %v12560_v46 = vld [vmem:[#allocation20 + $0x50] sm:$0xff] }
 0x885   : > { %v7743_v27 = vadd.f32 %v7735_v39, %v15185_v57  ;;  %v7681_v1 = vadd.f32 %v7680_v3, %v7651_v16  ;;  %8013 = vmatmul.bf16.gmra.mxu1 %v7799_v63  ;;  %v12554_v3 = vld [vmem:[#allocation20 + $0x20] sm:$0xff]  ;;  %v12553_v39 = vld [vmem:[#allocation20 + $0x18] sm:$0xff]  ;;  %v12559_v63 = vld [vmem:[#allocation20 + $0x48] sm:$0xff] }
 0x886   : > { %v7709_v41 = vpop.f32.mrf.mxu0  ;;  %8395 = vmatpush.bf16.msrb.mxu1 %v12564_v40  ;;  %8425 = vmatpush.bf16.msra.mxu2 %v12571_v38 }
 0x887   : > { %v7751_v17 = vmul.f32 0.01, %v7743_v27  ;;  %v7710_v47 = vadd.f32 %v7709_v41, %v7681_v1  ;;  %8367 = vmatpush.bf16.msra.mxu0 %v12555_v30  ;;  %v12552_v1 = vld [vmem:[#allocation20 + $0x10] sm:$0xff]  ;;  %v12551_v41 = vld [vmem:[#allocation20 + $0x8] sm:$0xff] }
 0x889   : > { %v7759_v7 = vmax.f32 %v7743_v27, %v7751_v17  ;;  %v7724_v23 = vmul.f32 %v15319_v5, %v7710_v47  ;;  %v12568_v27 = vld [vmem:[#allocation20 + $0x90] sm:$0xff] }
 0x88a   : > { %v7791_v14 = vld [vmem:[#allocation2 + $0x21] sm:$0xff]  ;;  %8396 = vmatpush.bf16.msrb.mxu1 %v12563_v43 }
 0x88b   : > { %7769 = vst [vmem:[#allocation2 + $0x30] sm:$0xff] %v7759_v7  ;;  %v7736_v55 = vadd.f32 %v15322_v34, %v7724_v23  ;;  %v7801_v54 = vpack.c.bf16 %v7791_v14, %v7790_v44  ;;  %v15351_v48 = vpack.c.bf16 %v7759_v7, %v7758_v10  ;;  %v7776_v52 = vld [vmem:[#allocation2 + $0x27] sm:$0xff]  ;;  %v12562_v10 = vld [vmem:[#allocation20 + $0x60] sm:$0xff]  ;;  %8368 = vmatpush.bf16.msra.mxu0 %v12554_v3  ;;  %v15363_v44 = vld [vmem:[%s15682_s10] ss:$0 sm:$0xff]  ;;  %s15689_s10 = sld [smem:[#allocation90_spill]] }
 0x88c   : > { %v7653_v57 = vpop.f32.mrf.mxu2  ;;  %v12550_v7 = vld [vmem:[#allocation20] sm:$0xff] }
 0x88d   : > { %v7744_v25 = vadd.f32 %v7736_v55, %v15046_v15  ;;  %v7683_v18 = vadd.f32 %v7682_v36, %v7653_v57  ;;  %8071 = vmatmul.bf16.gmra.mxu3 %v7801_v54  ;;  %8047 = vmatmul.bf16.gmra.mxu2 %v15351_v48  ;;  %v12575_v15 = vld [vmem:[#allocation21 + $0x8] sm:$0xff]  ;;  %v15366_v54 = vld [vmem:[%s15683_s6] ss:$0 sm:$0xff]  ;;  %v12566_v36 = vld [vmem:[#allocation20 + $0x80] sm:$0xff]  ;;  %s15690_s6 = sld [smem:[#allocation91_spill]] }
 0x88e   : > { %v7711_v8 = vpop.f32.mrf.mxu0  ;;  %8550 = vmatpush.bf16.msra.mxu3 %v12575_v15  ;;  %8397 = vmatpush.bf16.msrb.mxu1 %v12562_v10 }
 0x88f   : > { %v7752_v6 = vmul.f32 0.01, %v7744_v25  ;;  %v7712_v58 = vadd.f32 %v7711_v8, %v7683_v18  ;;  %8369 = vmatpush.bf16.msra.mxu0 %v12553_v39 }
 0x891   : > { %v7760_v28 = vmax.f32 %v7744_v25, %v7752_v6  ;;  %v7725_v42 = vmul.f32 %v15319_v5, %v7712_v58 }
 0x892   : > { %v7777_v56 = vld [vmem:[#allocation2 + $0x2f] sm:$0xff]  ;;  %8551 = vmatpush.bf16.msra.mxu3 %v12574_v9  ;;  %8398 = vmatpush.bf16.msrb.mxu1 %v12561_v60 }
 0x893   : > { %7770 = vst [vmem:[#allocation2 + $0x38] sm:$0xff] %v7760_v28  ;;  %v7737_v61 = vadd.f32 %v15322_v34, %v7725_v42  ;;  %v7802_v33 = vpack.c.bf16 %v7777_v56, %v7776_v52  ;;  %v7792_v62 = vld [vmem:[#allocation2 + $0x29] sm:$0xff]  ;;  %8370 = vmatpush.bf16.msra.mxu0 %v12552_v1 }
 0x895   : > { %v7745_v12 = vadd.f32 %v7737_v61, %v14810_v31  ;;  %8018 = vmatmul.bf16.gmra.mxu1 %v7802_v33 }
 0x896   : > { %8399 = vmatpush.bf16.msrb.mxu1 %v12560_v46 }
 0x897   : > { %v7753_v11 = vmul.f32 0.01, %v7745_v12  ;;  %8371 = vmatpush.bf16.msra.mxu0 %v12551_v41 }
 0x899   : > { %v7761_v50 = vmax.f32 %v7745_v12, %v7753_v11 }
 0x89a   : > { %v7793_v13 = vld [vmem:[#allocation2 + $0x31] sm:$0xff]  ;;  %8400 = vmatpush.bf16.msrb.mxu1 %v12559_v63 }
 0x89b   : > { %7771 = vst [vmem:[#allocation2 + $0x40] sm:$0xff] %v7761_v50  ;;  %v7804_v21 = vpack.c.bf16 %v7793_v13, %v7792_v62  ;;  %v7806_v5 = vpack.c.bf16 %v7761_v50, %v7760_v28  ;;  %v7778_v59 = vld [vmem:[#allocation2 + $0x37] sm:$0xff]  ;;  %8372 = vmatpush.bf16.msra.mxu0 %v12550_v7 }
 0x89d   : > { %8076 = vmatmul.bf16.gmra.mxu3 %v7804_v21  ;;  %8052 = vmatmul.bf16.gmra.mxu2 %v7806_v5 }
 0x89e   : > { %8401 = vmatpush.bf16.msrb.mxu1 %v12558_v49 }
 0x8a2   : > { %v7779_v34 = vld [vmem:[#allocation2 + $0x3f] sm:$0xff] }
 0x8a3   : > { %v7795_v32 = vld [vmem:[#allocation2 + $0x41] sm:$0xff]  ;;  %v7805_v53 = vpack.c.bf16 %v7779_v34, %v7778_v59  ;;  %v7794_v31 = vld [vmem:[#allocation2 + $0x39] sm:$0xff] }
 0x8a4   : > { %8128 = vst [vmem:[#allocation2 + $0x48] sm:$0x1] %v13751_v20  ;;  %v7807_v51 = vpack.c.bf16 %v7795_v32, %v7794_v31 }
 0x8a5   : > { %8023 = vmatmul.bf16.gmra.mxu1 %v7805_v53 }
 0x8ad   : > { %8081 = vmatmul.bf16.gmra.mxu3 %v7807_v51 }
 0x8bd   : > { %8552 = vmatmul.bf16.vlgmr.msra.gmra.mxu3 %v15331_v35  ;;  %v12570_v35 = vld [vmem:[#allocation20 + $0xa0] sm:$0xff] }
 0x8be   : > { %8426 = vmatpush.bf16.msra.mxu2 %v12570_v35 }
 0x8cd   : > { %8557 = vmatmul.bf16.gmra.mxu3 %v15342_v45  ;;  %v12569_v45 = vld [vmem:[#allocation20 + $0x98] sm:$0xff] }
 0x8ce   : > { %8427 = vmatpush.bf16.msra.mxu2 %v12569_v45 }
 0x8d2   : > { %8428 = vmatpush.bf16.msra.mxu2 %v12568_v27 }
 0x8d6   : > { %8429 = vmatpush.bf16.msra.mxu2 %v12567_v24 }
 0x8da   : > { %8430 = vmatpush.bf16.msra.mxu2 %v12566_v36 }
 0x8dd   : > { %8562 = vmatmul.bf16.gmra.mxu3 %v15351_v48 }
 0x8ed   : > { %8567 = vmatmul.bf16.gmra.mxu3 %v7806_v5 }
 0x8f0   : > { %v8038_v29 = vpop.f32.mrf.mxu2 }
 0x8f2   : > { %v8009_v16 = vpop.f32.mrf.mxu1 }
 0x8f3   : > { %v8039_v23 = vadd.f32 %v8038_v29, %v8009_v16 }
 0x8f8   : > { %v8040_v47 = vpop.f32.mrf.mxu2 }
 0x8fa   : > { %v8011_v17 = vpop.f32.mrf.mxu1 }
 0x8fb   : > { %v8041_v4 = vadd.f32 %v8040_v47, %v8011_v17 }
 0x900   : > { %v8067_v14 = vpop.f32.mrf.mxu3  ;;  %v8043_v25 = vpop.f32.mrf.mxu2 }
 0x901   : > { %v8068_v55 = vadd.f32 %v8067_v14, %v8039_v23 }
 0x902   : > { %v8014_v48 = vpop.f32.mrf.mxu1 }
 0x903   : > { %v8091_v57 = vmul.f32 %v15363_v44, %v8068_v55  ;;  %v8044_v61 = vadd.f32 %v8043_v25, %v8014_v48 }
 0x905   : > { %v8103_v18 = vadd.f32 %v15366_v54, %v8091_v57 }
 0x907   : > { %v8111_v8 = vmul.f32 0.01, %v8103_v18 }
 0x908   : > { %v8069_v6 = vpop.f32.mrf.mxu3  ;;  %v8045_v56 = vpop.f32.mrf.mxu2 }
 0x909   : > { %v8119_v58 = vmax.f32 %v8103_v18, %v8111_v8  ;;  %v8070_v26 = vadd.f32 %v8069_v6, %v8041_v4 }
 0x90a   : > { %v8016_v42 = vpop.f32.mrf.mxu1 }
 0x90b   : > { %8129 = vst [vmem:[#allocation2 + $0x8] sm:$0xff] %v8119_v58  ;;  %v8092_v28 = vmul.f32 %v15363_v44, %v8070_v26  ;;  %v8046_v5 = vadd.f32 %v8045_v56, %v8016_v42 }
 0x90d   : > { %v8104_v52 = vadd.f32 %v15366_v54, %v8092_v28 }
 0x90f   : > { %v8112_v33 = vmul.f32 0.01, %v8104_v52 }
 0x910   : > { %v8072_v15 = vpop.f32.mrf.mxu3  ;;  %v8048_v34 = vpop.f32.mrf.mxu2 }
 0x911   : > { %v8120_v12 = vmax.f32 %v8104_v52, %v8112_v33  ;;  %v8073_v11 = vadd.f32 %v8072_v15, %v8044_v61 }
 0x912   : > { %v8137_v50 = vld [vmem:[#allocation2 + $0x7] sm:$0xff]  ;;  %v8019_v21 = vpop.f32.mrf.mxu1 }
 0x913   : > { %8130 = vst [vmem:[#allocation2 + $0x10] sm:$0xff] %v8120_v12  ;;  %v8093_v9 = vmul.f32 %v15363_v44, %v8073_v11  ;;  %v8162_v62 = vpack.c.bf16 %v8120_v12, %v8119_v58  ;;  %v8049_v37 = vadd.f32 %v8048_v34, %v8019_v21 }
 0x914   : > { %8621 = vst [vmem:[#allocation2 + $0x7] sm:$0x1] %v13751_v20 }
 0x915   : > { %v8105_v13 = vadd.f32 %v15366_v54, %v8093_v9  ;;  %8402 = vmatmul.bf16.vlgmr.msrb.gmra.mxu1 %v8162_v62 }
 0x917   : > { %v8113_v59 = vmul.f32 0.01, %v8105_v13 }
 0x918   : > { %v8074_v32 = vpop.f32.mrf.mxu3  ;;  %v8050_v35 = vpop.f32.mrf.mxu2 }
 0x919   : > { %v8121_v53 = vmax.f32 %v8105_v13, %v8113_v59  ;;  %v8075_v31 = vadd.f32 %v8074_v32, %v8046_v5 }
 0x91a   : > { %v8138_v51 = vld [vmem:[#allocation2 + $0xf] sm:$0xff]  ;;  %v8021_v40 = vpop.f32.mrf.mxu1 }
 0x91b   : > { %8131 = vst [vmem:[#allocation2 + $0x18] sm:$0xff] %v8121_v53  ;;  %v8094_v0 = vmul.f32 %v15363_v44, %v8075_v31  ;;  %v8161_v19 = vpack.c.bf16 %v8138_v51, %v8137_v50  ;;  %v8153_v10 = vld [vmem:[#allocation2 + $0x9] sm:$0xff]  ;;  %v8051_v39 = vadd.f32 %v8050_v35, %v8021_v40  ;;  %v12596_v40 = vld [vmem:[#allocation23 + $0x70] sm:$0xff] }
 0x91c   : > { %v12602_v35 = vld [vmem:[#allocation23 + $0xa0] sm:$0xff] }
 0x91d   : > { %v8106_v22 = vadd.f32 %v15366_v54, %v8094_v0  ;;  %8373 = vmatmul.bf16.vlgmr.msra.gmra.mxu0 %v8161_v19  ;;  %v12589_v19 = vld [vmem:[#allocation23 + $0x38] sm:$0xff] }
 0x91e   : > { %8859 = vmatpush.bf16.msrb.mxu0 %v12589_v19 }
 0x91f   : > { %v8114_v2 = vmul.f32 0.01, %v8106_v22 }
 0x920   : > { %v8077_v38 = vpop.f32.mrf.mxu3  ;;  %v8053_v7 = vpop.f32.mrf.mxu2 }
 0x921   : > { %v8122_v30 = vmax.f32 %v8106_v22, %v8114_v2  ;;  %v8078_v43 = vadd.f32 %v8077_v38, %v8049_v37  ;;  %v12597_v22 = vld [vmem:[#allocation23 + $0x78] sm:$0xff]  ;;  %v12604_v37 = vld [vmem:[#allocation23 + $0xb0] sm:$0xff]  ;;  %v12603_v38 = vld [vmem:[#allocation23 + $0xa8] sm:$0xff] }
 0x922   : > { %v8154_v60 = vld [vmem:[#allocation2 + $0x11] sm:$0xff]  ;;  %v8024_v49 = vpop.f32.mrf.mxu1  ;;  %8888 = vmatpush.bf16.msra.mxu1 %v12597_v22  ;;  %v12588_v2 = vld [vmem:[#allocation23 + $0x30] sm:$0xff] }
 0x923   : > { %8132 = vst [vmem:[#allocation2 + $0x20] sm:$0xff] %v8122_v30  ;;  %v8095_v3 = vmul.f32 %v15363_v44, %v8078_v43  ;;  %v8163_v45 = vpack.c.bf16 %v8154_v60, %v8153_v10  ;;  %v8165_v46 = vpack.c.bf16 %v8122_v30, %v8121_v53  ;;  %v8139_v41 = vld [vmem:[#allocation2 + $0x17] sm:$0xff]  ;;  %v8054_v14 = vadd.f32 %v8053_v7, %v8024_v49  ;;  %v12593_v60 = vld [vmem:[#allocation23 + $0x58] sm:$0xff]  ;;  %v12584_v49 = vld [vmem:[#allocation23 + $0x10] sm:$0xff] }
 0x924   : > { %8860 = vmatpush.bf16.msrb.mxu0 %v12588_v2  ;;  %v12587_v30 = vld [vmem:[#allocation23 + $0x28] sm:$0xff]  ;;  %v12594_v10 = vld [vmem:[#allocation23 + $0x60] sm:$0xff] }
 0x925   : > { %v8107_v29 = vadd.f32 %v15366_v54, %v8095_v3  ;;  %8431 = vmatmul.bf16.vlgmr.msra.gmra.mxu2 %v8163_v45  ;;  %8407 = vmatmul.bf16.gmra.mxu1 %v8165_v46  ;;  %v12595_v43 = vld [vmem:[#allocation23 + $0x68] sm:$0xff]  ;;  %v12586_v3 = vld [vmem:[#allocation23 + $0x20] sm:$0xff]  ;;  %v12601_v45 = vld [vmem:[#allocation23 + $0x98] sm:$0xff] }
 0x926   : > { %8889 = vmatpush.bf16.msra.mxu1 %v12596_v40  ;;  %v12592_v46 = vld [vmem:[#allocation23 + $0x50] sm:$0xff]  ;;  %v12583_v7 = vld [vmem:[#allocation23 + $0x8] sm:$0xff] }
 0x927   : > { %v8115_v63 = vmul.f32 0.01, %v8107_v29 }
 0x928   : > { %v8079_v16 = vpop.f32.mrf.mxu3  ;;  %v8055_v28 = vpop.f32.mrf.mxu2  ;;  %8861 = vmatpush.bf16.msrb.mxu0 %v12587_v30 }
 0x929   : > { %v8123_v27 = vmax.f32 %v8107_v29, %v8115_v63  ;;  %v8080_v1 = vadd.f32 %v8079_v16, %v8051_v39  ;;  %v12585_v16 = vld [vmem:[#allocation23 + $0x18] sm:$0xff] }
 0x92a   : > { %v8140_v17 = vld [vmem:[#allocation2 + $0x1f] sm:$0xff]  ;;  %v8026_v58 = vpop.f32.mrf.mxu1  ;;  %8890 = vmatpush.bf16.msra.mxu1 %v12595_v43 }
 0x92b   : > { %8133 = vst [vmem:[#allocation2 + $0x28] sm:$0xff] %v8123_v27  ;;  %v8096_v47 = vmul.f32 %v15363_v44, %v8080_v1  ;;  %v8164_v24 = vpack.c.bf16 %v8140_v17, %v8139_v41  ;;  %v8155_v25 = vld [vmem:[#allocation2 + $0x19] sm:$0xff]  ;;  %v8056_v42 = vadd.f32 %v8055_v28, %v8026_v58  ;;  %v12590_v41 = vld [vmem:[#allocation23 + $0x40] sm:$0xff] }
 0x92c   : > { %8862 = vmatpush.bf16.msrb.mxu0 %v12586_v3  ;;  %v12600_v1 = vld [vmem:[#allocation23 + $0x90] sm:$0xff] }
 0x92d   : > { %v8108_v23 = vadd.f32 %v15366_v54, %v8096_v47  ;;  %8378 = vmatmul.bf16.gmra.mxu0 %v8164_v24 }
 0x92e   : > { %8891 = vmatpush.bf16.msra.mxu1 %v12594_v10 }
 0x92f   : > { %v8116_v55 = vmul.f32 0.01, %v8108_v23 }
 0x930   : > { %v8082_v48 = vpop.f32.mrf.mxu3  ;;  %8863 = vmatpush.bf16.msrb.mxu0 %v12585_v16 }
 0x931   : > { %v8124_v57 = vmax.f32 %v8108_v23, %v8116_v55  ;;  %v8083_v36 = vadd.f32 %v8082_v48, %v8054_v14  ;;  %v15387_v23 = vld [vmem:[%s15684_s0] ss:$0 sm:$0xff]  ;;  %v12599_v14 = vld [vmem:[#allocation23 + $0x88] sm:$0xff]  ;;  %v12582_v55 = vld [vmem:[#allocation23] sm:$0xff]  ;;  %s15691_s0 = sld [smem:[#allocation94_spill]] }
 0x932   : > { %v8156_v18 = vld [vmem:[#allocation2 + $0x21] sm:$0xff]  ;;  %8892 = vmatpush.bf16.msra.mxu1 %v12593_v60 }
 0x933   : > { %8134 = vst [vmem:[#allocation2 + $0x30] sm:$0xff] %v8124_v57  ;;  %v8097_v4 = vmul.f32 %v15363_v44, %v8083_v36  ;;  %v8166_v8 = vpack.c.bf16 %v8156_v18, %v8155_v25  ;;  %v8168_v6 = vpack.c.bf16 %v8124_v57, %v8123_v27  ;;  %v8141_v15 = vld [vmem:[#allocation2 + $0x27] sm:$0xff]  ;;  %v12591_v27 = vld [vmem:[#allocation23 + $0x48] sm:$0xff]  ;;  %v15390_v57 = vld [vmem:[%s15685_s4] ss:$0 sm:$0xff]  ;;  %s15692_s4 = sld [smem:[#allocation92_spill]] }
 0x934   : > { %8864 = vmatpush.bf16.msrb.mxu0 %v12584_v49  ;;  %v15394_v18 = vld [vmem:[%s15686_s2] ss:$0 sm:$0xff]  ;;  %s15693_s2 = sld [smem:[#allocation96_spill]] }
 0x935   : > { %v8109_v26 = vadd.f32 %v15366_v54, %v8097_v4  ;;  %8436 = vmatmul.bf16.gmra.mxu2 %v8166_v8  ;;  %8412 = vmatmul.bf16.gmra.mxu1 %v8168_v6  ;;  %v15397_v8 = vld [vmem:[%s15687_s26] ss:$0 sm:$0xff] }
 0x936   : > { %8893 = vmatpush.bf16.msra.mxu1 %v12592_v46 }
 0x937   : > { %v8117_v52 = vmul.f32 0.01, %v8109_v26 }
 0x938   : > { %v8084_v56 = vpop.f32.mrf.mxu3  ;;  %8865 = vmatpush.bf16.msrb.mxu0 %v12583_v7 }
 0x939   : > { %v8125_v61 = vmax.f32 %v8109_v26, %v8117_v52  ;;  %v8085_v33 = vadd.f32 %v8084_v56, %v8056_v42  ;;  %v12598_v56 = vld [vmem:[#allocation23 + $0x80] sm:$0xff] }
 0x93a   : > { %v8142_v12 = vld [vmem:[#allocation2 + $0x2f] sm:$0xff]  ;;  %8894 = vmatpush.bf16.msra.mxu1 %v12591_v27  ;;  %s15694_s26 = smov %s15693_s2 }
 0x93b   : > { %8135 = vst [vmem:[#allocation2 + $0x38] sm:$0xff] %v8125_v61  ;;  %v8098_v11 = vmul.f32 %v15363_v44, %v8085_v33  ;;  %v8167_v9 = vpack.c.bf16 %v8142_v12, %v8141_v15  ;;  %v8157_v21 = vld [vmem:[#allocation2 + $0x29] sm:$0xff]  ;;  %s13554_s11 = scalar_lea.hbm %s15694_s26, 80 }
 0x93c   : > { %8866 = vmatpush.bf16.msrb.mxu0 %v12582_v55 }
 0x93d   : > { %v8110_v50 = vadd.f32 %v15366_v54, %v8098_v11  ;;  %8383 = vmatmul.bf16.gmra.mxu0 %v8167_v9  ;;  %v12605_v54 = vld [vmem:[#allocation23 + $0xb8] sm:$0xff] }
 0x93e   : > { %8917 = vmatpush.bf16.msrb.mxu2 %v12605_v54  ;;  %8895 = vmatpush.bf16.msra.mxu1 %v12590_v41 }
 0x93f   : > { %v8118_v62 = vmul.f32 0.01, %v8110_v50 }
 0x940   : > { %v8553_v29 = vpop.f32.mrf.mxu3 }
 0x941   : > { %v8126_v13 = vmax.f32 %v8110_v50, %v8118_v62  ;;  %v8577_v25 = vmul.f32 %v15387_v23, %v8553_v29 }
 0x942   : > { %v8158_v5 = vld [vmem:[#allocation2 + $0x31] sm:$0xff]  ;;  %8918 = vmatpush.bf16.msrb.mxu2 %v12604_v37 }
 0x943   : > { %8136 = vst [vmem:[#allocation2 + $0x40] sm:$0xff] %v8126_v13  ;;  %v8169_v59 = vpack.c.bf16 %v8158_v5, %v8157_v21  ;;  %v8171_v34 = vpack.c.bf16 %v8126_v13, %v8125_v61  ;;  %v8143_v32 = vld [vmem:[#allocation2 + $0x37] sm:$0xff]  ;;  %v8589_v42 = vadd.f32 %v15394_v18, %v8577_v25 }
 0x945   : > { %8441 = vmatmul.bf16.gmra.mxu2 %v8169_v59  ;;  %8417 = vmatmul.bf16.gmra.mxu1 %v8171_v34 }
 0x946   : > { %8919 = vmatpush.bf16.msrb.mxu2 %v12603_v38 }
 0x948   : > { %v8555_v17 = vpop.f32.mrf.mxu3 }
 0x949   : > { %v8578_v12 = vmul.f32 %v15387_v23, %v8555_v17 }
 0x94a   : > { %v8144_v53 = vld [vmem:[#allocation2 + $0x3f] sm:$0xff]  ;;  %8920 = vmatpush.bf16.msrb.mxu2 %v12602_v35 }
 0x94b   : > { %v8160_v31 = vld [vmem:[#allocation2 + $0x41] sm:$0xff]  ;;  %v8170_v51 = vpack.c.bf16 %v8144_v53, %v8143_v32  ;;  %v8159_v44 = vld [vmem:[#allocation2 + $0x39] sm:$0xff]  ;;  %v8590_v21 = vadd.f32 %v15394_v18, %v8578_v12 }
 0x94c   : > { %8622 = vst [vmem:[#allocation2 + $0x48] sm:$0x1] %v13751_v20  ;;  %v8172_v0 = vpack.c.bf16 %v8160_v31, %v8159_v44 }
 0x94d   : > { %8388 = vmatmul.bf16.gmra.mxu0 %v8170_v51 }
 0x94e   : > { %8921 = vmatpush.bf16.msrb.mxu2 %v12601_v45 }
 0x950   : > { %v8558_v58 = vpop.f32.mrf.mxu3 }
 0x951   : > { %v8579_v51 = vmul.f32 %v15387_v23, %v8558_v58 }
 0x952   : > { %8922 = vmatpush.bf16.msrb.mxu2 %v12600_v1 }
 0x953   : > { %v8591_v22 = vadd.f32 %v15394_v18, %v8579_v51 }
 0x955   : > { %8446 = vmatmul.bf16.gmra.mxu2 %v8172_v0 }
 0x956   : > { %8923 = vmatpush.bf16.msrb.mxu2 %v12599_v14 }
 0x958   : > { %v8560_v5 = vpop.f32.mrf.mxu3 }
 0x959   : > { %v8580_v3 = vmul.f32 %v15387_v23, %v8560_v5 }
 0x95a   : > { %8924 = vmatpush.bf16.msrb.mxu2 %v12598_v56 }
 0x95b   : > { %v8592_v16 = vadd.f32 %v15394_v18, %v8580_v3 }
 0x960   : > { %v8563_v30 = vpop.f32.mrf.mxu3 }
 0x968   : > { %v8565_v55 = vpop.f32.mrf.mxu3 }
 0x992   : > { %v8403_v39 = vpop.f32.mrf.mxu1 }
 0x99a   : > { %v8374_v63 = vpop.f32.mrf.mxu0  ;;  %v8405_v24 = vpop.f32.mrf.mxu1 }
 0x99b   : > { %v8404_v48 = vadd.f32 %v8403_v39, %v8374_v63 }
 0x9a2   : > { %v8376_v47 = vpop.f32.mrf.mxu0  ;;  %v8408_v28 = vpop.f32.mrf.mxu1 }
 0x9a3   : > { %v8406_v61 = vadd.f32 %v8405_v24, %v8376_v47  ;;  %v8581_v24 = vmul.f32 %v15387_v23, %v8563_v30 }
 0x9a5   : > { %v8593_v58 = vadd.f32 %v15394_v18, %v8581_v24 }
 0x9a8   : > { %v8432_v36 = vpop.f32.mrf.mxu2 }
 0x9a9   : > { %v8433_v4 = vadd.f32 %v8432_v36, %v8404_v48 }
 0x9aa   : > { %v8379_v6 = vpop.f32.mrf.mxu0  ;;  %v8410_v34 = vpop.f32.mrf.mxu1 }
 0x9ab   : > { %v8456_v26 = vmul.f32 %v15390_v57, %v8433_v4  ;;  %v8409_v32 = vadd.f32 %v8408_v28, %v8379_v6 }
 0x9ad   : > { %v8468_v52 = vadd.f32 %v15397_v8, %v8456_v26 }
 0x9af   : > { %v8597_v33 = vadd.f32 %v8589_v42, %v8468_v52 }
 0x9b0   : > { %v8434_v15 = vpop.f32.mrf.mxu2 }
 0x9b1   : > { %v8605_v11 = vmul.f32 0.01, %v8597_v33  ;;  %v8435_v9 = vadd.f32 %v8434_v15, %v8406_v61  ;;  %v12637_v61 = vld [vmem:[#allocation26 + $0x38] sm:$0xff]  ;;  %v8582_v15 = vmul.f32 %v15387_v23, %v8565_v55 }
 0x9b2   : > { %v8381_v13 = vpop.f32.mrf.mxu0  ;;  %v8413_v10 = vpop.f32.mrf.mxu1  ;;  %9403 = vmatpush.bf16.msra.mxu2 %v12637_v61 }
 0x9b3   : > { %v8613_v50 = vmax.f32 %v8597_v33, %v8605_v11  ;;  %v8457_v62 = vmul.f32 %v15390_v57, %v8435_v9  ;;  %v8411_v43 = vadd.f32 %v8410_v34, %v8381_v13  ;;  %v12636_v9 = vld [vmem:[#allocation26 + $0x30] sm:$0xff] }
 0x9b5   : > { %8623 = vst [vmem:[#allocation2 + $0x8] sm:$0xff] %v8613_v50  ;;  %v8469_v59 = vadd.f32 %v15397_v8, %v8457_v62 }
 0x9b6   : > { %9404 = vmatpush.bf16.msra.mxu2 %v12636_v9  ;;  %v12621_v9 = vld [vmem:[#allocation24 + $0x78] sm:$0xff] }
 0x9b7   : > { %v8598_v53 = vadd.f32 %v8590_v21, %v8469_v59  ;;  %v8568_v21 = vpop.f32.mrf.mxu3  ;;  %9253 = vmatpush.bf16.msra.mxu0 %v12621_v9 }
 0x9b8   : > { %v8437_v31 = vpop.f32.mrf.mxu2 }
 0x9b9   : > { %v8606_v44 = vmul.f32 0.01, %v8598_v53  ;;  %v8438_v0 = vadd.f32 %v8437_v31, %v8409_v32  ;;  %v8594_v32 = vadd.f32 %v15394_v18, %v8582_v15 }
 0x9ba   : > { %v8384_v38 = vpop.f32.mrf.mxu0  ;;  %v8415_v48 = vpop.f32.mrf.mxu1 }
 0x9bb   : > { %v8614_v54 = vmax.f32 %v8598_v53, %v8606_v44  ;;  %v8458_v19 = vmul.f32 %v15390_v57, %v8438_v0  ;;  %v8414_v49 = vadd.f32 %v8413_v10, %v8384_v38  ;;  %v12635_v0 = vld [vmem:[#allocation26 + $0x28] sm:$0xff] }
 0x9bc   : > { %v8631_v40 = vld [vmem:[#allocation2 + $0x7] sm:$0xff]  ;;  %9405 = vmatpush.bf16.msra.mxu2 %v12635_v0 }
 0x9bd   : > { %v15409_v37 = vpack.c.bf16 %v8614_v54, %v8613_v50  ;;  %8624 = vst [vmem:[#allocation2 + $0x10] sm:$0xff] %v8614_v54  ;;  %v8470_v2 = vadd.f32 %v15397_v8, %v8458_v19  ;;  %v8583_v54 = vmul.f32 %v15387_v23, %v8568_v21  ;;  %v12611_v21 = vld [vmem:[#allocation24 + $0x28] sm:$0xff]  ;;  %v12616_v0 = vld [vmem:[#allocation24 + $0x50] sm:$0xff] }
 0x9be   : > { %8986 = vst [vmem:[#allocation2 + $0x7] sm:$0x1] %v13751_v20 }
 0x9bf   : > { %v8599_v35 = vadd.f32 %v8591_v22, %v8470_v2  ;;  %8896 = vmatmul.bf16.vlgmr.msra.gmra.mxu1 %v15409_v37 }
 0x9c0   : > { %v8439_v60 = vpop.f32.mrf.mxu2 }
 0x9c1   : > { %v8607_v45 = vmul.f32 0.01, %v8599_v35  ;;  %v8440_v46 = vadd.f32 %v8439_v60, %v8411_v43  ;;  %v8595_v43 = vadd.f32 %v15394_v18, %v8583_v54  ;;  %v12615_v54 = vld [vmem:[#allocation24 + $0x48] sm:$0xff] }
 0x9c2   : > { %v8386_v17 = vpop.f32.mrf.mxu0  ;;  %v8418_v5 = vpop.f32.mrf.mxu1 }
 0x9c3   : > { %v8615_v29 = vmax.f32 %v8599_v35, %v8607_v45  ;;  %v8459_v39 = vmul.f32 %v15390_v57, %v8440_v46  ;;  %v8416_v52 = vadd.f32 %v8415_v48, %v8386_v17 }
 0x9c4   : > { %v8632_v63 = vld [vmem:[#allocation2 + $0xf] sm:$0xff] }
 0x9c5   : > { %8625 = vst [vmem:[#allocation2 + $0x18] sm:$0xff] %v8615_v29  ;;  %v8471_v27 = vadd.f32 %v15397_v8, %v8459_v39  ;;  %v8655_v1 = vpack.c.bf16 %v8632_v63, %v8631_v40  ;;  %v8647_v4 = vld [vmem:[#allocation2 + $0x9] sm:$0xff] }
 0x9c6   : > { %v12634_v40 = vld [vmem:[#allocation26 + $0x20] sm:$0xff] }
 0x9c7   : > { %v8600_v41 = vadd.f32 %v8592_v16, %v8471_v27  ;;  %8867 = vmatmul.bf16.vlgmr.msrb.gmra.mxu0 %v8655_v1  ;;  %9406 = vmatpush.bf16.msra.mxu2 %v12634_v40  ;;  %v12633_v27 = vld [vmem:[#allocation26 + $0x18] sm:$0xff]  ;;  %v12614_v40 = vld [vmem:[#allocation24 + $0x40] sm:$0xff] }
 0x9c8   : > { %v8442_v47 = vpop.f32.mrf.mxu2 }
 0x9c9   : > { %v8608_v7 = vmul.f32 0.01, %v8600_v41  ;;  %v8443_v14 = vadd.f32 %v8442_v47, %v8414_v49  ;;  %v12632_v47 = vld [vmem:[#allocation26 + $0x10] sm:$0xff] }
 0x9ca   : > { %v8389_v50 = vpop.f32.mrf.mxu0  ;;  %v8420_v39 = vpop.f32.mrf.mxu1 }
 0x9cb   : > { %v8616_v36 = vmax.f32 %v8600_v41, %v8608_v7  ;;  %v8460_v25 = vmul.f32 %v15390_v57, %v8443_v14  ;;  %v8419_v51 = vadd.f32 %v8418_v5, %v8389_v50  ;;  %9407 = vmatpush.bf16.msra.mxu2 %v12633_v27  ;;  %v12612_v50 = vld [vmem:[#allocation24 + $0x30] sm:$0xff] }
 0x9cc   : > { %v8648_v6 = vld [vmem:[#allocation2 + $0x11] sm:$0xff]  ;;  %v12628_v5 = vld [vmem:[#allocation24 + $0xb0] sm:$0xff] }
 0x9cd   : > { %8626 = vst [vmem:[#allocation2 + $0x20] sm:$0xff] %v8616_v36  ;;  %v8472_v26 = vadd.f32 %v15397_v8, %v8460_v25  ;;  %v8657_v28 = vpack.c.bf16 %v8648_v6, %v8647_v4  ;;  %v15422_v42 = vpack.c.bf16 %v8616_v36, %v8615_v29  ;;  %v8633_v59 = vld [vmem:[#allocation2 + $0x17] sm:$0xff]  ;;  %v8570_v29 = vpop.f32.mrf.mxu3 }
 0x9ce   : > { %v8584_v49 = vmul.f32 %v15387_v23, %v8570_v29  ;;  %v12631_v4 = vld [vmem:[#allocation26 + $0x8] sm:$0xff] }
 0x9cf   : > { %v8601_v56 = vadd.f32 %v8593_v58, %v8472_v26  ;;  %8925 = vmatmul.bf16.vlgmr.msrb.gmra.mxu2 %v8657_v28  ;;  %8901 = vmatmul.bf16.gmra.mxu1 %v15422_v42  ;;  %v12630_v58 = vld [vmem:[#allocation26] sm:$0xff] }
 0x9d0   : > { %v8444_v33 = vpop.f32.mrf.mxu2  ;;  %v8596_v48 = vadd.f32 %v15394_v18, %v8584_v49  ;;  %9408 = vmatpush.bf16.msra.mxu2 %v12632_v47 }
 0x9d1   : > { %v8609_v12 = vmul.f32 0.01, %v8601_v56  ;;  %v8445_v11 = vadd.f32 %v8444_v33, %v8416_v52 }
 0x9d2   : > { %v8391_v35 = vpop.f32.mrf.mxu0 }
 0x9d3   : > { %v8617_v62 = vmax.f32 %v8601_v56, %v8609_v12  ;;  %v8461_v13 = vmul.f32 %v15390_v57, %v8445_v11  ;;  %v8421_v63 = vadd.f32 %v8420_v39, %v8391_v35  ;;  %v12613_v11 = vld [vmem:[#allocation24 + $0x38] sm:$0xff]  ;;  %v12623_v35 = vld [vmem:[#allocation24 + $0x88] sm:$0xff] }
 0x9d4   : > { %v8634_v34 = vld [vmem:[#allocation2 + $0x1f] sm:$0xff]  ;;  %9409 = vmatpush.bf16.msra.mxu2 %v12631_v4  ;;  %9224 = vmatpush.bf16.msrb.mxu3 %v12613_v11 }
 0x9d5   : > { %8627 = vst [vmem:[#allocation2 + $0x28] sm:$0xff] %v8617_v62  ;;  %v8473_v53 = vadd.f32 %v15397_v8, %v8461_v13  ;;  %v8658_v31 = vpack.c.bf16 %v8634_v34, %v8633_v59  ;;  %v8649_v10 = vld [vmem:[#allocation2 + $0x19] sm:$0xff]  ;;  %v12610_v59 = vld [vmem:[#allocation24 + $0x20] sm:$0xff] }
 0x9d6   : > { %v12620_v13 = vld [vmem:[#allocation24 + $0x70] sm:$0xff]  ;;  %v12627_v34 = vld [vmem:[#allocation24 + $0xa8] sm:$0xff] }
 0x9d7   : > { %v8602_v44 = vadd.f32 %v8594_v32, %v8473_v53  ;;  %8872 = vmatmul.bf16.gmra.mxu0 %v8658_v31  ;;  %v12609_v32 = vld [vmem:[#allocation24 + $0x18] sm:$0xff]  ;;  %v12626_v53 = vld [vmem:[#allocation24 + $0xa0] sm:$0xff] }
 0x9d8   : > { %v8447_v19 = vpop.f32.mrf.mxu2  ;;  %9410 = vmatpush.bf16.msra.mxu2 %v12630_v58  ;;  %9225 = vmatpush.bf16.msrb.mxu3 %v12612_v50  ;;  %v12617_v31 = vld [vmem:[#allocation24 + $0x58] sm:$0xff] }
 0x9d9   : > { %v8610_v22 = vmul.f32 0.01, %v8602_v44  ;;  %v8448_v2 = vadd.f32 %v8447_v19, %v8419_v51  ;;  %9254 = vmatpush.bf16.msra.mxu0 %v12620_v13  ;;  %v12608_v51 = vld [vmem:[#allocation24 + $0x10] sm:$0xff] }
 0x9db   : > { %v8618_v38 = vmax.f32 %v8602_v44, %v8610_v22  ;;  %v8462_v30 = vmul.f32 %v15390_v57, %v8448_v2  ;;  %v12625_v44 = vld [vmem:[#allocation24 + $0x98] sm:$0xff]  ;;  %v12607_v22 = vld [vmem:[#allocation24 + $0x8] sm:$0xff]  ;;  %v12624_v2 = vld [vmem:[#allocation24 + $0x90] sm:$0xff] }
 0x9dc   : > { %v8650_v60 = vld [vmem:[#allocation2 + $0x21] sm:$0xff]  ;;  %9226 = vmatpush.bf16.msrb.mxu3 %v12611_v21 }
 0x9dd   : > { %8628 = vst [vmem:[#allocation2 + $0x30] sm:$0xff] %v8618_v38  ;;  %v8474_v3 = vadd.f32 %v15397_v8, %v8462_v30  ;;  %v8660_v45 = vpack.c.bf16 %v8650_v60, %v8649_v10  ;;  %v15433_v46 = vpack.c.bf16 %v8618_v38, %v8617_v62  ;;  %v8635_v14 = vld [vmem:[#allocation2 + $0x27] sm:$0xff]  ;;  %v15445_v60 = vld [vmem:[%s15688_s18] ss:$0 sm:$0xff] }
 0x9de   : > { %v12629_v62 = vld [vmem:[#allocation24 + $0xb8] sm:$0xff] }
 0x9df   : > { %v8603_v16 = vadd.f32 %v8595_v43, %v8474_v3  ;;  %8930 = vmatmul.bf16.gmra.mxu2 %v8660_v45  ;;  %8906 = vmatmul.bf16.gmra.mxu1 %v15433_v46  ;;  %v12606_v43 = vld [vmem:[#allocation24] sm:$0xff] }
 0x9e0   : > { %v8449_v1 = vpop.f32.mrf.mxu2  ;;  %9282 = vmatpush.bf16.msrb.mxu1 %v12629_v62  ;;  %9227 = vmatpush.bf16.msrb.mxu3 %v12610_v59 }
 0x9e1   : > { %v8611_v41 = vmul.f32 0.01, %v8603_v16  ;;  %v8450_v17 = vadd.f32 %v8449_v1, %v8421_v63  ;;  %v12622_v63 = vld [vmem:[#allocation24 + $0x80] sm:$0xff] }
 0x9e3   : > { %v8619_v24 = vmax.f32 %v8603_v16, %v8611_v41  ;;  %v8463_v7 = vmul.f32 %v15390_v57, %v8450_v17 }
 0x9e4   : > { %v8636_v55 = vld [vmem:[#allocation2 + $0x2f] sm:$0xff]  ;;  %9283 = vmatpush.bf16.msrb.mxu1 %v12628_v5  ;;  %9228 = vmatpush.bf16.msrb.mxu3 %v12609_v32 }
 0x9e5   : > { %8629 = vst [vmem:[#allocation2 + $0x38] sm:$0xff] %v8619_v24  ;;  %v8475_v36 = vadd.f32 %v15397_v8, %v8463_v7  ;;  %v8661_v25 = vpack.c.bf16 %v8636_v55, %v8635_v14  ;;  %v8651_v28 = vld [vmem:[#allocation2 + $0x29] sm:$0xff] }
 0x9e7   : > { %v8604_v6 = vadd.f32 %v8596_v48, %v8475_v36  ;;  %8877 = vmatmul.bf16.gmra.mxu0 %v8661_v25 }
 0x9e8   : > { %9284 = vmatpush.bf16.msrb.mxu1 %v12627_v34  ;;  %9229 = vmatpush.bf16.msrb.mxu3 %v12608_v51 }
 0x9e9   : > { %v8612_v23 = vmul.f32 0.01, %v8604_v6 }
 0x9eb   : > { %v8620_v26 = vmax.f32 %v8604_v6, %v8612_v23 }
 0x9ec   : > { %v8652_v52 = vld [vmem:[#allocation2 + $0x31] sm:$0xff]  ;;  %9285 = vmatpush.bf16.msrb.mxu1 %v12626_v53  ;;  %9230 = vmatpush.bf16.msrb.mxu3 %v12607_v22 }
 0x9ed   : > { %8630 = vst [vmem:[#allocation2 + $0x40] sm:$0xff] %v8620_v26  ;;  %v8663_v57 = vpack.c.bf16 %v8652_v52, %v8651_v28  ;;  %v8665_v56 = vpack.c.bf16 %v8620_v26, %v8619_v24  ;;  %v8637_v18 = vld [vmem:[#allocation2 + $0x37] sm:$0xff] }
 0x9ef   : > { %8935 = vmatmul.bf16.gmra.mxu2 %v8663_v57  ;;  %8911 = vmatmul.bf16.gmra.mxu1 %v8665_v56 }
 0x9f0   : > { %9286 = vmatpush.bf16.msrb.mxu1 %v12625_v44  ;;  %9231 = vmatpush.bf16.msrb.mxu3 %v12606_v43 }
 0x9f4   : > { %v8638_v61 = vld [vmem:[#allocation2 + $0x3f] sm:$0xff]  ;;  %9287 = vmatpush.bf16.msrb.mxu1 %v12624_v2 }
 0x9f5   : > { %v8654_v8 = vld [vmem:[#allocation2 + $0x41] sm:$0xff]  ;;  %v8664_v33 = vpack.c.bf16 %v8638_v61, %v8637_v18  ;;  %v8653_v15 = vld [vmem:[#allocation2 + $0x39] sm:$0xff] }
 0x9f6   : > { %8987 = vst [vmem:[#allocation2 + $0x48] sm:$0x1] %v13751_v20  ;;  %v8666_v12 = vpack.c.bf16 %v8654_v8, %v8653_v15  ;;  %v12619_v20 = vld [vmem:[#allocation24 + $0x68] sm:$0xff] }
 0x9f7   : > { %8882 = vmatmul.bf16.gmra.mxu0 %v8664_v33 }
 0x9f8   : > { %9255 = vmatpush.bf16.msra.mxu0 %v12619_v20  ;;  %9288 = vmatpush.bf16.msrb.mxu1 %v12623_v35 }
 0x9fc   : > { %9289 = vmatpush.bf16.msrb.mxu1 %v12622_v63 }
 0x9ff   : > { %8940 = vmatmul.bf16.gmra.mxu2 %v8666_v12 }
 0xa0f   : > { %9411 = vmatmul.bf16.vlgmr.msra.gmra.mxu2 %v15409_v37  ;;  %v12618_v37 = vld [vmem:[#allocation24 + $0x60] sm:$0xff] }
 0xa10   : > { %9256 = vmatpush.bf16.msra.mxu0 %v12618_v37 }
 0xa14   : > { %9257 = vmatpush.bf16.msra.mxu0 %v12617_v31 }
 0xa18   : > { %9258 = vmatpush.bf16.msra.mxu0 %v12616_v0 }
 0xa1c   : > { %9259 = vmatpush.bf16.msra.mxu0 %v12615_v54 }
 0xa1f   : > { %9416 = vmatmul.bf16.gmra.mxu2 %v15422_v42 }
 0xa20   : > { %9260 = vmatpush.bf16.msra.mxu0 %v12614_v40 }
 0xa2f   : > { %9421 = vmatmul.bf16.gmra.mxu2 %v15433_v46  ;;  %v15448_v46 = vld [vmem:[%s15689_s10] ss:$0 sm:$0xff]  ;;  %s9607_s10 = sshll.u32 %s15311_s28, 4  ;;  %s9608_s10 = int_to_ptr.vmem [resolvable:$true] %s9607_s10 }
 0xa3c   : > { %v8897_v42 = vpop.f32.mrf.mxu1 }
 0xa3f   : > { %9426 = vmatmul.bf16.gmra.mxu2 %v8665_v56 }
 0xa44   : > { %v8868_v19 = vpop.f32.mrf.mxu0  ;;  %v8899_v30 = vpop.f32.mrf.mxu1 }
 0xa45   : > { %v8898_v10 = vadd.f32 %v8897_v42, %v8868_v19 }
 0xa4c   : > { %v8870_v38 = vpop.f32.mrf.mxu0  ;;  %v8902_v16 = vpop.f32.mrf.mxu1 }
 0xa4d   : > { %v8900_v1 = vadd.f32 %v8899_v30, %v8870_v38 }
 0xa52   : > { %v8926_v3 = vpop.f32.mrf.mxu2 }
 0xa53   : > { %v8927_v45 = vadd.f32 %v8926_v3, %v8898_v10 }
 0xa54   : > { %v8873_v29 = vpop.f32.mrf.mxu0  ;;  %v8904_v55 = vpop.f32.mrf.mxu1 }
 0xa55   : > { %v8950_v39 = vmul.f32 %v15445_v60, %v8927_v45  ;;  %v8903_v48 = vadd.f32 %v8902_v16, %v8873_v29 }
 0xa57   : > { %v8962_v27 = vadd.f32 %v15448_v46, %v8950_v39 }
 0xa59   : > { %v8970_v49 = vmul.f32 0.01, %v8962_v27 }
 0xa5a   : > { %v8928_v41 = vpop.f32.mrf.mxu2 }
 0xa5b   : > { %v8978_v17 = vmax.f32 %v8962_v27, %v8970_v49  ;;  %v8929_v47 = vadd.f32 %v8928_v41, %v8900_v1 }
 0xa5c   : > { %v8875_v7 = vpop.f32.mrf.mxu0  ;;  %v8907_v56 = vpop.f32.mrf.mxu1 }
 0xa5d   : > { %8988 = vst [vmem:[#allocation2 + $0x8] sm:$0xff] %v8978_v17  ;;  %v8951_v24 = vmul.f32 %v15445_v60, %v8929_v47  ;;  %v8905_v52 = vadd.f32 %v8904_v55, %v8875_v7 }
 0xa5f   : > { %v8963_v14 = vadd.f32 %v15448_v46, %v8951_v24 }
 0xa61   : > { %v8971_v36 = vmul.f32 0.01, %v8963_v14 }
 0xa62   : > { %v8931_v25 = vpop.f32.mrf.mxu2 }
 0xa63   : > { %v8979_v4 = vmax.f32 %v8963_v14, %v8971_v36  ;;  %v8932_v6 = vadd.f32 %v8931_v25, %v8903_v48 }
 0xa64   : > { %v8878_v28 = vpop.f32.mrf.mxu0  ;;  %v8996_v33 = vld [vmem:[#allocation2 + $0x7] sm:$0xff]  ;;  %v8909_v59 = vpop.f32.mrf.mxu1 }
 0xa65   : > { %8989 = vst [vmem:[#allocation2 + $0x10] sm:$0xff] %v8979_v4  ;;  %v8952_v23 = vmul.f32 %v15445_v60, %v8932_v6  ;;  %v9021_v58 = vpack.c.bf16 %v8979_v4, %v8978_v17  ;;  %v8908_v50 = vadd.f32 %v8907_v56, %v8878_v28 }
 0xa67   : > { %v8964_v26 = vadd.f32 %v15448_v46, %v8952_v23  ;;  %9261 = vmatmul.bf16.vlgmr.msra.gmra.mxu0 %v9021_v58 }
 0xa69   : > { %v8972_v57 = vmul.f32 0.01, %v8964_v26 }
 0xa6a   : > { %v8933_v18 = vpop.f32.mrf.mxu2 }
 0xa6b   : > { %v8980_v61 = vmax.f32 %v8964_v26, %v8972_v57  ;;  %v8934_v8 = vadd.f32 %v8933_v18, %v8905_v52 }
 0xa6c   : > { %v8997_v15 = vld [vmem:[#allocation2 + $0xf] sm:$0xff]  ;;  %v8880_v13 = vpop.f32.mrf.mxu0  ;;  %v8912_v43 = vpop.f32.mrf.mxu1 }
 0xa6d   : > { %8990 = vst [vmem:[#allocation2 + $0x18] sm:$0xff] %v8980_v61  ;;  %v8953_v12 = vmul.f32 %v15445_v60, %v8934_v8  ;;  %v9020_v11 = vpack.c.bf16 %v8997_v15, %v8996_v33  ;;  %v9012_v34 = vld [vmem:[#allocation2 + $0x9] sm:$0xff]  ;;  %v8910_v44 = vadd.f32 %v8909_v59, %v8880_v13  ;;  %v12639_v13 = vld [vmem:[#allocation29 + $0x8] sm:$0xff] }
 0xa6f   : > { %v8965_v9 = vadd.f32 %v15448_v46, %v8953_v12  ;;  %9232 = vmatmul.bf16.vlgmr.msrb.gmra.mxu3 %v9020_v11  ;;  %v12645_v12 = vld [vmem:[#allocation29 + $0x38] sm:$0xff]  ;;  %v12643_v11 = vld [vmem:[#allocation29 + $0x28] sm:$0xff] }
 0xa70   : > { %9552 = vmatpush.bf16.msra.mxu3 %v12645_v12 }
 0xa71   : > { %v8973_v62 = vmul.f32 0.01, %v8965_v9 }
 0xa72   : > { %v8936_v21 = vpop.f32.mrf.mxu2 }
 0xa73   : > { %v8981_v5 = vmax.f32 %v8965_v9, %v8973_v62  ;;  %v8937_v20 = vadd.f32 %v8936_v21, %v8908_v50  ;;  %v12642_v9 = vld [vmem:[#allocation29 + $0x20] sm:$0xff]  ;;  %v12641_v50 = vld [vmem:[#allocation29 + $0x18] sm:$0xff]  ;;  %v12640_v62 = vld [vmem:[#allocation29 + $0x10] sm:$0xff] }
 0xa74   : > { %v9013_v37 = vld [vmem:[#allocation2 + $0x11] sm:$0xff]  ;;  %v8883_v22 = vpop.f32.mrf.mxu0  ;;  %v8914_v47 = vpop.f32.mrf.mxu1 }
 0xa75   : > { %8991 = vst [vmem:[#allocation2 + $0x20] sm:$0xff] %v8981_v5  ;;  %v8954_v32 = vmul.f32 %v15445_v60, %v8937_v20  ;;  %v9022_v53 = vpack.c.bf16 %v9013_v37, %v9012_v34  ;;  %v9024_v31 = vpack.c.bf16 %v8981_v5, %v8980_v61  ;;  %v8998_v2 = vld [vmem:[#allocation2 + $0x17] sm:$0xff]  ;;  %v8913_v10 = vadd.f32 %v8912_v43, %v8883_v22 }
 0xa76   : > { %v12638_v20 = vld [vmem:[#allocation29] sm:$0xff] }
 0xa77   : > { %v8966_v51 = vadd.f32 %v15448_v46, %v8954_v32  ;;  %9290 = vmatmul.bf16.vlgmr.msrb.gmra.mxu1 %v9022_v53  ;;  %9266 = vmatmul.bf16.gmra.mxu0 %v9024_v31  ;;  %v15467_v53 = vld [vmem:[%s15690_s6] ss:$0 sm:$0xff]  ;;  %s12656_s6 = smul.u32 40, %s14085_s7 }
 0xa79   : > { %v8974_v0 = vmul.f32 0.01, %v8966_v51 }
 0xa7a   : > { %v8938_v42 = vpop.f32.mrf.mxu2 }
 0xa7b   : > { %v8982_v54 = vmax.f32 %v8966_v51, %v8974_v0  ;;  %v8939_v19 = vadd.f32 %v8938_v42, %v8910_v44  ;;  %v15470_v51 = vld [vmem:[%s15691_s0] ss:$0 sm:$0xff]  ;;  %s9606_s0 = scalar_lea.hbm %s15693_s2, %s12656_s6 }
 0xa7c   : > { %v8999_v40 = vld [vmem:[#allocation2 + $0x1f] sm:$0xff]  ;;  %v8885_v41 = vpop.f32.mrf.mxu0 }
 0xa7d   : > { %8992 = vst [vmem:[#allocation2 + $0x28] sm:$0xff] %v8982_v54  ;;  %v8955_v38 = vmul.f32 %v15445_v60, %v8939_v19  ;;  %v9023_v30 = vpack.c.bf16 %v8999_v40, %v8998_v2  ;;  %v9014_v63 = vld [vmem:[#allocation2 + $0x19] sm:$0xff]  ;;  %v8915_v24 = vadd.f32 %v8914_v47, %v8885_v41  ;;  %v15477_v2 = vld [vmem:[#allocation27] ss:$0 sm:$0xff] }
 0xa7f   : > { %v8967_v35 = vadd.f32 %v15448_v46, %v8955_v38  ;;  %9237 = vmatmul.bf16.gmra.mxu3 %v9023_v30 }
 0xa81   : > { %v8975_v3 = vmul.f32 0.01, %v8967_v35 }
 0xa82   : > { %v8941_v45 = vpop.f32.mrf.mxu2 }
 0xa83   : > { %v8983_v29 = vmax.f32 %v8967_v35, %v8975_v3  ;;  %v8942_v39 = vadd.f32 %v8941_v45, %v8913_v10 }
 0xa84   : > { %v9015_v16 = vld [vmem:[#allocation2 + $0x21] sm:$0xff] }
 0xa85   : > { %8993 = vst [vmem:[#allocation2 + $0x30] sm:$0xff] %v8983_v29  ;;  %v8956_v27 = vmul.f32 %v15445_v60, %v8942_v39  ;;  %v9025_v1 = vpack.c.bf16 %v9015_v16, %v9014_v63  ;;  %v9027_v49 = vpack.c.bf16 %v8983_v29, %v8982_v54  ;;  %v9000_v36 = vld [vmem:[#allocation2 + $0x27] sm:$0xff]  ;;  %v15474_v54 = vld [vmem:[%s15692_s4] ss:$0 sm:$0xff]  ;;  %s9609_s4 = sshll.u32 %s9606_s0, 4  ;;  %s9610_s4 = int_to_ptr.hbm [resolvable:$true] %s9609_s4 }
 0xa86   : > { %s13548_s8 = sshra.s32 %s9610_s4, 4  ;;  %s13549_s8 = int_to_ptr.hbm [resolvable:$true] %s13548_s8 }
 0xa87   : > { %v8968_v17 = vadd.f32 %v15448_v46, %v8956_v27  ;;  %9295 = vmatmul.bf16.gmra.mxu1 %v9025_v1  ;;  %9271 = vmatmul.bf16.gmra.mxu0 %v9027_v49  ;;  %s13550_s9 = scalar_lea.hbm %s13549_s8, 40  ;;  %p13555_p8 = scmp.lt.s32.totalorder %s13549_s8, %s15694_s26 }
 0xa88   : > { %p13551_p9 = scmp.ne.s32.totalorder %s13549_s8, %s13550_s9  ;;  %p13556_p11 = scmp.lt.s32.totalorder %s13554_s11, %s13550_s9 }
 0xa89   : > { %v8976_v7 = vmul.f32 0.01, %v8968_v17 }
 0xa8a   : > { %v8943_v14 = vpop.f32.mrf.mxu2  ;;  %p13552_p12 = pnand %p13551_p9, %p14102_p5  ;;  %p13557_p13 = por %p13556_p11, %p13555_p8 }
 0xa8b   : > { %v8984_v55 = vmax.f32 %v8968_v17, %v8976_v7  ;;  %v8944_v48 = vadd.f32 %v8943_v14, %v8915_v24 }
 0xa8c   : > { %v9001_v25 = vld [vmem:[#allocation2 + $0x2f] sm:$0xff]  ;;  %p13553_p0 = pneg %p13552_p12 }
 0xa8d   : > { %8994 = vst [vmem:[#allocation2 + $0x38] sm:$0xff] %v8984_v55  ;;  %v8957_v4 = vmul.f32 %v15445_v60, %v8944_v48  ;;  %v9026_v6 = vpack.c.bf16 %v9001_v25, %v9000_v36  ;;  %v9016_v28 = vld [vmem:[#allocation2 + $0x29] sm:$0xff] }
 0xa8e   : > { %p13558_p1 = pnand %p13557_p13, %p13553_p0 }
 0xa8f   : > { %v8969_v23 = vadd.f32 %v15448_v46, %v8957_v4  ;;  %9242 = vmatmul.bf16.gmra.mxu3 %v9026_v6  ;;  %v12644_v46 = vld [vmem:[#allocation29 + $0x30] sm:$0xff] }
 0xa90   : > { %9553 = vmatpush.bf16.msra.mxu3 %v12644_v46 }
 0xa91   : > { %v8977_v58 = vmul.f32 0.01, %v8969_v23 }
 0xa92   : > { %v9412_v21 = vpop.f32.mrf.mxu2 }
 0xa93   : > { %v8985_v26 = vmax.f32 %v8969_v23, %v8977_v58  ;;  %v9436_v22 = vmul.f32 %v15470_v51, %v9412_v21 }
 0xa94   : > { %v9017_v52 = vld [vmem:[#allocation2 + $0x31] sm:$0xff]  ;;  %9554 = vmatpush.bf16.msra.mxu3 %v12643_v11 }
 0xa95   : > { %8995 = vst [vmem:[#allocation2 + $0x40] sm:$0xff] %v8985_v26  ;;  %v9028_v57 = vpack.c.bf16 %v9017_v52, %v9016_v28  ;;  %v9030_v56 = vpack.c.bf16 %v8985_v26, %v8984_v55  ;;  %v9002_v18 = vld [vmem:[#allocation2 + $0x37] sm:$0xff]  ;;  %v9448_v35 = vadd.f32 %v15477_v2, %v9436_v22 }
 0xa97   : > { %9300 = vmatmul.bf16.gmra.mxu1 %v9028_v57  ;;  %9276 = vmatmul.bf16.gmra.mxu0 %v9030_v56 }
 0xa98   : > { %9555 = vmatpush.bf16.msra.mxu3 %v12642_v9 }
 0xa9a   : > { %v9414_v59 = vpop.f32.mrf.mxu2 }
 0xa9b   : > { %v9437_v10 = vmul.f32 %v15470_v51, %v9414_v59 }
 0xa9c   : > { %v9003_v61 = vld [vmem:[#allocation2 + $0x3f] sm:$0xff]  ;;  %9556 = vmatpush.bf16.msra.mxu3 %v12641_v50 }
 0xa9d   : > { %v9029_v8 = vpack.c.bf16 %v9003_v61, %v9002_v18  ;;  %v9018_v33 = vld [vmem:[#allocation2 + $0x39] sm:$0xff]  ;;  %v9019_v15 = vld [vmem:[#allocation2 + $0x41] sm:$0xff]  ;;  %v9449_v39 = vadd.f32 %v15477_v2, %v9437_v10 }
 0xa9e   : > { %v9031_v60 = vpack.c.bf16 %v9019_v15, %v9018_v33 }
 0xa9f   : > { %9247 = vmatmul.bf16.gmra.mxu3 %v9029_v8 }
 0xaa0   : > { %9557 = vmatpush.bf16.msra.mxu3 %v12640_v62 }
 0xaa2   : > { %v9417_v0 = vpop.f32.mrf.mxu2 }
 0xaa3   : > { %v9438_v36 = vmul.f32 %v15470_v51, %v9417_v0 }
 0xaa4   : > { %9558 = vmatpush.bf16.msra.mxu3 %v12639_v13 }
 0xaa5   : > { %v9450_v52 = vadd.f32 %v15477_v2, %v9438_v36 }
 0xaa7   : > { %9305 = vmatmul.bf16.gmra.mxu1 %v9031_v60 }
 0xaa8   : > { %9559 = vmatpush.bf16.msra.mxu3 %v12638_v20 }
 0xaaa   : > { %v9419_v63 = vpop.f32.mrf.mxu2 }
 0xaab   : > { %v9439_v57 = vmul.f32 %v15470_v51, %v9419_v63 }
 0xaad   : > { %v9451_v8 = vadd.f32 %v15477_v2, %v9439_v57 }
 0xab2   : > { %v9422_v6 = vpop.f32.mrf.mxu2 }
 0xab3   : > { %v9440_v59 = vmul.f32 %v15470_v51, %v9422_v6 }
 0xab5   : > { %v9452_v0 = vadd.f32 %v15477_v2, %v9440_v59 }
 0xaba   : > { %v9424_v9 = vpop.f32.mrf.mxu2 }
 0xac2   : > { %v9427_v22 = vpop.f32.mrf.mxu2 }
 0xae4   : > { %v9262_v5 = vpop.f32.mrf.mxu0 }
 0xaec   : > { %v9264_v34 = vpop.f32.mrf.mxu0 }
 0xaf2   : > { %v9233_v37 = vpop.f32.mrf.mxu3 }
 0xaf3   : > { %v9263_v32 = vadd.f32 %v9262_v5, %v9233_v37 }
 0xaf4   : > { %v9291_v31 = vpop.f32.mrf.mxu1  ;;  %v9267_v19 = vpop.f32.mrf.mxu0 }
 0xaf5   : > { %v9292_v44 = vadd.f32 %v9291_v31, %v9263_v32 }
 0xaf7   : > { %v9315_v42 = vmul.f32 %v15467_v53, %v9292_v44 }
 0xaf9   : > { %v9327_v38 = vadd.f32 %v15474_v54, %v9315_v42  ;;  %v9441_v42 = vmul.f32 %v15470_v51, %v9424_v9 }
 0xafa   : > { %v9235_v40 = vpop.f32.mrf.mxu3 }
 0xafb   : > { %v9265_v30 = vadd.f32 %v9264_v34, %v9235_v40  ;;  %v9456_v45 = vadd.f32 %v9448_v35, %v9327_v38 }
 0xafc   : > { %v9293_v43 = vpop.f32.mrf.mxu1  ;;  %v9269_v1 = vpop.f32.mrf.mxu0 }
 0xafd   : > { %v9294_v3 = vadd.f32 %v9293_v43, %v9265_v30  ;;  %v9464_v49 = vmul.f32 0.01, %v9456_v45  ;;  %v9453_v43 = vadd.f32 %v15477_v2, %v9441_v42 }
 0xaff   : > { %v9316_v29 = vmul.f32 %v15467_v53, %v9294_v3  ;;  %v9472_v14 = vmax.f32 %v9456_v45, %v9464_v49 }
 0xb01   : > { %v9328_v16 = vadd.f32 %v15474_v54, %v9316_v29 }
 0xb02   : > { %v9238_v27 = vpop.f32.mrf.mxu3 }
 0xb03   : > { %v9457_v41 = vadd.f32 %v9449_v39, %v9328_v16  ;;  %v9268_v17 = vadd.f32 %v9267_v19, %v9238_v27 }
 0xb04   : > { %v9296_v47 = vpop.f32.mrf.mxu1  ;;  %v9272_v26 = vpop.f32.mrf.mxu0 }
 0xb05   : > { %v9465_v24 = vmul.f32 0.01, %v9457_v41  ;;  %v9297_v7 = vadd.f32 %v9296_v47, %v9268_v17  ;;  %v9429_v17 = vpop.f32.mrf.mxu2 }
 0xb07   : > { %v9473_v55 = vmax.f32 %v9457_v41, %v9465_v24  ;;  %v9317_v48 = vmul.f32 %v15467_v53, %v9297_v7  ;;  %v9442_v41 = vmul.f32 %v15470_v51, %v9427_v22 }
 0xb09   : > { %v9480_v25 = vpack.c.bf16 %v9473_v55, %v9472_v14  ;;  %v9329_v23 = vadd.f32 %v15474_v54, %v9317_v48  ;;  %v9454_v36 = vadd.f32 %v15477_v2, %v9442_v41 }
 0xb0a   : > { %v9240_v4 = vpop.f32.mrf.mxu3 }
 0xb0b   : > { %v9270_v58 = vadd.f32 %v9269_v1, %v9240_v4  ;;  %9560 = vmatmul.bf16.vlgmr.msra.gmra.mxu3 %v9480_v25  ;;  %v9458_v18 = vadd.f32 %v9450_v52, %v9329_v23  ;;  %v9443_v25 = vmul.f32 %v15470_v51, %v9429_v17 }
 0xb0c   : > { %v9298_v28 = vpop.f32.mrf.mxu1  ;;  %v9274_v13 = vpop.f32.mrf.mxu0 }
 0xb0d   : > { %v9299_v56 = vadd.f32 %v9298_v28, %v9270_v58  ;;  %v9466_v46 = vmul.f32 0.01, %v9458_v18  ;;  %v9455_v58 = vadd.f32 %v15477_v2, %v9443_v25 }
 0xb0f   : > { %v9318_v61 = vmul.f32 %v15467_v53, %v9299_v56  ;;  %v9474_v5 = vmax.f32 %v9458_v18, %v9466_v46 }
 0xb11   : > { %v9330_v33 = vadd.f32 %v15474_v54, %v9318_v61 }
 0xb12   : > { %v9243_v15 = vpop.f32.mrf.mxu3 }
 0xb13   : > { %v9459_v60 = vadd.f32 %v9451_v8, %v9330_v33  ;;  %v9273_v12 = vadd.f32 %v9272_v26, %v9243_v15 }
 0xb14   : > { %v9301_v11 = vpop.f32.mrf.mxu1  ;;  %v9277_v30 = vpop.f32.mrf.mxu0 }
 0xb15   : > { %v9302_v50 = vadd.f32 %v9301_v11, %v9273_v12  ;;  %v9467_v62 = vmul.f32 0.01, %v9459_v60 }
 0xb17   : > { %v9319_v21 = vmul.f32 %v15467_v53, %v9302_v50  ;;  %v9475_v20 = vmax.f32 %v9459_v60, %v9467_v62 }
 0xb19   : > { %v9481_v34 = vpack.c.bf16 %v9475_v20, %v9474_v5  ;;  %v9331_v32 = vadd.f32 %v15474_v54, %v9319_v21 }
 0xb1a   : > { %v9245_v37 = vpop.f32.mrf.mxu3 }
 0xb1b   : > { %v9275_v31 = vadd.f32 %v9274_v13, %v9245_v37  ;;  %9565 = vmatmul.bf16.gmra.mxu3 %v9481_v34  ;;  %v9460_v40 = vadd.f32 %v9452_v0, %v9331_v32 }
 0xb1c   : > { %v9303_v44 = vpop.f32.mrf.mxu1  ;;  %v9279_v24 = vpop.f32.mrf.mxu0 }
 0xb1d   : > { %v9304_v19 = vadd.f32 %v9303_v44, %v9275_v31  ;;  %v9468_v29 = vmul.f32 0.01, %v9460_v40 }
 0xb1f   : > { %v9320_v38 = vmul.f32 %v15467_v53, %v9304_v19  ;;  %v9476_v1 = vmax.f32 %v9460_v40, %v9468_v29 }
 0xb21   : > { %v9332_v35 = vadd.f32 %v15474_v54, %v9320_v38 }
 0xb22   : > { %v9248_v10 = vpop.f32.mrf.mxu3 }
 0xb23   : > { %v9461_v3 = vadd.f32 %v9453_v43, %v9332_v35  ;;  %v9278_v45 = vadd.f32 %v9277_v30, %v9248_v10 }
 0xb24   : > { %v9306_v39 = vpop.f32.mrf.mxu1 }
 0xb25   : > { %v9307_v63 = vadd.f32 %v9306_v39, %v9278_v45  ;;  %v9469_v16 = vmul.f32 0.01, %v9461_v3 }
 0xb27   : > { %v9321_v27 = vmul.f32 %v15467_v53, %v9307_v63  ;;  %v9477_v49 = vmax.f32 %v9461_v3, %v9469_v16 }
 0xb29   : > { %v9482_v47 = vpack.c.bf16 %v9477_v49, %v9476_v1  ;;  %v9333_v14 = vadd.f32 %v15474_v54, %v9321_v27 }
 0xb2a   : > { %v9250_v7 = vpop.f32.mrf.mxu3 }
 0xb2b   : > { %v9280_v55 = vadd.f32 %v9279_v24, %v9250_v7  ;;  %9570 = vmatmul.bf16.gmra.mxu3 %v9482_v47  ;;  %v9462_v6 = vadd.f32 %v9454_v36, %v9333_v14 }
 0xb2c   : > { %v9308_v48 = vpop.f32.mrf.mxu1 }
 0xb2d   : > { %v9309_v4 = vadd.f32 %v9308_v48, %v9280_v55  ;;  %v9470_v52 = vmul.f32 0.01, %v9462_v6 }
 0xb2f   : > { %v9322_v23 = vmul.f32 %v15467_v53, %v9309_v4  ;;  %v9478_v56 = vmax.f32 %v9462_v6, %v9470_v52 }
 0xb31   : > { %v9334_v26 = vadd.f32 %v15474_v54, %v9322_v23 }
 0xb33   : > { %v9463_v28 = vadd.f32 %v9455_v58, %v9334_v26 }
 0xb35   : > { %v9471_v57 = vmul.f32 0.01, %v9463_v28 }
 0xb37   : > { %v9479_v18 = vmax.f32 %v9463_v28, %v9471_v57 }
 0xb39   : > { %v9483_v61 = vpack.c.bf16 %v9479_v18, %v9478_v56 }
 0xb3b   : > { %9575 = vmatmul.bf16.gmra.mxu3 %v9483_v61 }
 0xb3c   : > { %13561 = shalt.err (!%p13558_p1)
}
 0xb3d   : > { %s15577_s28 = smov 128   ;;  %s13753_s2 = smov 8   ;;  %v12990_v53 = vld [vmem:[#allocation30] ss:$0 sm:$0xff] }
 0xb3e   : > { %12729 = dma.vmem_to_hbm [thread:$0]  (%p14102_p5), %s9608_s10, 640, %s9610_s4, %s9590_s5, %s15577_s28, %s15577_s28, %s13753_s2  }
 0xb3f   : > { %s9996_s6 = sshll.u32 %s15307_s3, 6  ;;  %s15696_s9 = sld [smem:[#allocation97_spill]] }
 0xb40   : > { %s2068_s0 = scalar_lea.vmem [#allocation33], %s9996_s6  ;;  %s12646_s8 = sshll.u32 %s14085_s7, 6 }
 0xb41   : > { %s9624_s11 = sshll.u32 %s2068_s0, 4  ;;  %s9595_s4 = scalar_lea.sflag [#allocation34], %s15307_s3  ;;  %s9625_s11 = int_to_ptr.vmem [resolvable:$true] %s9624_s11 }
 0xb45   : > { %s9623_s5 = scalar_lea.hbm %s15696_s9, %s12646_s8  ;;  %s13582_s7 = scalar_lea.hbm %s15696_s9, 128 }
 0xb46   : > { %s9626_s10 = sshll.u32 %s9623_s5, 4  ;;  %s9627_s10 = int_to_ptr.hbm [resolvable:$true] %s9626_s10 }
 0xb47   : > { %s13576_s6 = sshra.s32 %s9627_s10, 4  ;;  %s13577_s6 = int_to_ptr.hbm [resolvable:$true] %s13576_s6 }
 0xb48   : > { %s13578_s28 = scalar_lea.hbm %s13577_s6, 64  ;;  %p13583_p7 = scmp.lt.s32.totalorder %s13577_s6, %s15696_s9 }
 0xb49   : > { %p13579_p2 = scmp.ne.s32.totalorder %s13577_s6, %s13578_s28  ;;  %p13584_p10 = scmp.lt.s32.totalorder %s13582_s7, %s13578_s28 }
 0xb4b   : > { %p13580_p3 = pnand %p13579_p2, %p14102_p5  ;;  %p13585_p9 = por %p13584_p10, %p13583_p7 }
 0xb4d   : > { %p13581_p4 = pneg %p13580_p3 }
 0xb4f   : > { %p13586_p12 = pnand %p13585_p9, %p13581_p4 }
 0xb8e   : > { %v9561_v51 = vpop.f32.mrf.mxu3 }
 0xb8f   : > { %v9562_v54 = vadd.f32 %v12990_v53, %v9561_v51 }
 0xb91   : > { %9581 = vst [vmem:[%s2068_s0] sm:$0xff] %v9562_v54 }
 0xb96   : > { %v9563_v2 = vpop.f32.mrf.mxu3 }
 0xb97   : > { %v9564_v8 = vadd.f32 %v12990_v53, %v9563_v2 }
 0xb99   : > { %9582 = vst [vmem:[%s2068_s0 + $0x8] sm:$0xff] %v9564_v8 }
 0xb9e   : > { %v9566_v33 = vpop.f32.mrf.mxu3 }
 0xb9f   : > { %v9567_v15 = vadd.f32 %v12990_v53, %v9566_v33 }
 0xba1   : > { %9583 = vst [vmem:[%s2068_s0 + $0x10] sm:$0xff] %v9567_v15 }
 0xba6   : > { %v9568_v60 = vpop.f32.mrf.mxu3 }
 0xba7   : > { %v9569_v12 = vadd.f32 %v12990_v53, %v9568_v60 }
 0xba9   : > { %9584 = vst [vmem:[%s2068_s0 + $0x18] sm:$0xff] %v9569_v12 }
 0xbae   : > { %v9571_v46 = vpop.f32.mrf.mxu3 }
 0xbaf   : > { %v9572_v11 = vadd.f32 %v12990_v53, %v9571_v46 }
 0xbb1   : > { %9585 = vst [vmem:[%s2068_s0 + $0x20] sm:$0xff] %v9572_v11 }
 0xbb6   : > { %v9573_v9 = vpop.f32.mrf.mxu3 }
 0xbb7   : > { %v9574_v50 = vadd.f32 %v12990_v53, %v9573_v9 }
 0xbb9   : > { %9586 = vst [vmem:[%s2068_s0 + $0x28] sm:$0xff] %v9574_v50 }
 0xbbe   : > { %v9576_v62 = vpop.f32.mrf.mxu3 }
 0xbbf   : > { %v9577_v13 = vadd.f32 %v12990_v53, %v9576_v62 }
 0xbc1   : > { %9587 = vst [vmem:[%s2068_s0 + $0x30] sm:$0xff] %v9577_v13 }
 0xbc6   : > { %v9578_v21 = vpop.f32.mrf.mxu3 }
 0xbc7   : > { %v9579_v5 = vadd.f32 %v12990_v53, %v9578_v21 }
 0xbc9   : > { %9588 = vst [vmem:[%s2068_s0 + $0x38] sm:$0xff] %v9579_v5 }
 0xbca   : > { %13589 = shalt.err (!%p13586_p12)
}
 0xbcb   : > { %s15697_s8 = smov 128  }
 0xbcc   : > { %12730 = dma.vmem_to_hbm [thread:$0]  (%p14102_p5), %s9625_s11, 1024, %s9627_s10, %s9595_s4, %s15697_s8, %s15697_s8, %s13753_s2  }
 0xbcd PF: > { %s15698_s3 = sld [smem:[#allocation100_spill]] }
 0xbce   : > { %s15699_s0 = sld [smem:[#allocation98_spill]] }
 0xbd3   : > { %p12831_p0 = scmp.ge.s32.totalorder %s15698_s3, 2 }
 0xbd4   : > { %s9641_s12 = sand.u32 1, %s15699_s0  }
 0xbd5   : > { %p12789_p8 = pnand %p12831_p0, %p14106_p6  ;;  %s9642_s6 = scalar_lea.sflag [#allocation5], %s9641_s12 }
 0xbd7   : > { %p12790_p11 = pneg %p12789_p8 }
 0xbd9   : > { %13647 = dma.done.wait (%p12790_p11), %s9642_s6, 640  }
 0xbda   : > { %13649 = vsyncadd (%p12790_p11), %s9642_s6, 4294966656  ;;  %s9652_s28 = scalar_lea.sflag [#allocation34], %s9641_s12 }
 0xbdb   : > { %13651 = dma.done.wait (%p12790_p11), %s9652_s28, 1024  }
 0xbdc   : > { %13653 = vsyncadd (%p12790_p11), %s9652_s28, 4294966272  ;;  %s15701_s2 = sld [smem:[#allocation101_spill]]  ;;  %s15704_s28 = smov %s13660_s1 }
 0xbdd   : > { %s15702_s18 = sld [smem:[#allocation99_spill]] }
 0xbde   : > { %s15703_s0 = sld [smem:[#allocation102_spill]] }
 0xbe2   : > { %p145_p5 = scmp.ge.s32.totalorder %s15701_s2, 4  }
 0xbe3   : > { %s15705_s1 = smov %s15702_s18 }
 0xbe4   :  { %147 = sbr.rel (!%p145_p5) target bundleno = 133 (0x85), region = 441 }
 0xbe9   :  { %9658 = vsyncpa [#allocation4], 1 }
 0xbea   :  { %9660 = vsyncpa [#allocation4 + $0x1], 1 }
 0xbeb   :  { %9661 = vsyncpa [#allocation7], 1 }
 0xbec   :  { %9662 = vsyncpa [#allocation10], 1 }
 0xbed   :  { %9663 = vsyncpa [#allocation13], 1 }
 0xbee   :  { %9664 = vsyncpa [#allocation16], 1 }
 0xbef   :  { %9665 = vsyncpa [#allocation19], 1 }
 0xbf0   :  { %9666 = vsyncpa [#allocation22], 1 }
 0xbf1   :  { %9667 = vsyncpa [#allocation25], 1 }
 0xbf2   :  { %9668 = vsyncpa [#allocation28], 1 }
 0xbf3   :  { %9669 = vsyncpa [#allocation31], 1 }
 0xbf4   :  { %9670 = vsyncpa [#allocation5], 1 }
 0xbf5   :  { %9672 = vsyncpa [#allocation5 + $0x1], 1 }
 0xbf6   :  { %9673 = vsyncpa [#allocation34], 1 }
 0xbf7   :  { %9675 = vsyncpa [#allocation34 + $0x1], 1 }

</bundles_post_ra>
